<compile_context>
chip_gen: v6e
topology: v6e:2x2x1
jax: 0.10.0
libtpu: 0.0.40
codegen_flags: <defaults>
</compile_context>

<pallas_src>
import functools

import jax
import jax.numpy as jnp
from jax.experimental import pallas as pl
from jax.experimental.pallas import tpu as pltpu


def _round_up(x, m):
    return (x + m - 1) // m * m


def _pad2d(x, rows, cols):
    """Zero-pad a 2-D array up to (rows, cols); no-op if already that shape."""
    r, c = x.shape
    if r == rows and c == cols:
        return x
    return jnp.pad(x, ((0, rows - r), (0, cols - c)))


def _choose_m_tiling(M):
    """Return (Mp, tm): padded M and the M tile (bf16 sublane-packed, <=512)."""
    mp0 = _round_up(M, 16)
    if mp0 <= 256:
        return mp0, mp0
    # Prefer big tiles, but never pad M by more than ~1/8 just to fit a tile.
    for tm in (512, 384, 256, 128):
        mp = _round_up(mp0, tm)
        if mp - mp0 <= mp0 // 8 or tm == 128:
            return mp, tm
    return mp0, 128  # unreachable


def _choose_k_tiling(K):
    """Return (Kp, tk): padded K and the K tile (multiple of 128)."""
    kp0 = _round_up(K, 128)
    if kp0 <= 1024:
        return kp0, kp0                      # single K step, no accumulator
    best = None
    for tk in (512, 384, 256):
        kp = _round_up(kp0, tk)
        key = (kp, kp // tk)                 # minimize (padded K, #K steps)
        if best is None or key < best[0]:
            best = (key, (kp, tk))
    return best[1]


# ---------------------------------------------------------------------------
# Fused matmul + bias + (residual) + (ReLU) kernels
# ---------------------------------------------------------------------------
def _epilogue(acc_f32, b_ref, r_ref, relu):
    y = acc_f32 + b_ref[...]
    if r_ref is not None:
        y = y + r_ref[...].astype(jnp.float32)
    if relu:
        y = jnp.maximum(y, 0.0)
    return y


def _mm_bn_kernel_multi(*refs, relu, has_res):
    if has_res:
        x_ref, w_ref, b_ref, r_ref, o_ref, acc_ref = refs
    else:
        x_ref, w_ref, b_ref, o_ref, acc_ref = refs
        r_ref = None
    k = pl.program_id(2)

    @pl.when(k == 0)
    def _():
        acc_ref[...] = jnp.zeros_like(acc_ref)

    acc_ref[...] += jnp.dot(x_ref[...], w_ref[...],
                            preferred_element_type=jnp.float32)

    @pl.when(k == pl.num_programs(2) - 1)
    def _():
        o_ref[...] = _epilogue(acc_ref[...], b_ref, r_ref, relu).astype(o_ref.dtype)


def _mm_bn_kernel_single(*refs, relu, has_res):
    # Single K step: no accumulator scratch, no pl.when.
    if has_res:
        x_ref, w_ref, b_ref, r_ref, o_ref = refs
    else:
        x_ref, w_ref, b_ref, o_ref = refs
        r_ref = None
    acc = jnp.dot(x_ref[...], w_ref[...], preferred_element_type=jnp.float32)
    o_ref[...] = _epilogue(acc, b_ref, r_ref, relu).astype(o_ref.dtype)


def fused_matmul_bn(x, w, bias, residual=None, relu=True):
    """out[:M,:N] = act(x @ w + bias [+ residual]).

    x:(M,K) bf16, w:(K,N) bf16 (BN scale pre-folded), bias:(N,) f32,
    residual:(M,N) bf16 or None.  Returns (M,N) bf16.
    """
    M, K = x.shape
    _, N = w.shape

    Kp, tk = _choose_k_tiling(K)
    nk = Kp // tk

    Mp, tm = _choose_m_tiling(M)

    Np = _round_up(N, 128)
    tn = Np if Np <= 512 else 512
    Np = _round_up(Np, tn)

    xp = _pad2d(x.astype(jnp.bfloat16), Mp, Kp)
    wp = _pad2d(w.astype(jnp.bfloat16), Kp, Np)
    bp = _pad2d(bias.astype(jnp.float32).reshape(1, N), 1, Np)

    has_res = residual is not None
    args = [xp, wp, bp]
    in_specs = [
        pl.BlockSpec((tm, tk), lambda i, j, k: (i, k)),
        pl.BlockSpec((tk, tn), lambda i, j, k: (k, j)),
        pl.BlockSpec((1, tn), lambda i, j, k: (0, j)),      # K-invariant block
    ]
    if has_res:
        rp = _pad2d(residual.astype(jnp.bfloat16), Mp, Np)
        args.append(rp)
        in_specs.append(pl.BlockSpec((tm, tn), lambda i, j, k: (i, j)))

    out_spec = pl.BlockSpec((tm, tn), lambda i, j, k: (i, j))

    if nk == 1:
        kernel = functools.partial(_mm_bn_kernel_single, relu=relu, has_res=has_res)
        scratch = []
    else:
        kernel = functools.partial(_mm_bn_kernel_multi, relu=relu, has_res=has_res)
        scratch = [pltpu.VMEM((tm, tn), jnp.float32)]

    out = pl.pallas_call(
        kernel,
        out_shape=jax.ShapeDtypeStruct((Mp, Np), jnp.bfloat16),
        grid_spec=pltpu.PrefetchScalarGridSpec(
            num_scalar_prefetch=0,
            grid=(Mp // tm, Np // tn, nk),
            in_specs=in_specs,
            out_specs=out_spec,
            scratch_shapes=scratch,
        ),
        compiler_params=pltpu.CompilerParams(
            dimension_semantics=("parallel", "parallel", "arbitrary"),
            vmem_limit_bytes=32 * 1024 * 1024,
        ),
    )(*args)
    return out[:M, :N]


# ---------------------------------------------------------------------------
# Convolution = im2col (bf16 glue) + fused Pallas matmul
# ---------------------------------------------------------------------------
def _im2col(x_nhwc, kh, kw, stride, pad):
    B, H, W, C = x_nhwc.shape
    Ho = (H + 2 * pad - kh) // stride + 1
    Wo = (W + 2 * pad - kw) // stride + 1
    xp = jnp.pad(x_nhwc, ((0, 0), (pad, pad), (pad, pad), (0, 0)))
    cols = []
    for i in range(kh):
        for j in range(kw):
            cols.append(xp[:, i:i + stride * Ho:stride, j:j + stride * Wo:stride, :])
    patches = jnp.stack(cols, axis=3)  # (B, Ho, Wo, kh*kw, C)
    return patches.reshape(B * Ho * Wo, kh * kw * C), (B, Ho, Wo)


def conv_bn(x_nhwc, w_oihw, scale, bias, stride, pad, relu=True, residual_nhwc=None):
    cout, cin, kh, kw = w_oihw.shape
    patches, (B, Ho, Wo) = _im2col(x_nhwc, kh, kw, stride, pad)
    # Fold the BN scale into the conv weights (free at trace time).
    w2d = jnp.transpose(w_oihw, (2, 3, 1, 0)).reshape(kh * kw * cin, cout)
    w2d = (w2d * scale[None, :]).astype(jnp.bfloat16)
    residual = None
    if residual_nhwc is not None:
        residual = residual_nhwc.reshape(B * Ho * Wo, cout)
    y = fused_matmul_bn(patches, w2d, bias, residual=residual, relu=relu)
    return y.reshape(B, Ho, Wo, cout)


# ---------------------------------------------------------------------------
# MaxPool 3x3 / stride 2 / pad 1 (Pallas max over 9 shifted windows, M-tiled)
# ---------------------------------------------------------------------------
def _maxpool_kernel(x_ref, o_ref):
    o_ref[...] = jnp.max(x_ref[...], axis=0)


def maxpool_3x3_s2_p1(x_nhwc):
    B, H, W, C = x_nhwc.shape
    Ho = (H + 2 - 3) // 2 + 1
    Wo = (W + 2 - 3) // 2 + 1
    neg = float("-inf")
    xp = jnp.pad(x_nhwc, ((0, 0), (1, 1), (1, 1), (0, 0)), constant_values=neg)
    wins = [xp[:, i:i + 2 * Ho:2, j:j + 2 * Wo:2, :]
            for i in range(3) for j in range(3)]
    M = B * Ho * Wo
    stacked = jnp.stack(wins, axis=0).reshape(9, M, C)

    Mp = _round_up(M, 16)
    tm = 1024 if Mp >= 1024 else Mp
    Mp = _round_up(Mp, tm)
    if Mp != M:
        stacked = jnp.pad(stacked, ((0, 0), (0, Mp - M), (0, 0)),
                          constant_values=neg)

    out = pl.pallas_call(
        _maxpool_kernel,
        out_shape=jax.ShapeDtypeStruct((Mp, C), x_nhwc.dtype),
        grid_spec=pltpu.PrefetchScalarGridSpec(
            num_scalar_prefetch=0,
            grid=(Mp // tm,),
            in_specs=[pl.BlockSpec((9, tm, C), lambda i: (0, i, 0))],
            out_specs=pl.BlockSpec((tm, C), lambda i: (i, 0)),
        ),
        compiler_params=pltpu.CompilerParams(
            dimension_semantics=("parallel",)),
    )(stacked)
    return out[:M].reshape(B, Ho, Wo, C)


# ---------------------------------------------------------------------------
# Deterministic parameter construction (resnet18 shapes)
# ---------------------------------------------------------------------------
_LAYER_CFG = ((64, 64, 1), (64, 128, 2), (128, 256, 2), (256, 512, 2))


def _init_conv(key, cout, cin, kh, kw):
    std = (2.0 / (cin * kh * kw)) ** 0.5
    return jax.random.normal(key, (cout, cin, kh, kw), jnp.float32) * std


def _init_bn(key, c, eps=1e-5):
    k1, k2, k3, k4 = jax.random.split(key, 4)
    gamma = jax.random.uniform(k1, (c,), jnp.float32, 0.5, 1.5)
    beta = jax.random.normal(k2, (c,), jnp.float32) * 0.1
    rmean = jax.random.normal(k3, (c,), jnp.float32) * 0.1
    rvar = jax.random.uniform(k4, (c,), jnp.float32, 0.5, 1.5)
    scale = gamma / jnp.sqrt(rvar + eps)
    bias = beta - rmean * scale
    return scale, bias


def make_resnet18_params(key):
    keys = iter(jax.random.split(key, 128))
    p = {"conv1": _init_conv(next(keys), 64, 3, 7, 7),
         "bn1": _init_bn(next(keys), 64)}

    def basic_block(cin, cout, stride):
        blk = {
            "conv1": _init_conv(next(keys), cout, cin, 3, 3),
            "bn1": _init_bn(next(keys), cout),
            "conv2": _init_conv(next(keys), cout, cout, 3, 3),
            "bn2": _init_bn(next(keys), cout),
        }
        if stride != 1 or cin != cout:
            blk["down_conv"] = _init_conv(next(keys), cout, cin, 1, 1)
            blk["down_bn"] = _init_bn(next(keys), cout)
        return blk

    for li, (cin, cout, stride) in enumerate(_LAYER_CFG, start=1):
        p[f"layer{li}"] = [basic_block(cin, cout, stride),
                           basic_block(cout, cout, 1)]
    return p


# ---------------------------------------------------------------------------
# Forward pass (torchvision resnet18 feature extractor -> layer4)
# ---------------------------------------------------------------------------
def resnet18_forward(params, x_nchw):
    x = jnp.transpose(x_nchw, (0, 2, 3, 1)).astype(jnp.bfloat16)  # NHWC, bf16

    s, b = params["bn1"]
    x = conv_bn(x, params["conv1"], s, b, stride=2, pad=3, relu=True)
    x = maxpool_3x3_s2_p1(x)

    for li, (_, _, layer_stride) in enumerate(_LAYER_CFG, start=1):
        for bi, blk in enumerate(params[f"layer{li}"]):
            stride = layer_stride if bi == 0 else 1
            identity = x
            if "down_conv" in blk:
                ds, db = blk["down_bn"]
                identity = conv_bn(x, blk["down_conv"], ds, db,
                                   stride=stride, pad=0, relu=False)
            s1, b1 = blk["bn1"]
            y = conv_bn(x, blk["conv1"], s1, b1,
                        stride=stride, pad=1, relu=True)
            s2, b2 = blk["bn2"]
            x = conv_bn(y, blk["conv2"], s2, b2,
                        stride=1, pad=1, relu=True, residual_nhwc=identity)

    return jnp.transpose(x, (0, 3, 1, 2)).astype(jnp.float32)  # NCHW feature4


if __name__ == "__main__":
    key = jax.random.PRNGKey(0)
    kp, kx = jax.random.split(key)
    params = make_resnet18_params(kp)
    x = jax.random.normal(kx, (2, 3, 32, 32), jnp.float32)  # small NCHW input

    fwd = jax.jit(resnet18_forward)
    out = jax.block_until_ready(fwd(params, x))
    assert out.shape == (2, 512, 1, 1), out.shape
    assert bool(jnp.all(jnp.isfinite(out)))
    print("KERNEL_OK")
</pallas_src>

<mosaic_0001>
module attributes {stable_mosaic.version = 11 : i64} {
  func.func @_mm_bn_kernel_single(%arg0: i32, %arg1: i32, %arg2: i32, %arg3: memref<512x256xbf16, #tpu.memory_space<vmem>>, %arg4: memref<256x128xbf16, #tpu.memory_space<vmem>>, %arg5: memref<1x128xf32, #tpu.memory_space<vmem>>, %arg6: memref<512x128xbf16, #tpu.memory_space<vmem>>) attributes {dimension_semantics = [#tpu.dimension_semantics<parallel>, #tpu.dimension_semantics<parallel>, #tpu.dimension_semantics<arbitrary>], iteration_bounds = array<i64: 1, 1, 1>, scalar_prefetch = 0 : i64, scratch_operands = 0 : i64, tpu.core_type = #tpu.core_type<tc>, window_params = [{transform_indices = @transform_0, window_bounds = array<i64: 512, 256>}, {transform_indices = @transform_1, window_bounds = array<i64: 256, 128>}, {transform_indices = @transform_2, window_bounds = array<i64: 1, 128>}, {transform_indices = @transform_3, window_bounds = array<i64: 512, 128>}]} {
    %c0 = arith.constant 0 : index
    %c0_0 = arith.constant 0 : index
    %0 = vector.load %arg3[%c0, %c0_0] : memref<512x256xbf16, #tpu.memory_space<vmem>>, vector<512x256xbf16>
    %c0_1 = arith.constant 0 : index
    %c0_2 = arith.constant 0 : index
    %1 = vector.load %arg4[%c0_1, %c0_2] : memref<256x128xbf16, #tpu.memory_space<vmem>>, vector<256x128xbf16>
    %cst = arith.constant dense<0.000000e+00> : vector<512x128xf32>
    %2 = tpu.matmul %0, %1, %cst {dimension_numbers = #tpu.dot_dimension_numbers<[1], [0], [0], [1], [0, 0, 1, 1], [], []>} : vector<512x256xbf16>, vector<256x128xbf16>, vector<512x128xf32> -> vector<512x128xf32>
    %c0_3 = arith.constant 0 : index
    %c0_4 = arith.constant 0 : index
    %3 = vector.load %arg5[%c0_3, %c0_4] : memref<1x128xf32, #tpu.memory_space<vmem>>, vector<1x128xf32>
    %4 = vector.broadcast %3 : vector<1x128xf32> to vector<512x128xf32>
    %5 = arith.addf %2, %4 : vector<512x128xf32>
    %cst_5 = arith.constant 0.000000e+00 : f32
    %6 = vector.broadcast %cst_5 : f32 to vector<512x128xf32>
    %7 = arith.maximumf %5, %6 : vector<512x128xf32>
    %8 = arith.truncf %7 : vector<512x128xf32> to vector<512x128xbf16>
    %c0_6 = arith.constant 0 : index
    %c0_7 = arith.constant 0 : index
    %9 = vector.load %arg6[%c0_6, %c0_7] : memref<512x128xbf16, #tpu.memory_space<vmem>>, vector<512x128xbf16>
    tpu.vector_store %arg6[%c0_6, %c0_7], %8 {strides = array<i32>} : memref<512x128xbf16, #tpu.memory_space<vmem>>, vector<512x128xbf16>,
    return
  }
  func.func @transform_0(%arg0: i32, %arg1: i32, %arg2: i32) -> (i32, i32) {
    %c0_i32 = arith.constant 0 : i32
    return %arg0, %arg2 : i32, i32
  }
  func.func @transform_1(%arg0: i32, %arg1: i32, %arg2: i32) -> (i32, i32) {
    %c0_i32 = arith.constant 0 : i32
    return %arg2, %arg1 : i32, i32
  }
  func.func @transform_2(%arg0: i32, %arg1: i32, %arg2: i32) -> (i32, i32) {
    %c0_i32 = arith.constant 0 : i32
    %c0_i32_0 = arith.constant 0 : i32
    return %c0_i32, %arg1 : i32, i32
  }
  func.func @transform_3(%arg0: i32, %arg1: i32, %arg2: i32) -> (i32, i32) {
    %c0_i32 = arith.constant 0 : i32
    return %arg0, %arg1 : i32, i32
  }
}

module attributes {stable_mosaic.version = 11 : i64} {
  func.func @_maxpool_kernel(%arg0: i32, %arg1: memref<9x128x64xbf16, #tpu.memory_space<vmem>>, %arg2: memref<128x64xbf16, #tpu.memory_space<vmem>>) attributes {dimension_semantics = [#tpu.dimension_semantics<parallel>], iteration_bounds = array<i64: 1>, scalar_prefetch = 0 : i64, scratch_operands = 0 : i64, tpu.core_type = #tpu.core_type<tc>, window_params = [{transform_indices = @transform_0, window_bounds = array<i64: 9, 128, 64>}, {transform_indices = @transform_1, window_bounds = array<i64: 128, 64>}]} {
    %c0 = arith.constant 0 : index
    %c0_0 = arith.constant 0 : index
    %c0_1 = arith.constant 0 : index
    %0 = vector.load %arg1[%c0, %c0_0, %c0_1] : memref<9x128x64xbf16, #tpu.memory_space<vmem>>, vector<9x128x64xbf16>
    %cst = arith.constant dense<0xFF80> : vector<128x64xbf16>
    %1 = vector.multi_reduction <maximumf>, %0, %cst [0] : vector<9x128x64xbf16> to vector<128x64xbf16>
    %c0_2 = arith.constant 0 : index
    %c0_3 = arith.constant 0 : index
    %2 = vector.load %arg2[%c0_2, %c0_3] : memref<128x64xbf16, #tpu.memory_space<vmem>>, vector<128x64xbf16>
    tpu.vector_store %arg2[%c0_2, %c0_3], %1 {strides = array<i32>} : memref<128x64xbf16, #tpu.memory_space<vmem>>, vector<128x64xbf16>,
    return
  }
  func.func @transform_0(%arg0: i32) -> (i32, i32, i32) {
    %c0_i32 = arith.constant 0 : i32
    %c0_i32_0 = arith.constant 0 : i32
    %c0_i32_1 = arith.constant 0 : i32
    return %c0_i32, %arg0, %c0_i32_0 : i32, i32, i32
  }
  func.func @transform_1(%arg0: i32) -> (i32, i32) {
    %c0_i32 = arith.constant 0 : i32
    %c0_i32_0 = arith.constant 0 : i32
    return %arg0, %c0_i32 : i32, i32
  }
}

module attributes {stable_mosaic.version = 11 : i64} {
  func.func @_mm_bn_kernel_single(%arg0: i32, %arg1: i32, %arg2: i32, %arg3: memref<128x640xbf16, #tpu.memory_space<vmem>>, %arg4: memref<640x128xbf16, #tpu.memory_space<vmem>>, %arg5: memref<1x128xf32, #tpu.memory_space<vmem>>, %arg6: memref<128x128xbf16, #tpu.memory_space<vmem>>) attributes {dimension_semantics = [#tpu.dimension_semantics<parallel>, #tpu.dimension_semantics<parallel>, #tpu.dimension_semantics<arbitrary>], iteration_bounds = array<i64: 1, 1, 1>, scalar_prefetch = 0 : i64, scratch_operands = 0 : i64, tpu.core_type = #tpu.core_type<tc>, window_params = [{transform_indices = @transform_0, window_bounds = array<i64: 128, 640>}, {transform_indices = @transform_1, window_bounds = array<i64: 640, 128>}, {transform_indices = @transform_2, window_bounds = array<i64: 1, 128>}, {transform_indices = @transform_3, window_bounds = array<i64: 128, 128>}]} {
    %c0 = arith.constant 0 : index
    %c0_0 = arith.constant 0 : index
    %0 = vector.load %arg3[%c0, %c0_0] : memref<128x640xbf16, #tpu.memory_space<vmem>>, vector<128x640xbf16>
    %c0_1 = arith.constant 0 : index
    %c0_2 = arith.constant 0 : index
    %1 = vector.load %arg4[%c0_1, %c0_2] : memref<640x128xbf16, #tpu.memory_space<vmem>>, vector<640x128xbf16>
    %cst = arith.constant dense<0.000000e+00> : vector<128x128xf32>
    %2 = tpu.matmul %0, %1, %cst {dimension_numbers = #tpu.dot_dimension_numbers<[1], [0], [0], [1], [0, 0, 1, 1], [], []>} : vector<128x640xbf16>, vector<640x128xbf16>, vector<128x128xf32> -> vector<128x128xf32>
    %c0_3 = arith.constant 0 : index
    %c0_4 = arith.constant 0 : index
    %3 = vector.load %arg5[%c0_3, %c0_4] : memref<1x128xf32, #tpu.memory_space<vmem>>, vector<1x128xf32>
    %4 = vector.broadcast %3 : vector<1x128xf32> to vector<128x128xf32>
    %5 = arith.addf %2, %4 : vector<128x128xf32>
    %cst_5 = arith.constant 0.000000e+00 : f32
    %6 = vector.broadcast %cst_5 : f32 to vector<128x128xf32>
    %7 = arith.maximumf %5, %6 : vector<128x128xf32>
    %8 = arith.truncf %7 : vector<128x128xf32> to vector<128x128xbf16>
    %c0_6 = arith.constant 0 : index
    %c0_7 = arith.constant 0 : index
    %9 = vector.load %arg6[%c0_6, %c0_7] : memref<128x128xbf16, #tpu.memory_space<vmem>>, vector<128x128xbf16>
    tpu.vector_store %arg6[%c0_6, %c0_7], %8 {strides = array<i32>} : memref<128x128xbf16, #tpu.memory_space<vmem>>, vector<128x128xbf16>,
    return
  }
  func.func @transform_0(%arg0: i32, %arg1: i32, %arg2: i32) -> (i32, i32) {
    %c0_i32 = arith.constant 0 : i32
    return %arg0, %arg2 : i32, i32
  }
  func.func @transform_1(%arg0: i32, %arg1: i32, %arg2: i32) -> (i32, i32) {
    %c0_i32 = arith.constant 0 : i32
    return %arg2, %arg1 : i32, i32
  }
  func.func @transform_2(%arg0: i32, %arg1: i32, %arg2: i32) -> (i32, i32) {
    %c0_i32 = arith.constant 0 : i32
    %c0_i32_0 = arith.constant 0 : i32
    return %c0_i32, %arg1 : i32, i32
  }
  func.func @transform_3(%arg0: i32, %arg1: i32, %arg2: i32) -> (i32, i32) {
    %c0_i32 = arith.constant 0 : i32
    return %arg0, %arg1 : i32, i32
  }
}

module attributes {stable_mosaic.version = 11 : i64} {
  func.func @_mm_bn_kernel_single(%arg0: i32, %arg1: i32, %arg2: i32, %arg3: memref<128x640xbf16, #tpu.memory_space<vmem>>, %arg4: memref<640x128xbf16, #tpu.memory_space<vmem>>, %arg5: memref<1x128xf32, #tpu.memory_space<vmem>>, %arg6: memref<128x128xbf16, #tpu.memory_space<vmem>>, %arg7: memref<128x128xbf16, #tpu.memory_space<vmem>>) attributes {dimension_semantics = [#tpu.dimension_semantics<parallel>, #tpu.dimension_semantics<parallel>, #tpu.dimension_semantics<arbitrary>], iteration_bounds = array<i64: 1, 1, 1>, scalar_prefetch = 0 : i64, scratch_operands = 0 : i64, tpu.core_type = #tpu.core_type<tc>, window_params = [{transform_indices = @transform_0, window_bounds = array<i64: 128, 640>}, {transform_indices = @transform_1, window_bounds = array<i64: 640, 128>}, {transform_indices = @transform_2, window_bounds = array<i64: 1, 128>}, {transform_indices = @transform_3, window_bounds = array<i64: 128, 128>}, {transform_indices = @transform_4, window_bounds = array<i64: 128, 128>}]} {
    %c0 = arith.constant 0 : index
    %c0_0 = arith.constant 0 : index
    %0 = vector.load %arg3[%c0, %c0_0] : memref<128x640xbf16, #tpu.memory_space<vmem>>, vector<128x640xbf16>
    %c0_1 = arith.constant 0 : index
    %c0_2 = arith.constant 0 : index
    %1 = vector.load %arg4[%c0_1, %c0_2] : memref<640x128xbf16, #tpu.memory_space<vmem>>, vector<640x128xbf16>
    %cst = arith.constant dense<0.000000e+00> : vector<128x128xf32>
    %2 = tpu.matmul %0, %1, %cst {dimension_numbers = #tpu.dot_dimension_numbers<[1], [0], [0], [1], [0, 0, 1, 1], [], []>} : vector<128x640xbf16>, vector<640x128xbf16>, vector<128x128xf32> -> vector<128x128xf32>
    %c0_3 = arith.constant 0 : index
    %c0_4 = arith.constant 0 : index
    %3 = vector.load %arg5[%c0_3, %c0_4] : memref<1x128xf32, #tpu.memory_space<vmem>>, vector<1x128xf32>
    %4 = vector.broadcast %3 : vector<1x128xf32> to vector<128x128xf32>
    %5 = arith.addf %2, %4 : vector<128x128xf32>
    %c0_5 = arith.constant 0 : index
    %c0_6 = arith.constant 0 : index
    %6 = vector.load %arg6[%c0_5, %c0_6] : memref<128x128xbf16, #tpu.memory_space<vmem>>, vector<128x128xbf16>
    %7 = arith.extf %6 : vector<128x128xbf16> to vector<128x128xf32>
    %8 = arith.addf %5, %7 : vector<128x128xf32>
    %cst_7 = arith.constant 0.000000e+00 : f32
    %9 = vector.broadcast %cst_7 : f32 to vector<128x128xf32>
    %10 = arith.maximumf %8, %9 : vector<128x128xf32>
    %11 = arith.truncf %10 : vector<128x128xf32> to vector<128x128xbf16>
    %c0_8 = arith.constant 0 : index
    %c0_9 = arith.constant 0 : index
    %12 = vector.load %arg7[%c0_8, %c0_9] : memref<128x128xbf16, #tpu.memory_space<vmem>>, vector<128x128xbf16>
    tpu.vector_store %arg7[%c0_8, %c0_9], %11 {strides = array<i32>} : memref<128x128xbf16, #tpu.memory_space<vmem>>, vector<128x128xbf16>,
    return
  }
  func.func @transform_0(%arg0: i32, %arg1: i32, %arg2: i32) -> (i32, i32) {
    %c0_i32 = arith.constant 0 : i32
    return %arg0, %arg2 : i32, i32
  }
  func.func @transform_1(%arg0: i32, %arg1: i32, %arg2: i32) -> (i32, i32) {
    %c0_i32 = arith.constant 0 : i32
    return %arg2, %arg1 : i32, i32
  }
  func.func @transform_2(%arg0: i32, %arg1: i32, %arg2: i32) -> (i32, i32) {
    %c0_i32 = arith.constant 0 : i32
    %c0_i32_0 = arith.constant 0 : i32
    return %c0_i32, %arg1 : i32, i32
  }
  func.func @transform_3(%arg0: i32, %arg1: i32, %arg2: i32) -> (i32, i32) {
    %c0_i32 = arith.constant 0 : i32
    return %arg0, %arg1 : i32, i32
  }
  func.func @transform_4(%arg0: i32, %arg1: i32, %arg2: i32) -> (i32, i32) {
    %c0_i32 = arith.constant 0 : i32
    return %arg0, %arg1 : i32, i32
  }
}

module attributes {stable_mosaic.version = 11 : i64} {
  func.func @_mm_bn_kernel_single(%arg0: i32, %arg1: i32, %arg2: i32, %arg3: memref<32x640xbf16, #tpu.memory_space<vmem>>, %arg4: memref<640x128xbf16, #tpu.memory_space<vmem>>, %arg5: memref<1x128xf32, #tpu.memory_space<vmem>>, %arg6: memref<32x128xbf16, #tpu.memory_space<vmem>>) attributes {dimension_semantics = [#tpu.dimension_semantics<parallel>, #tpu.dimension_semantics<parallel>, #tpu.dimension_semantics<arbitrary>], iteration_bounds = array<i64: 1, 1, 1>, scalar_prefetch = 0 : i64, scratch_operands = 0 : i64, tpu.core_type = #tpu.core_type<tc>, window_params = [{transform_indices = @transform_0, window_bounds = array<i64: 32, 640>}, {transform_indices = @transform_1, window_bounds = array<i64: 640, 128>}, {transform_indices = @transform_2, window_bounds = array<i64: 1, 128>}, {transform_indices = @transform_3, window_bounds = array<i64: 32, 128>}]} {
    %c0 = arith.constant 0 : index
    %c0_0 = arith.constant 0 : index
    %0 = vector.load %arg3[%c0, %c0_0] : memref<32x640xbf16, #tpu.memory_space<vmem>>, vector<32x640xbf16>
    %c0_1 = arith.constant 0 : index
    %c0_2 = arith.constant 0 : index
    %1 = vector.load %arg4[%c0_1, %c0_2] : memref<640x128xbf16, #tpu.memory_space<vmem>>, vector<640x128xbf16>
    %cst = arith.constant dense<0.000000e+00> : vector<32x128xf32>
    %2 = tpu.matmul %0, %1, %cst {dimension_numbers = #tpu.dot_dimension_numbers<[1], [0], [0], [1], [0, 0, 1, 1], [], []>} : vector<32x640xbf16>, vector<640x128xbf16>, vector<32x128xf32> -> vector<32x128xf32>
    %c0_3 = arith.constant 0 : index
    %c0_4 = arith.constant 0 : index
    %3 = vector.load %arg5[%c0_3, %c0_4] : memref<1x128xf32, #tpu.memory_space<vmem>>, vector<1x128xf32>
    %4 = vector.broadcast %3 : vector<1x128xf32> to vector<32x128xf32>
    %5 = arith.addf %2, %4 : vector<32x128xf32>
    %cst_5 = arith.constant 0.000000e+00 : f32
    %6 = vector.broadcast %cst_5 : f32 to vector<32x128xf32>
    %7 = arith.maximumf %5, %6 : vector<32x128xf32>
    %8 = arith.truncf %7 : vector<32x128xf32> to vector<32x128xbf16>
    %c0_6 = arith.constant 0 : index
    %c0_7 = arith.constant 0 : index
    %9 = vector.load %arg6[%c0_6, %c0_7] : memref<32x128xbf16, #tpu.memory_space<vmem>>, vector<32x128xbf16>
    tpu.vector_store %arg6[%c0_6, %c0_7], %8 {strides = array<i32>} : memref<32x128xbf16, #tpu.memory_space<vmem>>, vector<32x128xbf16>,
    return
  }
  func.func @transform_0(%arg0: i32, %arg1: i32, %arg2: i32) -> (i32, i32) {
    %c0_i32 = arith.constant 0 : i32
    return %arg0, %arg2 : i32, i32
  }
  func.func @transform_1(%arg0: i32, %arg1: i32, %arg2: i32) -> (i32, i32) {
    %c0_i32 = arith.constant 0 : i32
    return %arg2, %arg1 : i32, i32
  }
  func.func @transform_2(%arg0: i32, %arg1: i32, %arg2: i32) -> (i32, i32) {
    %c0_i32 = arith.constant 0 : i32
    %c0_i32_0 = arith.constant 0 : i32
    return %c0_i32, %arg1 : i32, i32
  }
  func.func @transform_3(%arg0: i32, %arg1: i32, %arg2: i32) -> (i32, i32) {
    %c0_i32 = arith.constant 0 : i32
    return %arg0, %arg1 : i32, i32
  }
}

module attributes {stable_mosaic.version = 11 : i64} {
  func.func @_mm_bn_kernel_single(%arg0: i32, %arg1: i32, %arg2: i32, %arg3: memref<32x128xbf16, #tpu.memory_space<vmem>>, %arg4: memref<128x128xbf16, #tpu.memory_space<vmem>>, %arg5: memref<1x128xf32, #tpu.memory_space<vmem>>, %arg6: memref<32x128xbf16, #tpu.memory_space<vmem>>) attributes {dimension_semantics = [#tpu.dimension_semantics<parallel>, #tpu.dimension_semantics<parallel>, #tpu.dimension_semantics<arbitrary>], iteration_bounds = array<i64: 1, 1, 1>, scalar_prefetch = 0 : i64, scratch_operands = 0 : i64, tpu.core_type = #tpu.core_type<tc>, window_params = [{transform_indices = @transform_0, window_bounds = array<i64: 32, 128>}, {transform_indices = @transform_1, window_bounds = array<i64: 128, 128>}, {transform_indices = @transform_2, window_bounds = array<i64: 1, 128>}, {transform_indices = @transform_3, window_bounds = array<i64: 32, 128>}]} {
    %c0 = arith.constant 0 : index
    %c0_0 = arith.constant 0 : index
    %0 = vector.load %arg3[%c0, %c0_0] : memref<32x128xbf16, #tpu.memory_space<vmem>>, vector<32x128xbf16>
    %c0_1 = arith.constant 0 : index
    %c0_2 = arith.constant 0 : index
    %1 = vector.load %arg4[%c0_1, %c0_2] : memref<128x128xbf16, #tpu.memory_space<vmem>>, vector<128x128xbf16>
    %cst = arith.constant dense<0.000000e+00> : vector<32x128xf32>
    %2 = tpu.matmul %0, %1, %cst {dimension_numbers = #tpu.dot_dimension_numbers<[1], [0], [0], [1], [0, 0, 1, 1], [], []>} : vector<32x128xbf16>, vector<128x128xbf16>, vector<32x128xf32> -> vector<32x128xf32>
    %c0_3 = arith.constant 0 : index
    %c0_4 = arith.constant 0 : index
    %3 = vector.load %arg5[%c0_3, %c0_4] : memref<1x128xf32, #tpu.memory_space<vmem>>, vector<1x128xf32>
    %4 = vector.broadcast %3 : vector<1x128xf32> to vector<32x128xf32>
    %5 = arith.addf %2, %4 : vector<32x128xf32>
    %6 = arith.truncf %5 : vector<32x128xf32> to vector<32x128xbf16>
    %c0_5 = arith.constant 0 : index
    %c0_6 = arith.constant 0 : index
    %7 = vector.load %arg6[%c0_5, %c0_6] : memref<32x128xbf16, #tpu.memory_space<vmem>>, vector<32x128xbf16>
    tpu.vector_store %arg6[%c0_5, %c0_6], %6 {strides = array<i32>} : memref<32x128xbf16, #tpu.memory_space<vmem>>, vector<32x128xbf16>,
    return
  }
  func.func @transform_0(%arg0: i32, %arg1: i32, %arg2: i32) -> (i32, i32) {
    %c0_i32 = arith.constant 0 : i32
    return %arg0, %arg2 : i32, i32
  }
  func.func @transform_1(%arg0: i32, %arg1: i32, %arg2: i32) -> (i32, i32) {
    %c0_i32 = arith.constant 0 : i32
    return %arg2, %arg1 : i32, i32
  }
  func.func @transform_2(%arg0: i32, %arg1: i32, %arg2: i32) -> (i32, i32) {
    %c0_i32 = arith.constant 0 : i32
    %c0_i32_0 = arith.constant 0 : i32
    return %c0_i32, %arg1 : i32, i32
  }
  func.func @transform_3(%arg0: i32, %arg1: i32, %arg2: i32) -> (i32, i32) {
    %c0_i32 = arith.constant 0 : i32
    return %arg0, %arg1 : i32, i32
  }
}

module attributes {stable_mosaic.version = 11 : i64} {
  func.func @_mm_bn_kernel_multi(%arg0: i32, %arg1: i32, %arg2: i32, %arg3: memref<32x384xbf16, #tpu.memory_space<vmem>>, %arg4: memref<384x128xbf16, #tpu.memory_space<vmem>>, %arg5: memref<1x128xf32, #tpu.memory_space<vmem>>, %arg6: memref<32x128xbf16, #tpu.memory_space<vmem>>, %arg7: memref<32x128xbf16, #tpu.memory_space<vmem>>, %arg8: memref<32x128xf32, #tpu.memory_space<vmem>>) attributes {dimension_semantics = [#tpu.dimension_semantics<parallel>, #tpu.dimension_semantics<parallel>, #tpu.dimension_semantics<arbitrary>], iteration_bounds = array<i64: 1, 1, 3>, scalar_prefetch = 0 : i64, scratch_operands = 1 : i64, tpu.core_type = #tpu.core_type<tc>, window_params = [{transform_indices = @transform_0, window_bounds = array<i64: 32, 384>}, {transform_indices = @transform_1, window_bounds = array<i64: 384, 128>}, {transform_indices = @transform_2, window_bounds = array<i64: 1, 128>}, {transform_indices = @transform_3, window_bounds = array<i64: 32, 128>}, {transform_indices = @transform_4, window_bounds = array<i64: 32, 128>}]} {
    %c0_i32 = arith.constant 0 : i32
    %0 = arith.cmpi eq, %arg2, %c0_i32 : i32
    %1 = arith.extui %0 : i1 to i32
    %c0_i32_0 = arith.constant 0 : i32
    %2 = arith.cmpi ne, %1, %c0_i32_0 : i32
    scf.if %2 {
      %cst_9 = arith.constant 0.000000e+00 : f32
      %12 = vector.broadcast %cst_9 : f32 to vector<32x128xf32>
      %c0_10 = arith.constant 0 : index
      %c0_11 = arith.constant 0 : index
      %13 = vector.load %arg8[%c0_10, %c0_11] : memref<32x128xf32, #tpu.memory_space<vmem>>, vector<32x128xf32>
      tpu.vector_store %arg8[%c0_10, %c0_11], %12 {strides = array<i32>} : memref<32x128xf32, #tpu.memory_space<vmem>>, vector<32x128xf32>,
    } else {
    }
    %c0 = arith.constant 0 : index
    %c0_1 = arith.constant 0 : index
    %3 = vector.load %arg8[%c0, %c0_1] : memref<32x128xf32, #tpu.memory_space<vmem>>, vector<32x128xf32>
    %c0_2 = arith.constant 0 : index
    %c0_3 = arith.constant 0 : index
    %4 = vector.load %arg3[%c0_2, %c0_3] : memref<32x384xbf16, #tpu.memory_space<vmem>>, vector<32x384xbf16>
    %c0_4 = arith.constant 0 : index
    %c0_5 = arith.constant 0 : index
    %5 = vector.load %arg4[%c0_4, %c0_5] : memref<384x128xbf16, #tpu.memory_space<vmem>>, vector<384x128xbf16>
    %cst = arith.constant dense<0.000000e+00> : vector<32x128xf32>
    %6 = tpu.matmul %4, %5, %cst {dimension_numbers = #tpu.dot_dimension_numbers<[1], [0], [0], [1], [0, 0, 1, 1], [], []>} : vector<32x384xbf16>, vector<384x128xbf16>, vector<32x128xf32> -> vector<32x128xf32>
    %7 = arith.addf %3, %6 : vector<32x128xf32>
    %c0_6 = arith.constant 0 : index
    %c0_7 = arith.constant 0 : index
    %8 = vector.load %arg8[%c0_6, %c0_7] : memref<32x128xf32, #tpu.memory_space<vmem>>, vector<32x128xf32>
    tpu.vector_store %arg8[%c0_6, %c0_7], %7 {strides = array<i32>} : memref<32x128xf32, #tpu.memory_space<vmem>>, vector<32x128xf32>,
    %c2_i32 = arith.constant 2 : i32
    %9 = arith.cmpi eq, %arg2, %c2_i32 : i32
    %10 = arith.extui %9 : i1 to i32
    %c0_i32_8 = arith.constant 0 : i32
    %11 = arith.cmpi ne, %10, %c0_i32_8 : i32
    scf.if %11 {
      %c0_9 = arith.constant 0 : index
      %c0_10 = arith.constant 0 : index
      %12 = vector.load %arg8[%c0_9, %c0_10] : memref<32x128xf32, #tpu.memory_space<vmem>>, vector<32x128xf32>
      %c0_11 = arith.constant 0 : index
      %c0_12 = arith.constant 0 : index
      %13 = vector.load %arg5[%c0_11, %c0_12] : memref<1x128xf32, #tpu.memory_space<vmem>>, vector<1x128xf32>
      %14 = vector.broadcast %13 : vector<1x128xf32> to vector<32x128xf32>
      %15 = arith.addf %12, %14 : vector<32x128xf32>
      %c0_13 = arith.constant 0 : index
      %c0_14 = arith.constant 0 : index
      %16 = vector.load %arg6[%c0_13, %c0_14] : memref<32x128xbf16, #tpu.memory_space<vmem>>, vector<32x128xbf16>
      %17 = arith.extf %16 : vector<32x128xbf16> to vector<32x128xf32>
      %18 = arith.addf %15, %17 : vector<32x128xf32>
      %cst_15 = arith.constant 0.000000e+00 : f32
      %19 = vector.broadcast %cst_15 : f32 to vector<32x128xf32>
      %20 = arith.maximumf %18, %19 : vector<32x128xf32>
      %21 = arith.truncf %20 : vector<32x128xf32> to vector<32x128xbf16>
      %c0_16 = arith.constant 0 : index
      %c0_17 = arith.constant 0 : index
      %22 = vector.load %arg7[%c0_16, %c0_17] : memref<32x128xbf16, #tpu.memory_space<vmem>>, vector<32x128xbf16>
      tpu.vector_store %arg7[%c0_16, %c0_17], %21 {strides = array<i32>} : memref<32x128xbf16, #tpu.memory_space<vmem>>, vector<32x128xbf16>,
    } else {
    }
    return
  }
  func.func @transform_0(%arg0: i32, %arg1: i32, %arg2: i32) -> (i32, i32) {
    %c0_i32 = arith.constant 0 : i32
    return %arg0, %arg2 : i32, i32
  }
  func.func @transform_1(%arg0: i32, %arg1: i32, %arg2: i32) -> (i32, i32) {
    %c0_i32 = arith.constant 0 : i32
    return %arg2, %arg1 : i32, i32
  }
  func.func @transform_2(%arg0: i32, %arg1: i32, %arg2: i32) -> (i32, i32) {
    %c0_i32 = arith.constant 0 : i32
    %c0_i32_0 = arith.constant 0 : i32
    return %c0_i32, %arg1 : i32, i32
  }
  func.func @transform_3(%arg0: i32, %arg1: i32, %arg2: i32) -> (i32, i32) {
    %c0_i32 = arith.constant 0 : i32
    return %arg0, %arg1 : i32, i32
  }
  func.func @transform_4(%arg0: i32, %arg1: i32, %arg2: i32) -> (i32, i32) {
    %c0_i32 = arith.constant 0 : i32
    return %arg0, %arg1 : i32, i32
  }
}

module attributes {stable_mosaic.version = 11 : i64} {
  func.func @_mm_bn_kernel_multi(%arg0: i32, %arg1: i32, %arg2: i32, %arg3: memref<32x384xbf16, #tpu.memory_space<vmem>>, %arg4: memref<384x128xbf16, #tpu.memory_space<vmem>>, %arg5: memref<1x128xf32, #tpu.memory_space<vmem>>, %arg6: memref<32x128xbf16, #tpu.memory_space<vmem>>, %arg7: memref<32x128xf32, #tpu.memory_space<vmem>>) attributes {dimension_semantics = [#tpu.dimension_semantics<parallel>, #tpu.dimension_semantics<parallel>, #tpu.dimension_semantics<arbitrary>], iteration_bounds = array<i64: 1, 1, 3>, scalar_prefetch = 0 : i64, scratch_operands = 1 : i64, tpu.core_type = #tpu.core_type<tc>, window_params = [{transform_indices = @transform_0, window_bounds = array<i64: 32, 384>}, {transform_indices = @transform_1, window_bounds = array<i64: 384, 128>}, {transform_indices = @transform_2, window_bounds = array<i64: 1, 128>}, {transform_indices = @transform_3, window_bounds = array<i64: 32, 128>}]} {
    %c0_i32 = arith.constant 0 : i32
    %0 = arith.cmpi eq, %arg2, %c0_i32 : i32
    %1 = arith.extui %0 : i1 to i32
    %c0_i32_0 = arith.constant 0 : i32
    %2 = arith.cmpi ne, %1, %c0_i32_0 : i32
    scf.if %2 {
      %cst_9 = arith.constant 0.000000e+00 : f32
      %12 = vector.broadcast %cst_9 : f32 to vector<32x128xf32>
      %c0_10 = arith.constant 0 : index
      %c0_11 = arith.constant 0 : index
      %13 = vector.load %arg7[%c0_10, %c0_11] : memref<32x128xf32, #tpu.memory_space<vmem>>, vector<32x128xf32>
      tpu.vector_store %arg7[%c0_10, %c0_11], %12 {strides = array<i32>} : memref<32x128xf32, #tpu.memory_space<vmem>>, vector<32x128xf32>,
    } else {
    }
    %c0 = arith.constant 0 : index
    %c0_1 = arith.constant 0 : index
    %3 = vector.load %arg7[%c0, %c0_1] : memref<32x128xf32, #tpu.memory_space<vmem>>, vector<32x128xf32>
    %c0_2 = arith.constant 0 : index
    %c0_3 = arith.constant 0 : index
    %4 = vector.load %arg3[%c0_2, %c0_3] : memref<32x384xbf16, #tpu.memory_space<vmem>>, vector<32x384xbf16>
    %c0_4 = arith.constant 0 : index
    %c0_5 = arith.constant 0 : index
    %5 = vector.load %arg4[%c0_4, %c0_5] : memref<384x128xbf16, #tpu.memory_space<vmem>>, vector<384x128xbf16>
    %cst = arith.constant dense<0.000000e+00> : vector<32x128xf32>
    %6 = tpu.matmul %4, %5, %cst {dimension_numbers = #tpu.dot_dimension_numbers<[1], [0], [0], [1], [0, 0, 1, 1], [], []>} : vector<32x384xbf16>, vector<384x128xbf16>, vector<32x128xf32> -> vector<32x128xf32>
    %7 = arith.addf %3, %6 : vector<32x128xf32>
    %c0_6 = arith.constant 0 : index
    %c0_7 = arith.constant 0 : index
    %8 = vector.load %arg7[%c0_6, %c0_7] : memref<32x128xf32, #tpu.memory_space<vmem>>, vector<32x128xf32>
    tpu.vector_store %arg7[%c0_6, %c0_7], %7 {strides = array<i32>} : memref<32x128xf32, #tpu.memory_space<vmem>>, vector<32x128xf32>,
    %c2_i32 = arith.constant 2 : i32
    %9 = arith.cmpi eq, %arg2, %c2_i32 : i32
    %10 = arith.extui %9 : i1 to i32
    %c0_i32_8 = arith.constant 0 : i32
    %11 = arith.cmpi ne, %10, %c0_i32_8 : i32
    scf.if %11 {
      %c0_9 = arith.constant 0 : index
      %c0_10 = arith.constant 0 : index
      %12 = vector.load %arg7[%c0_9, %c0_10] : memref<32x128xf32, #tpu.memory_space<vmem>>, vector<32x128xf32>
      %c0_11 = arith.constant 0 : index
      %c0_12 = arith.constant 0 : index
      %13 = vector.load %arg5[%c0_11, %c0_12] : memref<1x128xf32, #tpu.memory_space<vmem>>, vector<1x128xf32>
      %14 = vector.broadcast %13 : vector<1x128xf32> to vector<32x128xf32>
      %15 = arith.addf %12, %14 : vector<32x128xf32>
      %cst_13 = arith.constant 0.000000e+00 : f32
      %16 = vector.broadcast %cst_13 : f32 to vector<32x128xf32>
      %17 = arith.maximumf %15, %16 : vector<32x128xf32>
      %18 = arith.truncf %17 : vector<32x128xf32> to vector<32x128xbf16>
      %c0_14 = arith.constant 0 : index
      %c0_15 = arith.constant 0 : index
      %19 = vector.load %arg6[%c0_14, %c0_15] : memref<32x128xbf16, #tpu.memory_space<vmem>>, vector<32x128xbf16>
      tpu.vector_store %arg6[%c0_14, %c0_15], %18 {strides = array<i32>} : memref<32x128xbf16, #tpu.memory_space<vmem>>, vector<32x128xbf16>,
    } else {
    }
    return
  }
  func.func @transform_0(%arg0: i32, %arg1: i32, %arg2: i32) -> (i32, i32) {
    %c0_i32 = arith.constant 0 : i32
    return %arg0, %arg2 : i32, i32
  }
  func.func @transform_1(%arg0: i32, %arg1: i32, %arg2: i32) -> (i32, i32) {
    %c0_i32 = arith.constant 0 : i32
    return %arg2, %arg1 : i32, i32
  }
  func.func @transform_2(%arg0: i32, %arg1: i32, %arg2: i32) -> (i32, i32) {
    %c0_i32 = arith.constant 0 : i32
    %c0_i32_0 = arith.constant 0 : i32
    return %c0_i32, %arg1 : i32, i32
  }
  func.func @transform_3(%arg0: i32, %arg1: i32, %arg2: i32) -> (i32, i32) {
    %c0_i32 = arith.constant 0 : i32
    return %arg0, %arg1 : i32, i32
  }
}

module attributes {stable_mosaic.version = 11 : i64} {
  func.func @_mm_bn_kernel_multi(%arg0: i32, %arg1: i32, %arg2: i32, %arg3: memref<16x384xbf16, #tpu.memory_space<vmem>>, %arg4: memref<384x256xbf16, #tpu.memory_space<vmem>>, %arg5: memref<1x256xf32, #tpu.memory_space<vmem>>, %arg6: memref<16x256xbf16, #tpu.memory_space<vmem>>, %arg7: memref<16x256xf32, #tpu.memory_space<vmem>>) attributes {dimension_semantics = [#tpu.dimension_semantics<parallel>, #tpu.dimension_semantics<parallel>, #tpu.dimension_semantics<arbitrary>], iteration_bounds = array<i64: 1, 1, 3>, scalar_prefetch = 0 : i64, scratch_operands = 1 : i64, tpu.core_type = #tpu.core_type<tc>, window_params = [{transform_indices = @transform_0, window_bounds = array<i64: 16, 384>}, {transform_indices = @transform_1, window_bounds = array<i64: 384, 256>}, {transform_indices = @transform_2, window_bounds = array<i64: 1, 256>}, {transform_indices = @transform_3, window_bounds = array<i64: 16, 256>}]} {
    %c0_i32 = arith.constant 0 : i32
    %0 = arith.cmpi eq, %arg2, %c0_i32 : i32
    %1 = arith.extui %0 : i1 to i32
    %c0_i32_0 = arith.constant 0 : i32
    %2 = arith.cmpi ne, %1, %c0_i32_0 : i32
    scf.if %2 {
      %cst_9 = arith.constant 0.000000e+00 : f32
      %12 = vector.broadcast %cst_9 : f32 to vector<16x256xf32>
      %c0_10 = arith.constant 0 : index
      %c0_11 = arith.constant 0 : index
      %13 = vector.load %arg7[%c0_10, %c0_11] : memref<16x256xf32, #tpu.memory_space<vmem>>, vector<16x256xf32>
      tpu.vector_store %arg7[%c0_10, %c0_11], %12 {strides = array<i32>} : memref<16x256xf32, #tpu.memory_space<vmem>>, vector<16x256xf32>,
    } else {
    }
    %c0 = arith.constant 0 : index
    %c0_1 = arith.constant 0 : index
    %3 = vector.load %arg7[%c0, %c0_1] : memref<16x256xf32, #tpu.memory_space<vmem>>, vector<16x256xf32>
    %c0_2 = arith.constant 0 : index
    %c0_3 = arith.constant 0 : index
    %4 = vector.load %arg3[%c0_2, %c0_3] : memref<16x384xbf16, #tpu.memory_space<vmem>>, vector<16x384xbf16>
    %c0_4 = arith.constant 0 : index
    %c0_5 = arith.constant 0 : index
    %5 = vector.load %arg4[%c0_4, %c0_5] : memref<384x256xbf16, #tpu.memory_space<vmem>>, vector<384x256xbf16>
    %cst = arith.constant dense<0.000000e+00> : vector<16x256xf32>
    %6 = tpu.matmul %4, %5, %cst {dimension_numbers = #tpu.dot_dimension_numbers<[1], [0], [0], [1], [0, 0, 1, 1], [], []>} : vector<16x384xbf16>, vector<384x256xbf16>, vector<16x256xf32> -> vector<16x256xf32>
    %7 = arith.addf %3, %6 : vector<16x256xf32>
    %c0_6 = arith.constant 0 : index
    %c0_7 = arith.constant 0 : index
    %8 = vector.load %arg7[%c0_6, %c0_7] : memref<16x256xf32, #tpu.memory_space<vmem>>, vector<16x256xf32>
    tpu.vector_store %arg7[%c0_6, %c0_7], %7 {strides = array<i32>} : memref<16x256xf32, #tpu.memory_space<vmem>>, vector<16x256xf32>,
    %c2_i32 = arith.constant 2 : i32
    %9 = arith.cmpi eq, %arg2, %c2_i32 : i32
    %10 = arith.extui %9 : i1 to i32
    %c0_i32_8 = arith.constant 0 : i32
    %11 = arith.cmpi ne, %10, %c0_i32_8 : i32
    scf.if %11 {
      %c0_9 = arith.constant 0 : index
      %c0_10 = arith.constant 0 : index
      %12 = vector.load %arg7[%c0_9, %c0_10] : memref<16x256xf32, #tpu.memory_space<vmem>>, vector<16x256xf32>
      %c0_11 = arith.constant 0 : index
      %c0_12 = arith.constant 0 : index
      %13 = vector.load %arg5[%c0_11, %c0_12] : memref<1x256xf32, #tpu.memory_space<vmem>>, vector<1x256xf32>
      %14 = vector.broadcast %13 : vector<1x256xf32> to vector<16x256xf32>
      %15 = arith.addf %12, %14 : vector<16x256xf32>
      %cst_13 = arith.constant 0.000000e+00 : f32
      %16 = vector.broadcast %cst_13 : f32 to vector<16x256xf32>
      %17 = arith.maximumf %15, %16 : vector<16x256xf32>
      %18 = arith.truncf %17 : vector<16x256xf32> to vector<16x256xbf16>
      %c0_14 = arith.constant 0 : index
      %c0_15 = arith.constant 0 : index
      %19 = vector.load %arg6[%c0_14, %c0_15] : memref<16x256xbf16, #tpu.memory_space<vmem>>, vector<16x256xbf16>
      tpu.vector_store %arg6[%c0_14, %c0_15], %18 {strides = array<i32>} : memref<16x256xbf16, #tpu.memory_space<vmem>>, vector<16x256xbf16>,
    } else {
    }
    return
  }
  func.func @transform_0(%arg0: i32, %arg1: i32, %arg2: i32) -> (i32, i32) {
    %c0_i32 = arith.constant 0 : i32
    return %arg0, %arg2 : i32, i32
  }
  func.func @transform_1(%arg0: i32, %arg1: i32, %arg2: i32) -> (i32, i32) {
    %c0_i32 = arith.constant 0 : i32
    return %arg2, %arg1 : i32, i32
  }
  func.func @transform_2(%arg0: i32, %arg1: i32, %arg2: i32) -> (i32, i32) {
    %c0_i32 = arith.constant 0 : i32
    %c0_i32_0 = arith.constant 0 : i32
    return %c0_i32, %arg1 : i32, i32
  }
  func.func @transform_3(%arg0: i32, %arg1: i32, %arg2: i32) -> (i32, i32) {
    %c0_i32 = arith.constant 0 : i32
    return %arg0, %arg1 : i32, i32
  }
}

module attributes {stable_mosaic.version = 11 : i64} {
  func.func @_mm_bn_kernel_single(%arg0: i32, %arg1: i32, %arg2: i32, %arg3: memref<16x128xbf16, #tpu.memory_space<vmem>>, %arg4: memref<128x256xbf16, #tpu.memory_space<vmem>>, %arg5: memref<1x256xf32, #tpu.memory_space<vmem>>, %arg6: memref<16x256xbf16, #tpu.memory_space<vmem>>) attributes {dimension_semantics = [#tpu.dimension_semantics<parallel>, #tpu.dimension_semantics<parallel>, #tpu.dimension_semantics<arbitrary>], iteration_bounds = array<i64: 1, 1, 1>, scalar_prefetch = 0 : i64, scratch_operands = 0 : i64, tpu.core_type = #tpu.core_type<tc>, window_params = [{transform_indices = @transform_0, window_bounds = array<i64: 16, 128>}, {transform_indices = @transform_1, window_bounds = array<i64: 128, 256>}, {transform_indices = @transform_2, window_bounds = array<i64: 1, 256>}, {transform_indices = @transform_3, window_bounds = array<i64: 16, 256>}]} {
    %c0 = arith.constant 0 : index
    %c0_0 = arith.constant 0 : index
    %0 = vector.load %arg3[%c0, %c0_0] : memref<16x128xbf16, #tpu.memory_space<vmem>>, vector<16x128xbf16>
    %c0_1 = arith.constant 0 : index
    %c0_2 = arith.constant 0 : index
    %1 = vector.load %arg4[%c0_1, %c0_2] : memref<128x256xbf16, #tpu.memory_space<vmem>>, vector<128x256xbf16>
    %cst = arith.constant dense<0.000000e+00> : vector<16x256xf32>
    %2 = tpu.matmul %0, %1, %cst {dimension_numbers = #tpu.dot_dimension_numbers<[1], [0], [0], [1], [0, 0, 1, 1], [], []>} : vector<16x128xbf16>, vector<128x256xbf16>, vector<16x256xf32> -> vector<16x256xf32>
    %c0_3 = arith.constant 0 : index
    %c0_4 = arith.constant 0 : index
    %3 = vector.load %arg5[%c0_3, %c0_4] : memref<1x256xf32, #tpu.memory_space<vmem>>, vector<1x256xf32>
    %4 = vector.broadcast %3 : vector<1x256xf32> to vector<16x256xf32>
    %5 = arith.addf %2, %4 : vector<16x256xf32>
    %6 = arith.truncf %5 : vector<16x256xf32> to vector<16x256xbf16>
    %c0_5 = arith.constant 0 : index
    %c0_6 = arith.constant 0 : index
    %7 = vector.load %arg6[%c0_5, %c0_6] : memref<16x256xbf16, #tpu.memory_space<vmem>>, vector<16x256xbf16>
    tpu.vector_store %arg6[%c0_5, %c0_6], %6 {strides = array<i32>} : memref<16x256xbf16, #tpu.memory_space<vmem>>, vector<16x256xbf16>,
    return
  }
  func.func @transform_0(%arg0: i32, %arg1: i32, %arg2: i32) -> (i32, i32) {
    %c0_i32 = arith.constant 0 : i32
    return %arg0, %arg2 : i32, i32
  }
  func.func @transform_1(%arg0: i32, %arg1: i32, %arg2: i32) -> (i32, i32) {
    %c0_i32 = arith.constant 0 : i32
    return %arg2, %arg1 : i32, i32
  }
  func.func @transform_2(%arg0: i32, %arg1: i32, %arg2: i32) -> (i32, i32) {
    %c0_i32 = arith.constant 0 : i32
    %c0_i32_0 = arith.constant 0 : i32
    return %c0_i32, %arg1 : i32, i32
  }
  func.func @transform_3(%arg0: i32, %arg1: i32, %arg2: i32) -> (i32, i32) {
    %c0_i32 = arith.constant 0 : i32
    return %arg0, %arg1 : i32, i32
  }
}

module attributes {stable_mosaic.version = 11 : i64} {
  func.func @_mm_bn_kernel_multi(%arg0: i32, %arg1: i32, %arg2: i32, %arg3: memref<16x384xbf16, #tpu.memory_space<vmem>>, %arg4: memref<384x256xbf16, #tpu.memory_space<vmem>>, %arg5: memref<1x256xf32, #tpu.memory_space<vmem>>, %arg6: memref<16x256xbf16, #tpu.memory_space<vmem>>, %arg7: memref<16x256xbf16, #tpu.memory_space<vmem>>, %arg8: memref<16x256xf32, #tpu.memory_space<vmem>>) attributes {dimension_semantics = [#tpu.dimension_semantics<parallel>, #tpu.dimension_semantics<parallel>, #tpu.dimension_semantics<arbitrary>], iteration_bounds = array<i64: 1, 1, 6>, scalar_prefetch = 0 : i64, scratch_operands = 1 : i64, tpu.core_type = #tpu.core_type<tc>, window_params = [{transform_indices = @transform_0, window_bounds = array<i64: 16, 384>}, {transform_indices = @transform_1, window_bounds = array<i64: 384, 256>}, {transform_indices = @transform_2, window_bounds = array<i64: 1, 256>}, {transform_indices = @transform_3, window_bounds = array<i64: 16, 256>}, {transform_indices = @transform_4, window_bounds = array<i64: 16, 256>}]} {
    %c0_i32 = arith.constant 0 : i32
    %0 = arith.cmpi eq, %arg2, %c0_i32 : i32
    %1 = arith.extui %0 : i1 to i32
    %c0_i32_0 = arith.constant 0 : i32
    %2 = arith.cmpi ne, %1, %c0_i32_0 : i32
    scf.if %2 {
      %cst_9 = arith.constant 0.000000e+00 : f32
      %12 = vector.broadcast %cst_9 : f32 to vector<16x256xf32>
      %c0_10 = arith.constant 0 : index
      %c0_11 = arith.constant 0 : index
      %13 = vector.load %arg8[%c0_10, %c0_11] : memref<16x256xf32, #tpu.memory_space<vmem>>, vector<16x256xf32>
      tpu.vector_store %arg8[%c0_10, %c0_11], %12 {strides = array<i32>} : memref<16x256xf32, #tpu.memory_space<vmem>>, vector<16x256xf32>,
    } else {
    }
    %c0 = arith.constant 0 : index
    %c0_1 = arith.constant 0 : index
    %3 = vector.load %arg8[%c0, %c0_1] : memref<16x256xf32, #tpu.memory_space<vmem>>, vector<16x256xf32>
    %c0_2 = arith.constant 0 : index
    %c0_3 = arith.constant 0 : index
    %4 = vector.load %arg3[%c0_2, %c0_3] : memref<16x384xbf16, #tpu.memory_space<vmem>>, vector<16x384xbf16>
    %c0_4 = arith.constant 0 : index
    %c0_5 = arith.constant 0 : index
    %5 = vector.load %arg4[%c0_4, %c0_5] : memref<384x256xbf16, #tpu.memory_space<vmem>>, vector<384x256xbf16>
    %cst = arith.constant dense<0.000000e+00> : vector<16x256xf32>
    %6 = tpu.matmul %4, %5, %cst {dimension_numbers = #tpu.dot_dimension_numbers<[1], [0], [0], [1], [0, 0, 1, 1], [], []>} : vector<16x384xbf16>, vector<384x256xbf16>, vector<16x256xf32> -> vector<16x256xf32>
    %7 = arith.addf %3, %6 : vector<16x256xf32>
    %c0_6 = arith.constant 0 : index
    %c0_7 = arith.constant 0 : index
    %8 = vector.load %arg8[%c0_6, %c0_7] : memref<16x256xf32, #tpu.memory_space<vmem>>, vector<16x256xf32>
    tpu.vector_store %arg8[%c0_6, %c0_7], %7 {strides = array<i32>} : memref<16x256xf32, #tpu.memory_space<vmem>>, vector<16x256xf32>,
    %c5_i32 = arith.constant 5 : i32
    %9 = arith.cmpi eq, %arg2, %c5_i32 : i32
    %10 = arith.extui %9 : i1 to i32
    %c0_i32_8 = arith.constant 0 : i32
    %11 = arith.cmpi ne, %10, %c0_i32_8 : i32
    scf.if %11 {
      %c0_9 = arith.constant 0 : index
      %c0_10 = arith.constant 0 : index
      %12 = vector.load %arg8[%c0_9, %c0_10] : memref<16x256xf32, #tpu.memory_space<vmem>>, vector<16x256xf32>
      %c0_11 = arith.constant 0 : index
      %c0_12 = arith.constant 0 : index
      %13 = vector.load %arg5[%c0_11, %c0_12] : memref<1x256xf32, #tpu.memory_space<vmem>>, vector<1x256xf32>
      %14 = vector.broadcast %13 : vector<1x256xf32> to vector<16x256xf32>
      %15 = arith.addf %12, %14 : vector<16x256xf32>
      %c0_13 = arith.constant 0 : index
      %c0_14 = arith.constant 0 : index
      %16 = vector.load %arg6[%c0_13, %c0_14] : memref<16x256xbf16, #tpu.memory_space<vmem>>, vector<16x256xbf16>
      %17 = arith.extf %16 : vector<16x256xbf16> to vector<16x256xf32>
      %18 = arith.addf %15, %17 : vector<16x256xf32>
      %cst_15 = arith.constant 0.000000e+00 : f32
      %19 = vector.broadcast %cst_15 : f32 to vector<16x256xf32>
      %20 = arith.maximumf %18, %19 : vector<16x256xf32>
      %21 = arith.truncf %20 : vector<16x256xf32> to vector<16x256xbf16>
      %c0_16 = arith.constant 0 : index
      %c0_17 = arith.constant 0 : index
      %22 = vector.load %arg7[%c0_16, %c0_17] : memref<16x256xbf16, #tpu.memory_space<vmem>>, vector<16x256xbf16>
      tpu.vector_store %arg7[%c0_16, %c0_17], %21 {strides = array<i32>} : memref<16x256xbf16, #tpu.memory_space<vmem>>, vector<16x256xbf16>,
    } else {
    }
    return
  }
  func.func @transform_0(%arg0: i32, %arg1: i32, %arg2: i32) -> (i32, i32) {
    %c0_i32 = arith.constant 0 : i32
    return %arg0, %arg2 : i32, i32
  }
  func.func @transform_1(%arg0: i32, %arg1: i32, %arg2: i32) -> (i32, i32) {
    %c0_i32 = arith.constant 0 : i32
    return %arg2, %arg1 : i32, i32
  }
  func.func @transform_2(%arg0: i32, %arg1: i32, %arg2: i32) -> (i32, i32) {
    %c0_i32 = arith.constant 0 : i32
    %c0_i32_0 = arith.constant 0 : i32
    return %c0_i32, %arg1 : i32, i32
  }
  func.func @transform_3(%arg0: i32, %arg1: i32, %arg2: i32) -> (i32, i32) {
    %c0_i32 = arith.constant 0 : i32
    return %arg0, %arg1 : i32, i32
  }
  func.func @transform_4(%arg0: i32, %arg1: i32, %arg2: i32) -> (i32, i32) {
    %c0_i32 = arith.constant 0 : i32
    return %arg0, %arg1 : i32, i32
  }
}

module attributes {stable_mosaic.version = 11 : i64} {
  func.func @_mm_bn_kernel_multi(%arg0: i32, %arg1: i32, %arg2: i32, %arg3: memref<16x384xbf16, #tpu.memory_space<vmem>>, %arg4: memref<384x256xbf16, #tpu.memory_space<vmem>>, %arg5: memref<1x256xf32, #tpu.memory_space<vmem>>, %arg6: memref<16x256xbf16, #tpu.memory_space<vmem>>, %arg7: memref<16x256xf32, #tpu.memory_space<vmem>>) attributes {dimension_semantics = [#tpu.dimension_semantics<parallel>, #tpu.dimension_semantics<parallel>, #tpu.dimension_semantics<arbitrary>], iteration_bounds = array<i64: 1, 1, 6>, scalar_prefetch = 0 : i64, scratch_operands = 1 : i64, tpu.core_type = #tpu.core_type<tc>, window_params = [{transform_indices = @transform_0, window_bounds = array<i64: 16, 384>}, {transform_indices = @transform_1, window_bounds = array<i64: 384, 256>}, {transform_indices = @transform_2, window_bounds = array<i64: 1, 256>}, {transform_indices = @transform_3, window_bounds = array<i64: 16, 256>}]} {
    %c0_i32 = arith.constant 0 : i32
    %0 = arith.cmpi eq, %arg2, %c0_i32 : i32
    %1 = arith.extui %0 : i1 to i32
    %c0_i32_0 = arith.constant 0 : i32
    %2 = arith.cmpi ne, %1, %c0_i32_0 : i32
    scf.if %2 {
      %cst_9 = arith.constant 0.000000e+00 : f32
      %12 = vector.broadcast %cst_9 : f32 to vector<16x256xf32>
      %c0_10 = arith.constant 0 : index
      %c0_11 = arith.constant 0 : index
      %13 = vector.load %arg7[%c0_10, %c0_11] : memref<16x256xf32, #tpu.memory_space<vmem>>, vector<16x256xf32>
      tpu.vector_store %arg7[%c0_10, %c0_11], %12 {strides = array<i32>} : memref<16x256xf32, #tpu.memory_space<vmem>>, vector<16x256xf32>,
    } else {
    }
    %c0 = arith.constant 0 : index
    %c0_1 = arith.constant 0 : index
    %3 = vector.load %arg7[%c0, %c0_1] : memref<16x256xf32, #tpu.memory_space<vmem>>, vector<16x256xf32>
    %c0_2 = arith.constant 0 : index
    %c0_3 = arith.constant 0 : index
    %4 = vector.load %arg3[%c0_2, %c0_3] : memref<16x384xbf16, #tpu.memory_space<vmem>>, vector<16x384xbf16>
    %c0_4 = arith.constant 0 : index
    %c0_5 = arith.constant 0 : index
    %5 = vector.load %arg4[%c0_4, %c0_5] : memref<384x256xbf16, #tpu.memory_space<vmem>>, vector<384x256xbf16>
    %cst = arith.constant dense<0.000000e+00> : vector<16x256xf32>
    %6 = tpu.matmul %4, %5, %cst {dimension_numbers = #tpu.dot_dimension_numbers<[1], [0], [0], [1], [0, 0, 1, 1], [], []>} : vector<16x384xbf16>, vector<384x256xbf16>, vector<16x256xf32> -> vector<16x256xf32>
    %7 = arith.addf %3, %6 : vector<16x256xf32>
    %c0_6 = arith.constant 0 : index
    %c0_7 = arith.constant 0 : index
    %8 = vector.load %arg7[%c0_6, %c0_7] : memref<16x256xf32, #tpu.memory_space<vmem>>, vector<16x256xf32>
    tpu.vector_store %arg7[%c0_6, %c0_7], %7 {strides = array<i32>} : memref<16x256xf32, #tpu.memory_space<vmem>>, vector<16x256xf32>,
    %c5_i32 = arith.constant 5 : i32
    %9 = arith.cmpi eq, %arg2, %c5_i32 : i32
    %10 = arith.extui %9 : i1 to i32
    %c0_i32_8 = arith.constant 0 : i32
    %11 = arith.cmpi ne, %10, %c0_i32_8 : i32
    scf.if %11 {
      %c0_9 = arith.constant 0 : index
      %c0_10 = arith.constant 0 : index
      %12 = vector.load %arg7[%c0_9, %c0_10] : memref<16x256xf32, #tpu.memory_space<vmem>>, vector<16x256xf32>
      %c0_11 = arith.constant 0 : index
      %c0_12 = arith.constant 0 : index
      %13 = vector.load %arg5[%c0_11, %c0_12] : memref<1x256xf32, #tpu.memory_space<vmem>>, vector<1x256xf32>
      %14 = vector.broadcast %13 : vector<1x256xf32> to vector<16x256xf32>
      %15 = arith.addf %12, %14 : vector<16x256xf32>
      %cst_13 = arith.constant 0.000000e+00 : f32
      %16 = vector.broadcast %cst_13 : f32 to vector<16x256xf32>
      %17 = arith.maximumf %15, %16 : vector<16x256xf32>
      %18 = arith.truncf %17 : vector<16x256xf32> to vector<16x256xbf16>
      %c0_14 = arith.constant 0 : index
      %c0_15 = arith.constant 0 : index
      %19 = vector.load %arg6[%c0_14, %c0_15] : memref<16x256xbf16, #tpu.memory_space<vmem>>, vector<16x256xbf16>
      tpu.vector_store %arg6[%c0_14, %c0_15], %18 {strides = array<i32>} : memref<16x256xbf16, #tpu.memory_space<vmem>>, vector<16x256xbf16>,
    } else {
    }
    return
  }
  func.func @transform_0(%arg0: i32, %arg1: i32, %arg2: i32) -> (i32, i32) {
    %c0_i32 = arith.constant 0 : i32
    return %arg0, %arg2 : i32, i32
  }
  func.func @transform_1(%arg0: i32, %arg1: i32, %arg2: i32) -> (i32, i32) {
    %c0_i32 = arith.constant 0 : i32
    return %arg2, %arg1 : i32, i32
  }
  func.func @transform_2(%arg0: i32, %arg1: i32, %arg2: i32) -> (i32, i32) {
    %c0_i32 = arith.constant 0 : i32
    %c0_i32_0 = arith.constant 0 : i32
    return %c0_i32, %arg1 : i32, i32
  }
  func.func @transform_3(%arg0: i32, %arg1: i32, %arg2: i32) -> (i32, i32) {
    %c0_i32 = arith.constant 0 : i32
    return %arg0, %arg1 : i32, i32
  }
}

module attributes {stable_mosaic.version = 11 : i64} {
  func.func @_mm_bn_kernel_multi(%arg0: i32, %arg1: i32, %arg2: i32, %arg3: memref<16x384xbf16, #tpu.memory_space<vmem>>, %arg4: memref<384x512xbf16, #tpu.memory_space<vmem>>, %arg5: memref<1x512xf32, #tpu.memory_space<vmem>>, %arg6: memref<16x512xbf16, #tpu.memory_space<vmem>>, %arg7: memref<16x512xf32, #tpu.memory_space<vmem>>) attributes {dimension_semantics = [#tpu.dimension_semantics<parallel>, #tpu.dimension_semantics<parallel>, #tpu.dimension_semantics<arbitrary>], iteration_bounds = array<i64: 1, 1, 6>, scalar_prefetch = 0 : i64, scratch_operands = 1 : i64, tpu.core_type = #tpu.core_type<tc>, window_params = [{transform_indices = @transform_0, window_bounds = array<i64: 16, 384>}, {transform_indices = @transform_1, window_bounds = array<i64: 384, 512>}, {transform_indices = @transform_2, window_bounds = array<i64: 1, 512>}, {transform_indices = @transform_3, window_bounds = array<i64: 16, 512>}]} {
    %c0_i32 = arith.constant 0 : i32
    %0 = arith.cmpi eq, %arg2, %c0_i32 : i32
    %1 = arith.extui %0 : i1 to i32
    %c0_i32_0 = arith.constant 0 : i32
    %2 = arith.cmpi ne, %1, %c0_i32_0 : i32
    scf.if %2 {
      %cst_9 = arith.constant 0.000000e+00 : f32
      %12 = vector.broadcast %cst_9 : f32 to vector<16x512xf32>
      %c0_10 = arith.constant 0 : index
      %c0_11 = arith.constant 0 : index
      %13 = vector.load %arg7[%c0_10, %c0_11] : memref<16x512xf32, #tpu.memory_space<vmem>>, vector<16x512xf32>
      tpu.vector_store %arg7[%c0_10, %c0_11], %12 {strides = array<i32>} : memref<16x512xf32, #tpu.memory_space<vmem>>, vector<16x512xf32>,
    } else {
    }
    %c0 = arith.constant 0 : index
    %c0_1 = arith.constant 0 : index
    %3 = vector.load %arg7[%c0, %c0_1] : memref<16x512xf32, #tpu.memory_space<vmem>>, vector<16x512xf32>
    %c0_2 = arith.constant 0 : index
    %c0_3 = arith.constant 0 : index
    %4 = vector.load %arg3[%c0_2, %c0_3] : memref<16x384xbf16, #tpu.memory_space<vmem>>, vector<16x384xbf16>
    %c0_4 = arith.constant 0 : index
    %c0_5 = arith.constant 0 : index
    %5 = vector.load %arg4[%c0_4, %c0_5] : memref<384x512xbf16, #tpu.memory_space<vmem>>, vector<384x512xbf16>
    %cst = arith.constant dense<0.000000e+00> : vector<16x512xf32>
    %6 = tpu.matmul %4, %5, %cst {dimension_numbers = #tpu.dot_dimension_numbers<[1], [0], [0], [1], [0, 0, 1, 1], [], []>} : vector<16x384xbf16>, vector<384x512xbf16>, vector<16x512xf32> -> vector<16x512xf32>
    %7 = arith.addf %3, %6 : vector<16x512xf32>
    %c0_6 = arith.constant 0 : index
    %c0_7 = arith.constant 0 : index
    %8 = vector.load %arg7[%c0_6, %c0_7] : memref<16x512xf32, #tpu.memory_space<vmem>>, vector<16x512xf32>
    tpu.vector_store %arg7[%c0_6, %c0_7], %7 {strides = array<i32>} : memref<16x512xf32, #tpu.memory_space<vmem>>, vector<16x512xf32>,
    %c5_i32 = arith.constant 5 : i32
    %9 = arith.cmpi eq, %arg2, %c5_i32 : i32
    %10 = arith.extui %9 : i1 to i32
    %c0_i32_8 = arith.constant 0 : i32
    %11 = arith.cmpi ne, %10, %c0_i32_8 : i32
    scf.if %11 {
      %c0_9 = arith.constant 0 : index
      %c0_10 = arith.constant 0 : index
      %12 = vector.load %arg7[%c0_9, %c0_10] : memref<16x512xf32, #tpu.memory_space<vmem>>, vector<16x512xf32>
      %c0_11 = arith.constant 0 : index
      %c0_12 = arith.constant 0 : index
      %13 = vector.load %arg5[%c0_11, %c0_12] : memref<1x512xf32, #tpu.memory_space<vmem>>, vector<1x512xf32>
      %14 = vector.broadcast %13 : vector<1x512xf32> to vector<16x512xf32>
      %15 = arith.addf %12, %14 : vector<16x512xf32>
      %cst_13 = arith.constant 0.000000e+00 : f32
      %16 = vector.broadcast %cst_13 : f32 to vector<16x512xf32>
      %17 = arith.maximumf %15, %16 : vector<16x512xf32>
      %18 = arith.truncf %17 : vector<16x512xf32> to vector<16x512xbf16>
      %c0_14 = arith.constant 0 : index
      %c0_15 = arith.constant 0 : index
      %19 = vector.load %arg6[%c0_14, %c0_15] : memref<16x512xbf16, #tpu.memory_space<vmem>>, vector<16x512xbf16>
      tpu.vector_store %arg6[%c0_14, %c0_15], %18 {strides = array<i32>} : memref<16x512xbf16, #tpu.memory_space<vmem>>, vector<16x512xbf16>,
    } else {
    }
    return
  }
  func.func @transform_0(%arg0: i32, %arg1: i32, %arg2: i32) -> (i32, i32) {
    %c0_i32 = arith.constant 0 : i32
    return %arg0, %arg2 : i32, i32
  }
  func.func @transform_1(%arg0: i32, %arg1: i32, %arg2: i32) -> (i32, i32) {
    %c0_i32 = arith.constant 0 : i32
    return %arg2, %arg1 : i32, i32
  }
  func.func @transform_2(%arg0: i32, %arg1: i32, %arg2: i32) -> (i32, i32) {
    %c0_i32 = arith.constant 0 : i32
    %c0_i32_0 = arith.constant 0 : i32
    return %c0_i32, %arg1 : i32, i32
  }
  func.func @transform_3(%arg0: i32, %arg1: i32, %arg2: i32) -> (i32, i32) {
    %c0_i32 = arith.constant 0 : i32
    return %arg0, %arg1 : i32, i32
  }
}

module attributes {stable_mosaic.version = 11 : i64} {
  func.func @_mm_bn_kernel_single(%arg0: i32, %arg1: i32, %arg2: i32, %arg3: memref<16x256xbf16, #tpu.memory_space<vmem>>, %arg4: memref<256x512xbf16, #tpu.memory_space<vmem>>, %arg5: memref<1x512xf32, #tpu.memory_space<vmem>>, %arg6: memref<16x512xbf16, #tpu.memory_space<vmem>>) attributes {dimension_semantics = [#tpu.dimension_semantics<parallel>, #tpu.dimension_semantics<parallel>, #tpu.dimension_semantics<arbitrary>], iteration_bounds = array<i64: 1, 1, 1>, scalar_prefetch = 0 : i64, scratch_operands = 0 : i64, tpu.core_type = #tpu.core_type<tc>, window_params = [{transform_indices = @transform_0, window_bounds = array<i64: 16, 256>}, {transform_indices = @transform_1, window_bounds = array<i64: 256, 512>}, {transform_indices = @transform_2, window_bounds = array<i64: 1, 512>}, {transform_indices = @transform_3, window_bounds = array<i64: 16, 512>}]} {
    %c0 = arith.constant 0 : index
    %c0_0 = arith.constant 0 : index
    %0 = vector.load %arg3[%c0, %c0_0] : memref<16x256xbf16, #tpu.memory_space<vmem>>, vector<16x256xbf16>
    %c0_1 = arith.constant 0 : index
    %c0_2 = arith.constant 0 : index
    %1 = vector.load %arg4[%c0_1, %c0_2] : memref<256x512xbf16, #tpu.memory_space<vmem>>, vector<256x512xbf16>
    %cst = arith.constant dense<0.000000e+00> : vector<16x512xf32>
    %2 = tpu.matmul %0, %1, %cst {dimension_numbers = #tpu.dot_dimension_numbers<[1], [0], [0], [1], [0, 0, 1, 1], [], []>} : vector<16x256xbf16>, vector<256x512xbf16>, vector<16x512xf32> -> vector<16x512xf32>
    %c0_3 = arith.constant 0 : index
    %c0_4 = arith.constant 0 : index
    %3 = vector.load %arg5[%c0_3, %c0_4] : memref<1x512xf32, #tpu.memory_space<vmem>>, vector<1x512xf32>
    %4 = vector.broadcast %3 : vector<1x512xf32> to vector<16x512xf32>
    %5 = arith.addf %2, %4 : vector<16x512xf32>
    %6 = arith.truncf %5 : vector<16x512xf32> to vector<16x512xbf16>
    %c0_5 = arith.constant 0 : index
    %c0_6 = arith.constant 0 : index
    %7 = vector.load %arg6[%c0_5, %c0_6] : memref<16x512xbf16, #tpu.memory_space<vmem>>, vector<16x512xbf16>
    tpu.vector_store %arg6[%c0_5, %c0_6], %6 {strides = array<i32>} : memref<16x512xbf16, #tpu.memory_space<vmem>>, vector<16x512xbf16>,
    return
  }
  func.func @transform_0(%arg0: i32, %arg1: i32, %arg2: i32) -> (i32, i32) {
    %c0_i32 = arith.constant 0 : i32
    return %arg0, %arg2 : i32, i32
  }
  func.func @transform_1(%arg0: i32, %arg1: i32, %arg2: i32) -> (i32, i32) {
    %c0_i32 = arith.constant 0 : i32
    return %arg2, %arg1 : i32, i32
  }
  func.func @transform_2(%arg0: i32, %arg1: i32, %arg2: i32) -> (i32, i32) {
    %c0_i32 = arith.constant 0 : i32
    %c0_i32_0 = arith.constant 0 : i32
    return %c0_i32, %arg1 : i32, i32
  }
  func.func @transform_3(%arg0: i32, %arg1: i32, %arg2: i32) -> (i32, i32) {
    %c0_i32 = arith.constant 0 : i32
    return %arg0, %arg1 : i32, i32
  }
}

module attributes {stable_mosaic.version = 11 : i64} {
  func.func @_mm_bn_kernel_multi(%arg0: i32, %arg1: i32, %arg2: i32, %arg3: memref<16x512xbf16, #tpu.memory_space<vmem>>, %arg4: memref<512x512xbf16, #tpu.memory_space<vmem>>, %arg5: memref<1x512xf32, #tpu.memory_space<vmem>>, %arg6: memref<16x512xbf16, #tpu.memory_space<vmem>>, %arg7: memref<16x512xbf16, #tpu.memory_space<vmem>>, %arg8: memref<16x512xf32, #tpu.memory_space<vmem>>) attributes {dimension_semantics = [#tpu.dimension_semantics<parallel>, #tpu.dimension_semantics<parallel>, #tpu.dimension_semantics<arbitrary>], iteration_bounds = array<i64: 1, 1, 9>, scalar_prefetch = 0 : i64, scratch_operands = 1 : i64, tpu.core_type = #tpu.core_type<tc>, window_params = [{transform_indices = @transform_0, window_bounds = array<i64: 16, 512>}, {transform_indices = @transform_1, window_bounds = array<i64: 512, 512>}, {transform_indices = @transform_2, window_bounds = array<i64: 1, 512>}, {transform_indices = @transform_3, window_bounds = array<i64: 16, 512>}, {transform_indices = @transform_4, window_bounds = array<i64: 16, 512>}]} {
    %c0_i32 = arith.constant 0 : i32
    %0 = arith.cmpi eq, %arg2, %c0_i32 : i32
    %1 = arith.extui %0 : i1 to i32
    %c0_i32_0 = arith.constant 0 : i32
    %2 = arith.cmpi ne, %1, %c0_i32_0 : i32
    scf.if %2 {
      %cst_9 = arith.constant 0.000000e+00 : f32
      %12 = vector.broadcast %cst_9 : f32 to vector<16x512xf32>
      %c0_10 = arith.constant 0 : index
      %c0_11 = arith.constant 0 : index
      %13 = vector.load %arg8[%c0_10, %c0_11] : memref<16x512xf32, #tpu.memory_space<vmem>>, vector<16x512xf32>
      tpu.vector_store %arg8[%c0_10, %c0_11], %12 {strides = array<i32>} : memref<16x512xf32, #tpu.memory_space<vmem>>, vector<16x512xf32>,
    } else {
    }
    %c0 = arith.constant 0 : index
    %c0_1 = arith.constant 0 : index
    %3 = vector.load %arg8[%c0, %c0_1] : memref<16x512xf32, #tpu.memory_space<vmem>>, vector<16x512xf32>
    %c0_2 = arith.constant 0 : index
    %c0_3 = arith.constant 0 : index
    %4 = vector.load %arg3[%c0_2, %c0_3] : memref<16x512xbf16, #tpu.memory_space<vmem>>, vector<16x512xbf16>
    %c0_4 = arith.constant 0 : index
    %c0_5 = arith.constant 0 : index
    %5 = vector.load %arg4[%c0_4, %c0_5] : memref<512x512xbf16, #tpu.memory_space<vmem>>, vector<512x512xbf16>
    %cst = arith.constant dense<0.000000e+00> : vector<16x512xf32>
    %6 = tpu.matmul %4, %5, %cst {dimension_numbers = #tpu.dot_dimension_numbers<[1], [0], [0], [1], [0, 0, 1, 1], [], []>} : vector<16x512xbf16>, vector<512x512xbf16>, vector<16x512xf32> -> vector<16x512xf32>
    %7 = arith.addf %3, %6 : vector<16x512xf32>
    %c0_6 = arith.constant 0 : index
    %c0_7 = arith.constant 0 : index
    %8 = vector.load %arg8[%c0_6, %c0_7] : memref<16x512xf32, #tpu.memory_space<vmem>>, vector<16x512xf32>
    tpu.vector_store %arg8[%c0_6, %c0_7], %7 {strides = array<i32>} : memref<16x512xf32, #tpu.memory_space<vmem>>, vector<16x512xf32>,
    %c8_i32 = arith.constant 8 : i32
    %9 = arith.cmpi eq, %arg2, %c8_i32 : i32
    %10 = arith.extui %9 : i1 to i32
    %c0_i32_8 = arith.constant 0 : i32
    %11 = arith.cmpi ne, %10, %c0_i32_8 : i32
    scf.if %11 {
      %c0_9 = arith.constant 0 : index
      %c0_10 = arith.constant 0 : index
      %12 = vector.load %arg8[%c0_9, %c0_10] : memref<16x512xf32, #tpu.memory_space<vmem>>, vector<16x512xf32>
      %c0_11 = arith.constant 0 : index
      %c0_12 = arith.constant 0 : index
      %13 = vector.load %arg5[%c0_11, %c0_12] : memref<1x512xf32, #tpu.memory_space<vmem>>, vector<1x512xf32>
      %14 = vector.broadcast %13 : vector<1x512xf32> to vector<16x512xf32>
      %15 = arith.addf %12, %14 : vector<16x512xf32>
      %c0_13 = arith.constant 0 : index
      %c0_14 = arith.constant 0 : index
      %16 = vector.load %arg6[%c0_13, %c0_14] : memref<16x512xbf16, #tpu.memory_space<vmem>>, vector<16x512xbf16>
      %17 = arith.extf %16 : vector<16x512xbf16> to vector<16x512xf32>
      %18 = arith.addf %15, %17 : vector<16x512xf32>
      %cst_15 = arith.constant 0.000000e+00 : f32
      %19 = vector.broadcast %cst_15 : f32 to vector<16x512xf32>
      %20 = arith.maximumf %18, %19 : vector<16x512xf32>
      %21 = arith.truncf %20 : vector<16x512xf32> to vector<16x512xbf16>
      %c0_16 = arith.constant 0 : index
      %c0_17 = arith.constant 0 : index
      %22 = vector.load %arg7[%c0_16, %c0_17] : memref<16x512xbf16, #tpu.memory_space<vmem>>, vector<16x512xbf16>
      tpu.vector_store %arg7[%c0_16, %c0_17], %21 {strides = array<i32>} : memref<16x512xbf16, #tpu.memory_space<vmem>>, vector<16x512xbf16>,
    } else {
    }
    return
  }
  func.func @transform_0(%arg0: i32, %arg1: i32, %arg2: i32) -> (i32, i32) {
    %c0_i32 = arith.constant 0 : i32
    return %arg0, %arg2 : i32, i32
  }
  func.func @transform_1(%arg0: i32, %arg1: i32, %arg2: i32) -> (i32, i32) {
    %c0_i32 = arith.constant 0 : i32
    return %arg2, %arg1 : i32, i32
  }
  func.func @transform_2(%arg0: i32, %arg1: i32, %arg2: i32) -> (i32, i32) {
    %c0_i32 = arith.constant 0 : i32
    %c0_i32_0 = arith.constant 0 : i32
    return %c0_i32, %arg1 : i32, i32
  }
  func.func @transform_3(%arg0: i32, %arg1: i32, %arg2: i32) -> (i32, i32) {
    %c0_i32 = arith.constant 0 : i32
    return %arg0, %arg1 : i32, i32
  }
  func.func @transform_4(%arg0: i32, %arg1: i32, %arg2: i32) -> (i32, i32) {
    %c0_i32 = arith.constant 0 : i32
    return %arg0, %arg1 : i32, i32
  }
}

module attributes {stable_mosaic.version = 11 : i64} {
  func.func @_mm_bn_kernel_multi(%arg0: i32, %arg1: i32, %arg2: i32, %arg3: memref<16x512xbf16, #tpu.memory_space<vmem>>, %arg4: memref<512x512xbf16, #tpu.memory_space<vmem>>, %arg5: memref<1x512xf32, #tpu.memory_space<vmem>>, %arg6: memref<16x512xbf16, #tpu.memory_space<vmem>>, %arg7: memref<16x512xf32, #tpu.memory_space<vmem>>) attributes {dimension_semantics = [#tpu.dimension_semantics<parallel>, #tpu.dimension_semantics<parallel>, #tpu.dimension_semantics<arbitrary>], iteration_bounds = array<i64: 1, 1, 9>, scalar_prefetch = 0 : i64, scratch_operands = 1 : i64, tpu.core_type = #tpu.core_type<tc>, window_params = [{transform_indices = @transform_0, window_bounds = array<i64: 16, 512>}, {transform_indices = @transform_1, window_bounds = array<i64: 512, 512>}, {transform_indices = @transform_2, window_bounds = array<i64: 1, 512>}, {transform_indices = @transform_3, window_bounds = array<i64: 16, 512>}]} {
    %c0_i32 = arith.constant 0 : i32
    %0 = arith.cmpi eq, %arg2, %c0_i32 : i32
    %1 = arith.extui %0 : i1 to i32
    %c0_i32_0 = arith.constant 0 : i32
    %2 = arith.cmpi ne, %1, %c0_i32_0 : i32
    scf.if %2 {
      %cst_9 = arith.constant 0.000000e+00 : f32
      %12 = vector.broadcast %cst_9 : f32 to vector<16x512xf32>
      %c0_10 = arith.constant 0 : index
      %c0_11 = arith.constant 0 : index
      %13 = vector.load %arg7[%c0_10, %c0_11] : memref<16x512xf32, #tpu.memory_space<vmem>>, vector<16x512xf32>
      tpu.vector_store %arg7[%c0_10, %c0_11], %12 {strides = array<i32>} : memref<16x512xf32, #tpu.memory_space<vmem>>, vector<16x512xf32>,
    } else {
    }
    %c0 = arith.constant 0 : index
    %c0_1 = arith.constant 0 : index
    %3 = vector.load %arg7[%c0, %c0_1] : memref<16x512xf32, #tpu.memory_space<vmem>>, vector<16x512xf32>
    %c0_2 = arith.constant 0 : index
    %c0_3 = arith.constant 0 : index
    %4 = vector.load %arg3[%c0_2, %c0_3] : memref<16x512xbf16, #tpu.memory_space<vmem>>, vector<16x512xbf16>
    %c0_4 = arith.constant 0 : index
    %c0_5 = arith.constant 0 : index
    %5 = vector.load %arg4[%c0_4, %c0_5] : memref<512x512xbf16, #tpu.memory_space<vmem>>, vector<512x512xbf16>
    %cst = arith.constant dense<0.000000e+00> : vector<16x512xf32>
    %6 = tpu.matmul %4, %5, %cst {dimension_numbers = #tpu.dot_dimension_numbers<[1], [0], [0], [1], [0, 0, 1, 1], [], []>} : vector<16x512xbf16>, vector<512x512xbf16>, vector<16x512xf32> -> vector<16x512xf32>
    %7 = arith.addf %3, %6 : vector<16x512xf32>
    %c0_6 = arith.constant 0 : index
    %c0_7 = arith.constant 0 : index
    %8 = vector.load %arg7[%c0_6, %c0_7] : memref<16x512xf32, #tpu.memory_space<vmem>>, vector<16x512xf32>
    tpu.vector_store %arg7[%c0_6, %c0_7], %7 {strides = array<i32>} : memref<16x512xf32, #tpu.memory_space<vmem>>, vector<16x512xf32>,
    %c8_i32 = arith.constant 8 : i32
    %9 = arith.cmpi eq, %arg2, %c8_i32 : i32
    %10 = arith.extui %9 : i1 to i32
    %c0_i32_8 = arith.constant 0 : i32
    %11 = arith.cmpi ne, %10, %c0_i32_8 : i32
    scf.if %11 {
      %c0_9 = arith.constant 0 : index
      %c0_10 = arith.constant 0 : index
      %12 = vector.load %arg7[%c0_9, %c0_10] : memref<16x512xf32, #tpu.memory_space<vmem>>, vector<16x512xf32>
      %c0_11 = arith.constant 0 : index
      %c0_12 = arith.constant 0 : index
      %13 = vector.load %arg5[%c0_11, %c0_12] : memref<1x512xf32, #tpu.memory_space<vmem>>, vector<1x512xf32>
      %14 = vector.broadcast %13 : vector<1x512xf32> to vector<16x512xf32>
      %15 = arith.addf %12, %14 : vector<16x512xf32>
      %cst_13 = arith.constant 0.000000e+00 : f32
      %16 = vector.broadcast %cst_13 : f32 to vector<16x512xf32>
      %17 = arith.maximumf %15, %16 : vector<16x512xf32>
      %18 = arith.truncf %17 : vector<16x512xf32> to vector<16x512xbf16>
      %c0_14 = arith.constant 0 : index
      %c0_15 = arith.constant 0 : index
      %19 = vector.load %arg6[%c0_14, %c0_15] : memref<16x512xbf16, #tpu.memory_space<vmem>>, vector<16x512xbf16>
      tpu.vector_store %arg6[%c0_14, %c0_15], %18 {strides = array<i32>} : memref<16x512xbf16, #tpu.memory_space<vmem>>, vector<16x512xbf16>,
    } else {
    }
    return
  }
  func.func @transform_0(%arg0: i32, %arg1: i32, %arg2: i32) -> (i32, i32) {
    %c0_i32 = arith.constant 0 : i32
    return %arg0, %arg2 : i32, i32
  }
  func.func @transform_1(%arg0: i32, %arg1: i32, %arg2: i32) -> (i32, i32) {
    %c0_i32 = arith.constant 0 : i32
    return %arg2, %arg1 : i32, i32
  }
  func.func @transform_2(%arg0: i32, %arg1: i32, %arg2: i32) -> (i32, i32) {
    %c0_i32 = arith.constant 0 : i32
    %c0_i32_0 = arith.constant 0 : i32
    return %c0_i32, %arg1 : i32, i32
  }
  func.func @transform_3(%arg0: i32, %arg1: i32, %arg2: i32) -> (i32, i32) {
    %c0_i32 = arith.constant 0 : i32
    return %arg0, %arg1 : i32, i32
  }
}

</mosaic_0001>

<bundles_post_ra>
// kernel: resnet18_forward.21
= control target key start
LH: loop header
LB: loop body
LE: loop exit
PB: predicated region body
PF: predicated region fallthrough
CT: control target
= control target key end

     0   :  { %v1756_v0 = vmov 0   ;;  %s2214_s1 = inlined_call_operand.vmem [shape: bf16[256,128], index: 1, kind: input, shape index: {}]   ;;  %s2215_s0 = inlined_call_operand.vmem [shape: bf16[512,256], index: 0, kind: input, shape index: {}]   ;;  %s2216_s2 = inlined_call_operand.vmem [shape: f32[1,128], index: 2, kind: input, shape index: {}]   ;;  %s2217_s3 = inlined_call_operand.vmem [shape: bf16[512,128], index: 3, kind: output, shape index: {}]  }
   0x1   :  { %534 = vmatprep.subr.bf16.mxu0 %v1756_v0  ;;  %1611 = vmatprep.subr.bf16.mxu1 %v1756_v0  ;;  %v1644_v1 = vld [vmem:[%s2214_s1 + $0x38] sm:$0xff]   ;;  %v1645_v2 = vld [vmem:[%s2214_s1 + $0x30] sm:$0xff]   ;;  %v1646_v3 = vld [vmem:[%s2214_s1 + $0x28] sm:$0xff]  }
   0x2   :  { %535 = vmatpush1.bf16.msra.mxu0 %v1644_v1  ;;  %1627 = vmatpush1.bf16.msra.mxu1 %v1644_v1  ;;  %v1647_v4 = vld [vmem:[%s2214_s1 + $0x20] sm:$0xff]   ;;  %v1648_v5 = vld [vmem:[%s2214_s1 + $0x18] sm:$0xff]   ;;  %v1649_v7 = vld [vmem:[%s2214_s1 + $0x10] sm:$0xff]  }
   0x3   :  { %536 = vmatprep.subr.bf16.mxu0 %v1756_v0  ;;  %1612 = vmatprep.subr.bf16.mxu1 %v1756_v0  ;;  %v1662_v6 = vld [vmem:[%s2215_s0 + $0x4] ss:$8 sps:$4 sm:$0xff]   ;;  %v1652_v11 = vld [vmem:[%s2214_s1 + $0x78] sm:$0xff]   ;;  %v1653_v12 = vld [vmem:[%s2214_s1 + $0x70] sm:$0xff]  }
   0x4   :  { %v1665_v8 = vld [vmem:[%s2215_s0 + $0x104] ss:$8 sps:$4 sm:$0xff]   ;;  %566 = vmatprep.mubr.bf16.mxu0 %v1662_v6  ;;  %v1656_v15 = vld [vmem:[%s2214_s1 + $0x58] sm:$0xff]   ;;  %v1657_v16 = vld [vmem:[%s2214_s1 + $0x50] sm:$0xff]  }
   0x5   :  { %694 = vmatprep.mubr.bf16.mxu1 %v1665_v8  ;;  %v1650_v9 = vld [vmem:[%s2214_s1 + $0x8] sm:$0xff]   ;;  %v1651_v10 = vld [vmem:[%s2214_s1] sm:$0xff]   ;;  %v1666_v21 = vld [vmem:[%s2215_s0 + $0x14] ss:$8 sps:$4 sm:$0xff]  }
   0x6   :  { %537 = vmatpush1.bf16.msra.mxu0 %v1645_v2  ;;  %1628 = vmatpush1.bf16.msra.mxu1 %v1645_v2  ;;  %v1654_v13 = vld [vmem:[%s2214_s1 + $0x68] sm:$0xff]   ;;  %v1655_v14 = vld [vmem:[%s2214_s1 + $0x60] sm:$0xff]   ;;  %v1668_v22 = vld [vmem:[%s2215_s0 + $0x114] ss:$8 sps:$4 sm:$0xff]  }
   0x7   :  { %538 = vmatprep.subr.bf16.mxu0 %v1756_v0  ;;  %1613 = vmatprep.subr.bf16.mxu1 %v1756_v0  ;;  %v1658_v17 = vld [vmem:[%s2214_s1 + $0x48] sm:$0xff]   ;;  %v1659_v18 = vld [vmem:[%s2214_s1 + $0x40] sm:$0xff]   ;;  %v1670_v23 = vld [vmem:[%s2215_s0 + $0x10] ss:$8 sps:$4 sm:$0xff]  }
   0x8   :  { %v1660_v19 = vld [vmem:[%s2215_s0] ss:$8 sps:$4 sm:$0xff]   ;;  %v1671_v24 = vld [vmem:[%s2215_s0 + $0x110] ss:$8 sps:$4 sm:$0xff]   ;;  %v1672_v25 = vld [vmem:[%s2215_s0 + $0x24] ss:$8 sps:$4 sm:$0xff]  }
   0x9   :  { %v1663_v20 = vld [vmem:[%s2215_s0 + $0x100] ss:$8 sps:$4 sm:$0xff]   ;;  %v1674_v26 = vld [vmem:[%s2215_s0 + $0x124] ss:$8 sps:$4 sm:$0xff]   ;;  %v1678_v29 = vld [vmem:[%s2215_s0 + $0x34] ss:$8 sps:$4 sm:$0xff]  }
   0xa   :  { %539 = vmatpush1.bf16.msra.mxu0 %v1646_v3  ;;  %1629 = vmatpush1.bf16.msra.mxu1 %v1646_v3  ;;  %v1676_v27 = vld [vmem:[%s2215_s0 + $0x20] ss:$8 sps:$4 sm:$0xff]   ;;  %v1680_v30 = vld [vmem:[%s2215_s0 + $0x134] ss:$8 sps:$4 sm:$0xff]   ;;  %v1682_v31 = vld [vmem:[%s2215_s0 + $0x30] ss:$8 sps:$4 sm:$0xff]  }
   0xb   :  { %540 = vmatprep.subr.bf16.mxu0 %v1756_v0  ;;  %1614 = vmatprep.subr.bf16.mxu1 %v1756_v0  ;;  %v1677_v28 = vld [vmem:[%s2215_s0 + $0x120] ss:$8 sps:$4 sm:$0xff]   ;;  %v1683_v32 = vld [vmem:[%s2215_s0 + $0x130] ss:$8 sps:$4 sm:$0xff]   ;;  %v1684_v33 = vld [vmem:[%s2215_s0 + $0x44] ss:$8 sps:$4 sm:$0xff]  }
   0xc   :  { %v1686_v34 = vld [vmem:[%s2215_s0 + $0x144] ss:$8 sps:$4 sm:$0xff]   ;;  %v1688_v35 = vld [vmem:[%s2215_s0 + $0x40] ss:$8 sps:$4 sm:$0xff]   ;;  %v1690_v37 = vld [vmem:[%s2215_s0 + $0x54] ss:$8 sps:$4 sm:$0xff]  }
   0xd   :  { %v1689_v36 = vld [vmem:[%s2215_s0 + $0x140] ss:$8 sps:$4 sm:$0xff]   ;;  %v1692_v38 = vld [vmem:[%s2215_s0 + $0x154] ss:$8 sps:$4 sm:$0xff]   ;;  %v1694_v39 = vld [vmem:[%s2215_s0 + $0x50] ss:$8 sps:$4 sm:$0xff]  }
   0xe   :  { %541 = vmatpush1.bf16.msra.mxu0 %v1647_v4  ;;  %1630 = vmatpush1.bf16.msra.mxu1 %v1647_v4  ;;  %v1695_v40 = vld [vmem:[%s2215_s0 + $0x150] ss:$8 sps:$4 sm:$0xff]   ;;  %v1696_v41 = vld [vmem:[%s2215_s0 + $0x64] ss:$8 sps:$4 sm:$0xff]   ;;  %v1700_v43 = vld [vmem:[%s2215_s0 + $0x60] ss:$8 sps:$4 sm:$0xff]  }
   0xf   :  { %542 = vmatprep.subr.bf16.mxu0 %v1756_v0  ;;  %1615 = vmatprep.subr.bf16.mxu1 %v1756_v0  ;;  %v1698_v42 = vld [vmem:[%s2215_s0 + $0x164] ss:$8 sps:$4 sm:$0xff]   ;;  %v1701_v44 = vld [vmem:[%s2215_s0 + $0x160] ss:$8 sps:$4 sm:$0xff]   ;;  %v1702_v45 = vld [vmem:[%s2215_s0 + $0x74] ss:$8 sps:$4 sm:$0xff]  }
  0x10   :  { %v1704_v46 = vld [vmem:[%s2215_s0 + $0x174] ss:$8 sps:$4 sm:$0xff]   ;;  %v1706_v47 = vld [vmem:[%s2215_s0 + $0x70] ss:$8 sps:$4 sm:$0xff]   ;;  %v1708_v49 = vld [vmem:[%s2215_s0 + $0x84] ss:$8 sps:$4 sm:$0xff]  }
  0x11   :  { %v1707_v48 = vld [vmem:[%s2215_s0 + $0x170] ss:$8 sps:$4 sm:$0xff]   ;;  %v1710_v50 = vld [vmem:[%s2215_s0 + $0x184] ss:$8 sps:$4 sm:$0xff]   ;;  %v1712_v51 = vld [vmem:[%s2215_s0 + $0x80] ss:$8 sps:$4 sm:$0xff]  }
  0x12   :  { %543 = vmatpush1.bf16.msra.mxu0 %v1648_v5  ;;  %1631 = vmatpush1.bf16.msra.mxu1 %v1648_v5  ;;  %v1713_v52 = vld [vmem:[%s2215_s0 + $0x180] ss:$8 sps:$4 sm:$0xff]   ;;  %v1714_v53 = vld [vmem:[%s2215_s0 + $0x94] ss:$8 sps:$4 sm:$0xff]   ;;  %v1718_v55 = vld [vmem:[%s2215_s0 + $0x90] ss:$8 sps:$4 sm:$0xff]  }
  0x13   :  { %544 = vmatprep.subr.bf16.mxu0 %v1756_v0  ;;  %1616 = vmatprep.subr.bf16.mxu1 %v1756_v0  ;;  %v1716_v54 = vld [vmem:[%s2215_s0 + $0x194] ss:$8 sps:$4 sm:$0xff]   ;;  %v1719_v56 = vld [vmem:[%s2215_s0 + $0x190] ss:$8 sps:$4 sm:$0xff]   ;;  %v1720_v57 = vld [vmem:[%s2215_s0 + $0xa4] ss:$8 sps:$4 sm:$0xff]  }
  0x14   :  { %v1722_v58 = vld [vmem:[%s2215_s0 + $0x1a4] ss:$8 sps:$4 sm:$0xff]   ;;  %v1724_v59 = vld [vmem:[%s2215_s0 + $0xa0] ss:$8 sps:$4 sm:$0xff]   ;;  %v1726_v61 = vld [vmem:[%s2215_s0 + $0xb4] ss:$8 sps:$4 sm:$0xff]  }
  0x15   :  { %v1725_v60 = vld [vmem:[%s2215_s0 + $0x1a0] ss:$8 sps:$4 sm:$0xff]   ;;  %v1728_v62 = vld [vmem:[%s2215_s0 + $0x1b4] ss:$8 sps:$4 sm:$0xff]   ;;  %v1730_v63 = vld [vmem:[%s2215_s0 + $0xb0] ss:$8 sps:$4 sm:$0xff]  }
  0x16   :  { %545 = vmatpush1.bf16.msra.mxu0 %v1649_v7  ;;  %1632 = vmatpush1.bf16.msra.mxu1 %v1649_v7  ;;  %v1732_v1 = vld [vmem:[%s2215_s0 + $0xc4] ss:$8 sps:$4 sm:$0xff]   ;;  %v1736_v3 = vld [vmem:[%s2215_s0 + $0xc0] ss:$8 sps:$4 sm:$0xff]   ;;  %v1738_v5 = vld [vmem:[%s2215_s0 + $0xd4] ss:$8 sps:$4 sm:$0xff]  }
  0x17   :  { %546 = vmatprep.subr.bf16.mxu0 %v1756_v0  ;;  %1617 = vmatprep.subr.bf16.mxu1 %v1756_v0  ;;  %v1734_v2 = vld [vmem:[%s2215_s0 + $0x1c4] ss:$8 sps:$4 sm:$0xff]   ;;  %v1737_v4 = vld [vmem:[%s2215_s0 + $0x1c0] ss:$8 sps:$4 sm:$0xff]   ;;  %v1740_v6 = vld [vmem:[%s2215_s0 + $0x1d4] ss:$8 sps:$4 sm:$0xff]  }
  0x18   :  { %v1742_v7 = vld [vmem:[%s2215_s0 + $0xd0] ss:$8 sps:$4 sm:$0xff]  }
  0x19   :  { %v1743_v8 = vld [vmem:[%s2215_s0 + $0x1d0] ss:$8 sps:$4 sm:$0xff]  }
  0x1a   :  { %547 = vmatpush1.bf16.msra.mxu0 %v1650_v9  ;;  %1633 = vmatpush1.bf16.msra.mxu1 %v1650_v9  ;;  %v1744_v9 = vld [vmem:[%s2215_s0 + $0xe4] ss:$8 sps:$4 sm:$0xff]  }
  0x1b   :  { %548 = vmatprep.subr.bf16.mxu0 %v1756_v0  ;;  %1618 = vmatprep.subr.bf16.mxu1 %v1756_v0 }
  0x1e   :  { %549 = vmatpush1.bf16.msra.mxu0 %v1651_v10  ;;  %1634 = vmatpush1.bf16.msra.mxu1 %v1651_v10  ;;  %v1746_v10 = vld [vmem:[%s2215_s0 + $0x1e4] ss:$8 sps:$4 sm:$0xff]  }
  0x1f   :  { %550 = vmatprep.subr.bf16.mxu0 %v1756_v0  ;;  %1619 = vmatprep.subr.bf16.mxu1 %v1756_v0 }
  0x22   :  { %551 = vmatpush2.bf16.msra.mxu0 %v1652_v11  ;;  %1635 = vmatpush2.bf16.msra.mxu1 %v1652_v11  ;;  %v1748_v11 = vld [vmem:[%s2215_s0 + $0xe0] ss:$8 sps:$4 sm:$0xff]  }
  0x23   :  { %552 = vmatprep.subr.bf16.mxu0 %v1756_v0  ;;  %1620 = vmatprep.subr.bf16.mxu1 %v1756_v0 }
  0x26   :  { %553 = vmatpush2.bf16.msra.mxu0 %v1653_v12  ;;  %1636 = vmatpush2.bf16.msra.mxu1 %v1653_v12  ;;  %v1749_v12 = vld [vmem:[%s2215_s0 + $0x1e0] ss:$8 sps:$4 sm:$0xff]  }
  0x27   :  { %554 = vmatprep.subr.bf16.mxu0 %v1756_v0  ;;  %1621 = vmatprep.subr.bf16.mxu1 %v1756_v0 }
  0x2a   :  { %555 = vmatpush2.bf16.msra.mxu0 %v1654_v13  ;;  %1637 = vmatpush2.bf16.msra.mxu1 %v1654_v13  ;;  %v1750_v13 = vld [vmem:[%s2215_s0 + $0xf4] ss:$8 sps:$4 sm:$0xff]  }
  0x2b   :  { %556 = vmatprep.subr.bf16.mxu0 %v1756_v0  ;;  %1622 = vmatprep.subr.bf16.mxu1 %v1756_v0 }
  0x2e   :  { %557 = vmatpush2.bf16.msra.mxu0 %v1655_v14  ;;  %1638 = vmatpush2.bf16.msra.mxu1 %v1655_v14  ;;  %v1752_v14 = vld [vmem:[%s2215_s0 + $0x1f4] ss:$8 sps:$4 sm:$0xff]  }
  0x2f   :  { %558 = vmatprep.subr.bf16.mxu0 %v1756_v0  ;;  %1623 = vmatprep.subr.bf16.mxu1 %v1756_v0 }
  0x32   :  { %559 = vmatpush2.bf16.msra.mxu0 %v1656_v15  ;;  %1639 = vmatpush2.bf16.msra.mxu1 %v1656_v15  ;;  %v1754_v15 = vld [vmem:[%s2215_s0 + $0xf0] ss:$8 sps:$4 sm:$0xff]  }
  0x33   :  { %560 = vmatprep.subr.bf16.mxu0 %v1756_v0  ;;  %1624 = vmatprep.subr.bf16.mxu1 %v1756_v0 }
  0x36   :  { %561 = vmatpush2.bf16.msra.mxu0 %v1657_v16  ;;  %1640 = vmatpush2.bf16.msra.mxu1 %v1657_v16  ;;  %v1755_v16 = vld [vmem:[%s2215_s0 + $0x1f0] ss:$8 sps:$4 sm:$0xff]  }
  0x37   :  { %562 = vmatprep.subr.bf16.mxu0 %v1756_v0  ;;  %1625 = vmatprep.subr.bf16.mxu1 %v1756_v0 }
  0x3a   :  { %563 = vmatpush2.bf16.msra.mxu0 %v1658_v17  ;;  %1641 = vmatpush2.bf16.msra.mxu1 %v1658_v17  ;;  %v2052_v17 = vld [vmem:[%s2216_s2] ss:$0 sm:$0xff] }
  0x3b   :  { %564 = vmatprep.subr.bf16.mxu0 %v1756_v0  ;;  %1626 = vmatprep.subr.bf16.mxu1 %v1756_v0  ;;  %v1731_v0 = vld [vmem:[%s2215_s0 + $0x1b0] ss:$8 sps:$4 sm:$0xff]  }
  0x3e   :  { %565 = vmatpush2.bf16.msra.mxu0 %v1659_v18  ;;  %1642 = vmatpush2.bf16.msra.mxu1 %v1659_v18 }
  0x41   :  { %567 = vmatmul.mubr.bf16.vlgmr.msra.gmra.mxu0 %v1660_v19  ;;  %695 = vmatmul.mubr.bf16.vlgmr.msra.gmra.mxu1 %v1663_v20 }
  0x42   :  { %574 = vmatprep.mubr.bf16.mxu0 %v1666_v21  ;;  %702 = vmatprep.mubr.bf16.mxu1 %v1668_v22 }
  0x49   :  { %575 = vmatmul.mubr.bf16.gmra.mxu0 %v1670_v23  ;;  %703 = vmatmul.mubr.bf16.gmra.mxu1 %v1671_v24 }
  0x4a   :  { %582 = vmatprep.mubr.bf16.mxu0 %v1672_v25  ;;  %710 = vmatprep.mubr.bf16.mxu1 %v1674_v26 }
  0x51   :  { %583 = vmatmul.mubr.bf16.gmra.mxu0 %v1676_v27  ;;  %711 = vmatmul.mubr.bf16.gmra.mxu1 %v1677_v28 }
  0x52   :  { %590 = vmatprep.mubr.bf16.mxu0 %v1678_v29  ;;  %718 = vmatprep.mubr.bf16.mxu1 %v1680_v30 }
  0x59   :  { %591 = vmatmul.mubr.bf16.gmra.mxu0 %v1682_v31  ;;  %719 = vmatmul.mubr.bf16.gmra.mxu1 %v1683_v32 }
  0x5a   :  { %598 = vmatprep.mubr.bf16.mxu0 %v1684_v33  ;;  %726 = vmatprep.mubr.bf16.mxu1 %v1686_v34 }
  0x61   :  { %599 = vmatmul.mubr.bf16.gmra.mxu0 %v1688_v35  ;;  %727 = vmatmul.mubr.bf16.gmra.mxu1 %v1689_v36 }
  0x62   :  { %606 = vmatprep.mubr.bf16.mxu0 %v1690_v37  ;;  %734 = vmatprep.mubr.bf16.mxu1 %v1692_v38 }
  0x69   :  { %607 = vmatmul.mubr.bf16.gmra.mxu0 %v1694_v39  ;;  %735 = vmatmul.mubr.bf16.gmra.mxu1 %v1695_v40 }
  0x6a   :  { %614 = vmatprep.mubr.bf16.mxu0 %v1696_v41  ;;  %742 = vmatprep.mubr.bf16.mxu1 %v1698_v42 }
  0x71   :  { %615 = vmatmul.mubr.bf16.gmra.mxu0 %v1700_v43  ;;  %743 = vmatmul.mubr.bf16.gmra.mxu1 %v1701_v44 }
  0x72   :  { %622 = vmatprep.mubr.bf16.mxu0 %v1702_v45  ;;  %750 = vmatprep.mubr.bf16.mxu1 %v1704_v46 }
  0x79   :  { %623 = vmatmul.mubr.bf16.gmra.mxu0 %v1706_v47  ;;  %751 = vmatmul.mubr.bf16.gmra.mxu1 %v1707_v48 }
  0x7a   :  { %630 = vmatprep.mubr.bf16.mxu0 %v1708_v49  ;;  %758 = vmatprep.mubr.bf16.mxu1 %v1710_v50 }
  0x81   :  { %631 = vmatmul.mubr.bf16.gmra.mxu0 %v1712_v51  ;;  %759 = vmatmul.mubr.bf16.gmra.mxu1 %v1713_v52 }
  0x82   :  { %638 = vmatprep.mubr.bf16.mxu0 %v1714_v53  ;;  %766 = vmatprep.mubr.bf16.mxu1 %v1716_v54 }
  0x89   :  { %639 = vmatmul.mubr.bf16.gmra.mxu0 %v1718_v55  ;;  %767 = vmatmul.mubr.bf16.gmra.mxu1 %v1719_v56 }
  0x8a   :  { %646 = vmatprep.mubr.bf16.mxu0 %v1720_v57  ;;  %774 = vmatprep.mubr.bf16.mxu1 %v1722_v58 }
  0x91   :  { %647 = vmatmul.mubr.bf16.gmra.mxu0 %v1724_v59  ;;  %775 = vmatmul.mubr.bf16.gmra.mxu1 %v1725_v60 }
  0x92   :  { %654 = vmatprep.mubr.bf16.mxu0 %v1726_v61  ;;  %782 = vmatprep.mubr.bf16.mxu1 %v1728_v62 }
  0x99   :  { %655 = vmatmul.mubr.bf16.gmra.mxu0 %v1730_v63  ;;  %783 = vmatmul.mubr.bf16.gmra.mxu1 %v1731_v0 }
  0x9a   :  { %662 = vmatprep.mubr.bf16.mxu0 %v1732_v1  ;;  %790 = vmatprep.mubr.bf16.mxu1 %v1734_v2 }
  0xa1   :  { %663 = vmatmul.mubr.bf16.gmra.mxu0 %v1736_v3  ;;  %791 = vmatmul.mubr.bf16.gmra.mxu1 %v1737_v4 }
  0xa2   :  { %670 = vmatprep.mubr.bf16.mxu0 %v1738_v5  ;;  %798 = vmatprep.mubr.bf16.mxu1 %v1740_v6 }
  0xa9   :  { %671 = vmatmul.mubr.bf16.gmra.mxu0 %v1742_v7  ;;  %799 = vmatmul.mubr.bf16.gmra.mxu1 %v1743_v8 }
  0xaa   :  { %678 = vmatprep.mubr.bf16.mxu0 %v1744_v9  ;;  %806 = vmatprep.mubr.bf16.mxu1 %v1746_v10 }
  0xb1   :  { %679 = vmatmul.mubr.bf16.gmra.mxu0 %v1748_v11  ;;  %807 = vmatmul.mubr.bf16.gmra.mxu1 %v1749_v12 }
  0xb2   :  { %686 = vmatprep.mubr.bf16.mxu0 %v1750_v13  ;;  %814 = vmatprep.mubr.bf16.mxu1 %v1752_v14 }
  0xb9   :  { %687 = vmatmul.mubr.bf16.gmra.mxu0 %v1754_v15  ;;  %815 = vmatmul.mubr.bf16.gmra.mxu1 %v1755_v16 }
 0x101   :  { %v568_v18 = vpop.f32.mrf.mxu0  ;;  %v696_v19 = vpop.f32.mrf.mxu1 }
 0x102   :  { %v569_v22 = vadd.f32 %v2052_v17, %v568_v18  ;;  %v697_v23 = vadd.f32 %v2052_v17, %v696_v19 }
 0x103   :  { %v570_v20 = vpop.f32.mrf.mxu0  ;;  %v698_v21 = vpop.f32.mrf.mxu1 }
 0x104   :  { %v823_v30 = vmax.f32 %v569_v22, 0.0  ;;  %v855_v31 = vmax.f32 %v697_v23, 0.0 }
 0x105   :  { %v571_v24 = vpop.f32.mrf.mxu0  ;;  %v699_v25 = vpop.f32.mrf.mxu1 }
 0x106   :  { %v572_v26 = vadd.f32 %v2052_v17, %v571_v24  ;;  %v700_v27 = vadd.f32 %v2052_v17, %v699_v25 }
 0x107   :  { %v573_v28 = vpop.f32.mrf.mxu0  ;;  %v701_v29 = vpop.f32.mrf.mxu1 }
 0x108   :  { %v824_v32 = vmax.f32 %v572_v26, 0.0  ;;  %v856_v33 = vmax.f32 %v700_v27, 0.0 }
 0x109   :  { %v576_v34 = vpop.f32.mrf.mxu0  ;;  %v704_v35 = vpop.f32.mrf.mxu1 }
 0x10a   :  { %v1423_v36 = vpack.c.bf16 %v824_v32, %v823_v30  ;;  %v1503_v37 = vpack.c.bf16 %v856_v33, %v855_v31  ;;  %v577_v40 = vadd.f32 %v2052_v17, %v576_v34  ;;  %v705_v41 = vadd.f32 %v2052_v17, %v704_v35 }
 0x10b   :  { %v578_v38 = vpop.f32.mrf.mxu0  ;;  %v706_v39 = vpop.f32.mrf.mxu1 }
 0x10c   :  { %1424 = vst [vmem:[%s2217_s3] sm:$0xff] %v1423_v36   ;;  %1595 = vst [vmem:[%s2217_s3 + $0x80] sm:$0xff] %v1503_v37   ;;  %v825_v48 = vmax.f32 %v577_v40, 0.0  ;;  %v857_v49 = vmax.f32 %v705_v41, 0.0 }
 0x10d   :  { %v579_v42 = vpop.f32.mrf.mxu0  ;;  %v707_v43 = vpop.f32.mrf.mxu1 }
 0x10e   :  { %v580_v44 = vadd.f32 %v2052_v17, %v579_v42  ;;  %v708_v45 = vadd.f32 %v2052_v17, %v707_v43 }
 0x10f   :  { %v581_v46 = vpop.f32.mrf.mxu0  ;;  %v709_v47 = vpop.f32.mrf.mxu1 }
 0x110   :  { %v826_v50 = vmax.f32 %v580_v44, 0.0  ;;  %v858_v51 = vmax.f32 %v708_v45, 0.0 }
 0x111   :  { %v584_v52 = vpop.f32.mrf.mxu0  ;;  %v712_v53 = vpop.f32.mrf.mxu1 }
 0x112   :  { %v1428_v54 = vpack.c.bf16 %v826_v50, %v825_v48  ;;  %v1508_v55 = vpack.c.bf16 %v858_v51, %v857_v49  ;;  %v585_v58 = vadd.f32 %v2052_v17, %v584_v52  ;;  %v713_v59 = vadd.f32 %v2052_v17, %v712_v53 }
 0x113   :  { %v586_v56 = vpop.f32.mrf.mxu0  ;;  %v714_v57 = vpop.f32.mrf.mxu1 }
 0x114   :  { %1580 = vst [vmem:[%s2217_s3 + $0x8] sm:$0xff] %v1428_v54   ;;  %1596 = vst [vmem:[%s2217_s3 + $0x88] sm:$0xff] %v1508_v55   ;;  %v827_v2 = vmax.f32 %v585_v58, 0.0  ;;  %v859_v3 = vmax.f32 %v713_v59, 0.0 }
 0x115   :  { %v587_v60 = vpop.f32.mrf.mxu0  ;;  %v715_v61 = vpop.f32.mrf.mxu1 }
 0x116   :  { %v588_v62 = vadd.f32 %v2052_v17, %v587_v60  ;;  %v716_v63 = vadd.f32 %v2052_v17, %v715_v61 }
 0x117   :  { %v589_v0 = vpop.f32.mrf.mxu0  ;;  %v717_v1 = vpop.f32.mrf.mxu1 }
 0x118   :  { %v828_v4 = vmax.f32 %v588_v62, 0.0  ;;  %v860_v5 = vmax.f32 %v716_v63, 0.0 }
 0x119   :  { %v592_v6 = vpop.f32.mrf.mxu0  ;;  %v720_v7 = vpop.f32.mrf.mxu1 }
 0x11a   :  { %v1433_v8 = vpack.c.bf16 %v828_v4, %v827_v2  ;;  %v1513_v9 = vpack.c.bf16 %v860_v5, %v859_v3  ;;  %v593_v12 = vadd.f32 %v2052_v17, %v592_v6  ;;  %v721_v13 = vadd.f32 %v2052_v17, %v720_v7 }
 0x11b   :  { %v594_v10 = vpop.f32.mrf.mxu0  ;;  %v722_v11 = vpop.f32.mrf.mxu1 }
 0x11c   :  { %1581 = vst [vmem:[%s2217_s3 + $0x10] sm:$0xff] %v1433_v8   ;;  %1597 = vst [vmem:[%s2217_s3 + $0x90] sm:$0xff] %v1513_v9   ;;  %v829_v21 = vmax.f32 %v593_v12, 0.0  ;;  %v861_v22 = vmax.f32 %v721_v13, 0.0 }
 0x11d   :  { %v595_v14 = vpop.f32.mrf.mxu0  ;;  %v723_v15 = vpop.f32.mrf.mxu1 }
 0x11e   :  { %v596_v16 = vadd.f32 %v2052_v17, %v595_v14  ;;  %v724_v18 = vadd.f32 %v2052_v17, %v723_v15 }
 0x11f   :  { %v597_v19 = vpop.f32.mrf.mxu0  ;;  %v725_v20 = vpop.f32.mrf.mxu1 }
 0x120   :  { %v830_v23 = vmax.f32 %v596_v16, 0.0  ;;  %v862_v24 = vmax.f32 %v724_v18, 0.0 }
 0x121   :  { %v600_v25 = vpop.f32.mrf.mxu0  ;;  %v728_v26 = vpop.f32.mrf.mxu1 }
 0x122   :  { %v1438_v27 = vpack.c.bf16 %v830_v23, %v829_v21  ;;  %v1518_v28 = vpack.c.bf16 %v862_v24, %v861_v22  ;;  %v601_v31 = vadd.f32 %v2052_v17, %v600_v25  ;;  %v729_v32 = vadd.f32 %v2052_v17, %v728_v26 }
 0x123   :  { %v602_v29 = vpop.f32.mrf.mxu0  ;;  %v730_v30 = vpop.f32.mrf.mxu1 }
 0x124   :  { %1582 = vst [vmem:[%s2217_s3 + $0x18] sm:$0xff] %v1438_v27   ;;  %1598 = vst [vmem:[%s2217_s3 + $0x98] sm:$0xff] %v1518_v28   ;;  %v831_v39 = vmax.f32 %v601_v31, 0.0  ;;  %v863_v40 = vmax.f32 %v729_v32, 0.0 }
 0x125   :  { %v603_v33 = vpop.f32.mrf.mxu0  ;;  %v731_v34 = vpop.f32.mrf.mxu1 }
 0x126   :  { %v604_v35 = vadd.f32 %v2052_v17, %v603_v33  ;;  %v732_v36 = vadd.f32 %v2052_v17, %v731_v34 }
 0x127   :  { %v605_v37 = vpop.f32.mrf.mxu0  ;;  %v733_v38 = vpop.f32.mrf.mxu1 }
 0x128   :  { %v832_v41 = vmax.f32 %v604_v35, 0.0  ;;  %v864_v42 = vmax.f32 %v732_v36, 0.0 }
 0x129   :  { %v608_v43 = vpop.f32.mrf.mxu0  ;;  %v736_v44 = vpop.f32.mrf.mxu1 }
 0x12a   :  { %v1443_v45 = vpack.c.bf16 %v832_v41, %v831_v39  ;;  %v1523_v46 = vpack.c.bf16 %v864_v42, %v863_v40  ;;  %v609_v49 = vadd.f32 %v2052_v17, %v608_v43  ;;  %v737_v50 = vadd.f32 %v2052_v17, %v736_v44 }
 0x12b   :  { %v610_v47 = vpop.f32.mrf.mxu0  ;;  %v738_v48 = vpop.f32.mrf.mxu1 }
 0x12c   :  { %1583 = vst [vmem:[%s2217_s3 + $0x20] sm:$0xff] %v1443_v45   ;;  %1599 = vst [vmem:[%s2217_s3 + $0xa0] sm:$0xff] %v1523_v46   ;;  %v833_v57 = vmax.f32 %v609_v49, 0.0  ;;  %v865_v58 = vmax.f32 %v737_v50, 0.0 }
 0x12d   :  { %v611_v51 = vpop.f32.mrf.mxu0  ;;  %v739_v52 = vpop.f32.mrf.mxu1 }
 0x12e   :  { %v612_v53 = vadd.f32 %v2052_v17, %v611_v51  ;;  %v740_v54 = vadd.f32 %v2052_v17, %v739_v52 }
 0x12f   :  { %v613_v55 = vpop.f32.mrf.mxu0  ;;  %v741_v56 = vpop.f32.mrf.mxu1 }
 0x130   :  { %v834_v59 = vmax.f32 %v612_v53, 0.0  ;;  %v866_v60 = vmax.f32 %v740_v54, 0.0 }
 0x131   :  { %v616_v61 = vpop.f32.mrf.mxu0  ;;  %v744_v62 = vpop.f32.mrf.mxu1 }
 0x132   :  { %v1448_v63 = vpack.c.bf16 %v834_v59, %v833_v57  ;;  %v1528_v0 = vpack.c.bf16 %v866_v60, %v865_v58  ;;  %v617_v3 = vadd.f32 %v2052_v17, %v616_v61  ;;  %v745_v4 = vadd.f32 %v2052_v17, %v744_v62 }
 0x133   :  { %v618_v1 = vpop.f32.mrf.mxu0  ;;  %v746_v2 = vpop.f32.mrf.mxu1 }
 0x134   :  { %1584 = vst [vmem:[%s2217_s3 + $0x28] sm:$0xff] %v1448_v63   ;;  %1600 = vst [vmem:[%s2217_s3 + $0xa8] sm:$0xff] %v1528_v0   ;;  %v835_v11 = vmax.f32 %v617_v3, 0.0  ;;  %v867_v12 = vmax.f32 %v745_v4, 0.0 }
 0x135   :  { %v619_v5 = vpop.f32.mrf.mxu0  ;;  %v747_v6 = vpop.f32.mrf.mxu1 }
 0x136   :  { %v620_v7 = vadd.f32 %v2052_v17, %v619_v5  ;;  %v748_v8 = vadd.f32 %v2052_v17, %v747_v6 }
 0x137   :  { %v621_v9 = vpop.f32.mrf.mxu0  ;;  %v749_v10 = vpop.f32.mrf.mxu1 }
 0x138   :  { %v836_v13 = vmax.f32 %v620_v7, 0.0  ;;  %v868_v14 = vmax.f32 %v748_v8, 0.0 }
 0x139   :  { %v624_v15 = vpop.f32.mrf.mxu0  ;;  %v752_v16 = vpop.f32.mrf.mxu1 }
 0x13a   :  { %v1453_v18 = vpack.c.bf16 %v836_v13, %v835_v11  ;;  %v1533_v19 = vpack.c.bf16 %v868_v14, %v867_v12  ;;  %v625_v22 = vadd.f32 %v2052_v17, %v624_v15  ;;  %v753_v23 = vadd.f32 %v2052_v17, %v752_v16 }
 0x13b   :  { %v626_v20 = vpop.f32.mrf.mxu0  ;;  %v754_v21 = vpop.f32.mrf.mxu1 }
 0x13c   :  { %1585 = vst [vmem:[%s2217_s3 + $0x30] sm:$0xff] %v1453_v18   ;;  %1601 = vst [vmem:[%s2217_s3 + $0xb0] sm:$0xff] %v1533_v19   ;;  %v837_v30 = vmax.f32 %v625_v22, 0.0  ;;  %v869_v31 = vmax.f32 %v753_v23, 0.0 }
 0x13d   :  { %v627_v24 = vpop.f32.mrf.mxu0  ;;  %v755_v25 = vpop.f32.mrf.mxu1 }
 0x13e   :  { %v628_v26 = vadd.f32 %v2052_v17, %v627_v24  ;;  %v756_v27 = vadd.f32 %v2052_v17, %v755_v25 }
 0x13f   :  { %v629_v28 = vpop.f32.mrf.mxu0  ;;  %v757_v29 = vpop.f32.mrf.mxu1 }
 0x140   :  { %v838_v32 = vmax.f32 %v628_v26, 0.0  ;;  %v870_v33 = vmax.f32 %v756_v27, 0.0 }
 0x141   :  { %v632_v34 = vpop.f32.mrf.mxu0  ;;  %v760_v35 = vpop.f32.mrf.mxu1 }
 0x142   :  { %v1458_v36 = vpack.c.bf16 %v838_v32, %v837_v30  ;;  %v1538_v37 = vpack.c.bf16 %v870_v33, %v869_v31  ;;  %v633_v40 = vadd.f32 %v2052_v17, %v632_v34  ;;  %v761_v41 = vadd.f32 %v2052_v17, %v760_v35 }
 0x143   :  { %v634_v38 = vpop.f32.mrf.mxu0  ;;  %v762_v39 = vpop.f32.mrf.mxu1 }
 0x144   :  { %1586 = vst [vmem:[%s2217_s3 + $0x38] sm:$0xff] %v1458_v36   ;;  %1602 = vst [vmem:[%s2217_s3 + $0xb8] sm:$0xff] %v1538_v37   ;;  %v839_v48 = vmax.f32 %v633_v40, 0.0  ;;  %v871_v49 = vmax.f32 %v761_v41, 0.0 }
 0x145   :  { %v635_v42 = vpop.f32.mrf.mxu0  ;;  %v763_v43 = vpop.f32.mrf.mxu1 }
 0x146   :  { %v636_v44 = vadd.f32 %v2052_v17, %v635_v42  ;;  %v764_v45 = vadd.f32 %v2052_v17, %v763_v43 }
 0x147   :  { %v637_v46 = vpop.f32.mrf.mxu0  ;;  %v765_v47 = vpop.f32.mrf.mxu1 }
 0x148   :  { %v840_v50 = vmax.f32 %v636_v44, 0.0  ;;  %v872_v51 = vmax.f32 %v764_v45, 0.0 }
 0x149   :  { %v640_v52 = vpop.f32.mrf.mxu0  ;;  %v768_v53 = vpop.f32.mrf.mxu1 }
 0x14a   :  { %v1463_v54 = vpack.c.bf16 %v840_v50, %v839_v48  ;;  %v1543_v55 = vpack.c.bf16 %v872_v51, %v871_v49  ;;  %v641_v58 = vadd.f32 %v2052_v17, %v640_v52  ;;  %v769_v59 = vadd.f32 %v2052_v17, %v768_v53 }
 0x14b   :  { %v642_v56 = vpop.f32.mrf.mxu0  ;;  %v770_v57 = vpop.f32.mrf.mxu1 }
 0x14c   :  { %1587 = vst [vmem:[%s2217_s3 + $0x40] sm:$0xff] %v1463_v54   ;;  %1603 = vst [vmem:[%s2217_s3 + $0xc0] sm:$0xff] %v1543_v55   ;;  %v841_v2 = vmax.f32 %v641_v58, 0.0  ;;  %v873_v3 = vmax.f32 %v769_v59, 0.0 }
 0x14d   :  { %v643_v60 = vpop.f32.mrf.mxu0  ;;  %v771_v61 = vpop.f32.mrf.mxu1 }
 0x14e   :  { %v644_v62 = vadd.f32 %v2052_v17, %v643_v60  ;;  %v772_v63 = vadd.f32 %v2052_v17, %v771_v61 }
 0x14f   :  { %v645_v0 = vpop.f32.mrf.mxu0  ;;  %v773_v1 = vpop.f32.mrf.mxu1 }
 0x150   :  { %v842_v4 = vmax.f32 %v644_v62, 0.0  ;;  %v874_v5 = vmax.f32 %v772_v63, 0.0 }
 0x151   :  { %v648_v6 = vpop.f32.mrf.mxu0  ;;  %v776_v7 = vpop.f32.mrf.mxu1 }
 0x152   :  { %v1468_v8 = vpack.c.bf16 %v842_v4, %v841_v2  ;;  %v1548_v9 = vpack.c.bf16 %v874_v5, %v873_v3  ;;  %v649_v12 = vadd.f32 %v2052_v17, %v648_v6  ;;  %v777_v13 = vadd.f32 %v2052_v17, %v776_v7 }
 0x153   :  { %v650_v10 = vpop.f32.mrf.mxu0  ;;  %v778_v11 = vpop.f32.mrf.mxu1 }
 0x154   :  { %1588 = vst [vmem:[%s2217_s3 + $0x48] sm:$0xff] %v1468_v8   ;;  %1604 = vst [vmem:[%s2217_s3 + $0xc8] sm:$0xff] %v1548_v9   ;;  %v843_v21 = vmax.f32 %v649_v12, 0.0  ;;  %v875_v22 = vmax.f32 %v777_v13, 0.0 }
 0x155   :  { %v651_v14 = vpop.f32.mrf.mxu0  ;;  %v779_v15 = vpop.f32.mrf.mxu1 }
 0x156   :  { %v652_v16 = vadd.f32 %v2052_v17, %v651_v14  ;;  %v780_v18 = vadd.f32 %v2052_v17, %v779_v15 }
 0x157   :  { %v653_v19 = vpop.f32.mrf.mxu0  ;;  %v781_v20 = vpop.f32.mrf.mxu1 }
 0x158   :  { %v844_v23 = vmax.f32 %v652_v16, 0.0  ;;  %v876_v24 = vmax.f32 %v780_v18, 0.0 }
 0x159   :  { %v656_v25 = vpop.f32.mrf.mxu0  ;;  %v784_v26 = vpop.f32.mrf.mxu1 }
 0x15a   :  { %v1473_v27 = vpack.c.bf16 %v844_v23, %v843_v21  ;;  %v1553_v28 = vpack.c.bf16 %v876_v24, %v875_v22  ;;  %v657_v31 = vadd.f32 %v2052_v17, %v656_v25  ;;  %v785_v32 = vadd.f32 %v2052_v17, %v784_v26 }
 0x15b   :  { %v658_v29 = vpop.f32.mrf.mxu0  ;;  %v786_v30 = vpop.f32.mrf.mxu1 }
 0x15c   :  { %1589 = vst [vmem:[%s2217_s3 + $0x50] sm:$0xff] %v1473_v27   ;;  %1605 = vst [vmem:[%s2217_s3 + $0xd0] sm:$0xff] %v1553_v28   ;;  %v845_v39 = vmax.f32 %v657_v31, 0.0  ;;  %v877_v40 = vmax.f32 %v785_v32, 0.0 }
 0x15d   :  { %v659_v33 = vpop.f32.mrf.mxu0  ;;  %v787_v34 = vpop.f32.mrf.mxu1 }
 0x15e   :  { %v660_v35 = vadd.f32 %v2052_v17, %v659_v33  ;;  %v788_v36 = vadd.f32 %v2052_v17, %v787_v34 }
 0x15f   :  { %v661_v37 = vpop.f32.mrf.mxu0  ;;  %v789_v38 = vpop.f32.mrf.mxu1 }
 0x160   :  { %v846_v41 = vmax.f32 %v660_v35, 0.0  ;;  %v878_v42 = vmax.f32 %v788_v36, 0.0 }
 0x161   :  { %v664_v43 = vpop.f32.mrf.mxu0  ;;  %v792_v44 = vpop.f32.mrf.mxu1 }
 0x162   :  { %v1478_v45 = vpack.c.bf16 %v846_v41, %v845_v39  ;;  %v1558_v46 = vpack.c.bf16 %v878_v42, %v877_v40  ;;  %v665_v49 = vadd.f32 %v2052_v17, %v664_v43  ;;  %v793_v50 = vadd.f32 %v2052_v17, %v792_v44 }
 0x163   :  { %v666_v47 = vpop.f32.mrf.mxu0  ;;  %v794_v48 = vpop.f32.mrf.mxu1 }
 0x164   :  { %1590 = vst [vmem:[%s2217_s3 + $0x58] sm:$0xff] %v1478_v45   ;;  %1606 = vst [vmem:[%s2217_s3 + $0xd8] sm:$0xff] %v1558_v46   ;;  %v847_v57 = vmax.f32 %v665_v49, 0.0  ;;  %v879_v58 = vmax.f32 %v793_v50, 0.0 }
 0x165   :  { %v667_v51 = vpop.f32.mrf.mxu0  ;;  %v795_v52 = vpop.f32.mrf.mxu1 }
 0x166   :  { %v668_v53 = vadd.f32 %v2052_v17, %v667_v51  ;;  %v796_v54 = vadd.f32 %v2052_v17, %v795_v52 }
 0x167   :  { %v669_v55 = vpop.f32.mrf.mxu0  ;;  %v797_v56 = vpop.f32.mrf.mxu1 }
 0x168   :  { %v848_v59 = vmax.f32 %v668_v53, 0.0  ;;  %v880_v60 = vmax.f32 %v796_v54, 0.0 }
 0x169   :  { %v672_v61 = vpop.f32.mrf.mxu0  ;;  %v800_v62 = vpop.f32.mrf.mxu1 }
 0x16a   :  { %v1483_v63 = vpack.c.bf16 %v848_v59, %v847_v57  ;;  %v1563_v0 = vpack.c.bf16 %v880_v60, %v879_v58  ;;  %v673_v3 = vadd.f32 %v2052_v17, %v672_v61  ;;  %v801_v4 = vadd.f32 %v2052_v17, %v800_v62 }
 0x16b   :  { %v674_v1 = vpop.f32.mrf.mxu0  ;;  %v802_v2 = vpop.f32.mrf.mxu1 }
 0x16c   :  { %1591 = vst [vmem:[%s2217_s3 + $0x60] sm:$0xff] %v1483_v63   ;;  %1607 = vst [vmem:[%s2217_s3 + $0xe0] sm:$0xff] %v1563_v0   ;;  %v849_v11 = vmax.f32 %v673_v3, 0.0  ;;  %v881_v12 = vmax.f32 %v801_v4, 0.0 }
 0x16d   :  { %v675_v5 = vpop.f32.mrf.mxu0  ;;  %v803_v6 = vpop.f32.mrf.mxu1 }
 0x16e   :  { %v676_v7 = vadd.f32 %v2052_v17, %v675_v5  ;;  %v804_v8 = vadd.f32 %v2052_v17, %v803_v6 }
 0x16f   :  { %v677_v9 = vpop.f32.mrf.mxu0  ;;  %v805_v10 = vpop.f32.mrf.mxu1 }
 0x170   :  { %v850_v13 = vmax.f32 %v676_v7, 0.0  ;;  %v882_v14 = vmax.f32 %v804_v8, 0.0 }
 0x171   :  { %v680_v15 = vpop.f32.mrf.mxu0  ;;  %v808_v16 = vpop.f32.mrf.mxu1 }
 0x172   :  { %v1488_v18 = vpack.c.bf16 %v850_v13, %v849_v11  ;;  %v1568_v19 = vpack.c.bf16 %v882_v14, %v881_v12  ;;  %v681_v22 = vadd.f32 %v2052_v17, %v680_v15  ;;  %v809_v23 = vadd.f32 %v2052_v17, %v808_v16 }
 0x173   :  { %v682_v20 = vpop.f32.mrf.mxu0  ;;  %v810_v21 = vpop.f32.mrf.mxu1 }
 0x174   :  { %1592 = vst [vmem:[%s2217_s3 + $0x68] sm:$0xff] %v1488_v18   ;;  %1608 = vst [vmem:[%s2217_s3 + $0xe8] sm:$0xff] %v1568_v19   ;;  %v851_v30 = vmax.f32 %v681_v22, 0.0  ;;  %v883_v31 = vmax.f32 %v809_v23, 0.0 }
 0x175   :  { %v683_v24 = vpop.f32.mrf.mxu0  ;;  %v811_v25 = vpop.f32.mrf.mxu1 }
 0x176   :  { %v684_v26 = vadd.f32 %v2052_v17, %v683_v24  ;;  %v812_v27 = vadd.f32 %v2052_v17, %v811_v25 }
 0x177   :  { %v685_v28 = vpop.f32.mrf.mxu0  ;;  %v813_v29 = vpop.f32.mrf.mxu1 }
 0x178   :  { %v852_v32 = vmax.f32 %v684_v26, 0.0  ;;  %v884_v33 = vmax.f32 %v812_v27, 0.0 }
 0x179   :  { %v688_v34 = vpop.f32.mrf.mxu0  ;;  %v816_v35 = vpop.f32.mrf.mxu1 }
 0x17a   :  { %v1493_v36 = vpack.c.bf16 %v852_v32, %v851_v30  ;;  %v1573_v37 = vpack.c.bf16 %v884_v33, %v883_v31  ;;  %v689_v40 = vadd.f32 %v2052_v17, %v688_v34  ;;  %v817_v41 = vadd.f32 %v2052_v17, %v816_v35 }
 0x17b   :  { %v690_v38 = vpop.f32.mrf.mxu0  ;;  %v818_v39 = vpop.f32.mrf.mxu1 }
 0x17c   :  { %1593 = vst [vmem:[%s2217_s3 + $0x70] sm:$0xff] %v1493_v36   ;;  %1609 = vst [vmem:[%s2217_s3 + $0xf0] sm:$0xff] %v1573_v37   ;;  %v853_v48 = vmax.f32 %v689_v40, 0.0  ;;  %v885_v49 = vmax.f32 %v817_v41, 0.0 }
 0x17d   :  { %v691_v42 = vpop.f32.mrf.mxu0  ;;  %v819_v43 = vpop.f32.mrf.mxu1 }
 0x17e   :  { %v692_v44 = vadd.f32 %v2052_v17, %v691_v42  ;;  %v820_v45 = vadd.f32 %v2052_v17, %v819_v43 }
 0x17f   :  { %v693_v46 = vpop.f32.mrf.mxu0  ;;  %v821_v47 = vpop.f32.mrf.mxu1 }
 0x180   :  { %v854_v50 = vmax.f32 %v692_v44, 0.0  ;;  %v886_v51 = vmax.f32 %v820_v45, 0.0 }
 0x182   :  { %v1498_v52 = vpack.c.bf16 %v854_v50, %v853_v48  ;;  %v1578_v53 = vpack.c.bf16 %v886_v51, %v885_v49 }
 0x184   :  { %1594 = vst [vmem:[%s2217_s3 + $0x78] sm:$0xff] %v1498_v52   ;;  %1610 = vst [vmem:[%s2217_s3 + $0xf8] sm:$0xff] %v1578_v53  }

// kernel: resnet18_forward.22
= control target key start
LH: loop header
LB: loop body
LE: loop exit
PB: predicated region body
PF: predicated region fallthrough
CT: control target
= control target key end

     0   :  { %vm153_vm0 = vcmask 519168   ;;  %s1385_s0 = inlined_call_operand.vmem [shape: bf16[9,128,64], index: 0, kind: input, shape index: {}]   ;;  %s1386_s1 = inlined_call_operand.vmem [shape: bf16[128,64], index: 1, kind: output, shape index: {}]  }
   0x1   :  { %v9_v0 = vld [vmem:[%s1385_s0] sm:$0xf]  ;;  %v10_v12 = vld [vmem:[%s1385_s0 + $0x4] sm:$0xf]  ;;  %v11_v33 = vld [vmem:[%s1385_s0 + $0x8] sm:$0xf] }
   0x2   :  { %v25_v1 = vld [vmem:[%s1385_s0 + $0x40] sm:$0xf]  ;;  %v156_v4 = vsel %vm153_vm0, %v9_v0, 4286644096  ;;  %v26_v13 = vld [vmem:[%s1385_s0 + $0x44] sm:$0xf] }
   0x3   :  { %v41_v2 = vld [vmem:[%s1385_s0 + $0x80] sm:$0xf]  ;;  %v159_v5 = vsel %vm153_vm0, %v25_v1, 4286644096  ;;  %v42_v14 = vld [vmem:[%s1385_s0 + $0x84] sm:$0xf] }
   0x4   :  { %v57_v3 = vld [vmem:[%s1385_s0 + $0xc0] sm:$0xf]  ;;  %v163_v6 = vsel %vm153_vm0, %v41_v2, 4286644096  ;;  %v161_v8 = vmax.bf16 %v159_v5, %v156_v4  ;;  %v58_v19 = vld [vmem:[%s1385_s0 + $0xc4] sm:$0xf] }
   0x5   :  { %v73_v7 = vld [vmem:[%s1385_s0 + $0x100] sm:$0xf]  ;;  %v167_v10 = vsel %vm153_vm0, %v57_v3, 4286644096  ;;  %v191_v20 = vsel %vm153_vm0, %v10_v12, 4286644096 }
   0x6   :  { %v89_v9 = vld [vmem:[%s1385_s0 + $0x140] sm:$0xf]  ;;  %v165_v11 = vmax.bf16 %v163_v6, %v161_v8  ;;  %v171_v15 = vsel %vm153_vm0, %v73_v7, 4286644096  ;;  %v194_v21 = vsel %vm153_vm0, %v26_v13, 4286644096 }
   0x7   :  { %v105_v16 = vld [vmem:[%s1385_s0 + $0x180] sm:$0xf]  ;;  %v175_v18 = vsel %vm153_vm0, %v89_v9, 4286644096  ;;  %v198_v22 = vsel %vm153_vm0, %v42_v14, 4286644096  ;;  %v196_v27 = vmax.bf16 %v194_v21, %v191_v20 }
   0x8   :  { %v169_v17 = vmax.bf16 %v167_v10, %v165_v11  ;;  %v121_v23 = vld [vmem:[%s1385_s0 + $0x1c0] sm:$0xf]  ;;  %v74_v26 = vld [vmem:[%s1385_s0 + $0x104] sm:$0xf]  ;;  %v179_v28 = vsel %vm153_vm0, %v105_v16, 4286644096 }
   0x9   :  { %v137_v24 = vld [vmem:[%s1385_s0 + $0x200] sm:$0xf]  ;;  %v90_v29 = vld [vmem:[%s1385_s0 + $0x144] sm:$0xf]  ;;  %v202_v30 = vsel %vm153_vm0, %v58_v19, 4286644096  ;;  %v200_v32 = vmax.bf16 %v198_v22, %v196_v27 }
   0xa   :  { %v173_v25 = vmax.bf16 %v171_v15, %v169_v17  ;;  %v27_v34 = vld [vmem:[%s1385_s0 + $0x48] sm:$0xf]  ;;  %v183_v36 = vsel %vm153_vm0, %v121_v23, 4286644096  ;;  %v187_v37 = vsel %vm153_vm0, %v137_v24, 4286644096 }
   0xb   :  { %v43_v35 = vld [vmem:[%s1385_s0 + $0x88] sm:$0xf]  ;;  %v206_v38 = vsel %vm153_vm0, %v74_v26, 4286644096  ;;  %v106_v40 = vld [vmem:[%s1385_s0 + $0x184] sm:$0xf]  ;;  %v204_v41 = vmax.bf16 %v202_v30, %v200_v32 }
   0xc   :  { %v177_v31 = vmax.bf16 %v175_v18, %v173_v25  ;;  %v210_v42 = vsel %vm153_vm0, %v90_v29, 4286644096  ;;  %v59_v43 = vld [vmem:[%s1385_s0 + $0xc8] sm:$0xf]  ;;  %v226_v44 = vsel %vm153_vm0, %v11_v33, 4286644096 }
   0xd   :  { %v229_v45 = vsel %vm153_vm0, %v27_v34, 4286644096  ;;  %v233_v46 = vsel %vm153_vm0, %v43_v35, 4286644096  ;;  %v122_v48 = vld [vmem:[%s1385_s0 + $0x1c4] sm:$0xf]  ;;  %v208_v50 = vmax.bf16 %v206_v38, %v204_v41 }
   0xe   :  { %v181_v39 = vmax.bf16 %v179_v28, %v177_v31  ;;  %v138_v49 = vld [vmem:[%s1385_s0 + $0x204] sm:$0xf]  ;;  %v75_v51 = vld [vmem:[%s1385_s0 + $0x108] sm:$0xf]  ;;  %v231_v52 = vmax.bf16 %v229_v45, %v226_v44  ;;  %v214_v53 = vsel %vm153_vm0, %v106_v40, 4286644096 }
   0xf   :  { %v91_v54 = vld [vmem:[%s1385_s0 + $0x148] sm:$0xf]  ;;  %v237_v55 = vsel %vm153_vm0, %v59_v43, 4286644096  ;;  %v212_v57 = vmax.bf16 %v210_v42, %v208_v50  ;;  %v12_v59 = vld [vmem:[%s1385_s0 + $0xc] sm:$0xf] }
  0x10   :  { %v185_v47 = vmax.bf16 %v183_v36, %v181_v39  ;;  %v235_v58 = vmax.bf16 %v233_v46, %v231_v52  ;;  %v28_v60 = vld [vmem:[%s1385_s0 + $0x4c] sm:$0xf]  ;;  %v218_v62 = vsel %vm153_vm0, %v122_v48, 4286644096  ;;  %v222_v63 = vsel %vm153_vm0, %v138_v49, 4286644096 }
  0x11   :  { %v44_v61 = vld [vmem:[%s1385_s0 + $0x8c] sm:$0xf]  ;;  %v241_v0 = vsel %vm153_vm0, %v75_v51, 4286644096  ;;  %v216_v1 = vmax.bf16 %v214_v53, %v212_v57  ;;  %v107_v2 = vld [vmem:[%s1385_s0 + $0x188] sm:$0xf] }
  0x12   :  { %v189_v56 = vmax.bf16 %v187_v37, %v185_v47  ;;  %v239_v3 = vmax.bf16 %v237_v55, %v235_v58  ;;  %v245_v4 = vsel %vm153_vm0, %v91_v54, 4286644096  ;;  %v60_v5 = vld [vmem:[%s1385_s0 + $0xcc] sm:$0xf]  ;;  %v261_v6 = vsel %vm153_vm0, %v12_v59, 4286644096 }
  0x13   :  { %v264_v7 = vsel %vm153_vm0, %v28_v60, 4286644096  ;;  %v268_v8 = vsel %vm153_vm0, %v44_v61, 4286644096  ;;  %v220_v9 = vmax.bf16 %v218_v62, %v216_v1  ;;  %v123_v10 = vld [vmem:[%s1385_s0 + $0x1c8] sm:$0xf] }
  0x14   :  { %715 = vst.msk [vmem:[%s1386_s1] sm:$0xf] %vm153_vm0, %v189_v56  ;;  %v139_v11 = vld [vmem:[%s1385_s0 + $0x208] sm:$0xf]  ;;  %v243_v12 = vmax.bf16 %v241_v0, %v239_v3  ;;  %v76_v13 = vld [vmem:[%s1385_s0 + $0x10c] sm:$0xf]  ;;  %v266_v14 = vmax.bf16 %v264_v7, %v261_v6 }
  0x15   :  { %v249_v15 = vsel %vm153_vm0, %v107_v2, 4286644096  ;;  %v92_v16 = vld [vmem:[%s1385_s0 + $0x14c] sm:$0xf]  ;;  %v272_v17 = vsel %vm153_vm0, %v60_v5, 4286644096  ;;  %v224_v18 = vmax.bf16 %v222_v63, %v220_v9 }
  0x16   :  { %v247_v19 = vmax.bf16 %v245_v4, %v243_v12  ;;  %v270_v20 = vmax.bf16 %v268_v8, %v266_v14  ;;  %v13_v21 = vld [vmem:[%s1385_s0 + $0x10] sm:$0xf]  ;;  %v253_v24 = vsel %vm153_vm0, %v123_v10, 4286644096  ;;  %v257_v25 = vsel %vm153_vm0, %v139_v11, 4286644096 }
  0x17   :  { %v29_v22 = vld [vmem:[%s1385_s0 + $0x50] sm:$0xf]  ;;  %v276_v26 = vsel %vm153_vm0, %v76_v13, 4286644096  ;;  %716 = vst.msk [vmem:[%s1386_s1 + $0x4] sm:$0xf] %vm153_vm0, %v224_v18 }
  0x18   :  { %v45_v23 = vld [vmem:[%s1385_s0 + $0x90] sm:$0xf]  ;;  %v251_v27 = vmax.bf16 %v249_v15, %v247_v19  ;;  %v108_v28 = vld [vmem:[%s1385_s0 + $0x18c] sm:$0xf]  ;;  %v274_v29 = vmax.bf16 %v272_v17, %v270_v20  ;;  %v280_v30 = vsel %vm153_vm0, %v92_v16, 4286644096 }
  0x19   :  { %v61_v31 = vld [vmem:[%s1385_s0 + $0xd0] sm:$0xf]  ;;  %v296_v32 = vsel %vm153_vm0, %v13_v21, 4286644096  ;;  %v299_v33 = vsel %vm153_vm0, %v29_v22, 4286644096 }
  0x1a   :  { %v303_v34 = vsel %vm153_vm0, %v45_v23, 4286644096  ;;  %v255_v35 = vmax.bf16 %v253_v24, %v251_v27  ;;  %v124_v36 = vld [vmem:[%s1385_s0 + $0x1cc] sm:$0xf]  ;;  %v278_v38 = vmax.bf16 %v276_v26, %v274_v29  ;;  %v77_v39 = vld [vmem:[%s1385_s0 + $0x110] sm:$0xf]  ;;  %v301_v40 = vmax.bf16 %v299_v33, %v296_v32 }
  0x1b   :  { %v140_v37 = vld [vmem:[%s1385_s0 + $0x20c] sm:$0xf]  ;;  %v284_v41 = vsel %vm153_vm0, %v108_v28, 4286644096  ;;  %v93_v42 = vld [vmem:[%s1385_s0 + $0x150] sm:$0xf] }
  0x1c   :  { %v307_v43 = vsel %vm153_vm0, %v61_v31, 4286644096  ;;  %v259_v44 = vmax.bf16 %v257_v25, %v255_v35  ;;  %v282_v45 = vmax.bf16 %v280_v30, %v278_v38  ;;  %v305_v46 = vmax.bf16 %v303_v34, %v301_v40  ;;  %v14_v47 = vld [vmem:[%s1385_s0 + $0x14] sm:$0xf]  ;;  %v109_v54 = vld [vmem:[%s1385_s0 + $0x190] sm:$0xf] }
  0x1d   :  { %v30_v48 = vld [vmem:[%s1385_s0 + $0x54] sm:$0xf]  ;;  %v288_v50 = vsel %vm153_vm0, %v124_v36, 4286644096  ;;  %v292_v51 = vsel %vm153_vm0, %v140_v37, 4286644096 }
  0x1e   :  { %v46_v49 = vld [vmem:[%s1385_s0 + $0x94] sm:$0xf]  ;;  %v311_v52 = vsel %vm153_vm0, %v77_v39, 4286644096  ;;  %717 = vst.msk [vmem:[%s1386_s1 + $0x8] sm:$0xf] %vm153_vm0, %v259_v44  ;;  %v286_v53 = vmax.bf16 %v284_v41, %v282_v45  ;;  %v309_v55 = vmax.bf16 %v307_v43, %v305_v46 }
  0x1f   :  { %v315_v56 = vsel %vm153_vm0, %v93_v42, 4286644096  ;;  %v62_v57 = vld [vmem:[%s1385_s0 + $0xd4] sm:$0xf]  ;;  %v331_v58 = vsel %vm153_vm0, %v14_v47, 4286644096 }
  0x20   :  { %v334_v59 = vsel %vm153_vm0, %v30_v48, 4286644096  ;;  %v338_v60 = vsel %vm153_vm0, %v46_v49, 4286644096  ;;  %v290_v61 = vmax.bf16 %v288_v50, %v286_v53  ;;  %v125_v62 = vld [vmem:[%s1385_s0 + $0x1d0] sm:$0xf]  ;;  %v313_v0 = vmax.bf16 %v311_v52, %v309_v55 }
  0x21   :  { %v141_v63 = vld [vmem:[%s1385_s0 + $0x210] sm:$0xf]  ;;  %v78_v1 = vld [vmem:[%s1385_s0 + $0x114] sm:$0xf]  ;;  %v336_v2 = vmax.bf16 %v334_v59, %v331_v58  ;;  %v319_v3 = vsel %vm153_vm0, %v109_v54, 4286644096 }
  0x22   :  { %v94_v4 = vld [vmem:[%s1385_s0 + $0x154] sm:$0xf]  ;;  %v342_v5 = vsel %vm153_vm0, %v62_v57, 4286644096  ;;  %v294_v6 = vmax.bf16 %v292_v51, %v290_v61  ;;  %v317_v7 = vmax.bf16 %v315_v56, %v313_v0  ;;  %v15_v9 = vld [vmem:[%s1385_s0 + $0x18] sm:$0xf] }
  0x23   :  { %v340_v8 = vmax.bf16 %v338_v60, %v336_v2  ;;  %v31_v10 = vld [vmem:[%s1385_s0 + $0x58] sm:$0xf]  ;;  %v323_v12 = vsel %vm153_vm0, %v125_v62, 4286644096  ;;  %v327_v13 = vsel %vm153_vm0, %v141_v63, 4286644096 }
  0x24   :  { %v47_v11 = vld [vmem:[%s1385_s0 + $0x98] sm:$0xf]  ;;  %v346_v14 = vsel %vm153_vm0, %v78_v1, 4286644096  ;;  %718 = vst.msk [vmem:[%s1386_s1 + $0xc] sm:$0xf] %vm153_vm0, %v294_v6  ;;  %v321_v15 = vmax.bf16 %v319_v3, %v317_v7 }
  0x25   :  { %v110_v16 = vld [vmem:[%s1385_s0 + $0x194] sm:$0xf]  ;;  %v344_v17 = vmax.bf16 %v342_v5, %v340_v8  ;;  %v350_v18 = vsel %vm153_vm0, %v94_v4, 4286644096  ;;  %v63_v19 = vld [vmem:[%s1385_s0 + $0xd8] sm:$0xf] }
  0x26   :  { %v366_v20 = vsel %vm153_vm0, %v15_v9, 4286644096  ;;  %v369_v21 = vsel %vm153_vm0, %v31_v10, 4286644096  ;;  %v373_v22 = vsel %vm153_vm0, %v47_v11, 4286644096  ;;  %v325_v23 = vmax.bf16 %v323_v12, %v321_v15 }
  0x27   :  { %v126_v24 = vld [vmem:[%s1385_s0 + $0x1d4] sm:$0xf]  ;;  %v348_v26 = vmax.bf16 %v346_v14, %v344_v17  ;;  %v79_v27 = vld [vmem:[%s1385_s0 + $0x118] sm:$0xf]  ;;  %v371_v28 = vmax.bf16 %v369_v21, %v366_v20  ;;  %v354_v29 = vsel %vm153_vm0, %v110_v16, 4286644096 }
  0x28   :  { %v142_v25 = vld [vmem:[%s1385_s0 + $0x214] sm:$0xf]  ;;  %v95_v30 = vld [vmem:[%s1385_s0 + $0x158] sm:$0xf]  ;;  %v377_v31 = vsel %vm153_vm0, %v63_v19, 4286644096  ;;  %v329_v32 = vmax.bf16 %v327_v13, %v325_v23 }
  0x29   :  { %v352_v33 = vmax.bf16 %v350_v18, %v348_v26  ;;  %v375_v34 = vmax.bf16 %v373_v22, %v371_v28  ;;  %v16_v35 = vld [vmem:[%s1385_s0 + $0x1c] sm:$0xf]  ;;  %v358_v38 = vsel %vm153_vm0, %v126_v24, 4286644096  ;;  %v362_v39 = vsel %vm153_vm0, %v142_v25, 4286644096 }
  0x2a   :  { %v32_v36 = vld [vmem:[%s1385_s0 + $0x5c] sm:$0xf]  ;;  %v381_v40 = vsel %vm153_vm0, %v79_v27, 4286644096  ;;  %719 = vst.msk [vmem:[%s1386_s1 + $0x10] sm:$0xf] %vm153_vm0, %v329_v32 }
  0x2b   :  { %v48_v37 = vld [vmem:[%s1385_s0 + $0x9c] sm:$0xf]  ;;  %v356_v41 = vmax.bf16 %v354_v29, %v352_v33  ;;  %v111_v42 = vld [vmem:[%s1385_s0 + $0x198] sm:$0xf]  ;;  %v379_v43 = vmax.bf16 %v377_v31, %v375_v34  ;;  %v385_v44 = vsel %vm153_vm0, %v95_v30, 4286644096 }
  0x2c   :  { %v64_v45 = vld [vmem:[%s1385_s0 + $0xdc] sm:$0xf]  ;;  %v401_v46 = vsel %vm153_vm0, %v16_v35, 4286644096  ;;  %v404_v47 = vsel %vm153_vm0, %v32_v36, 4286644096 }
  0x2d   :  { %v408_v48 = vsel %vm153_vm0, %v48_v37, 4286644096  ;;  %v360_v49 = vmax.bf16 %v358_v38, %v356_v41  ;;  %v127_v50 = vld [vmem:[%s1385_s0 + $0x1d8] sm:$0xf]  ;;  %v383_v52 = vmax.bf16 %v381_v40, %v379_v43  ;;  %v80_v53 = vld [vmem:[%s1385_s0 + $0x11c] sm:$0xf]  ;;  %v406_v54 = vmax.bf16 %v404_v47, %v401_v46 }
  0x2e   :  { %v143_v51 = vld [vmem:[%s1385_s0 + $0x218] sm:$0xf]  ;;  %v389_v55 = vsel %vm153_vm0, %v111_v42, 4286644096  ;;  %v96_v56 = vld [vmem:[%s1385_s0 + $0x15c] sm:$0xf] }
  0x2f   :  { %v412_v57 = vsel %vm153_vm0, %v64_v45, 4286644096  ;;  %v364_v58 = vmax.bf16 %v362_v39, %v360_v49  ;;  %v387_v59 = vmax.bf16 %v385_v44, %v383_v52  ;;  %v410_v60 = vmax.bf16 %v408_v48, %v406_v54  ;;  %v17_v61 = vld [vmem:[%s1385_s0 + $0x20] sm:$0xf]  ;;  %v112_v4 = vld [vmem:[%s1385_s0 + $0x19c] sm:$0xf] }
  0x30   :  { %v33_v62 = vld [vmem:[%s1385_s0 + $0x60] sm:$0xf]  ;;  %v393_v0 = vsel %vm153_vm0, %v127_v50, 4286644096  ;;  %v397_v1 = vsel %vm153_vm0, %v143_v51, 4286644096 }
  0x31   :  { %v49_v63 = vld [vmem:[%s1385_s0 + $0xa0] sm:$0xf]  ;;  %v416_v2 = vsel %vm153_vm0, %v80_v53, 4286644096  ;;  %720 = vst.msk [vmem:[%s1386_s1 + $0x14] sm:$0xf] %vm153_vm0, %v364_v58  ;;  %v391_v3 = vmax.bf16 %v389_v55, %v387_v59  ;;  %v414_v5 = vmax.bf16 %v412_v57, %v410_v60 }
  0x32   :  { %v420_v6 = vsel %vm153_vm0, %v96_v56, 4286644096  ;;  %v65_v7 = vld [vmem:[%s1385_s0 + $0xe0] sm:$0xf]  ;;  %v436_v8 = vsel %vm153_vm0, %v17_v61, 4286644096 }
  0x33   :  { %v439_v9 = vsel %vm153_vm0, %v33_v62, 4286644096  ;;  %v443_v10 = vsel %vm153_vm0, %v49_v63, 4286644096  ;;  %v395_v11 = vmax.bf16 %v393_v0, %v391_v3  ;;  %v128_v12 = vld [vmem:[%s1385_s0 + $0x1dc] sm:$0xf]  ;;  %v418_v14 = vmax.bf16 %v416_v2, %v414_v5 }
  0x34   :  { %v144_v13 = vld [vmem:[%s1385_s0 + $0x21c] sm:$0xf]  ;;  %v81_v15 = vld [vmem:[%s1385_s0 + $0x120] sm:$0xf]  ;;  %v441_v16 = vmax.bf16 %v439_v9, %v436_v8  ;;  %v424_v17 = vsel %vm153_vm0, %v112_v4, 4286644096 }
  0x35   :  { %v97_v18 = vld [vmem:[%s1385_s0 + $0x160] sm:$0xf]  ;;  %v447_v19 = vsel %vm153_vm0, %v65_v7, 4286644096  ;;  %v399_v20 = vmax.bf16 %v397_v1, %v395_v11  ;;  %v422_v21 = vmax.bf16 %v420_v6, %v418_v14  ;;  %v18_v23 = vld [vmem:[%s1385_s0 + $0x24] sm:$0xf] }
  0x36   :  { %v445_v22 = vmax.bf16 %v443_v10, %v441_v16  ;;  %v34_v24 = vld [vmem:[%s1385_s0 + $0x64] sm:$0xf]  ;;  %v428_v26 = vsel %vm153_vm0, %v128_v12, 4286644096  ;;  %v432_v27 = vsel %vm153_vm0, %v144_v13, 4286644096 }
  0x37   :  { %v50_v25 = vld [vmem:[%s1385_s0 + $0xa4] sm:$0xf]  ;;  %v451_v28 = vsel %vm153_vm0, %v81_v15, 4286644096  ;;  %721 = vst.msk [vmem:[%s1386_s1 + $0x18] sm:$0xf] %vm153_vm0, %v399_v20  ;;  %v426_v29 = vmax.bf16 %v424_v17, %v422_v21 }
  0x38   :  { %v113_v30 = vld [vmem:[%s1385_s0 + $0x1a0] sm:$0xf]  ;;  %v449_v31 = vmax.bf16 %v447_v19, %v445_v22  ;;  %v455_v32 = vsel %vm153_vm0, %v97_v18, 4286644096  ;;  %v66_v33 = vld [vmem:[%s1385_s0 + $0xe4] sm:$0xf] }
  0x39   :  { %v471_v34 = vsel %vm153_vm0, %v18_v23, 4286644096  ;;  %v474_v35 = vsel %vm153_vm0, %v34_v24, 4286644096  ;;  %v478_v36 = vsel %vm153_vm0, %v50_v25, 4286644096  ;;  %v430_v37 = vmax.bf16 %v428_v26, %v426_v29 }
  0x3a   :  { %v129_v38 = vld [vmem:[%s1385_s0 + $0x1e0] sm:$0xf]  ;;  %v453_v40 = vmax.bf16 %v451_v28, %v449_v31  ;;  %v82_v41 = vld [vmem:[%s1385_s0 + $0x124] sm:$0xf]  ;;  %v476_v42 = vmax.bf16 %v474_v35, %v471_v34  ;;  %v459_v43 = vsel %vm153_vm0, %v113_v30, 4286644096 }
  0x3b   :  { %v145_v39 = vld [vmem:[%s1385_s0 + $0x220] sm:$0xf]  ;;  %v98_v44 = vld [vmem:[%s1385_s0 + $0x164] sm:$0xf]  ;;  %v482_v45 = vsel %vm153_vm0, %v66_v33, 4286644096  ;;  %v434_v46 = vmax.bf16 %v432_v27, %v430_v37 }
  0x3c   :  { %v457_v47 = vmax.bf16 %v455_v32, %v453_v40  ;;  %v480_v48 = vmax.bf16 %v478_v36, %v476_v42  ;;  %v19_v49 = vld [vmem:[%s1385_s0 + $0x28] sm:$0xf]  ;;  %v463_v52 = vsel %vm153_vm0, %v129_v38, 4286644096  ;;  %v467_v53 = vsel %vm153_vm0, %v145_v39, 4286644096 }
  0x3d   :  { %v35_v50 = vld [vmem:[%s1385_s0 + $0x68] sm:$0xf]  ;;  %v486_v54 = vsel %vm153_vm0, %v82_v41, 4286644096  ;;  %722 = vst.msk [vmem:[%s1386_s1 + $0x1c] sm:$0xf] %vm153_vm0, %v434_v46 }
  0x3e   :  { %v51_v51 = vld [vmem:[%s1385_s0 + $0xa8] sm:$0xf]  ;;  %v461_v55 = vmax.bf16 %v459_v43, %v457_v47  ;;  %v114_v56 = vld [vmem:[%s1385_s0 + $0x1a4] sm:$0xf]  ;;  %v484_v57 = vmax.bf16 %v482_v45, %v480_v48  ;;  %v490_v58 = vsel %vm153_vm0, %v98_v44, 4286644096 }
  0x3f   :  { %v67_v59 = vld [vmem:[%s1385_s0 + $0xe8] sm:$0xf]  ;;  %v506_v60 = vsel %vm153_vm0, %v19_v49, 4286644096  ;;  %v509_v61 = vsel %vm153_vm0, %v35_v50, 4286644096 }
  0x40   :  { %v513_v62 = vsel %vm153_vm0, %v51_v51, 4286644096  ;;  %v465_v63 = vmax.bf16 %v463_v52, %v461_v55  ;;  %v130_v0 = vld [vmem:[%s1385_s0 + $0x1e4] sm:$0xf]  ;;  %v488_v2 = vmax.bf16 %v486_v54, %v484_v57  ;;  %v83_v3 = vld [vmem:[%s1385_s0 + $0x128] sm:$0xf]  ;;  %v511_v4 = vmax.bf16 %v509_v61, %v506_v60 }
  0x41   :  { %v146_v1 = vld [vmem:[%s1385_s0 + $0x224] sm:$0xf]  ;;  %v494_v5 = vsel %vm153_vm0, %v114_v56, 4286644096  ;;  %v99_v6 = vld [vmem:[%s1385_s0 + $0x168] sm:$0xf] }
  0x42   :  { %v517_v7 = vsel %vm153_vm0, %v67_v59, 4286644096  ;;  %v469_v8 = vmax.bf16 %v467_v53, %v465_v63  ;;  %v492_v9 = vmax.bf16 %v490_v58, %v488_v2  ;;  %v515_v10 = vmax.bf16 %v513_v62, %v511_v4  ;;  %v20_v11 = vld [vmem:[%s1385_s0 + $0x2c] sm:$0xf]  ;;  %v115_v18 = vld [vmem:[%s1385_s0 + $0x1a8] sm:$0xf] }
  0x43   :  { %v36_v12 = vld [vmem:[%s1385_s0 + $0x6c] sm:$0xf]  ;;  %v498_v14 = vsel %vm153_vm0, %v130_v0, 4286644096  ;;  %v502_v15 = vsel %vm153_vm0, %v146_v1, 4286644096 }
  0x44   :  { %v52_v13 = vld [vmem:[%s1385_s0 + $0xac] sm:$0xf]  ;;  %v521_v16 = vsel %vm153_vm0, %v83_v3, 4286644096  ;;  %723 = vst.msk [vmem:[%s1386_s1 + $0x20] sm:$0xf] %vm153_vm0, %v469_v8  ;;  %v496_v17 = vmax.bf16 %v494_v5, %v492_v9  ;;  %v519_v19 = vmax.bf16 %v517_v7, %v515_v10 }
  0x45   :  { %v525_v20 = vsel %vm153_vm0, %v99_v6, 4286644096  ;;  %v68_v21 = vld [vmem:[%s1385_s0 + $0xec] sm:$0xf]  ;;  %v541_v22 = vsel %vm153_vm0, %v20_v11, 4286644096 }
  0x46   :  { %v544_v23 = vsel %vm153_vm0, %v36_v12, 4286644096  ;;  %v548_v24 = vsel %vm153_vm0, %v52_v13, 4286644096  ;;  %v500_v25 = vmax.bf16 %v498_v14, %v496_v17  ;;  %v131_v26 = vld [vmem:[%s1385_s0 + $0x1e8] sm:$0xf]  ;;  %v523_v28 = vmax.bf16 %v521_v16, %v519_v19 }
  0x47   :  { %v147_v27 = vld [vmem:[%s1385_s0 + $0x228] sm:$0xf]  ;;  %v84_v29 = vld [vmem:[%s1385_s0 + $0x12c] sm:$0xf]  ;;  %v546_v30 = vmax.bf16 %v544_v23, %v541_v22  ;;  %v529_v31 = vsel %vm153_vm0, %v115_v18, 4286644096 }
  0x48   :  { %v100_v32 = vld [vmem:[%s1385_s0 + $0x16c] sm:$0xf]  ;;  %v552_v33 = vsel %vm153_vm0, %v68_v21, 4286644096  ;;  %v504_v34 = vmax.bf16 %v502_v15, %v500_v25  ;;  %v527_v35 = vmax.bf16 %v525_v20, %v523_v28  ;;  %v21_v37 = vld [vmem:[%s1385_s0 + $0x30] sm:$0xf] }
  0x49   :  { %v550_v36 = vmax.bf16 %v548_v24, %v546_v30  ;;  %v37_v38 = vld [vmem:[%s1385_s0 + $0x70] sm:$0xf]  ;;  %v533_v40 = vsel %vm153_vm0, %v131_v26, 4286644096  ;;  %v537_v41 = vsel %vm153_vm0, %v147_v27, 4286644096 }
  0x4a   :  { %v53_v39 = vld [vmem:[%s1385_s0 + $0xb0] sm:$0xf]  ;;  %v556_v42 = vsel %vm153_vm0, %v84_v29, 4286644096  ;;  %724 = vst.msk [vmem:[%s1386_s1 + $0x24] sm:$0xf] %vm153_vm0, %v504_v34  ;;  %v531_v43 = vmax.bf16 %v529_v31, %v527_v35 }
  0x4b   :  { %v116_v44 = vld [vmem:[%s1385_s0 + $0x1ac] sm:$0xf]  ;;  %v554_v45 = vmax.bf16 %v552_v33, %v550_v36  ;;  %v560_v46 = vsel %vm153_vm0, %v100_v32, 4286644096  ;;  %v69_v47 = vld [vmem:[%s1385_s0 + $0xf0] sm:$0xf] }
  0x4c   :  { %v576_v48 = vsel %vm153_vm0, %v21_v37, 4286644096  ;;  %v579_v49 = vsel %vm153_vm0, %v37_v38, 4286644096  ;;  %v583_v50 = vsel %vm153_vm0, %v53_v39, 4286644096  ;;  %v535_v51 = vmax.bf16 %v533_v40, %v531_v43 }
  0x4d   :  { %v132_v52 = vld [vmem:[%s1385_s0 + $0x1ec] sm:$0xf]  ;;  %v558_v54 = vmax.bf16 %v556_v42, %v554_v45  ;;  %v85_v55 = vld [vmem:[%s1385_s0 + $0x130] sm:$0xf]  ;;  %v581_v56 = vmax.bf16 %v579_v49, %v576_v48  ;;  %v564_v57 = vsel %vm153_vm0, %v116_v44, 4286644096 }
  0x4e   :  { %v148_v53 = vld [vmem:[%s1385_s0 + $0x22c] sm:$0xf]  ;;  %v101_v58 = vld [vmem:[%s1385_s0 + $0x170] sm:$0xf]  ;;  %v587_v59 = vsel %vm153_vm0, %v69_v47, 4286644096  ;;  %v539_v60 = vmax.bf16 %v537_v41, %v535_v51 }
  0x4f   :  { %v562_v61 = vmax.bf16 %v560_v46, %v558_v54  ;;  %v585_v62 = vmax.bf16 %v583_v50, %v581_v56  ;;  %v22_v63 = vld [vmem:[%s1385_s0 + $0x34] sm:$0xf]  ;;  %v568_v2 = vsel %vm153_vm0, %v132_v52, 4286644096  ;;  %v572_v3 = vsel %vm153_vm0, %v148_v53, 4286644096 }
  0x50   :  { %v38_v0 = vld [vmem:[%s1385_s0 + $0x74] sm:$0xf]  ;;  %v591_v4 = vsel %vm153_vm0, %v85_v55, 4286644096  ;;  %725 = vst.msk [vmem:[%s1386_s1 + $0x28] sm:$0xf] %vm153_vm0, %v539_v60 }
  0x51   :  { %v54_v1 = vld [vmem:[%s1385_s0 + $0xb4] sm:$0xf]  ;;  %v566_v5 = vmax.bf16 %v564_v57, %v562_v61  ;;  %v117_v6 = vld [vmem:[%s1385_s0 + $0x1b0] sm:$0xf]  ;;  %v589_v7 = vmax.bf16 %v587_v59, %v585_v62  ;;  %v595_v8 = vsel %vm153_vm0, %v101_v58, 4286644096 }
  0x52   :  { %v70_v9 = vld [vmem:[%s1385_s0 + $0xf4] sm:$0xf]  ;;  %v611_v10 = vsel %vm153_vm0, %v22_v63, 4286644096  ;;  %v614_v11 = vsel %vm153_vm0, %v38_v0, 4286644096 }
  0x53   :  { %v618_v12 = vsel %vm153_vm0, %v54_v1, 4286644096  ;;  %v570_v13 = vmax.bf16 %v568_v2, %v566_v5  ;;  %v133_v14 = vld [vmem:[%s1385_s0 + $0x1f0] sm:$0xf]  ;;  %v593_v16 = vmax.bf16 %v591_v4, %v589_v7  ;;  %v86_v17 = vld [vmem:[%s1385_s0 + $0x134] sm:$0xf]  ;;  %v616_v18 = vmax.bf16 %v614_v11, %v611_v10 }
  0x54   :  { %v149_v15 = vld [vmem:[%s1385_s0 + $0x230] sm:$0xf]  ;;  %v599_v19 = vsel %vm153_vm0, %v117_v6, 4286644096  ;;  %v102_v20 = vld [vmem:[%s1385_s0 + $0x174] sm:$0xf] }
  0x55   :  { %v622_v21 = vsel %vm153_vm0, %v70_v9, 4286644096  ;;  %v574_v22 = vmax.bf16 %v572_v3, %v570_v13  ;;  %v597_v23 = vmax.bf16 %v595_v8, %v593_v16  ;;  %v620_v24 = vmax.bf16 %v618_v12, %v616_v18  ;;  %v23_v25 = vld [vmem:[%s1385_s0 + $0x38] sm:$0xf]  ;;  %v118_v32 = vld [vmem:[%s1385_s0 + $0x1b4] sm:$0xf] }
  0x56   :  { %v39_v26 = vld [vmem:[%s1385_s0 + $0x78] sm:$0xf]  ;;  %v603_v28 = vsel %vm153_vm0, %v133_v14, 4286644096  ;;  %v607_v29 = vsel %vm153_vm0, %v149_v15, 4286644096 }
  0x57   :  { %v55_v27 = vld [vmem:[%s1385_s0 + $0xb8] sm:$0xf]  ;;  %v626_v30 = vsel %vm153_vm0, %v86_v17, 4286644096  ;;  %726 = vst.msk [vmem:[%s1386_s1 + $0x2c] sm:$0xf] %vm153_vm0, %v574_v22  ;;  %v601_v31 = vmax.bf16 %v599_v19, %v597_v23  ;;  %v624_v33 = vmax.bf16 %v622_v21, %v620_v24 }
  0x58   :  { %v630_v34 = vsel %vm153_vm0, %v102_v20, 4286644096  ;;  %v71_v35 = vld [vmem:[%s1385_s0 + $0xf8] sm:$0xf]  ;;  %v646_v36 = vsel %vm153_vm0, %v23_v25, 4286644096 }
  0x59   :  { %v649_v37 = vsel %vm153_vm0, %v39_v26, 4286644096  ;;  %v653_v38 = vsel %vm153_vm0, %v55_v27, 4286644096  ;;  %v605_v39 = vmax.bf16 %v603_v28, %v601_v31  ;;  %v134_v40 = vld [vmem:[%s1385_s0 + $0x1f4] sm:$0xf]  ;;  %v628_v42 = vmax.bf16 %v626_v30, %v624_v33 }
  0x5a   :  { %v150_v41 = vld [vmem:[%s1385_s0 + $0x234] sm:$0xf]  ;;  %v87_v43 = vld [vmem:[%s1385_s0 + $0x138] sm:$0xf]  ;;  %v651_v44 = vmax.bf16 %v649_v37, %v646_v36  ;;  %v634_v45 = vsel %vm153_vm0, %v118_v32, 4286644096 }
  0x5b   :  { %v103_v46 = vld [vmem:[%s1385_s0 + $0x178] sm:$0xf]  ;;  %v657_v47 = vsel %vm153_vm0, %v71_v35, 4286644096  ;;  %v609_v48 = vmax.bf16 %v607_v29, %v605_v39  ;;  %v632_v49 = vmax.bf16 %v630_v34, %v628_v42  ;;  %v24_v51 = vld [vmem:[%s1385_s0 + $0x3c] sm:$0xf] }
  0x5c   :  { %v655_v50 = vmax.bf16 %v653_v38, %v651_v44  ;;  %v40_v52 = vld [vmem:[%s1385_s0 + $0x7c] sm:$0xf]  ;;  %v638_v54 = vsel %vm153_vm0, %v134_v40, 4286644096  ;;  %v642_v55 = vsel %vm153_vm0, %v150_v41, 4286644096 }
  0x5d   :  { %v56_v53 = vld [vmem:[%s1385_s0 + $0xbc] sm:$0xf]  ;;  %v661_v56 = vsel %vm153_vm0, %v87_v43, 4286644096  ;;  %727 = vst.msk [vmem:[%s1386_s1 + $0x30] sm:$0xf] %vm153_vm0, %v609_v48  ;;  %v636_v57 = vmax.bf16 %v634_v45, %v632_v49 }
  0x5e   :  { %v119_v58 = vld [vmem:[%s1385_s0 + $0x1b8] sm:$0xf]  ;;  %v659_v59 = vmax.bf16 %v657_v47, %v655_v50  ;;  %v665_v60 = vsel %vm153_vm0, %v103_v46, 4286644096  ;;  %v72_v61 = vld [vmem:[%s1385_s0 + $0xfc] sm:$0xf] }
  0x5f   :  { %v681_v62 = vsel %vm153_vm0, %v24_v51, 4286644096  ;;  %v684_v63 = vsel %vm153_vm0, %v40_v52, 4286644096  ;;  %v688_v0 = vsel %vm153_vm0, %v56_v53, 4286644096  ;;  %v640_v1 = vmax.bf16 %v638_v54, %v636_v57 }
  0x60   :  { %v135_v2 = vld [vmem:[%s1385_s0 + $0x1f8] sm:$0xf]  ;;  %v663_v3 = vmax.bf16 %v661_v56, %v659_v59  ;;  %v88_v4 = vld [vmem:[%s1385_s0 + $0x13c] sm:$0xf]  ;;  %v686_v5 = vmax.bf16 %v684_v63, %v681_v62  ;;  %v669_v6 = vsel %vm153_vm0, %v119_v58, 4286644096 }
  0x61   :  { %v692_v7 = vsel %vm153_vm0, %v72_v61, 4286644096  ;;  %v644_v8 = vmax.bf16 %v642_v55, %v640_v1  ;;  %v151_v9 = vld [vmem:[%s1385_s0 + $0x238] sm:$0xf]  ;;  %v104_v11 = vld [vmem:[%s1385_s0 + $0x17c] sm:$0xf] }
  0x62   :  { %v667_v10 = vmax.bf16 %v665_v60, %v663_v3  ;;  %v690_v12 = vmax.bf16 %v688_v0, %v686_v5  ;;  %v673_v13 = vsel %vm153_vm0, %v135_v2, 4286644096  ;;  %v696_v14 = vsel %vm153_vm0, %v88_v4, 4286644096  ;;  %v120_v16 = vld [vmem:[%s1385_s0 + $0x1bc] sm:$0xf] }
  0x63   :  { %728 = vst.msk [vmem:[%s1386_s1 + $0x34] sm:$0xf] %vm153_vm0, %v644_v8  ;;  %v677_v18 = vsel %vm153_vm0, %v151_v9, 4286644096  ;;  %v700_v19 = vsel %vm153_vm0, %v104_v11, 4286644096 }
  0x64   :  { %v671_v15 = vmax.bf16 %v669_v6, %v667_v10  ;;  %v694_v17 = vmax.bf16 %v692_v7, %v690_v12  ;;  %v136_v21 = vld [vmem:[%s1385_s0 + $0x1fc] sm:$0xf]  ;;  %v704_v23 = vsel %vm153_vm0, %v120_v16, 4286644096 }
  0x65   :  { %v152_v25 = vld [vmem:[%s1385_s0 + $0x23c] sm:$0xf]  ;;  %v708_v27 = vsel %vm153_vm0, %v136_v21, 4286644096 }
  0x66   :  { %v675_v20 = vmax.bf16 %v673_v13, %v671_v15  ;;  %v698_v22 = vmax.bf16 %v696_v14, %v694_v17  ;;  %v712_v29 = vsel %vm153_vm0, %v152_v25, 4286644096 }
  0x68   :  { %v679_v24 = vmax.bf16 %v677_v18, %v675_v20  ;;  %v702_v26 = vmax.bf16 %v700_v19, %v698_v22 }
  0x6a   :  { %729 = vst.msk [vmem:[%s1386_s1 + $0x38] sm:$0xf] %vm153_vm0, %v679_v24  ;;  %v706_v28 = vmax.bf16 %v704_v23, %v702_v26 }
  0x6c   :  { %v710_v30 = vmax.bf16 %v708_v27, %v706_v28 }
  0x6e   :  { %v714_v31 = vmax.bf16 %v712_v29, %v710_v30 }
  0x70   :  { %730 = vst.msk [vmem:[%s1386_s1 + $0x3c] sm:$0xf] %vm153_vm0, %v714_v31 }

// kernel: resnet18_forward.23
= control target key start
LH: loop header
LB: loop body
LE: loop exit
PB: predicated region body
PF: predicated region fallthrough
CT: control target
= control target key end

     0   :  { %s1796_s1 = inlined_call_operand.vmem [shape: bf16[640,128], index: 1, kind: input, shape index: {}]   ;;  %s1797_s0 = inlined_call_operand.vmem [shape: bf16[128,640], index: 0, kind: input, shape index: {}]   ;;  %s1798_s2 = inlined_call_operand.vmem [shape: f32[1,128], index: 2, kind: input, shape index: {}]   ;;  %s1799_s3 = inlined_call_operand.vmem [shape: bf16[128,128], index: 3, kind: output, shape index: {}]  }
   0x1   :  { %v1341_v0 = vld [vmem:[%s1796_s1 + $0x78] sm:$0xff]   ;;  %v1345_v4 = vld [vmem:[%s1796_s1 + $0x70] sm:$0xff]   ;;  %v1349_v8 = vld [vmem:[%s1796_s1 + $0x68] sm:$0xff]  }
   0x2   :  { %v1342_v1 = vld [vmem:[%s1796_s1 + $0xf8] sm:$0xff]   ;;  %1149 = vmatprep.subr.bf16.mxu0 %v1341_v0  ;;  %v1346_v5 = vld [vmem:[%s1796_s1 + $0xf0] sm:$0xff]   ;;  %v1350_v9 = vld [vmem:[%s1796_s1 + $0xe8] sm:$0xff]  }
   0x3   :  { %v1343_v2 = vld [vmem:[%s1796_s1 + $0x38] sm:$0xff]   ;;  %1213 = vmatprep.subr.bf16.mxu1 %v1342_v1  ;;  %v1347_v6 = vld [vmem:[%s1796_s1 + $0x30] sm:$0xff]   ;;  %v1351_v10 = vld [vmem:[%s1796_s1 + $0x28] sm:$0xff]  }
   0x4   :  { %v1344_v3 = vld [vmem:[%s1796_s1 + $0xb8] sm:$0xff]   ;;  %1150 = vmatpush3.bf16.msra.mxu0 %v1343_v2  ;;  %v1348_v7 = vld [vmem:[%s1796_s1 + $0xb0] sm:$0xff]   ;;  %v1352_v11 = vld [vmem:[%s1796_s1 + $0xa8] sm:$0xff]  }
   0x5   :  { %1214 = vmatpush3.bf16.msra.mxu1 %v1344_v3  ;;  %1151 = vmatprep.subr.bf16.mxu0 %v1345_v4  ;;  %v1353_v12 = vld [vmem:[%s1796_s1 + $0x60] sm:$0xff]   ;;  %v1357_v16 = vld [vmem:[%s1796_s1 + $0x58] sm:$0xff]   ;;  %v1361_v20 = vld [vmem:[%s1796_s1 + $0x50] sm:$0xff]  }
   0x6   :  { %1215 = vmatprep.subr.bf16.mxu1 %v1346_v5  ;;  %v1354_v13 = vld [vmem:[%s1796_s1 + $0xe0] sm:$0xff]   ;;  %v1358_v17 = vld [vmem:[%s1796_s1 + $0xd8] sm:$0xff]   ;;  %v1362_v21 = vld [vmem:[%s1796_s1 + $0xd0] sm:$0xff]  }
   0x7   :  { %v1355_v14 = vld [vmem:[%s1796_s1 + $0x20] sm:$0xff]   ;;  %v1359_v18 = vld [vmem:[%s1796_s1 + $0x18] sm:$0xff]   ;;  %v1363_v22 = vld [vmem:[%s1796_s1 + $0x10] sm:$0xff]  }
   0x8   :  { %1152 = vmatpush3.bf16.msra.mxu0 %v1347_v6  ;;  %v1356_v15 = vld [vmem:[%s1796_s1 + $0xa0] sm:$0xff]   ;;  %v1360_v19 = vld [vmem:[%s1796_s1 + $0x98] sm:$0xff]   ;;  %v1364_v23 = vld [vmem:[%s1796_s1 + $0x90] sm:$0xff]  }
   0x9   :  { %1216 = vmatpush3.bf16.msra.mxu1 %v1348_v7  ;;  %1153 = vmatprep.subr.bf16.mxu0 %v1349_v8  ;;  %v1365_v24 = vld [vmem:[%s1796_s1 + $0x48] sm:$0xff]   ;;  %v1369_v28 = vld [vmem:[%s1796_s1 + $0x40] sm:$0xff]   ;;  %v1379_v36 = vld [vmem:[%s1796_s1 + $0x138] sm:$0xff]  }
   0xa   :  { %1217 = vmatprep.subr.bf16.mxu1 %v1350_v9  ;;  %v1366_v25 = vld [vmem:[%s1796_s1 + $0xc8] sm:$0xff]   ;;  %v1370_v29 = vld [vmem:[%s1796_s1 + $0xc0] sm:$0xff]   ;;  %v1386_v39 = vld [vmem:[%s1796_s1 + $0x130] sm:$0xff]  }
   0xb   :  { %v1367_v26 = vld [vmem:[%s1796_s1 + $0x8] sm:$0xff]   ;;  %v1371_v30 = vld [vmem:[%s1796_s1] sm:$0xff]   ;;  %v1389_v43 = vld [vmem:[%s1797_s0 + $0x5c] ss:$20 sps:$4 sm:$0xff]  }
   0xc   :  { %1154 = vmatpush3.bf16.msra.mxu0 %v1351_v10  ;;  %v1368_v27 = vld [vmem:[%s1796_s1 + $0x88] sm:$0xff]   ;;  %v1372_v31 = vld [vmem:[%s1796_s1 + $0x80] sm:$0xff]   ;;  %v1394_v48 = vld [vmem:[%s1797_s0 + $0x7c] ss:$20 sps:$4 sm:$0xff]  }
   0xd   :  { %1218 = vmatpush3.bf16.msra.mxu1 %v1352_v11  ;;  %1155 = vmatprep.subr.bf16.mxu0 %v1353_v12  ;;  %v1373_v32 = vld [vmem:[%s1797_s0] ss:$20 sps:$4 sm:$0xff]   ;;  %v1375_v33 = vld [vmem:[%s1797_s0 + $0x4] ss:$20 sps:$4 sm:$0xff]   ;;  %v1376_v34 = vld [vmem:[%s1797_s0 + $0x8] ss:$20 sps:$4 sm:$0xff]  }
   0xe   :  { %1219 = vmatprep.subr.bf16.mxu1 %v1354_v13  ;;  %v1378_v35 = vld [vmem:[%s1797_s0 + $0xc] ss:$20 sps:$4 sm:$0xff]   ;;  %630 = vmatprep.mubr.bf16.mxu0 %v1375_v33  ;;  %v1382_v38 = vld [vmem:[%s1797_s0 + $0x34] ss:$20 sps:$4 sm:$0xff]   ;;  %v1385_v41 = vld [vmem:[%s1797_s0 + $0x30] ss:$20 sps:$4 sm:$0xff]  }
   0xf   :  { %727 = vmatprep.mubr.bf16.mxu1 %v1378_v35  ;;  %v1380_v37 = vld [vmem:[%s1797_s0 + $0x2c] ss:$20 sps:$4 sm:$0xff]   ;;  %v1384_v40 = vld [vmem:[%s1797_s0 + $0x28] ss:$20 sps:$4 sm:$0xff]   ;;  %v1391_v46 = vld [vmem:[%s1797_s0 + $0x50] ss:$20 sps:$4 sm:$0xff]  }
  0x10   :  { %1156 = vmatpush3.bf16.msra.mxu0 %v1355_v14  ;;  %v1387_v42 = vld [vmem:[%s1797_s0 + $0x54] ss:$20 sps:$4 sm:$0xff]   ;;  %v1400_v45 = vld [vmem:[%s1796_s1 + $0x120] sm:$0xff]   ;;  %v1392_v47 = vld [vmem:[%s1797_s0 + $0x58] ss:$20 sps:$4 sm:$0xff]  }
  0x11   :  { %1220 = vmatpush3.bf16.msra.mxu1 %v1356_v15  ;;  %1157 = vmatprep.subr.bf16.mxu0 %v1357_v16  ;;  %v1393_v44 = vld [vmem:[%s1796_s1 + $0x128] sm:$0xff]   ;;  %v1396_v49 = vld [vmem:[%s1797_s0 + $0x84] ss:$20 sps:$4 sm:$0xff]   ;;  %v1414_v51 = vld [vmem:[%s1796_s1 + $0x110] sm:$0xff]  }
  0x12   :  { %1221 = vmatprep.subr.bf16.mxu1 %v1358_v17  ;;  %v1407_v50 = vld [vmem:[%s1796_s1 + $0x118] sm:$0xff]   ;;  %v1399_v53 = vld [vmem:[%s1797_s0 + $0x80] ss:$20 sps:$4 sm:$0xff]   ;;  %v1421_v55 = vld [vmem:[%s1796_s1 + $0x108] sm:$0xff]  }
  0x13   :  { %v1398_v52 = vld [vmem:[%s1797_s0 + $0x78] ss:$20 sps:$4 sm:$0xff]   ;;  %v1428_v57 = vld [vmem:[%s1796_s1 + $0x100] sm:$0xff]   ;;  %v1406_v59 = vld [vmem:[%s1797_s0 + $0xa8] ss:$20 sps:$4 sm:$0xff]  }
  0x14   :  { %1158 = vmatpush3.bf16.msra.mxu0 %v1359_v18  ;;  %v1401_v54 = vld [vmem:[%s1797_s0 + $0xa4] ss:$20 sps:$4 sm:$0xff]   ;;  %v1403_v56 = vld [vmem:[%s1797_s0 + $0xac] ss:$20 sps:$4 sm:$0xff]   ;;  %v1410_v61 = vld [vmem:[%s1797_s0 + $0xd4] ss:$20 sps:$4 sm:$0xff]  }
  0x15   :  { %1222 = vmatpush3.bf16.msra.mxu1 %v1360_v19  ;;  %1159 = vmatprep.subr.bf16.mxu0 %v1361_v20  ;;  %v1405_v58 = vld [vmem:[%s1797_s0 + $0xa0] ss:$20 sps:$4 sm:$0xff]   ;;  %v1412_v62 = vld [vmem:[%s1797_s0 + $0xc8] ss:$20 sps:$4 sm:$0xff]   ;;  %v1413_v63 = vld [vmem:[%s1797_s0 + $0xd0] ss:$20 sps:$4 sm:$0xff]  }
  0x16   :  { %1223 = vmatprep.subr.bf16.mxu1 %v1362_v21  ;;  %v1408_v60 = vld [vmem:[%s1797_s0 + $0xcc] ss:$20 sps:$4 sm:$0xff]   ;;  %v1415_v0 = vld [vmem:[%s1797_s0 + $0xf4] ss:$20 sps:$4 sm:$0xff]   ;;  %v1417_v1 = vld [vmem:[%s1797_s0 + $0xfc] ss:$20 sps:$4 sm:$0xff]  }
  0x17   :  { %v1419_v2 = vld [vmem:[%s1797_s0 + $0xf0] ss:$20 sps:$4 sm:$0xff]   ;;  %v1420_v3 = vld [vmem:[%s1797_s0 + $0xf8] ss:$20 sps:$4 sm:$0xff]   ;;  %v1427_v7 = vld [vmem:[%s1797_s0 + $0x120] ss:$20 sps:$4 sm:$0xff]  }
  0x18   :  { %1160 = vmatpush3.bf16.msra.mxu0 %v1363_v22  ;;  %v1422_v4 = vld [vmem:[%s1797_s0 + $0x11c] ss:$20 sps:$4 sm:$0xff]   ;;  %v1424_v5 = vld [vmem:[%s1797_s0 + $0x124] ss:$20 sps:$4 sm:$0xff]   ;;  %v1433_v12 = vld [vmem:[%s1797_s0 + $0x60] ss:$20 sps:$4 sm:$0xff]  }
  0x19   :  { %1224 = vmatpush3.bf16.msra.mxu1 %v1364_v23  ;;  %1161 = vmatprep.subr.bf16.mxu0 %v1365_v24  ;;  %v1426_v6 = vld [vmem:[%s1797_s0 + $0x118] ss:$20 sps:$4 sm:$0xff]   ;;  %v1429_v8 = vld [vmem:[%s1797_s0 + $0x10] ss:$20 sps:$4 sm:$0xff]   ;;  %v1434_v13 = vld [vmem:[%s1797_s0 + $0x100] ss:$20 sps:$4 sm:$0xff]  }
  0x1a   :  { %1225 = vmatprep.subr.bf16.mxu1 %v1366_v25  ;;  %v1430_v9 = vld [vmem:[%s1797_s0 + $0xb0] ss:$20 sps:$4 sm:$0xff]   ;;  %v1431_v10 = vld [vmem:[%s1797_s0 + $0x38] ss:$20 sps:$4 sm:$0xff]   ;;  %v1435_v14 = vld [vmem:[%s1797_s0 + $0x88] ss:$20 sps:$4 sm:$0xff]  }
  0x1b   :  { %v1432_v11 = vld [vmem:[%s1797_s0 + $0xd8] ss:$20 sps:$4 sm:$0xff]   ;;  %v1436_v15 = vld [vmem:[%s1797_s0 + $0x128] ss:$20 sps:$4 sm:$0xff]   ;;  %v1700_v18 = vld [vmem:[%s1798_s2] ss:$0 sm:$0xff] }
  0x1c   :  { %1162 = vmatpush3.bf16.msra.mxu0 %v1367_v26 }
  0x1d   :  { %1226 = vmatpush3.bf16.msra.mxu1 %v1368_v27  ;;  %1163 = vmatprep.subr.bf16.mxu0 %v1369_v28 }
  0x1e   :  { %1227 = vmatprep.subr.bf16.mxu1 %v1370_v29 }
  0x20   :  { %1164 = vmatpush3.bf16.msra.mxu0 %v1371_v30 }
  0x21   :  { %1228 = vmatpush3.bf16.msra.mxu1 %v1372_v31  ;;  %1293 = vmatprep.subr.bf16.mxu0 %v1379_v36 }
  0x22   :  { %1325 = vmatprep.subr.bf16.mxu1 %v1379_v36 }
  0x23   :  { %631 = vmatmul.mubr.bf16.vlgmr.msra.gmra.mxu0 %v1373_v32 }
  0x24   :  { %728 = vmatmul.mubr.bf16.vlgmr.msra.gmra.mxu1 %v1376_v34  ;;  %1294 = vmatpush3.bf16.msra.mxu0 %v1379_v36 }
  0x25   :  { %1333 = vmatpush3.bf16.msra.mxu1 %v1379_v36  ;;  %638 = vmatprep.mubr.bf16.mxu0 %v1380_v37 }
  0x26   :  { %735 = vmatprep.mubr.bf16.mxu1 %v1382_v38  ;;  %1295 = vmatprep.subr.bf16.mxu0 %v1386_v39 }
  0x27   :  { %1326 = vmatprep.subr.bf16.mxu1 %v1386_v39 }
  0x28   :  { %1296 = vmatpush3.bf16.msra.mxu0 %v1386_v39 }
  0x29   :  { %1334 = vmatpush3.bf16.msra.mxu1 %v1386_v39  ;;  %1297 = vmatprep.subr.bf16.mxu0 %v1393_v44 }
  0x2a   :  { %1327 = vmatprep.subr.bf16.mxu1 %v1393_v44 }
  0x2b   :  { %639 = vmatmul.mubr.bf16.gmra.mxu0 %v1384_v40 }
  0x2c   :  { %736 = vmatmul.mubr.bf16.gmra.mxu1 %v1385_v41  ;;  %646 = vmatprep.mubr.bf16.mxu0 %v1387_v42 }
  0x2d   :  { %743 = vmatprep.mubr.bf16.mxu1 %v1389_v43  ;;  %1298 = vmatpush3.bf16.msra.mxu0 %v1393_v44 }
  0x2e   :  { %1335 = vmatpush3.bf16.msra.mxu1 %v1393_v44  ;;  %1299 = vmatprep.subr.bf16.mxu0 %v1400_v45 }
  0x2f   :  { %1328 = vmatprep.subr.bf16.mxu1 %v1400_v45 }
  0x31   :  { %1300 = vmatpush3.bf16.msra.mxu0 %v1400_v45 }
  0x32   :  { %1336 = vmatpush3.bf16.msra.mxu1 %v1400_v45  ;;  %1301 = vmatprep.subr.bf16.mxu0 %v1407_v50 }
  0x33   :  { %647 = vmatmul.mubr.bf16.gmra.mxu0 %v1391_v46  ;;  %1329 = vmatprep.subr.bf16.mxu1 %v1407_v50 }
  0x34   :  { %744 = vmatmul.mubr.bf16.gmra.mxu1 %v1392_v47  ;;  %654 = vmatprep.mubr.bf16.mxu0 %v1394_v48 }
  0x35   :  { %751 = vmatprep.mubr.bf16.mxu1 %v1396_v49  ;;  %1302 = vmatpush3.bf16.msra.mxu0 %v1407_v50 }
  0x36   :  { %1337 = vmatpush3.bf16.msra.mxu1 %v1407_v50  ;;  %1303 = vmatprep.subr.bf16.mxu0 %v1414_v51 }
  0x37   :  { %1330 = vmatprep.subr.bf16.mxu1 %v1414_v51 }
  0x39   :  { %1304 = vmatpush3.bf16.msra.mxu0 %v1414_v51 }
  0x3a   :  { %1338 = vmatpush3.bf16.msra.mxu1 %v1414_v51  ;;  %1305 = vmatprep.subr.bf16.mxu0 %v1421_v55 }
  0x3b   :  { %655 = vmatmul.mubr.bf16.gmra.mxu0 %v1398_v52  ;;  %1331 = vmatprep.subr.bf16.mxu1 %v1421_v55 }
  0x3c   :  { %752 = vmatmul.mubr.bf16.gmra.mxu1 %v1399_v53  ;;  %662 = vmatprep.mubr.bf16.mxu0 %v1401_v54 }
  0x3d   :  { %759 = vmatprep.mubr.bf16.mxu1 %v1403_v56  ;;  %1306 = vmatpush3.bf16.msra.mxu0 %v1421_v55 }
  0x3e   :  { %1339 = vmatpush3.bf16.msra.mxu1 %v1421_v55  ;;  %1307 = vmatprep.subr.bf16.mxu0 %v1428_v57 }
  0x3f   :  { %1332 = vmatprep.subr.bf16.mxu1 %v1428_v57 }
  0x41   :  { %1308 = vmatpush3.bf16.msra.mxu0 %v1428_v57 }
  0x42   :  { %1340 = vmatpush3.bf16.msra.mxu1 %v1428_v57 }
  0x43   :  { %663 = vmatmul.mubr.bf16.gmra.mxu0 %v1405_v58 }
  0x44   :  { %760 = vmatmul.mubr.bf16.gmra.mxu1 %v1406_v59  ;;  %670 = vmatprep.mubr.bf16.mxu0 %v1408_v60 }
  0x45   :  { %767 = vmatprep.mubr.bf16.mxu1 %v1410_v61 }
  0x4b   :  { %671 = vmatmul.mubr.bf16.gmra.mxu0 %v1412_v62 }
  0x4c   :  { %768 = vmatmul.mubr.bf16.gmra.mxu1 %v1413_v63  ;;  %678 = vmatprep.mubr.bf16.mxu0 %v1415_v0 }
  0x4d   :  { %775 = vmatprep.mubr.bf16.mxu1 %v1417_v1 }
  0x53   :  { %679 = vmatmul.mubr.bf16.gmra.mxu0 %v1419_v2 }
  0x54   :  { %776 = vmatmul.mubr.bf16.gmra.mxu1 %v1420_v3  ;;  %686 = vmatprep.mubr.bf16.mxu0 %v1422_v4 }
  0x55   :  { %783 = vmatprep.mubr.bf16.mxu1 %v1424_v5 }
  0x5b   :  { %687 = vmatmul.mubr.bf16.gmra.mxu0 %v1426_v6 }
  0x5c   :  { %784 = vmatmul.mubr.bf16.gmra.mxu1 %v1427_v7  ;;  %1309 = vmatprep.mubr.bf16.mxu0 %v1429_v8 }
  0x5d   :  { %1317 = vmatprep.mubr.bf16.mxu1 %v1430_v9 }
  0x63   :  { %1310 = vmatmul.mubr.bf16.vlgmr.msra.gmra.mxu0 %v1431_v10 }
  0x64   :  { %1318 = vmatmul.mubr.bf16.vlgmr.msra.gmra.mxu1 %v1432_v11  ;;  %1313 = vmatprep.mubr.bf16.mxu0 %v1433_v12 }
  0x65   :  { %1321 = vmatprep.mubr.bf16.mxu1 %v1434_v13 }
  0x6b   :  { %1314 = vmatmul.mubr.bf16.gmra.mxu0 %v1435_v14 }
  0x6c   :  { %1322 = vmatmul.mubr.bf16.gmra.mxu1 %v1436_v15 }
  0xe3   :  { %v1165_v16 = vpop.f32.mrf.mxu0 }
  0xe4   :  { %v1229_v17 = vpop.f32.mrf.mxu1 }
  0xe5   :  { %v1166_v19 = vpop.f32.mrf.mxu0 }
  0xe6   :  { %v1167_v20 = vadd.f32 %v1166_v19, %v1165_v16  ;;  %v1230_v21 = vpop.f32.mrf.mxu1 }
  0xe7   :  { %v1168_v22 = vpop.f32.mrf.mxu0  ;;  %v1231_v24 = vadd.f32 %v1230_v21, %v1229_v17 }
  0xe8   :  { %v633_v23 = vadd.f32 %v1167_v20, %v1700_v18  ;;  %v1703_v25 = vpop.f32.mrf.mxu1 }
  0xe9   :  { %v1169_v26 = vpop.f32.mrf.mxu0 }
  0xea   :  { %v1705_v27 = vpop.f32.mrf.mxu1  ;;  %v1707_v28 = vadd.f32 %v1231_v24, %v633_v23  ;;  %v1170_v10 = vadd.f32 %v1169_v26, %v1168_v22 }
  0xeb   :  { %v1171_v29 = vpop.f32.mrf.mxu0 }
  0xec   :  { %1800 = vst [vmem:[#allocation2_spill] sm:$0xff] %v1707_v28  ;;  %v1235_v30 = vpop.f32.mrf.mxu1  ;;  %v636_v19 = vadd.f32 %v1170_v10, %v1700_v18 }
  0xed   :  { %v1172_v31 = vpop.f32.mrf.mxu0 }
  0xee   :  { %v1236_v32 = vpop.f32.mrf.mxu1  ;;  %v1173_v12 = vadd.f32 %v1172_v31, %v1171_v29  ;;  %v1234_v29 = vadd.f32 %v1705_v27, %v1703_v25 }
  0xef   :  { %v1174_v33 = vpop.f32.mrf.mxu0  ;;  %v1237_v31 = vadd.f32 %v1236_v32, %v1235_v30 }
  0xf0   :  { %v1238_v34 = vpop.f32.mrf.mxu1  ;;  %v641_v23 = vadd.f32 %v1173_v12, %v1700_v18 }
  0xf1   :  { %v1175_v35 = vpop.f32.mrf.mxu0 }
  0xf2   :  { %v1239_v36 = vpop.f32.mrf.mxu1  ;;  %v1176_v13 = vadd.f32 %v1175_v35, %v1174_v33 }
  0xf3   :  { %v1177_v37 = vpop.f32.mrf.mxu0  ;;  %v1240_v33 = vadd.f32 %v1239_v36, %v1238_v34 }
  0xf4   :  { %v1241_v38 = vpop.f32.mrf.mxu1  ;;  %v644_v24 = vadd.f32 %v1176_v13, %v1700_v18  ;;  %v733_v13 = vadd.f32 %v1234_v29, %v636_v19 }
  0xf5   :  { %v1178_v39 = vpop.f32.mrf.mxu0 }
  0xf6   :  { %v1242_v40 = vpop.f32.mrf.mxu1  ;;  %v1179_v14 = vadd.f32 %v1178_v39, %v1177_v37  ;;  %v741_v28 = vadd.f32 %v1240_v33, %v644_v24 }
  0xf7   :  { %v1180_v41 = vpop.f32.mrf.mxu0  ;;  %v1243_v39 = vadd.f32 %v1242_v40, %v1241_v38 }
  0xf8   :  { %v1709_v42 = vpop.f32.mrf.mxu1  ;;  %v649_v22 = vadd.f32 %v1179_v14, %v1700_v18  ;;  %v738_v14 = vadd.f32 %v1237_v31, %v641_v23 }
  0xf9   :  { %v1181_v43 = vpop.f32.mrf.mxu0 }
  0xfa   :  { %v1711_v44 = vpop.f32.mrf.mxu1  ;;  %v1182_v10 = vadd.f32 %v1181_v43, %v1180_v41  ;;  %v1741_v25 = vadd.f32 %v1243_v39, %v649_v22 }
  0xfb   :  { %v1183_v45 = vpop.f32.mrf.mxu0  ;;  %v1745_v27 = vadd.f32 %v1711_v44, %v1709_v42 }
  0xfc   :  { %v1713_v46 = vpop.f32.mrf.mxu1  ;;  %v1750_v38 = vadd.f32 %v1182_v10, %v1700_v18 }
  0xfd   :  { %v1184_v47 = vpop.f32.mrf.mxu0 }
  0xfe   :  { %v1248_v48 = vpop.f32.mrf.mxu1  ;;  %v1185_v20 = vadd.f32 %v1184_v47, %v1183_v45 }
  0xff   :  { %v1186_v49 = vpop.f32.mrf.mxu0  ;;  %v1249_v30 = vadd.f32 %v1248_v48, %v1713_v46 }
 0x100   :  { %v1715_v50 = vpop.f32.mrf.mxu1  ;;  %v657_v12 = vadd.f32 %v1185_v20, %v1700_v18 }
 0x101   :  { %v1187_v51 = vpop.f32.mrf.mxu0 }
 0x102   :  { %v1717_v52 = vpop.f32.mrf.mxu1  ;;  %v1188_v32 = vadd.f32 %v1187_v51, %v1186_v49 }
 0x103   :  { %v1189_v53 = vpop.f32.mrf.mxu0  ;;  %v1252_v19 = vadd.f32 %v1717_v52, %v1715_v50 }
 0x104   :  { %v1719_v54 = vpop.f32.mrf.mxu1 }
 0x105   :  { %v1190_v55 = vpop.f32.mrf.mxu0 }
 0x106   :  { %v1254_v56 = vpop.f32.mrf.mxu1  ;;  %v1191_v35 = vadd.f32 %v1190_v55, %v1189_v53 }
 0x107   :  { %v1192_v57 = vpop.f32.mrf.mxu0  ;;  %v1255_v55 = vadd.f32 %v1254_v56, %v1719_v54 }
 0x108   :  { %v1256_v58 = vpop.f32.mrf.mxu1  ;;  %v665_v34 = vadd.f32 %v1191_v35, %v1700_v18 }
 0x109   :  { %v1193_v59 = vpop.f32.mrf.mxu0 }
 0x10a   :  { %v1257_v60 = vpop.f32.mrf.mxu1  ;;  %v1194_v45 = vadd.f32 %v1193_v59, %v1192_v57  ;;  %v754_v59 = vadd.f32 %v1249_v30, %v657_v12 }
 0x10b   :  { %v1195_v61 = vpop.f32.mrf.mxu0  ;;  %v1258_v57 = vadd.f32 %v1257_v60, %v1256_v58 }
 0x10c   :  { %v1259_v62 = vpop.f32.mrf.mxu1  ;;  %v668_v40 = vadd.f32 %v1194_v45, %v1700_v18 }
 0x10d   :  { %v1196_v63 = vpop.f32.mrf.mxu0 }
 0x10e   :  { %v1260_v0 = vpop.f32.mrf.mxu1  ;;  %v1197_v26 = vadd.f32 %v1196_v63, %v1195_v61  ;;  %v765_v58 = vadd.f32 %v1258_v57, %v668_v40 }
 0x10f   :  { %v1198_v1 = vpop.f32.mrf.mxu0  ;;  %v1261_v41 = vadd.f32 %v1260_v0, %v1259_v62  ;;  %v762_v0 = vadd.f32 %v1255_v55, %v665_v34 }
 0x110   :  { %v1262_v2 = vpop.f32.mrf.mxu1  ;;  %v673_v61 = vadd.f32 %v1197_v26, %v1700_v18 }
 0x111   :  { %v1199_v3 = vpop.f32.mrf.mxu0 }
 0x112   :  { %v1263_v4 = vpop.f32.mrf.mxu1  ;;  %v1200_v47 = vadd.f32 %v1199_v3, %v1198_v1  ;;  %v770_v51 = vadd.f32 %v1261_v41, %v673_v61  ;;  %v660_v3 = vadd.f32 %v1188_v32, %v1700_v18 }
 0x113   :  { %v1201_v5 = vpop.f32.mrf.mxu0  ;;  %v1264_v46 = vadd.f32 %v1263_v4, %v1262_v2  ;;  %v1804_v4 = vld [vmem:[#allocation2_spill] sm:$0xff] }
 0x114   :  { %v1721_v6 = vpop.f32.mrf.mxu1  ;;  %v676_v43 = vadd.f32 %v1200_v47, %v1700_v18  ;;  %v757_v41 = vadd.f32 %v1252_v19, %v660_v3 }
 0x115   :  { %v1202_v7 = vpop.f32.mrf.mxu0 }
 0x116   :  { %v1723_v8 = vpop.f32.mrf.mxu1  ;;  %v1203_v48 = vadd.f32 %v1202_v7, %v1201_v5  ;;  %v773_v56 = vadd.f32 %v1264_v46, %v676_v43 }
 0x117   :  { %v1204_v9 = vpop.f32.mrf.mxu0  ;;  %v1267_v60 = vadd.f32 %v1723_v8, %v1721_v6 }
 0x118   :  { %v1725_v11 = vpop.f32.mrf.mxu1 }
 0x119   :  { %1801 = vst [vmem:[#allocation3_spill] sm:$0xff] %v1725_v11  ;;  %v1205_v15 = vpop.f32.mrf.mxu0 }
 0x11a   :  { %v1727_v16 = vpop.f32.mrf.mxu1  ;;  %v1206_v49 = vadd.f32 %v1205_v15, %v1204_v9 }
 0x11b   :  { %1802 = vst [vmem:[#allocation4_spill] sm:$0xff] %v1727_v16  ;;  %v1207_v17 = vpop.f32.mrf.mxu0 }
 0x11c   :  { %v1730_v21 = vpop.f32.mrf.mxu1  ;;  %v684_v50 = vadd.f32 %v1206_v49, %v1700_v18 }
 0x11d   :  { %1803 = vst [vmem:[#allocation5_spill] sm:$0xff] %v1730_v21  ;;  %v1208_v11 = vpop.f32.mrf.mxu0 }
 0x11e   :  { %v1272_v37 = vpop.f32.mrf.mxu1  ;;  %v1209_v42 = vadd.f32 %v1208_v11, %v1207_v17  ;;  %v681_v11 = vadd.f32 %v1203_v48, %v1700_v18  ;;  %v749_v48 = vadd.f32 %v1745_v27, %v1750_v38 }
 0x11f   :  { %v1210_v16 = vpop.f32.mrf.mxu0 }
 0x120   :  { %v1738_v21 = vpop.f32.mrf.mxu1  ;;  %v689_v2 = vadd.f32 %v1209_v42, %v1700_v18  ;;  %v778_v34 = vadd.f32 %v1267_v60, %v681_v11  ;;  %v1806_v43 = vld [vmem:[#allocation3_spill] sm:$0xff] }
 0x121   :  { %v1211_v63 = vpop.f32.mrf.mxu0 }
 0x122   :  { %v1275_v36 = vpop.f32.mrf.mxu1  ;;  %v1212_v23 = vadd.f32 %v1211_v63, %v1210_v16 }
 0x123   :  { %v1311_v53 = vpop.f32.mrf.mxu0  ;;  %v1276_v63 = vadd.f32 %v1275_v36, %v1738_v21 }
 0x124   :  { %v1319_v44 = vpop.f32.mrf.mxu1  ;;  %v835_v62 = vadd.f32 %v1311_v53, %v738_v14  ;;  %v1805_v17 = vld [vmem:[#allocation5_spill] sm:$0xff]  ;;  %v692_v6 = vadd.f32 %v1212_v23, %v1700_v18  ;;  %v1807_v53 = vld [vmem:[#allocation4_spill] sm:$0xff] }
 0x125   :  { %v826_v1 = vpop.f32.mrf.mxu0  ;;  %v867_v24 = vadd.f32 %v1319_v44, %v770_v51  ;;  %v1273_v22 = vadd.f32 %v1272_v37, %v1805_v17  ;;  %v1270_v55 = vadd.f32 %v1807_v53, %v1806_v43 }
 0x126   :  { %v858_v20 = vpop.f32.mrf.mxu1  ;;  %v827_v5 = vadd.f32 %v826_v1, %v1804_v4  ;;  %v891_v26 = vmax.f32 %v835_v62, 0.0  ;;  %v789_v42 = vadd.f32 %v1276_v63, %v692_v6 }
 0x127   :  { %v1312_v54 = vpop.f32.mrf.mxu0  ;;  %v859_v52 = vadd.f32 %v858_v20, %v762_v0  ;;  %v899_v8 = vmax.f32 %v867_v24, 0.0  ;;  %v786_v12 = vadd.f32 %v1273_v22, %v689_v2  ;;  %v781_v3 = vadd.f32 %v1270_v55, %v684_v50 }
 0x128   :  { %v838_v7 = vadd.f32 %v1312_v54, %v741_v28  ;;  %v1320_v9 = vpop.f32.mrf.mxu1  ;;  %v889_v10 = vmax.f32 %v827_v5, 0.0 }
 0x129   :  { %v870_v15 = vadd.f32 %v1320_v9, %v773_v56  ;;  %v829_v16 = vpop.f32.mrf.mxu0  ;;  %v897_v14 = vmax.f32 %v859_v52, 0.0 }
 0x12a   :  { %v892_v29 = vmax.f32 %v838_v7, 0.0  ;;  %v830_v31 = vadd.f32 %v829_v16, %v733_v13  ;;  %v861_v33 = vpop.f32.mrf.mxu1 }
 0x12b   :  { %v900_v35 = vmax.f32 %v870_v15, 0.0  ;;  %v862_v39 = vadd.f32 %v861_v33, %v765_v58  ;;  %v1315_v28 = vpop.f32.mrf.mxu0 }
 0x12c   :  { %v1110_v45 = vpack.c.bf16 %v892_v29, %v891_v26  ;;  %v890_v47 = vmax.f32 %v830_v31, 0.0  ;;  %v1323_v61 = vpop.f32.mrf.mxu1  ;;  %v851_v13 = vadd.f32 %v1315_v28, %v754_v59 }
 0x12d   :  { %v1130_v30 = vpack.c.bf16 %v900_v35, %v899_v8  ;;  %v898_v37 = vmax.f32 %v862_v39, 0.0  ;;  %v842_v32 = vpop.f32.mrf.mxu0  ;;  %v883_v36 = vadd.f32 %v1323_v61, %v786_v12 }
 0x12e   :  { %1142 = vst [vmem:[%s1799_s3 + $0x8] sm:$0xff] %v1110_v45   ;;  %v1105_v18 = vpack.c.bf16 %v890_v47, %v889_v10  ;;  %v874_v40 = vpop.f32.mrf.mxu1  ;;  %v843_v44 = vadd.f32 %v842_v32, %v1741_v25  ;;  %v895_v19 = vmax.f32 %v851_v13, 0.0 }
 0x12f   :  { %1146 = vst [vmem:[%s1799_s3 + $0x28] sm:$0xff] %v1130_v30   ;;  %v1125_v21 = vpack.c.bf16 %v898_v37, %v897_v14  ;;  %v1316_v57 = vpop.f32.mrf.mxu0  ;;  %v875_v49 = vadd.f32 %v874_v40, %v778_v34  ;;  %v903_v23 = vmax.f32 %v883_v36, 0.0 }
 0x130   :  { %1106 = vst [vmem:[%s1799_s3] sm:$0xff] %v1105_v18   ;;  %v854_v59 = vadd.f32 %v1316_v57, %v757_v41  ;;  %v1324_v46 = vpop.f32.mrf.mxu1  ;;  %v893_v54 = vmax.f32 %v843_v44, 0.0 }
 0x131   :  { %1145 = vst [vmem:[%s1799_s3 + $0x20] sm:$0xff] %v1125_v21   ;;  %v886_v51 = vadd.f32 %v1324_v46, %v789_v42  ;;  %v845_v1 = vpop.f32.mrf.mxu0  ;;  %v901_v60 = vmax.f32 %v875_v49, 0.0 }
 0x132   :  { %v896_v62 = vmax.f32 %v854_v59, 0.0  ;;  %v846_v0 = vadd.f32 %v845_v1, %v749_v48  ;;  %v877_v20 = vpop.f32.mrf.mxu1 }
 0x133   :  { %v904_v24 = vmax.f32 %v886_v51, 0.0  ;;  %v878_v25 = vadd.f32 %v877_v20, %v781_v3 }
 0x134   :  { %v1120_v56 = vpack.c.bf16 %v896_v62, %v895_v19  ;;  %v894_v58 = vmax.f32 %v846_v0, 0.0 }
 0x135   :  { %v1140_v27 = vpack.c.bf16 %v904_v24, %v903_v23  ;;  %v902_v38 = vmax.f32 %v878_v25, 0.0 }
 0x136   :  { %1144 = vst [vmem:[%s1799_s3 + $0x18] sm:$0xff] %v1120_v56   ;;  %v1115_v2 = vpack.c.bf16 %v894_v58, %v893_v54 }
 0x137   :  { %1148 = vst [vmem:[%s1799_s3 + $0x38] sm:$0xff] %v1140_v27   ;;  %v1135_v4 = vpack.c.bf16 %v902_v38, %v901_v60 }
 0x138   :  { %1143 = vst [vmem:[%s1799_s3 + $0x10] sm:$0xff] %v1115_v2  }
 0x139   :  { %1147 = vst [vmem:[%s1799_s3 + $0x30] sm:$0xff] %v1135_v4  }

// kernel: resnet18_forward.24
= control target key start
LH: loop header
LB: loop body
LE: loop exit
PB: predicated region body
PF: predicated region fallthrough
CT: control target
= control target key end

     0   :  { %s2042_s1 = inlined_call_operand.vmem [shape: bf16[640,128], index: 1, kind: input, shape index: {}]   ;;  %s2043_s0 = inlined_call_operand.vmem [shape: bf16[128,640], index: 0, kind: input, shape index: {}]   ;;  %s2044_s2 = inlined_call_operand.vmem [shape: f32[1,128], index: 2, kind: input, shape index: {}]   ;;  %s2045_s3 = inlined_call_operand.vmem [shape: bf16[128,128], index: 3, kind: input, shape index: {}]   ;;  %s2046_s4 = inlined_call_operand.vmem [shape: bf16[128,128], index: 4, kind: output, shape index: {}]  }
   0x1   :  { %v1431_v0 = vld [vmem:[%s2042_s1 + $0x78] sm:$0xff]   ;;  %v1435_v4 = vld [vmem:[%s2042_s1 + $0x70] sm:$0xff]   ;;  %v1439_v8 = vld [vmem:[%s2042_s1 + $0x68] sm:$0xff]  }
   0x2   :  { %v1432_v1 = vld [vmem:[%s2042_s1 + $0xf8] sm:$0xff]   ;;  %1239 = vmatprep.subr.bf16.mxu0 %v1431_v0  ;;  %v1436_v5 = vld [vmem:[%s2042_s1 + $0xf0] sm:$0xff]   ;;  %v1440_v9 = vld [vmem:[%s2042_s1 + $0xe8] sm:$0xff]  }
   0x3   :  { %v1433_v2 = vld [vmem:[%s2042_s1 + $0x38] sm:$0xff]   ;;  %1303 = vmatprep.subr.bf16.mxu1 %v1432_v1  ;;  %v1437_v6 = vld [vmem:[%s2042_s1 + $0x30] sm:$0xff]   ;;  %v1441_v10 = vld [vmem:[%s2042_s1 + $0x28] sm:$0xff]  }
   0x4   :  { %v1434_v3 = vld [vmem:[%s2042_s1 + $0xb8] sm:$0xff]   ;;  %1240 = vmatpush3.bf16.msra.mxu0 %v1433_v2  ;;  %v1438_v7 = vld [vmem:[%s2042_s1 + $0xb0] sm:$0xff]   ;;  %v1442_v11 = vld [vmem:[%s2042_s1 + $0xa8] sm:$0xff]  }
   0x5   :  { %1304 = vmatpush3.bf16.msra.mxu1 %v1434_v3  ;;  %1241 = vmatprep.subr.bf16.mxu0 %v1435_v4  ;;  %v1443_v12 = vld [vmem:[%s2042_s1 + $0x60] sm:$0xff]   ;;  %v1447_v16 = vld [vmem:[%s2042_s1 + $0x58] sm:$0xff]   ;;  %v1451_v20 = vld [vmem:[%s2042_s1 + $0x50] sm:$0xff]  }
   0x6   :  { %1305 = vmatprep.subr.bf16.mxu1 %v1436_v5  ;;  %v1444_v13 = vld [vmem:[%s2042_s1 + $0xe0] sm:$0xff]   ;;  %v1448_v17 = vld [vmem:[%s2042_s1 + $0xd8] sm:$0xff]   ;;  %v1452_v21 = vld [vmem:[%s2042_s1 + $0xd0] sm:$0xff]  }
   0x7   :  { %v1445_v14 = vld [vmem:[%s2042_s1 + $0x20] sm:$0xff]   ;;  %v1449_v18 = vld [vmem:[%s2042_s1 + $0x18] sm:$0xff]   ;;  %v1453_v22 = vld [vmem:[%s2042_s1 + $0x10] sm:$0xff]  }
   0x8   :  { %1242 = vmatpush3.bf16.msra.mxu0 %v1437_v6  ;;  %v1446_v15 = vld [vmem:[%s2042_s1 + $0xa0] sm:$0xff]   ;;  %v1450_v19 = vld [vmem:[%s2042_s1 + $0x98] sm:$0xff]   ;;  %v1454_v23 = vld [vmem:[%s2042_s1 + $0x90] sm:$0xff]  }
   0x9   :  { %1306 = vmatpush3.bf16.msra.mxu1 %v1438_v7  ;;  %1243 = vmatprep.subr.bf16.mxu0 %v1439_v8  ;;  %v1455_v24 = vld [vmem:[%s2042_s1 + $0x48] sm:$0xff]   ;;  %v1459_v28 = vld [vmem:[%s2042_s1 + $0x40] sm:$0xff]   ;;  %v1469_v36 = vld [vmem:[%s2042_s1 + $0x138] sm:$0xff]  }
   0xa   :  { %1307 = vmatprep.subr.bf16.mxu1 %v1440_v9  ;;  %v1456_v25 = vld [vmem:[%s2042_s1 + $0xc8] sm:$0xff]   ;;  %v1460_v29 = vld [vmem:[%s2042_s1 + $0xc0] sm:$0xff]   ;;  %v1476_v39 = vld [vmem:[%s2042_s1 + $0x130] sm:$0xff]  }
   0xb   :  { %v1457_v26 = vld [vmem:[%s2042_s1 + $0x8] sm:$0xff]   ;;  %v1461_v30 = vld [vmem:[%s2042_s1] sm:$0xff]   ;;  %v1479_v43 = vld [vmem:[%s2043_s0 + $0x5c] ss:$20 sps:$4 sm:$0xff]  }
   0xc   :  { %1244 = vmatpush3.bf16.msra.mxu0 %v1441_v10  ;;  %v1458_v27 = vld [vmem:[%s2042_s1 + $0x88] sm:$0xff]   ;;  %v1462_v31 = vld [vmem:[%s2042_s1 + $0x80] sm:$0xff]   ;;  %v1484_v48 = vld [vmem:[%s2043_s0 + $0x7c] ss:$20 sps:$4 sm:$0xff]  }
   0xd   :  { %1308 = vmatpush3.bf16.msra.mxu1 %v1442_v11  ;;  %1245 = vmatprep.subr.bf16.mxu0 %v1443_v12  ;;  %v1463_v32 = vld [vmem:[%s2043_s0] ss:$20 sps:$4 sm:$0xff]   ;;  %v1465_v33 = vld [vmem:[%s2043_s0 + $0x4] ss:$20 sps:$4 sm:$0xff]   ;;  %v1466_v34 = vld [vmem:[%s2043_s0 + $0x8] ss:$20 sps:$4 sm:$0xff]  }
   0xe   :  { %1309 = vmatprep.subr.bf16.mxu1 %v1444_v13  ;;  %v1468_v35 = vld [vmem:[%s2043_s0 + $0xc] ss:$20 sps:$4 sm:$0xff]   ;;  %633 = vmatprep.mubr.bf16.mxu0 %v1465_v33  ;;  %v1472_v38 = vld [vmem:[%s2043_s0 + $0x34] ss:$20 sps:$4 sm:$0xff]   ;;  %v1475_v41 = vld [vmem:[%s2043_s0 + $0x30] ss:$20 sps:$4 sm:$0xff]  }
   0xf   :  { %730 = vmatprep.mubr.bf16.mxu1 %v1468_v35  ;;  %v1470_v37 = vld [vmem:[%s2043_s0 + $0x2c] ss:$20 sps:$4 sm:$0xff]   ;;  %v1474_v40 = vld [vmem:[%s2043_s0 + $0x28] ss:$20 sps:$4 sm:$0xff]   ;;  %v1481_v46 = vld [vmem:[%s2043_s0 + $0x50] ss:$20 sps:$4 sm:$0xff]  }
  0x10   :  { %1246 = vmatpush3.bf16.msra.mxu0 %v1445_v14  ;;  %v1477_v42 = vld [vmem:[%s2043_s0 + $0x54] ss:$20 sps:$4 sm:$0xff]   ;;  %v1490_v45 = vld [vmem:[%s2042_s1 + $0x120] sm:$0xff]   ;;  %v1482_v47 = vld [vmem:[%s2043_s0 + $0x58] ss:$20 sps:$4 sm:$0xff]  }
  0x11   :  { %1310 = vmatpush3.bf16.msra.mxu1 %v1446_v15  ;;  %1247 = vmatprep.subr.bf16.mxu0 %v1447_v16  ;;  %v1483_v44 = vld [vmem:[%s2042_s1 + $0x128] sm:$0xff]   ;;  %v1486_v49 = vld [vmem:[%s2043_s0 + $0x84] ss:$20 sps:$4 sm:$0xff]   ;;  %v1504_v51 = vld [vmem:[%s2042_s1 + $0x110] sm:$0xff]  }
  0x12   :  { %1311 = vmatprep.subr.bf16.mxu1 %v1448_v17  ;;  %v1497_v50 = vld [vmem:[%s2042_s1 + $0x118] sm:$0xff]   ;;  %v1489_v53 = vld [vmem:[%s2043_s0 + $0x80] ss:$20 sps:$4 sm:$0xff]   ;;  %v1511_v55 = vld [vmem:[%s2042_s1 + $0x108] sm:$0xff]  }
  0x13   :  { %v1488_v52 = vld [vmem:[%s2043_s0 + $0x78] ss:$20 sps:$4 sm:$0xff]   ;;  %v1518_v57 = vld [vmem:[%s2042_s1 + $0x100] sm:$0xff]   ;;  %v1496_v59 = vld [vmem:[%s2043_s0 + $0xa8] ss:$20 sps:$4 sm:$0xff]  }
  0x14   :  { %1248 = vmatpush3.bf16.msra.mxu0 %v1449_v18  ;;  %v1491_v54 = vld [vmem:[%s2043_s0 + $0xa4] ss:$20 sps:$4 sm:$0xff]   ;;  %v1493_v56 = vld [vmem:[%s2043_s0 + $0xac] ss:$20 sps:$4 sm:$0xff]   ;;  %v1500_v61 = vld [vmem:[%s2043_s0 + $0xd4] ss:$20 sps:$4 sm:$0xff]  }
  0x15   :  { %1312 = vmatpush3.bf16.msra.mxu1 %v1450_v19  ;;  %1249 = vmatprep.subr.bf16.mxu0 %v1451_v20  ;;  %v1495_v58 = vld [vmem:[%s2043_s0 + $0xa0] ss:$20 sps:$4 sm:$0xff]   ;;  %v1502_v62 = vld [vmem:[%s2043_s0 + $0xc8] ss:$20 sps:$4 sm:$0xff]   ;;  %v1503_v63 = vld [vmem:[%s2043_s0 + $0xd0] ss:$20 sps:$4 sm:$0xff]  }
  0x16   :  { %1313 = vmatprep.subr.bf16.mxu1 %v1452_v21  ;;  %v1498_v60 = vld [vmem:[%s2043_s0 + $0xcc] ss:$20 sps:$4 sm:$0xff]   ;;  %v1505_v0 = vld [vmem:[%s2043_s0 + $0xf4] ss:$20 sps:$4 sm:$0xff]   ;;  %v1507_v1 = vld [vmem:[%s2043_s0 + $0xfc] ss:$20 sps:$4 sm:$0xff]  }
  0x17   :  { %v1509_v2 = vld [vmem:[%s2043_s0 + $0xf0] ss:$20 sps:$4 sm:$0xff]   ;;  %v1510_v3 = vld [vmem:[%s2043_s0 + $0xf8] ss:$20 sps:$4 sm:$0xff]   ;;  %v1517_v7 = vld [vmem:[%s2043_s0 + $0x120] ss:$20 sps:$4 sm:$0xff]  }
  0x18   :  { %1250 = vmatpush3.bf16.msra.mxu0 %v1453_v22  ;;  %v1512_v4 = vld [vmem:[%s2043_s0 + $0x11c] ss:$20 sps:$4 sm:$0xff]   ;;  %v1514_v5 = vld [vmem:[%s2043_s0 + $0x124] ss:$20 sps:$4 sm:$0xff]   ;;  %v1523_v12 = vld [vmem:[%s2043_s0 + $0x60] ss:$20 sps:$4 sm:$0xff]  }
  0x19   :  { %1314 = vmatpush3.bf16.msra.mxu1 %v1454_v23  ;;  %1251 = vmatprep.subr.bf16.mxu0 %v1455_v24  ;;  %v1516_v6 = vld [vmem:[%s2043_s0 + $0x118] ss:$20 sps:$4 sm:$0xff]   ;;  %v1519_v8 = vld [vmem:[%s2043_s0 + $0x10] ss:$20 sps:$4 sm:$0xff]   ;;  %v1524_v13 = vld [vmem:[%s2043_s0 + $0x100] ss:$20 sps:$4 sm:$0xff]  }
  0x1a   :  { %1315 = vmatprep.subr.bf16.mxu1 %v1456_v25  ;;  %v1520_v9 = vld [vmem:[%s2043_s0 + $0xb0] ss:$20 sps:$4 sm:$0xff]   ;;  %v1521_v10 = vld [vmem:[%s2043_s0 + $0x38] ss:$20 sps:$4 sm:$0xff]   ;;  %v1525_v14 = vld [vmem:[%s2043_s0 + $0x88] ss:$20 sps:$4 sm:$0xff]  }
  0x1b   :  { %v1522_v11 = vld [vmem:[%s2043_s0 + $0xd8] ss:$20 sps:$4 sm:$0xff]   ;;  %v1526_v15 = vld [vmem:[%s2043_s0 + $0x128] ss:$20 sps:$4 sm:$0xff]   ;;  %v1795_v18 = vld [vmem:[%s2044_s2] ss:$0 sm:$0xff] }
  0x1c   :  { %1252 = vmatpush3.bf16.msra.mxu0 %v1457_v26 }
  0x1d   :  { %1316 = vmatpush3.bf16.msra.mxu1 %v1458_v27  ;;  %1253 = vmatprep.subr.bf16.mxu0 %v1459_v28 }
  0x1e   :  { %1317 = vmatprep.subr.bf16.mxu1 %v1460_v29 }
  0x20   :  { %1254 = vmatpush3.bf16.msra.mxu0 %v1461_v30 }
  0x21   :  { %1318 = vmatpush3.bf16.msra.mxu1 %v1462_v31  ;;  %1383 = vmatprep.subr.bf16.mxu0 %v1469_v36 }
  0x22   :  { %1415 = vmatprep.subr.bf16.mxu1 %v1469_v36 }
  0x23   :  { %634 = vmatmul.mubr.bf16.vlgmr.msra.gmra.mxu0 %v1463_v32 }
  0x24   :  { %731 = vmatmul.mubr.bf16.vlgmr.msra.gmra.mxu1 %v1466_v34  ;;  %1384 = vmatpush3.bf16.msra.mxu0 %v1469_v36 }
  0x25   :  { %1423 = vmatpush3.bf16.msra.mxu1 %v1469_v36  ;;  %641 = vmatprep.mubr.bf16.mxu0 %v1470_v37 }
  0x26   :  { %738 = vmatprep.mubr.bf16.mxu1 %v1472_v38  ;;  %1385 = vmatprep.subr.bf16.mxu0 %v1476_v39 }
  0x27   :  { %1416 = vmatprep.subr.bf16.mxu1 %v1476_v39 }
  0x28   :  { %1386 = vmatpush3.bf16.msra.mxu0 %v1476_v39 }
  0x29   :  { %1424 = vmatpush3.bf16.msra.mxu1 %v1476_v39  ;;  %1387 = vmatprep.subr.bf16.mxu0 %v1483_v44 }
  0x2a   :  { %1417 = vmatprep.subr.bf16.mxu1 %v1483_v44 }
  0x2b   :  { %642 = vmatmul.mubr.bf16.gmra.mxu0 %v1474_v40 }
  0x2c   :  { %739 = vmatmul.mubr.bf16.gmra.mxu1 %v1475_v41  ;;  %649 = vmatprep.mubr.bf16.mxu0 %v1477_v42 }
  0x2d   :  { %746 = vmatprep.mubr.bf16.mxu1 %v1479_v43  ;;  %1388 = vmatpush3.bf16.msra.mxu0 %v1483_v44 }
  0x2e   :  { %1425 = vmatpush3.bf16.msra.mxu1 %v1483_v44  ;;  %1389 = vmatprep.subr.bf16.mxu0 %v1490_v45 }
  0x2f   :  { %1418 = vmatprep.subr.bf16.mxu1 %v1490_v45 }
  0x31   :  { %1390 = vmatpush3.bf16.msra.mxu0 %v1490_v45 }
  0x32   :  { %1426 = vmatpush3.bf16.msra.mxu1 %v1490_v45  ;;  %1391 = vmatprep.subr.bf16.mxu0 %v1497_v50 }
  0x33   :  { %650 = vmatmul.mubr.bf16.gmra.mxu0 %v1481_v46  ;;  %1419 = vmatprep.subr.bf16.mxu1 %v1497_v50 }
  0x34   :  { %747 = vmatmul.mubr.bf16.gmra.mxu1 %v1482_v47  ;;  %657 = vmatprep.mubr.bf16.mxu0 %v1484_v48 }
  0x35   :  { %754 = vmatprep.mubr.bf16.mxu1 %v1486_v49  ;;  %1392 = vmatpush3.bf16.msra.mxu0 %v1497_v50 }
  0x36   :  { %1427 = vmatpush3.bf16.msra.mxu1 %v1497_v50  ;;  %1393 = vmatprep.subr.bf16.mxu0 %v1504_v51 }
  0x37   :  { %1420 = vmatprep.subr.bf16.mxu1 %v1504_v51 }
  0x39   :  { %1394 = vmatpush3.bf16.msra.mxu0 %v1504_v51 }
  0x3a   :  { %1428 = vmatpush3.bf16.msra.mxu1 %v1504_v51  ;;  %1395 = vmatprep.subr.bf16.mxu0 %v1511_v55 }
  0x3b   :  { %658 = vmatmul.mubr.bf16.gmra.mxu0 %v1488_v52  ;;  %1421 = vmatprep.subr.bf16.mxu1 %v1511_v55 }
  0x3c   :  { %755 = vmatmul.mubr.bf16.gmra.mxu1 %v1489_v53  ;;  %665 = vmatprep.mubr.bf16.mxu0 %v1491_v54 }
  0x3d   :  { %762 = vmatprep.mubr.bf16.mxu1 %v1493_v56  ;;  %1396 = vmatpush3.bf16.msra.mxu0 %v1511_v55 }
  0x3e   :  { %1429 = vmatpush3.bf16.msra.mxu1 %v1511_v55  ;;  %1397 = vmatprep.subr.bf16.mxu0 %v1518_v57 }
  0x3f   :  { %1422 = vmatprep.subr.bf16.mxu1 %v1518_v57 }
  0x41   :  { %1398 = vmatpush3.bf16.msra.mxu0 %v1518_v57 }
  0x42   :  { %1430 = vmatpush3.bf16.msra.mxu1 %v1518_v57 }
  0x43   :  { %666 = vmatmul.mubr.bf16.gmra.mxu0 %v1495_v58 }
  0x44   :  { %763 = vmatmul.mubr.bf16.gmra.mxu1 %v1496_v59  ;;  %673 = vmatprep.mubr.bf16.mxu0 %v1498_v60 }
  0x45   :  { %770 = vmatprep.mubr.bf16.mxu1 %v1500_v61 }
  0x4b   :  { %674 = vmatmul.mubr.bf16.gmra.mxu0 %v1502_v62 }
  0x4c   :  { %771 = vmatmul.mubr.bf16.gmra.mxu1 %v1503_v63  ;;  %681 = vmatprep.mubr.bf16.mxu0 %v1505_v0 }
  0x4d   :  { %778 = vmatprep.mubr.bf16.mxu1 %v1507_v1 }
  0x53   :  { %682 = vmatmul.mubr.bf16.gmra.mxu0 %v1509_v2 }
  0x54   :  { %779 = vmatmul.mubr.bf16.gmra.mxu1 %v1510_v3  ;;  %689 = vmatprep.mubr.bf16.mxu0 %v1512_v4 }
  0x55   :  { %786 = vmatprep.mubr.bf16.mxu1 %v1514_v5 }
  0x5b   :  { %690 = vmatmul.mubr.bf16.gmra.mxu0 %v1516_v6  ;;  %v1861_v6 = vld [vmem:[%s2045_s3 + $0x8] sm:$0xff]  }
  0x5c   :  { %787 = vmatmul.mubr.bf16.gmra.mxu1 %v1517_v7  ;;  %1399 = vmatprep.mubr.bf16.mxu0 %v1519_v8  ;;  %2054 = vst [vmem:[#allocation3_spill] sm:$0xff] %v1861_v6  ;;  %v1866_v7 = vld [vmem:[%s2045_s3 + $0x28] sm:$0xff]   ;;  %v1871_v8 = vld [vmem:[%s2045_s3] sm:$0xff]  }
  0x5d   :  { %1407 = vmatprep.mubr.bf16.mxu1 %v1520_v9  ;;  %2055 = vst [vmem:[#allocation4_spill] sm:$0xff] %v1866_v7  ;;  %2056 = vst [vmem:[#allocation5_spill] sm:$0xff] %v1871_v8 }
  0x63   :  { %1400 = vmatmul.mubr.bf16.vlgmr.msra.gmra.mxu0 %v1521_v10  ;;  %v1878_v10 = vld [vmem:[%s2045_s3 + $0x20] sm:$0xff]  }
  0x64   :  { %1408 = vmatmul.mubr.bf16.vlgmr.msra.gmra.mxu1 %v1522_v11  ;;  %1403 = vmatprep.mubr.bf16.mxu0 %v1523_v12 }
  0x65   :  { %1411 = vmatprep.mubr.bf16.mxu1 %v1524_v13 }
  0x6b   :  { %1404 = vmatmul.mubr.bf16.gmra.mxu0 %v1525_v14 }
  0x6c   :  { %1412 = vmatmul.mubr.bf16.gmra.mxu1 %v1526_v15 }
  0xe3   :  { %v1255_v16 = vpop.f32.mrf.mxu0 }
  0xe4   :  { %v1319_v17 = vpop.f32.mrf.mxu1 }
  0xe5   :  { %v1256_v19 = vpop.f32.mrf.mxu0 }
  0xe6   :  { %v1257_v20 = vadd.f32 %v1256_v19, %v1255_v16  ;;  %v1320_v21 = vpop.f32.mrf.mxu1  ;;  %v1893_v19 = vld [vmem:[%s2045_s3 + $0x38] sm:$0xff]   ;;  %v1909_v16 = vld [vmem:[%s2045_s3 + $0x30] sm:$0xff]  }
  0xe7   :  { %v1258_v22 = vpop.f32.mrf.mxu0  ;;  %v1321_v24 = vadd.f32 %v1320_v21, %v1319_v17  ;;  %v1888_v17 = vld [vmem:[%s2045_s3 + $0x18] sm:$0xff]  }
  0xe8   :  { %v636_v23 = vadd.f32 %v1257_v20, %v1795_v18  ;;  %v1798_v25 = vpop.f32.mrf.mxu1 }
  0xe9   :  { %v1259_v26 = vpop.f32.mrf.mxu0 }
  0xea   :  { %v1800_v27 = vpop.f32.mrf.mxu1  ;;  %v1802_v28 = vadd.f32 %v1321_v24, %v636_v23  ;;  %v1260_v11 = vadd.f32 %v1259_v26, %v1258_v22  ;;  %v1904_v26 = vld [vmem:[%s2045_s3 + $0x10] sm:$0xff]   ;;  %v1172_v22 = vunpack.c.h.bf16 %v1878_v10 }
  0xeb   :  { %v1261_v29 = vpop.f32.mrf.mxu0 }
  0xec   :  { %2053 = vst [vmem:[#allocation2_spill] sm:$0xff] %v1802_v28  ;;  %v1804_v30 = vpop.f32.mrf.mxu1  ;;  %v639_v23 = vadd.f32 %v1260_v11, %v1795_v18 }
  0xed   :  { %v1262_v31 = vpop.f32.mrf.mxu0 }
  0xee   :  { %v1806_v32 = vpop.f32.mrf.mxu1  ;;  %v1263_v15 = vadd.f32 %v1262_v31, %v1261_v29  ;;  %v1168_v31 = vunpack.c.h.bf16 %v1888_v17 }
  0xef   :  { %v1264_v33 = vpop.f32.mrf.mxu0 }
  0xf0   :  { %v1808_v34 = vpop.f32.mrf.mxu1  ;;  %v644_v11 = vadd.f32 %v1263_v15, %v1795_v18 }
  0xf1   :  { %v1265_v35 = vpop.f32.mrf.mxu0 }
  0xf2   :  { %v1810_v36 = vpop.f32.mrf.mxu1  ;;  %v1266_v14 = vadd.f32 %v1265_v35, %v1264_v33  ;;  %v1324_v35 = vadd.f32 %v1800_v27, %v1798_v25  ;;  %v1327_v33 = vadd.f32 %v1806_v32, %v1804_v30 }
  0xf3   :  { %v1267_v37 = vpop.f32.mrf.mxu0  ;;  %v1330_v15 = vadd.f32 %v1810_v36, %v1808_v34 }
  0xf4   :  { %v1812_v38 = vpop.f32.mrf.mxu1  ;;  %v647_v6 = vadd.f32 %v1266_v14, %v1795_v18 }
  0xf5   :  { %v1268_v39 = vpop.f32.mrf.mxu0 }
  0xf6   :  { %v1814_v40 = vpop.f32.mrf.mxu1  ;;  %v1269_v28 = vadd.f32 %v1268_v39, %v1267_v37 }
  0xf7   :  { %v1816_v41 = vpop.f32.mrf.mxu0  ;;  %v1333_v14 = vadd.f32 %v1814_v40, %v1812_v38  ;;  %v741_v38 = vadd.f32 %v1327_v33, %v644_v11  ;;  %v744_v40 = vadd.f32 %v1330_v15, %v647_v6 }
  0xf8   :  { %v1818_v42 = vpop.f32.mrf.mxu1 }
  0xf9   :  { %v1820_v43 = vpop.f32.mrf.mxu0 }
  0xfa   :  { %v1822_v44 = vpop.f32.mrf.mxu1  ;;  %v1272_v25 = vadd.f32 %v1820_v43, %v1816_v41 }
  0xfb   :  { %v1273_v45 = vpop.f32.mrf.mxu0 }
  0xfc   :  { %v1824_v46 = vpop.f32.mrf.mxu1 }
  0xfd   :  { %v1274_v47 = vpop.f32.mrf.mxu0 }
  0xfe   :  { %v1826_v48 = vpop.f32.mrf.mxu1  ;;  %v1275_v24 = vadd.f32 %v1274_v47, %v1273_v45  ;;  %v1164_v45 = vunpack.c.h.bf16 %v1904_v26  ;;  %v1180_v47 = vunpack.c.h.bf16 %v1909_v16 }
  0xff   :  { %v1828_v49 = vpop.f32.mrf.mxu0  ;;  %v1339_v41 = vadd.f32 %v1826_v48, %v1824_v46 }
 0x100   :  { %v1830_v50 = vpop.f32.mrf.mxu1  ;;  %v660_v27 = vadd.f32 %v1275_v24, %v1795_v18 }
 0x101   :  { %v1832_v51 = vpop.f32.mrf.mxu0 }
 0x102   :  { %v1834_v52 = vpop.f32.mrf.mxu1 }
 0x103   :  { %v1279_v53 = vpop.f32.mrf.mxu0 }
 0x104   :  { %v1836_v54 = vpop.f32.mrf.mxu1 }
 0x105   :  { %v1280_v55 = vpop.f32.mrf.mxu0 }
 0x106   :  { %v1838_v56 = vpop.f32.mrf.mxu1  ;;  %v1281_v29 = vadd.f32 %v1280_v55, %v1279_v53 }
 0x107   :  { %v1840_v57 = vpop.f32.mrf.mxu0 }
 0x108   :  { %v1842_v58 = vpop.f32.mrf.mxu1  ;;  %v668_v34 = vadd.f32 %v1281_v29, %v1795_v18 }
 0x109   :  { %v1844_v59 = vpop.f32.mrf.mxu0 }
 0x10a   :  { %v1846_v60 = vpop.f32.mrf.mxu1  ;;  %v1284_v30 = vadd.f32 %v1844_v59, %v1840_v57  ;;  %v757_v57 = vadd.f32 %v1339_v41, %v660_v27 }
 0x10b   :  { %v1285_v61 = vpop.f32.mrf.mxu0 }
 0x10c   :  { %v1848_v62 = vpop.f32.mrf.mxu1 }
 0x10d   :  { %v1286_v63 = vpop.f32.mrf.mxu0 }
 0x10e   :  { %v1850_v0 = vpop.f32.mrf.mxu1  ;;  %v1287_v37 = vadd.f32 %v1286_v63, %v1285_v61  ;;  %v1935_v63 = vadd.f32 %v1324_v35, %v639_v23 }
 0x10f   :  { %v1852_v1 = vpop.f32.mrf.mxu0  ;;  %v1351_v46 = vadd.f32 %v1850_v0, %v1848_v62  ;;  %v1342_v62 = vadd.f32 %v1834_v52, %v1830_v50  ;;  %v1348_v0 = vadd.f32 %v1846_v60, %v1842_v58 }
 0x110   :  { %v1854_v2 = vpop.f32.mrf.mxu1  ;;  %v676_v43 = vadd.f32 %v1287_v37, %v1795_v18 }
 0x111   :  { %v1289_v3 = vpop.f32.mrf.mxu0 }
 0x112   :  { %v1856_v4 = vpop.f32.mrf.mxu1  ;;  %v1290_v53 = vadd.f32 %v1289_v3, %v1852_v1  ;;  %v1345_v1 = vadd.f32 %v1838_v56, %v1836_v54  ;;  %v671_v3 = vadd.f32 %v1284_v30, %v1795_v18  ;;  %v773_v29 = vadd.f32 %v1351_v46, %v676_v43 }
 0x113   :  { %v1291_v5 = vpop.f32.mrf.mxu0  ;;  %v1354_v56 = vadd.f32 %v1856_v4, %v1854_v2 }
 0x114   :  { %v1873_v9 = vpop.f32.mrf.mxu1  ;;  %v765_v54 = vadd.f32 %v1345_v1, %v668_v34 }
 0x115   :  { %v1292_v12 = vpop.f32.mrf.mxu0 }
 0x116   :  { %v1880_v13 = vpop.f32.mrf.mxu1  ;;  %v1293_v55 = vadd.f32 %v1292_v12, %v1291_v5  ;;  %v679_v12 = vadd.f32 %v1290_v53, %v1795_v18 }
 0x117   :  { %2057 = vst [vmem:[#allocation6_spill] sm:$0xff] %v1880_v13  ;;  %v1895_v20 = vpop.f32.mrf.mxu0  ;;  %v652_v13 = vadd.f32 %v1269_v28, %v1795_v18  ;;  %v1278_v28 = vadd.f32 %v1832_v51, %v1828_v49  ;;  %v1953_v49 = vadd.f32 %v1272_v25, %v1795_v18  ;;  %v1957_v51 = vadd.f32 %v1822_v44, %v1818_v42 }
 0x118   :  { %2058 = vst [vmem:[#allocation7_spill] sm:$0xff] %v1895_v20  ;;  %v1911_v21 = vpop.f32.mrf.mxu1  ;;  %v776_v43 = vadd.f32 %v1354_v56, %v679_v12 }
 0x119   :  { %v1295_v8 = vpop.f32.mrf.mxu0  ;;  %v1950_v24 = vadd.f32 %v1333_v14, %v652_v13  ;;  %v663_v59 = vadd.f32 %v1278_v28, %v1795_v18  ;;  %v684_v13 = vadd.f32 %v1293_v55, %v1795_v18  ;;  %v2061_v14 = vld [vmem:[#allocation2_spill] sm:$0xff]  ;;  %v768_v28 = vadd.f32 %v1348_v0, %v671_v3 }
 0x11a   :  { %v1917_v20 = vpop.f32.mrf.mxu1 }
 0x11b   :  { %v1297_v39 = vpop.f32.mrf.mxu0  ;;  %v760_v58 = vadd.f32 %v1342_v62, %v663_v59  ;;  %v1360_v4 = vadd.f32 %v1917_v20, %v1911_v21 }
 0x11c   :  { %v1361_v7 = vpop.f32.mrf.mxu1 }
 0x11d   :  { %v1298_v61 = vpop.f32.mrf.mxu0 }
 0x11e   :  { %v1362_v32 = vpop.f32.mrf.mxu1  ;;  %v1299_v5 = vadd.f32 %v1298_v61, %v1297_v39  ;;  %v2059_v37 = vld [vmem:[#allocation6_spill] sm:$0xff] }
 0x11f   :  { %v1300_v23 = vpop.f32.mrf.mxu0  ;;  %v1357_v39 = vadd.f32 %v2059_v37, %v1873_v9  ;;  %v2060_v11 = vld [vmem:[#allocation7_spill] sm:$0xff]  ;;  %v1363_v9 = vadd.f32 %v1362_v32, %v1361_v7 }
 0x120   :  { %v1364_v36 = vpop.f32.mrf.mxu1  ;;  %v1296_v25 = vadd.f32 %v1295_v8, %v2060_v11  ;;  %v692_v15 = vadd.f32 %v1299_v5, %v1795_v18  ;;  %v2062_v8 = vld [vmem:[#allocation3_spill] sm:$0xff] }
 0x121   :  { %v1301_v48 = vpop.f32.mrf.mxu0  ;;  %v781_v2 = vadd.f32 %v1357_v39, %v684_v13  ;;  %v2063_v53 = vunpack.c.l.bf16 %v2062_v8 }
 0x122   :  { %v1365_v6 = vpop.f32.mrf.mxu1  ;;  %v1302_v42 = vadd.f32 %v1301_v48, %v1300_v23  ;;  %v2064_v48 = vld [vmem:[#allocation4_spill] sm:$0xff]  ;;  %v789_v32 = vadd.f32 %v1363_v9, %v692_v15 }
 0x123   :  { %v1401_v44 = vpop.f32.mrf.mxu0  ;;  %v1366_v46 = vadd.f32 %v1365_v6, %v1364_v36  ;;  %v2065_v59 = vunpack.c.l.bf16 %v2064_v48 }
 0x124   :  { %v838_v33 = vadd.f32 %v1401_v44, %v741_v38  ;;  %v1409_v35 = vpop.f32.mrf.mxu1  ;;  %v695_v60 = vadd.f32 %v1302_v42, %v1795_v18  ;;  %v687_v38 = vadd.f32 %v1296_v25, %v1795_v18  ;;  %v2066_v42 = vld [vmem:[#allocation5_spill] sm:$0xff]  ;;  %v2068_v44 = vunpack.c.h.bf16 %v2062_v8 }
 0x125   :  { %v870_v27 = vadd.f32 %v1409_v35, %v773_v29  ;;  %v829_v61 = vpop.f32.mrf.mxu0  ;;  %v2067_v12 = vunpack.c.l.bf16 %v2066_v42  ;;  %v2070_v18 = vunpack.c.h.bf16 %v2064_v48 }
 0x126   :  { %v830_v50 = vadd.f32 %v829_v61, %v2061_v14  ;;  %v861_v52 = vpop.f32.mrf.mxu1  ;;  %v926_v55 = vadd.f32 %v2063_v53, %v838_v33  ;;  %v792_v0 = vadd.f32 %v1366_v46, %v695_v60  ;;  %v784_v48 = vadd.f32 %v1360_v4, %v687_v38 }
 0x127   :  { %v862_v30 = vadd.f32 %v861_v52, %v765_v54  ;;  %v1402_v41 = vpop.f32.mrf.mxu0  ;;  %v934_v1 = vadd.f32 %v2065_v59, %v870_v27  ;;  %v2071_v54 = vunpack.c.h.bf16 %v2066_v42  ;;  %v2076_v4 = vunpack.c.h.bf16 %v1893_v19 }
 0x128   :  { %v841_v23 = vadd.f32 %v1402_v41, %v744_v40  ;;  %v1410_v34 = vpop.f32.mrf.mxu1  ;;  %v924_v13 = vadd.f32 %v2067_v12, %v830_v50  ;;  %v2069_v40 = vunpack.c.l.bf16 %v1878_v10  ;;  %v942_v33 = vmax.f32 %v926_v55, 0.0 }
 0x129   :  { %v873_v3 = vadd.f32 %v1410_v34, %v776_v43  ;;  %v832_v5 = vpop.f32.mrf.mxu0  ;;  %v950_v11 = vmax.f32 %v934_v1, 0.0  ;;  %v2072_v10 = vunpack.c.l.bf16 %v1888_v17  ;;  %v752_v55 = vadd.f32 %v1957_v51, %v1953_v49 }
 0x12a   :  { %v927_v20 = vadd.f32 %v2068_v44, %v841_v23  ;;  %v833_v7 = vadd.f32 %v832_v5, %v1935_v63  ;;  %v864_v21 = vpop.f32.mrf.mxu1  ;;  %v932_v29 = vadd.f32 %v2069_v40, %v862_v30  ;;  %v940_v15 = vmax.f32 %v924_v13, 0.0 }
 0x12b   :  { %v935_v36 = vadd.f32 %v2070_v18, %v873_v3  ;;  %v865_v6 = vadd.f32 %v864_v21, %v768_v28  ;;  %v1405_v62 = vpop.f32.mrf.mxu0  ;;  %v2075_v3 = vunpack.c.l.bf16 %v1909_v16 }
 0x12c   :  { %v943_v35 = vmax.f32 %v927_v20, 0.0  ;;  %v925_v56 = vadd.f32 %v2071_v54, %v833_v7  ;;  %v854_v37 = vadd.f32 %v1405_v62, %v757_v57  ;;  %v1413_v39 = vpop.f32.mrf.mxu1  ;;  %v948_v60 = vmax.f32 %v932_v29, 0.0 }
 0x12d   :  { %v951_v63 = vmax.f32 %v935_v36, 0.0  ;;  %v933_v25 = vadd.f32 %v1172_v22, %v865_v6  ;;  %v886_v27 = vadd.f32 %v1413_v39, %v789_v32  ;;  %v845_v61 = vpop.f32.mrf.mxu0 }
 0x12e   :  { %v1193_v14 = vpack.c.bf16 %v943_v35, %v942_v33  ;;  %v941_v50 = vmax.f32 %v925_v56, 0.0  ;;  %v846_v52 = vadd.f32 %v845_v61, %v1950_v24  ;;  %v877_v28 = vpop.f32.mrf.mxu1  ;;  %v930_v22 = vadd.f32 %v2072_v10, %v854_v37 }
 0x12f   :  { %v1213_v30 = vpack.c.bf16 %v951_v63, %v950_v11  ;;  %v949_v41 = vmax.f32 %v933_v25, 0.0  ;;  %v878_v43 = vadd.f32 %v877_v28, %v781_v2  ;;  %v1406_v9 = vpop.f32.mrf.mxu0  ;;  %v2073_v2 = vunpack.c.l.bf16 %v1893_v19 }
 0x130   :  { %1232 = vst [vmem:[%s2046_s4 + $0x8] sm:$0xff] %v1193_v14   ;;  %v1188_v57 = vpack.c.bf16 %v941_v50, %v940_v15  ;;  %v857_v8 = vadd.f32 %v1406_v9, %v760_v58  ;;  %v1414_v53 = vpop.f32.mrf.mxu1  ;;  %v2074_v58 = vunpack.c.l.bf16 %v1904_v26  ;;  %v946_v12 = vmax.f32 %v930_v22, 0.0 }
 0x131   :  { %1236 = vst [vmem:[%s2046_s4 + $0x28] sm:$0xff] %v1213_v30   ;;  %v1208_v24 = vpack.c.bf16 %v949_v41, %v948_v60  ;;  %v938_v23 = vadd.f32 %v2073_v2, %v886_v27  ;;  %v889_v34 = vadd.f32 %v1414_v53, %v792_v0  ;;  %v848_v46 = vpop.f32.mrf.mxu0  ;;  %v936_v5 = vadd.f32 %v2075_v3, %v878_v43 }
 0x132   :  { %1189 = vst [vmem:[%s2046_s4] sm:$0xff] %v1188_v57   ;;  %v928_v59 = vadd.f32 %v2074_v58, %v846_v52  ;;  %v931_v49 = vadd.f32 %v1168_v31, %v857_v8  ;;  %v849_v51 = vadd.f32 %v848_v46, %v752_v55  ;;  %v880_v1 = vpop.f32.mrf.mxu1 }
 0x133   :  { %1235 = vst [vmem:[%s2046_s4 + $0x20] sm:$0xff] %v1208_v24   ;;  %v939_v38 = vadd.f32 %v2076_v4, %v889_v34  ;;  %v881_v42 = vadd.f32 %v880_v1, %v784_v48  ;;  %v954_v17 = vmax.f32 %v938_v23, 0.0  ;;  %v952_v40 = vmax.f32 %v936_v5, 0.0 }
 0x134   :  { %v947_v13 = vmax.f32 %v931_v49, 0.0  ;;  %v929_v44 = vadd.f32 %v1164_v45, %v849_v51  ;;  %v944_v7 = vmax.f32 %v928_v59, 0.0 }
 0x135   :  { %v955_v31 = vmax.f32 %v939_v38, 0.0  ;;  %v937_v20 = vadd.f32 %v1180_v47, %v881_v42 }
 0x136   :  { %v1203_v21 = vpack.c.bf16 %v947_v13, %v946_v12  ;;  %v945_v32 = vmax.f32 %v929_v44, 0.0 }
 0x137   :  { %v1223_v29 = vpack.c.bf16 %v955_v31, %v954_v17  ;;  %v953_v18 = vmax.f32 %v937_v20, 0.0 }
 0x138   :  { %1234 = vst [vmem:[%s2046_s4 + $0x18] sm:$0xff] %v1203_v21   ;;  %v1198_v19 = vpack.c.bf16 %v945_v32, %v944_v7 }
 0x139   :  { %1238 = vst [vmem:[%s2046_s4 + $0x38] sm:$0xff] %v1223_v29   ;;  %v1218_v26 = vpack.c.bf16 %v953_v18, %v952_v40 }
 0x13a   :  { %1233 = vst [vmem:[%s2046_s4 + $0x10] sm:$0xff] %v1198_v19  }
 0x13b   :  { %1237 = vst [vmem:[%s2046_s4 + $0x30] sm:$0xff] %v1218_v26  }

// kernel: resnet18_forward.28
= control target key start
LH: loop header
LB: loop body
LE: loop exit
PB: predicated region body
PF: predicated region fallthrough
CT: control target
= control target key end

     0   :  { %s970_s1 = inlined_call_operand.vmem [shape: bf16[640,128], index: 1, kind: input, shape index: {}]   ;;  %s971_s0 = inlined_call_operand.vmem [shape: bf16[32,640], index: 0, kind: input, shape index: {}]   ;;  %s972_s2 = inlined_call_operand.vmem [shape: f32[1,128], index: 2, kind: input, shape index: {}]   ;;  %s973_s3 = inlined_call_operand.vmem [shape: bf16[32,128], index: 3, kind: output, shape index: {}]  }
   0x1   :  { %v737_v0 = vld [vmem:[%s970_s1 + $0x78] sm:$0xff]   ;;  %v741_v4 = vld [vmem:[%s970_s1 + $0x70] sm:$0xff]   ;;  %v745_v8 = vld [vmem:[%s970_s1 + $0x68] sm:$0xff]  }
   0x2   :  { %v738_v1 = vld [vmem:[%s970_s1 + $0x38] sm:$0xff]   ;;  %651 = vmatprep.subr.bf16.mxu0 %v737_v0  ;;  %v742_v5 = vld [vmem:[%s970_s1 + $0x30] sm:$0xff]   ;;  %v746_v9 = vld [vmem:[%s970_s1 + $0x28] sm:$0xff]  }
   0x3   :  { %v739_v2 = vld [vmem:[%s970_s1 + $0xf8] sm:$0xff]   ;;  %652 = vmatpush3.bf16.msra.mxu0 %v738_v1  ;;  %v743_v6 = vld [vmem:[%s970_s1 + $0xf0] sm:$0xff]   ;;  %v747_v10 = vld [vmem:[%s970_s1 + $0xe8] sm:$0xff]  }
   0x4   :  { %v740_v3 = vld [vmem:[%s970_s1 + $0xb8] sm:$0xff]   ;;  %679 = vmatprep.subr.bf16.mxu1 %v739_v2  ;;  %653 = vmatprep.subr.bf16.mxu0 %v741_v4  ;;  %v744_v7 = vld [vmem:[%s970_s1 + $0xb0] sm:$0xff]   ;;  %v748_v11 = vld [vmem:[%s970_s1 + $0xa8] sm:$0xff]  }
   0x5   :  { %680 = vmatpush3.bf16.msra.mxu1 %v740_v3  ;;  %v749_v12 = vld [vmem:[%s970_s1 + $0x60] sm:$0xff]   ;;  %v753_v16 = vld [vmem:[%s970_s1 + $0x58] sm:$0xff]   ;;  %v757_v20 = vld [vmem:[%s970_s1 + $0x50] sm:$0xff]  }
   0x6   :  { %681 = vmatprep.subr.bf16.mxu1 %v743_v6  ;;  %v750_v13 = vld [vmem:[%s970_s1 + $0x20] sm:$0xff]   ;;  %v754_v17 = vld [vmem:[%s970_s1 + $0x18] sm:$0xff]   ;;  %v758_v21 = vld [vmem:[%s970_s1 + $0x10] sm:$0xff]  }
   0x7   :  { %654 = vmatpush3.bf16.msra.mxu0 %v742_v5  ;;  %v751_v14 = vld [vmem:[%s970_s1 + $0xe0] sm:$0xff]   ;;  %v755_v18 = vld [vmem:[%s970_s1 + $0xd8] sm:$0xff]   ;;  %v759_v22 = vld [vmem:[%s970_s1 + $0xd0] sm:$0xff]  }
   0x8   :  { %655 = vmatprep.subr.bf16.mxu0 %v745_v8  ;;  %v752_v15 = vld [vmem:[%s970_s1 + $0xa0] sm:$0xff]   ;;  %v756_v19 = vld [vmem:[%s970_s1 + $0x98] sm:$0xff]   ;;  %v760_v23 = vld [vmem:[%s970_s1 + $0x90] sm:$0xff]  }
   0x9   :  { %682 = vmatpush3.bf16.msra.mxu1 %v744_v7  ;;  %v761_v24 = vld [vmem:[%s970_s1 + $0x48] sm:$0xff]   ;;  %v765_v28 = vld [vmem:[%s970_s1 + $0x40] sm:$0xff]   ;;  %v772_v34 = vld [vmem:[%s970_s1 + $0x138] sm:$0xff]  }
   0xa   :  { %683 = vmatprep.subr.bf16.mxu1 %v747_v10  ;;  %v762_v25 = vld [vmem:[%s970_s1 + $0x8] sm:$0xff]   ;;  %v766_v29 = vld [vmem:[%s970_s1] sm:$0xff]   ;;  %v776_v37 = vld [vmem:[%s970_s1 + $0x130] sm:$0xff]  }
   0xb   :  { %656 = vmatpush3.bf16.msra.mxu0 %v746_v9  ;;  %v763_v26 = vld [vmem:[%s970_s1 + $0xc8] sm:$0xff]   ;;  %v767_v30 = vld [vmem:[%s970_s1 + $0xc0] sm:$0xff]   ;;  %v779_v44 = vld [vmem:[%s970_s1 + $0x118] sm:$0xff]  }
   0xc   :  { %657 = vmatprep.subr.bf16.mxu0 %v749_v12  ;;  %v764_v27 = vld [vmem:[%s970_s1 + $0x88] sm:$0xff]   ;;  %v768_v31 = vld [vmem:[%s971_s0] ss:$20 sps:$4 sm:$0xff]   ;;  %v770_v32 = vld [vmem:[%s971_s0 + $0x4] ss:$20 sps:$4 sm:$0xff]  }
   0xd   :  { %684 = vmatpush3.bf16.msra.mxu1 %v748_v11  ;;  %v771_v33 = vld [vmem:[%s970_s1 + $0x80] sm:$0xff]   ;;  %438 = vmatprep.mubr.bf16.mxu0 %v770_v32  ;;  %v773_v35 = vld [vmem:[%s971_s0 + $0x8] ss:$20 sps:$4 sm:$0xff]   ;;  %v786_v46 = vld [vmem:[%s970_s1 + $0x110] sm:$0xff]  }
   0xe   :  { %685 = vmatprep.subr.bf16.mxu1 %v751_v14  ;;  %v775_v36 = vld [vmem:[%s971_s0 + $0xc] ss:$20 sps:$4 sm:$0xff]   ;;  %v782_v41 = vld [vmem:[%s971_s0 + $0x28] ss:$20 sps:$4 sm:$0xff]   ;;  %v785_v43 = vld [vmem:[%s971_s0 + $0x30] ss:$20 sps:$4 sm:$0xff]  }
   0xf   :  { %658 = vmatpush3.bf16.msra.mxu0 %v750_v13  ;;  %487 = vmatprep.mubr.bf16.mxu1 %v775_v36  ;;  %v777_v38 = vld [vmem:[%s970_s1 + $0x128] sm:$0xff]   ;;  %v778_v39 = vld [vmem:[%s970_s1 + $0x120] sm:$0xff]  }
  0x10   :  { %659 = vmatprep.subr.bf16.mxu0 %v753_v16  ;;  %v780_v40 = vld [vmem:[%s971_s0 + $0x2c] ss:$20 sps:$4 sm:$0xff]   ;;  %v783_v42 = vld [vmem:[%s971_s0 + $0x34] ss:$20 sps:$4 sm:$0xff]   ;;  %v789_v45 = vld [vmem:[%s971_s0 + $0x10] ss:$20 sps:$4 sm:$0xff]  }
  0x11   :  { %686 = vmatpush3.bf16.msra.mxu1 %v752_v15  ;;  %v787_v47 = vld [vmem:[%s970_s1 + $0x108] sm:$0xff]   ;;  %v788_v48 = vld [vmem:[%s970_s1 + $0x100] sm:$0xff]  }
  0x12   :  { %687 = vmatprep.subr.bf16.mxu1 %v755_v18  ;;  %v790_v49 = vld [vmem:[%s971_s0 + $0x38] ss:$20 sps:$4 sm:$0xff]   ;;  %v581_v4 = vld [vmem:[%s972_s2] ss:$0 sm:$0xff] }
  0x13   :  { %660 = vmatpush3.bf16.msra.mxu0 %v754_v17 }
  0x14   :  { %661 = vmatprep.subr.bf16.mxu0 %v757_v20 }
  0x15   :  { %688 = vmatpush3.bf16.msra.mxu1 %v756_v19 }
  0x16   :  { %689 = vmatprep.subr.bf16.mxu1 %v759_v22 }
  0x17   :  { %662 = vmatpush3.bf16.msra.mxu0 %v758_v21 }
  0x18   :  { %663 = vmatprep.subr.bf16.mxu0 %v761_v24 }
  0x19   :  { %690 = vmatpush3.bf16.msra.mxu1 %v760_v23 }
  0x1a   :  { %691 = vmatprep.subr.bf16.mxu1 %v763_v26 }
  0x1b   :  { %664 = vmatpush3.bf16.msra.mxu0 %v762_v25 }
  0x1c   :  { %665 = vmatprep.subr.bf16.mxu0 %v765_v28 }
  0x1d   :  { %692 = vmatpush3.bf16.msra.mxu1 %v764_v27 }
  0x1e   :  { %693 = vmatprep.subr.bf16.mxu1 %v767_v30 }
  0x1f   :  { %666 = vmatpush3.bf16.msra.mxu0 %v766_v29 }
  0x20   :  { %717 = vmatprep.subr.bf16.mxu0 %v772_v34 }
  0x21   :  { %694 = vmatpush3.bf16.msra.mxu1 %v771_v33 }
  0x22   :  { %439 = vmatmul.mubr.bf16.vlgmr.msra.gmra.mxu0 %v768_v31 }
  0x23   :  { %718 = vmatpush3.bf16.msra.mxu0 %v772_v34  ;;  %446 = vmatprep.mubr.bf16.mxu0 %v780_v40 }
  0x24   :  { %488 = vmatmul.mubr.bf16.vlgmr.msra.gmra.mxu1 %v773_v35  ;;  %719 = vmatprep.subr.bf16.mxu0 %v776_v37 }
  0x25   :  { %495 = vmatprep.mubr.bf16.mxu1 %v783_v42 }
  0x27   :  { %720 = vmatpush3.bf16.msra.mxu0 %v776_v37 }
  0x28   :  { %721 = vmatprep.subr.bf16.mxu0 %v777_v38 }
  0x2a   :  { %447 = vmatmul.mubr.bf16.gmra.mxu0 %v782_v41 }
  0x2b   :  { %722 = vmatpush3.bf16.msra.mxu0 %v777_v38  ;;  %733 = vmatprep.mubr.bf16.mxu0 %v789_v45 }
  0x2c   :  { %723 = vmatprep.subr.bf16.mxu0 %v778_v39  ;;  %496 = vmatmul.mubr.bf16.gmra.mxu1 %v785_v43 }
  0x2f   :  { %724 = vmatpush3.bf16.msra.mxu0 %v778_v39 }
  0x30   :  { %725 = vmatprep.subr.bf16.mxu0 %v779_v44 }
  0x33   :  { %726 = vmatpush3.bf16.msra.mxu0 %v779_v44 }
  0x34   :  { %727 = vmatprep.subr.bf16.mxu0 %v786_v46 }
  0x37   :  { %728 = vmatpush3.bf16.msra.mxu0 %v786_v46 }
  0x38   :  { %729 = vmatprep.subr.bf16.mxu0 %v787_v47 }
  0x3b   :  { %730 = vmatpush3.bf16.msra.mxu0 %v787_v47 }
  0x3c   :  { %731 = vmatprep.subr.bf16.mxu0 %v788_v48 }
  0x3f   :  { %732 = vmatpush3.bf16.msra.mxu0 %v788_v48 }
  0x42   :  { %734 = vmatmul.mubr.bf16.vlgmr.msra.gmra.mxu0 %v790_v49 }
  0xe2   :  { %v667_v50 = vpop.f32.mrf.mxu0 }
  0xe4   :  { %v668_v51 = vpop.f32.mrf.mxu0  ;;  %v695_v52 = vpop.f32.mrf.mxu1 }
  0xe5   :  { %v669_v2 = vadd.f32 %v668_v51, %v667_v50 }
  0xe6   :  { %v670_v53 = vpop.f32.mrf.mxu0  ;;  %v696_v54 = vpop.f32.mrf.mxu1 }
  0xe7   :  { %v441_v9 = vadd.f32 %v669_v2, %v581_v4  ;;  %v697_v10 = vadd.f32 %v696_v54, %v695_v52 }
  0xe8   :  { %v671_v55 = vpop.f32.mrf.mxu0  ;;  %v698_v56 = vpop.f32.mrf.mxu1 }
  0xe9   :  { %v672_v6 = vadd.f32 %v671_v55, %v670_v53  ;;  %v490_v19 = vadd.f32 %v697_v10, %v441_v9 }
  0xea   :  { %v673_v57 = vpop.f32.mrf.mxu0  ;;  %v699_v58 = vpop.f32.mrf.mxu1 }
  0xeb   :  { %v444_v14 = vadd.f32 %v672_v6, %v581_v4  ;;  %v700_v15 = vadd.f32 %v699_v58, %v698_v56 }
  0xec   :  { %v674_v59 = vpop.f32.mrf.mxu0  ;;  %v701_v60 = vpop.f32.mrf.mxu1 }
  0xed   :  { %v675_v1 = vadd.f32 %v674_v59, %v673_v57  ;;  %v493_v24 = vadd.f32 %v700_v15, %v444_v14 }
  0xee   :  { %v676_v61 = vpop.f32.mrf.mxu0  ;;  %v702_v62 = vpop.f32.mrf.mxu1 }
  0xef   :  { %v449_v7 = vadd.f32 %v675_v1, %v581_v4  ;;  %v703_v8 = vadd.f32 %v702_v62, %v701_v60 }
  0xf0   :  { %v677_v63 = vpop.f32.mrf.mxu0  ;;  %v704_v0 = vpop.f32.mrf.mxu1 }
  0xf1   :  { %v678_v3 = vadd.f32 %v677_v63, %v676_v61  ;;  %v498_v16 = vadd.f32 %v703_v8, %v449_v7 }
  0xf2   :  { %v705_v5 = vpop.f32.mrf.mxu1 }
  0xf3   :  { %v452_v11 = vadd.f32 %v678_v3, %v581_v4  ;;  %v706_v12 = vadd.f32 %v705_v5, %v704_v0 }
  0xf5   :  { %v501_v20 = vadd.f32 %v706_v12, %v452_v11 }
 0x102   :  { %v735_v13 = vpop.f32.mrf.mxu0 }
 0x103   :  { %v547_v18 = vadd.f32 %v735_v13, %v498_v16 }
 0x104   :  { %v538_v17 = vpop.f32.mrf.mxu0 }
 0x105   :  { %v539_v22 = vadd.f32 %v538_v17, %v490_v19  ;;  %v555_v26 = vmax.f32 %v547_v18, 0.0 }
 0x106   :  { %v736_v21 = vpop.f32.mrf.mxu0 }
 0x107   :  { %v550_v23 = vadd.f32 %v736_v21, %v501_v20  ;;  %v553_v29 = vmax.f32 %v539_v22, 0.0 }
 0x108   :  { %v541_v25 = vpop.f32.mrf.mxu0 }
 0x109   :  { %v556_v27 = vmax.f32 %v550_v23, 0.0  ;;  %v542_v28 = vadd.f32 %v541_v25, %v493_v24 }
 0x10b   :  { %v648_v30 = vpack.c.bf16 %v556_v27, %v555_v26  ;;  %v554_v31 = vmax.f32 %v542_v28, 0.0 }
 0x10d   :  { %650 = vst [vmem:[%s973_s3 + $0x8] sm:$0xff] %v648_v30   ;;  %v643_v32 = vpack.c.bf16 %v554_v31, %v553_v29 }
 0x10f   :  { %644 = vst [vmem:[%s973_s3] sm:$0xff] %v643_v32  }

// kernel: resnet18_forward.27
= control target key start
LH: loop header
LB: loop body
LE: loop exit
PB: predicated region body
PF: predicated region fallthrough
CT: control target
= control target key end

     0   :  { %s304_s1 = inlined_call_operand.vmem [shape: bf16[128,128], index: 1, kind: input, shape index: {}]   ;;  %s305_s0 = inlined_call_operand.vmem [shape: bf16[32,128], index: 0, kind: input, shape index: {}]   ;;  %s306_s2 = inlined_call_operand.vmem [shape: f32[1,128], index: 2, kind: input, shape index: {}]   ;;  %s307_s3 = inlined_call_operand.vmem [shape: bf16[32,128], index: 3, kind: output, shape index: {}]  }
   0x1   :  { %v235_v0 = vld [vmem:[%s304_s1 + $0x38] sm:$0xff]   ;;  %v236_v1 = vld [vmem:[%s304_s1 + $0x30] sm:$0xff]   ;;  %v237_v2 = vld [vmem:[%s304_s1 + $0x28] sm:$0xff]  }
   0x2   :  { %215 = vmatprep.subr.bf16.mxu0 %v235_v0  ;;  %v238_v3 = vld [vmem:[%s304_s1 + $0x20] sm:$0xff]   ;;  %v239_v5 = vld [vmem:[%s304_s1 + $0x18] sm:$0xff]   ;;  %v240_v6 = vld [vmem:[%s304_s1 + $0x10] sm:$0xff]  }
   0x3   :  { %216 = vmatpush3.bf16.msra.mxu0 %v235_v0  ;;  %v243_v4 = vld [vmem:[%s305_s0] sm:$0xff]   ;;  %v241_v7 = vld [vmem:[%s304_s1 + $0x8] sm:$0xff]  }
   0x4   :  { %217 = vmatprep.subr.bf16.mxu0 %v236_v1  ;;  %231 = vmatprep.mubr.bf16.mxu0 %v243_v4  ;;  %v242_v8 = vld [vmem:[%s304_s1] sm:$0xff]   ;;  %v244_v9 = vld [vmem:[%s305_s0 + $0x8] sm:$0xff]  }
   0x5   :  { %v175_v11 = vld [vmem:[%s306_s2] ss:$0 sm:$0xff] }
   0x7   :  { %218 = vmatpush3.bf16.msra.mxu0 %v236_v1 }
   0x8   :  { %219 = vmatprep.subr.bf16.mxu0 %v237_v2 }
   0xb   :  { %220 = vmatpush3.bf16.msra.mxu0 %v237_v2 }
   0xc   :  { %221 = vmatprep.subr.bf16.mxu0 %v238_v3 }
   0xf   :  { %222 = vmatpush3.bf16.msra.mxu0 %v238_v3 }
  0x10   :  { %223 = vmatprep.subr.bf16.mxu0 %v239_v5 }
  0x13   :  { %224 = vmatpush3.bf16.msra.mxu0 %v239_v5 }
  0x14   :  { %225 = vmatprep.subr.bf16.mxu0 %v240_v6 }
  0x17   :  { %226 = vmatpush3.bf16.msra.mxu0 %v240_v6 }
  0x18   :  { %227 = vmatprep.subr.bf16.mxu0 %v241_v7 }
  0x1b   :  { %228 = vmatpush3.bf16.msra.mxu0 %v241_v7 }
  0x1c   :  { %229 = vmatprep.subr.bf16.mxu0 %v242_v8 }
  0x1f   :  { %230 = vmatpush3.bf16.msra.mxu0 %v242_v8 }
  0x22   :  { %232 = vmatmul.mubr.bf16.vlgmr.msra.gmra.mxu0 %v244_v9 }
  0xe2   :  { %v233_v10 = vpop.f32.mrf.mxu0 }
  0xe3   :  { %v145_v14 = vadd.f32 %v233_v10, %v175_v11 }
  0xe4   :  { %v136_v12 = vpop.f32.mrf.mxu0 }
  0xe5   :  { %v137_v17 = vadd.f32 %v175_v11, %v136_v12 }
  0xe6   :  { %v234_v13 = vpop.f32.mrf.mxu0 }
  0xe7   :  { %v148_v15 = vadd.f32 %v234_v13, %v175_v11 }
  0xe8   :  { %v139_v16 = vpop.f32.mrf.mxu0 }
  0xe9   :  { %v202_v18 = vpack.c.bf16 %v148_v15, %v145_v14  ;;  %v140_v19 = vadd.f32 %v175_v11, %v139_v16 }
  0xeb   :  { %204 = vst [vmem:[%s307_s3 + $0x8] sm:$0xff] %v202_v18   ;;  %v197_v20 = vpack.c.bf16 %v140_v19, %v137_v17 }
  0xed   :  { %198 = vst [vmem:[%s307_s3] sm:$0xff] %v197_v20  }

// kernel: resnet18_forward.29
= control target key start
LH: loop header
LB: loop body
LE: loop exit
PB: predicated region body
PF: predicated region fallthrough
CT: control target
= control target key end

     0   :  { %s1177_s15 = smov 0   ;;  %s1179_s16 = smov 0   ;;  %s1293_s0 = inlined_call_operand.vmem [shape: bf16[32,1152], index: 0, kind: input, shape index: {}]   ;;  %s1294_s1 = inlined_call_operand.vmem [shape: bf16[1152,128], index: 1, kind: input, shape index: {}]   ;;  %s1295_s2 = inlined_call_operand.vmem [shape: f32[1,128], index: 2, kind: input, shape index: {}]   ;;  %s1296_s3 = inlined_call_operand.vmem [shape: bf16[32,128], index: 3, kind: input, shape index: {}]   ;;  %s1297_s4 = inlined_call_operand.vmem [shape: bf16[32,128], index: 4, kind: output, shape index: {}]  }
   0x1   :  { %s1181_s17 = smov 0   ;;  %s1183_s18 = smov 0  }
   0x2   :  { %s1185_s19 = smov 0  }
   0x3 LB: > { %s26_s20 = sadd.s32 1, %s1145_s18  ;;  %p49_p1 = scmp.ne.s32.totalorder %s1137_s16, %s1133_s15  ;;  %s1149_s19 = sphi %s1185_s19, %s14_s19   ;;  %s1145_s18 = sphi %s1183_s18, %s1301_s18   ;;  %s1141_s17 = sphi %s1181_s17, %s1300_s17   ;;  %s1137_s16 = sphi %s1179_s16, %s1299_s16   ;;  %s1133_s15 = sphi %s1177_s15, %s1298_s15  }
   0x4   : > { %p27_p0 = scmp.ge.s32.totalorder %s26_s20, 3  ;;  %p50_p2 = scmp.eq.s32.totalorder %s1149_s19, 0 }
   0x5   : > { %s42_s22 = sadd.s32 1, %s1137_s16  ;;  %p900_p5 = scmp.ge.s32.totalorder %s1149_s19, 3 }
   0x6   : > { %s1303_s20 = smov (%p27_p0, %s26_s20), 0  ;;  %p51_p3 = por %p50_p2, %p49_p1 }
   0x7   : > { %s38_s21 = ssub.s32 %s1145_s18, %s1303_s20  ;;  %203 = sbr.rel (%p900_p5) target bundleno = 21 (0x15), region = 24 }
   0x8   : > { %p40_p4 = scmp.eq.s32.totalorder %s38_s21, 0 }
   0xa   : > { %s1212_s23 = scalar_select %p40_p4, %s1137_s16, %s42_s22  }
   0xc   : > { %206 = sbr.rel (!%p51_p3) target bundleno = 21 (0x15), region = 28  ;;  %s208_s24 = sand.u32 (%p51_p3), 1, %s1137_s16  }
   0xd   : > { %s953_s25 = smul.u32 (%p51_p3), 12, %s1145_s18 }
   0xe   : > { %s1036_s26 = smul.u32 (%p51_p3), 48, %s208_s24 }
   0xf   : > { %s216_s29 = scalar_lea.vmem (%p51_p3), %s1293_s0, %s953_s25 }
  0x10   : > { %v231_v0 = vld [vmem:[%s216_s29] sm:$0xff] (%p51_p3)  ;;  %v235_v2 = vld [vmem:[%s216_s29 + $0x48] sm:$0xff] (%p51_p3)  ;;  %s210_s30 = scalar_lea.vmem (%p51_p3), [#allocation3], %s1036_s26  ;;  %v906_v6 = vld [vmem:[%s216_s29 + $0x50] sm:$0xf] (%p51_p3) }
  0x11   : > { %v233_v1 = vld [vmem:[%s216_s29 + $0x24] sm:$0xff]  ;;  %232 = vst [vmem:[%s210_s30] sm:$0xff] %v231_v0  ;;  %236 = vst [vmem:[%s210_s30 + $0x18] sm:$0xff] %v235_v2  ;;  %v237_v3 = vld [vmem:[%s216_s29 + $0x6c] sm:$0xff] }
  0x12   : > { %234 = vst [vmem:[%s210_s30 + $0xc] sm:$0xff] %v233_v1  ;;  %v902_v4 = vld [vmem:[%s216_s29 + $0x8] sm:$0xf]  ;;  %v904_v5 = vld [vmem:[%s216_s29 + $0x2c] sm:$0xf]  ;;  %238 = vst [vmem:[%s210_s30 + $0x24] sm:$0xff] %v237_v3 }
  0x13   : > { %903 = vst [vmem:[%s210_s30 + $0x8] sm:$0xf] %v902_v4  ;;  %905 = vst [vmem:[%s210_s30 + $0x14] sm:$0xf] %v904_v5  ;;  %v908_v7 = vld [vmem:[%s216_s29 + $0x74] sm:$0xf] }
  0x14   : > { %907 = vst [vmem:[%s210_s30 + $0x20] sm:$0xf] %v906_v6  ;;  %909 = vst [vmem:[%s210_s30 + $0x2c] sm:$0xf] %v908_v7 }
  0x15 PF: > { %p910_p6 = scmp.ge.s32.totalorder %s1149_s19, 1  ;;  %p271_p7 = scmp.lt.s32.totalorder %s1149_s19, 4 }
  0x17   : > { %p272_p8 = pnand %p910_p6, %p271_p7 }
  0x18   : > { %s278_s5 = sand.u32 (!%p272_p8), 1, %s1133_s15   ;;  %s327_s6 = smul.u32 (!%p272_p8), 48, %s1141_s17 }
  0x19   : > { %275 = sbr.rel (%p272_p8) target bundleno = 301 (0x12d), region = 58  ;;  %p912_p10 = scmp.ne.s32.totalorder (!%p272_p8), %s1141_s17, 0 }
  0x1a   : > { %s1037_s7 = smul.u32 (!%p272_p8), 48, %s278_s5  ;;  %p328_p9 = scmp.lt.s32.totalorder (!%p272_p8), %s327_s6, 143 }
  0x1c   : > { %s1229_s12 = scalar_lea.vmem (!%p272_p8), [#allocation3], %s1037_s7 }
  0x1e   : > { %s1305_s6 = smov (!%p328_p9, %s327_s6), 143  ;;  %361 = sbr.rel (%p912_p10) target bundleno = 38 (0x26), region = 66 }
  0x1f   : > { %s911_s8 = sshll.u32 %s1305_s6, 2 }
  0x20   : > { %s1227_s11 = scalar_lea.vmem %s1294_s1, %s911_s8 }
  0x23   : > { %v1151_v8 = vmov 0.0  }
  0x24   : > { %362 = vst [vmem:[#allocation2 + $0x10] sm:$0xff] %v1151_v8  ;;  %363 = vst [vmem:[#allocation2] sm:$0xff] %v1151_v8 }
  0x25   : > { %364 = vst [vmem:[#allocation2 + $0x18] sm:$0xff] %v1151_v8  ;;  %365 = vst [vmem:[#allocation2 + $0x8] sm:$0xff] %v1151_v8 }
  0x26 PF: > { %v1079_v9 = vld [vmem:[%s1227_s11 + $0x78] sm:$0xff]   ;;  %v1082_v12 = vld [vmem:[%s1227_s11 + $0x70] sm:$0xff]   ;;  %v1085_v15 = vld [vmem:[%s1227_s11 + $0x68] sm:$0xff]   ;;  %p943_p11 = scmp.ne.s32.totalorder %s1141_s17, 2 }
  0x27   : > { %v1080_v10 = vld [vmem:[%s1227_s11 + $0x38] sm:$0xff]   ;;  %978 = vmatprep.subr.bf16.mxu0 %v1079_v9  ;;  %v1083_v13 = vld [vmem:[%s1227_s11 + $0x30] sm:$0xff]   ;;  %v1086_v16 = vld [vmem:[%s1227_s11 + $0x28] sm:$0xff]  }
  0x28   : > { %v1081_v11 = vld [vmem:[%s1227_s11 + $0xb8] sm:$0xff]   ;;  %979 = vmatpush3.bf16.msra.mxu0 %v1080_v10  ;;  %v1084_v14 = vld [vmem:[%s1227_s11 + $0xb0] sm:$0xff]   ;;  %v1087_v17 = vld [vmem:[%s1227_s11 + $0xa8] sm:$0xff]  }
  0x29   : > { %1016 = vmatprep.subr.bf16.mxu1 %v1081_v11  ;;  %980 = vmatprep.subr.bf16.mxu0 %v1082_v12  ;;  %v1088_v18 = vld [vmem:[%s1227_s11 + $0x60] sm:$0xff]   ;;  %v1091_v21 = vld [vmem:[%s1227_s11 + $0x58] sm:$0xff]   ;;  %v1094_v24 = vld [vmem:[%s1227_s11 + $0x50] sm:$0xff]  }
  0x2a   : > { %1017 = vmatpush3.bf16.msra.mxu1 %v1081_v11  ;;  %v1089_v19 = vld [vmem:[%s1227_s11 + $0x20] sm:$0xff]   ;;  %v1093_v22 = vld [vmem:[%s1227_s11 + $0x98] sm:$0xff]   ;;  %v1096_v25 = vld [vmem:[%s1227_s11 + $0x90] sm:$0xff]  }
  0x2b   : > { %1018 = vmatprep.subr.bf16.mxu1 %v1084_v14  ;;  %v1090_v20 = vld [vmem:[%s1227_s11 + $0xa0] sm:$0xff]   ;;  %v1092_v23 = vld [vmem:[%s1227_s11 + $0x18] sm:$0xff]   ;;  %v1095_v26 = vld [vmem:[%s1227_s11 + $0x10] sm:$0xff]  }
  0x2c   : > { %981 = vmatpush3.bf16.msra.mxu0 %v1083_v13  ;;  %v1097_v27 = vld [vmem:[%s1227_s11 + $0x48] sm:$0xff]   ;;  %v1100_v30 = vld [vmem:[%s1227_s11 + $0x40] sm:$0xff]   ;;  %v366_v44 = vld [vmem:[#allocation2 + $0x10] sm:$0xff] }
  0x2d   : > { %982 = vmatprep.subr.bf16.mxu0 %v1085_v15  ;;  %v1098_v28 = vld [vmem:[%s1227_s11 + $0x8] sm:$0xff]   ;;  %v1102_v31 = vld [vmem:[%s1227_s11 + $0x80] sm:$0xff]   ;;  %v368_v58 = vld [vmem:[#allocation2 + $0x18] sm:$0xff] }
  0x2e   : > { %1019 = vmatpush3.bf16.msra.mxu1 %v1084_v14  ;;  %v1099_v29 = vld [vmem:[%s1227_s11 + $0x88] sm:$0xff]   ;;  %v1105_v32 = vld [vmem:[%s1229_s12 + $0x4] ss:$12 sps:$4 sm:$0xff]  }
  0x2f   : > { %1020 = vmatprep.subr.bf16.mxu1 %v1087_v17  ;;  %v1106_v33 = vld [vmem:[%s1229_s12 + $0x8] ss:$12 sps:$4 sm:$0xff]   ;;  %634 = vmatprep.mubr.bf16.mxu0 %v1105_v32  ;;  %v1103_v35 = vld [vmem:[%s1229_s12] ss:$12 sps:$4 sm:$0xff]   ;;  %v1110_v38 = vld [vmem:[%s1229_s12 + $0x18] ss:$12 sps:$4 sm:$0xff]  }
  0x30   : > { %983 = vmatpush3.bf16.msra.mxu0 %v1086_v16  ;;  %v1101_v34 = vld [vmem:[%s1227_s11] sm:$0xff]   ;;  %1032 = vmatprep.mubr.bf16.mxu1 %v1106_v33  ;;  %v1108_v36 = vld [vmem:[%s1229_s12 + $0x1c] ss:$12 sps:$4 sm:$0xff]  }
  0x31   : > { %984 = vmatprep.subr.bf16.mxu0 %v1088_v18  ;;  %v1107_v37 = vld [vmem:[%s1229_s12 + $0x20] ss:$12 sps:$4 sm:$0xff]  }
  0x32   : > { %1021 = vmatpush3.bf16.msra.mxu1 %v1087_v17  ;;  %v367_v52 = vld [vmem:[#allocation2] sm:$0xff]  ;;  %v369_v0 = vld [vmem:[#allocation2 + $0x8] sm:$0xff] }
  0x33   : > { %1022 = vmatprep.subr.bf16.mxu1 %v1090_v20 }
  0x34   : > { %985 = vmatpush3.bf16.msra.mxu0 %v1089_v19 }
  0x35   : > { %986 = vmatprep.subr.bf16.mxu0 %v1091_v21 }
  0x36   : > { %1023 = vmatpush3.bf16.msra.mxu1 %v1090_v20 }
  0x37   : > { %1024 = vmatprep.subr.bf16.mxu1 %v1093_v22 }
  0x38   : > { %987 = vmatpush3.bf16.msra.mxu0 %v1092_v23 }
  0x39   : > { %988 = vmatprep.subr.bf16.mxu0 %v1094_v24 }
  0x3a   : > { %1025 = vmatpush3.bf16.msra.mxu1 %v1093_v22 }
  0x3b   : > { %1026 = vmatprep.subr.bf16.mxu1 %v1096_v25 }
  0x3c   : > { %989 = vmatpush3.bf16.msra.mxu0 %v1095_v26 }
  0x3d   : > { %990 = vmatprep.subr.bf16.mxu0 %v1097_v27 }
  0x3e   : > { %1027 = vmatpush3.bf16.msra.mxu1 %v1096_v25 }
  0x3f   : > { %1028 = vmatprep.subr.bf16.mxu1 %v1099_v29 }
  0x40   : > { %991 = vmatpush3.bf16.msra.mxu0 %v1098_v28 }
  0x41   : > { %992 = vmatprep.subr.bf16.mxu0 %v1100_v30 }
  0x42   : > { %1029 = vmatpush3.bf16.msra.mxu1 %v1099_v29 }
  0x43   : > { %1030 = vmatprep.subr.bf16.mxu1 %v1102_v31 }
  0x44   : > { %993 = vmatpush3.bf16.msra.mxu0 %v1101_v34 }
  0x46   : > { %1031 = vmatpush3.bf16.msra.mxu1 %v1102_v31 }
  0x47   : > { %635 = vmatmul.mubr.bf16.vlgmr.msra.gmra.mxu0 %v1103_v35 }
  0x48   : > { %642 = vmatprep.mubr.bf16.mxu0 %v1108_v36 }
  0x49   : > { %1033 = vmatmul.mubr.bf16.vlgmr.msra.gmra.mxu1 %v1107_v37 }
  0x4f   : > { %643 = vmatmul.mubr.bf16.gmra.mxu0 %v1110_v38 }
 0x107   : > { %v994_v39 = vpop.f32.mrf.mxu0 }
 0x109   : > { %v995_v40 = vpop.f32.mrf.mxu0  ;;  %v1034_v41 = vpop.f32.mrf.mxu1 }
 0x10a   : > { %v996_v42 = vadd.f32 %v995_v40, %v994_v39 }
 0x10b   : > { %v997_v43 = vpop.f32.mrf.mxu0  ;;  %v685_v45 = vpop.f32.mrf.mxu1 }
 0x10c   : > { %v686_v46 = vadd.f32 %v996_v42, %v685_v45 }
 0x10d   : > { %v998_v47 = vpop.f32.mrf.mxu0  ;;  %v1035_v48 = vpop.f32.mrf.mxu1 }
 0x10e   : > { %v700_v49 = vadd.f32 %v686_v46, %v366_v44  ;;  %v999_v50 = vadd.f32 %v998_v47, %v997_v43 }
 0x10f   : > { %v1000_v51 = vpop.f32.mrf.mxu0  ;;  %v688_v53 = vpop.f32.mrf.mxu1 }
 0x110   : > { %704 = vst [vmem:[#allocation2 + $0x10] sm:$0xff] %v700_v49  ;;  %v689_v54 = vadd.f32 %v999_v50, %v688_v53 }
 0x111   : > { %v1001_v55 = vpop.f32.mrf.mxu0 }
 0x112   : > { %v701_v56 = vadd.f32 %v689_v54, %v367_v52  ;;  %v1002_v57 = vadd.f32 %v1001_v55, %v1000_v51 }
 0x113   : > { %v1003_v59 = vpop.f32.mrf.mxu0 }
 0x114   : > { %705 = vst [vmem:[#allocation2] sm:$0xff] %v701_v56  ;;  %v694_v60 = vadd.f32 %v1034_v41, %v1002_v57 }
 0x115   : > { %v1004_v61 = vpop.f32.mrf.mxu0 }
 0x116   : > { %v702_v62 = vadd.f32 %v694_v60, %v368_v58  ;;  %v1005_v63 = vadd.f32 %v1004_v61, %v1003_v59 }
 0x118   : > { %706 = vst [vmem:[#allocation2 + $0x18] sm:$0xff] %v702_v62  ;;  %v697_v1 = vadd.f32 %v1035_v48, %v1005_v63  ;;  %711 = sbr.rel (%p943_p11) target bundleno = 301 (0x12d), region = 70 }
 0x11a   : > { %v703_v2 = vadd.f32 %v697_v1, %v369_v0 }
 0x11c   : > { %707 = vst [vmem:[#allocation2 + $0x8] sm:$0xff] %v703_v2 }
 0x11d   : > { %v712_v3 = vld [vmem:[#allocation2 + $0x10] sm:$0xff]  ;;  %v713_v4 = vld [vmem:[#allocation2] sm:$0xff]  ;;  %v976_v15 = vld [vmem:[%s1296_s3 + $0x8] sm:$0xff]  }
 0x11e   : > { %v944_v5 = vld [vmem:[%s1295_s2] ss:$0 sm:$0xff]  ;;  %v964_v16 = vunpack.c.l.bf16 %v976_v15  ;;  %v965_v17 = vunpack.c.h.bf16 %v976_v15 }
 0x11f   : > { %v723_v6 = vadd.f32 %v944_v5, %v712_v3  ;;  %v724_v7 = vadd.f32 %v944_v5, %v713_v4  ;;  %v959_v8 = vld [vmem:[%s1296_s3] sm:$0xff]   ;;  %v714_v9 = vld [vmem:[#allocation2 + $0x18] sm:$0xff] }
 0x120   : > { %v960_v11 = vunpack.c.l.bf16 %v959_v8  ;;  %v961_v12 = vunpack.c.h.bf16 %v959_v8  ;;  %v725_v13 = vadd.f32 %v944_v5, %v714_v9 }
 0x122   : > { %v735_v18 = vadd.f32 %v960_v11, %v723_v6  ;;  %v736_v19 = vadd.f32 %v961_v12, %v724_v7  ;;  %v737_v20 = vadd.f32 %v964_v16, %v725_v13 }
 0x123   : > { %v715_v10 = vld [vmem:[#allocation2 + $0x8] sm:$0xff] }
 0x124   : > { %v726_v14 = vadd.f32 %v944_v5, %v715_v10  ;;  %v739_v22 = vmax.f32 %v735_v18, 0.0  ;;  %v740_v23 = vmax.f32 %v736_v19, 0.0  ;;  %v741_v24 = vmax.f32 %v737_v20, 0.0 }
 0x126   : > { %v738_v21 = vadd.f32 %v965_v17, %v726_v14  ;;  %v969_v26 = vpack.c.bf16 %v740_v23, %v739_v22 }
 0x128   : > { %v742_v25 = vmax.f32 %v738_v21, 0.0  ;;  %970 = vst [vmem:[%s1297_s4] sm:$0xff] %v969_v26  }
 0x12a   : > { %v974_v27 = vpack.c.bf16 %v742_v25, %v741_v24 }
 0x12c   : > { %977 = vst [vmem:[%s1297_s4 + $0x8] sm:$0xff] %v974_v27  }
 0x12d PF: > { %s14_s19 = sadd.s32 1, %s1149_s19   ;;  %s1298_s15 = smov %s1137_s16 }
 0x12e   : > { %p11_p12 = scmp.ge.s32.totalorder %s14_s19, 5   ;;  %s1299_s16 = smov %s1212_s23 }
 0x12f   : > { %s1300_s17 = smov %s1145_s18  ;;  %s1301_s18 = smov %s1303_s20 }
 0x130   :  { %13 = sbr.rel (!%p11_p12) target bundleno = 3 (0x3), region = 120 }

// kernel: resnet18_forward.30
= control target key start
LH: loop header
LB: loop body
LE: loop exit
PB: predicated region body
PF: predicated region fallthrough
CT: control target
= control target key end

     0   :  { %s1072_s12 = smov 0   ;;  %s1074_s13 = smov 0   ;;  %s1182_s0 = inlined_call_operand.vmem [shape: bf16[32,1152], index: 0, kind: input, shape index: {}]   ;;  %s1183_s1 = inlined_call_operand.vmem [shape: bf16[1152,128], index: 1, kind: input, shape index: {}]   ;;  %s1184_s2 = inlined_call_operand.vmem [shape: f32[1,128], index: 2, kind: input, shape index: {}]   ;;  %s1185_s3 = inlined_call_operand.vmem [shape: bf16[32,128], index: 3, kind: output, shape index: {}]  }
   0x1   :  { %s1076_s14 = smov 0   ;;  %s1078_s15 = smov 0  }
   0x2   :  { %s1080_s16 = smov 0  }
   0x3 LB: > { %s25_s17 = sadd.s32 1, %s1045_s15  ;;  %p48_p1 = scmp.ne.s32.totalorder %s1037_s13, %s1033_s12  ;;  %s1049_s16 = sphi %s1080_s16, %s13_s16   ;;  %s1045_s15 = sphi %s1078_s15, %s1189_s15   ;;  %s1041_s14 = sphi %s1076_s14, %s1188_s14   ;;  %s1037_s13 = sphi %s1074_s13, %s1187_s13   ;;  %s1033_s12 = sphi %s1072_s12, %s1186_s12  }
   0x4   : > { %p26_p0 = scmp.ge.s32.totalorder %s25_s17, 3  ;;  %p49_p2 = scmp.eq.s32.totalorder %s1049_s16, 0 }
   0x5   : > { %s41_s19 = sadd.s32 1, %s1037_s13  ;;  %p809_p5 = scmp.ge.s32.totalorder %s1049_s16, 3 }
   0x6   : > { %s1191_s17 = smov (%p26_p0, %s25_s17), 0  ;;  %p50_p3 = por %p49_p2, %p48_p1 }
   0x7   : > { %s37_s18 = ssub.s32 %s1045_s15, %s1191_s17  ;;  %162 = sbr.rel (%p809_p5) target bundleno = 21 (0x15), region = 20 }
   0x8   : > { %p39_p4 = scmp.eq.s32.totalorder %s37_s18, 0 }
   0xa   : > { %s1107_s20 = scalar_select %p39_p4, %s1037_s13, %s41_s19  }
   0xc   : > { %165 = sbr.rel (!%p50_p3) target bundleno = 21 (0x15), region = 24  ;;  %s167_s21 = sand.u32 (%p50_p3), 1, %s1037_s13  }
   0xd   : > { %s862_s22 = smul.u32 (%p50_p3), 12, %s1045_s15 }
   0xe   : > { %s936_s23 = smul.u32 (%p50_p3), 48, %s167_s21 }
   0xf   : > { %s175_s26 = scalar_lea.vmem (%p50_p3), %s1182_s0, %s862_s22 }
  0x10   : > { %v190_v0 = vld [vmem:[%s175_s26] sm:$0xff] (%p50_p3)  ;;  %v194_v2 = vld [vmem:[%s175_s26 + $0x48] sm:$0xff] (%p50_p3)  ;;  %s169_s27 = scalar_lea.vmem (%p50_p3), [#allocation3], %s936_s23  ;;  %v815_v6 = vld [vmem:[%s175_s26 + $0x50] sm:$0xf] (%p50_p3) }
  0x11   : > { %v192_v1 = vld [vmem:[%s175_s26 + $0x24] sm:$0xff]  ;;  %191 = vst [vmem:[%s169_s27] sm:$0xff] %v190_v0  ;;  %195 = vst [vmem:[%s169_s27 + $0x18] sm:$0xff] %v194_v2  ;;  %v196_v3 = vld [vmem:[%s175_s26 + $0x6c] sm:$0xff] }
  0x12   : > { %193 = vst [vmem:[%s169_s27 + $0xc] sm:$0xff] %v192_v1  ;;  %v811_v4 = vld [vmem:[%s175_s26 + $0x8] sm:$0xf]  ;;  %v813_v5 = vld [vmem:[%s175_s26 + $0x2c] sm:$0xf]  ;;  %197 = vst [vmem:[%s169_s27 + $0x24] sm:$0xff] %v196_v3 }
  0x13   : > { %812 = vst [vmem:[%s169_s27 + $0x8] sm:$0xf] %v811_v4  ;;  %814 = vst [vmem:[%s169_s27 + $0x14] sm:$0xf] %v813_v5  ;;  %v817_v7 = vld [vmem:[%s175_s26 + $0x74] sm:$0xf] }
  0x14   : > { %816 = vst [vmem:[%s169_s27 + $0x20] sm:$0xf] %v815_v6  ;;  %818 = vst [vmem:[%s169_s27 + $0x2c] sm:$0xf] %v817_v7 }
  0x15 PF: > { %p819_p6 = scmp.ge.s32.totalorder %s1049_s16, 1  ;;  %p230_p7 = scmp.lt.s32.totalorder %s1049_s16, 4 }
  0x17   : > { %p231_p8 = pnand %p819_p6, %p230_p7 }
  0x18   : > { %s237_s28 = sand.u32 (!%p231_p8), 1, %s1033_s12   ;;  %s276_s29 = smul.u32 (!%p231_p8), 48, %s1041_s14 }
  0x19   : > { %234 = sbr.rel (%p231_p8) target bundleno = 299 (0x12b), region = 54  ;;  %p821_p10 = scmp.ne.s32.totalorder (!%p231_p8), %s1041_s14, 0 }
  0x1a   : > { %s937_s30 = smul.u32 (!%p231_p8), 48, %s237_s28  ;;  %p277_p9 = scmp.lt.s32.totalorder (!%p231_p8), %s276_s29, 143 }
  0x1c   : > { %s1124_s8 = scalar_lea.vmem (!%p231_p8), [#allocation3], %s937_s30 }
  0x1e   : > { %s1193_s29 = smov (!%p277_p9, %s276_s29), 143  ;;  %301 = sbr.rel (%p821_p10) target bundleno = 38 (0x26), region = 62 }
  0x1f   : > { %s820_s4 = sshll.u32 %s1193_s29, 2 }
  0x20   : > { %s1122_s7 = scalar_lea.vmem %s1183_s1, %s820_s4 }
  0x23   : > { %v1051_v8 = vmov 0.0  }
  0x24   : > { %302 = vst [vmem:[#allocation2 + $0x10] sm:$0xff] %v1051_v8  ;;  %303 = vst [vmem:[#allocation2] sm:$0xff] %v1051_v8 }
  0x25   : > { %304 = vst [vmem:[#allocation2 + $0x18] sm:$0xff] %v1051_v8  ;;  %305 = vst [vmem:[#allocation2 + $0x8] sm:$0xff] %v1051_v8 }
  0x26 PF: > { %v979_v9 = vld [vmem:[%s1122_s7 + $0x78] sm:$0xff]   ;;  %v982_v12 = vld [vmem:[%s1122_s7 + $0x70] sm:$0xff]   ;;  %v985_v15 = vld [vmem:[%s1122_s7 + $0x68] sm:$0xff]   ;;  %p852_p11 = scmp.ne.s32.totalorder %s1041_s14, 2 }
  0x27   : > { %v980_v10 = vld [vmem:[%s1122_s7 + $0x38] sm:$0xff]   ;;  %878 = vmatprep.subr.bf16.mxu0 %v979_v9  ;;  %v983_v13 = vld [vmem:[%s1122_s7 + $0x30] sm:$0xff]   ;;  %v986_v16 = vld [vmem:[%s1122_s7 + $0x28] sm:$0xff]  }
  0x28   : > { %v981_v11 = vld [vmem:[%s1122_s7 + $0xb8] sm:$0xff]   ;;  %879 = vmatpush3.bf16.msra.mxu0 %v980_v10  ;;  %v984_v14 = vld [vmem:[%s1122_s7 + $0xb0] sm:$0xff]   ;;  %v987_v17 = vld [vmem:[%s1122_s7 + $0xa8] sm:$0xff]  }
  0x29   : > { %916 = vmatprep.subr.bf16.mxu1 %v981_v11  ;;  %880 = vmatprep.subr.bf16.mxu0 %v982_v12  ;;  %v988_v18 = vld [vmem:[%s1122_s7 + $0x60] sm:$0xff]   ;;  %v991_v21 = vld [vmem:[%s1122_s7 + $0x58] sm:$0xff]   ;;  %v994_v24 = vld [vmem:[%s1122_s7 + $0x50] sm:$0xff]  }
  0x2a   : > { %917 = vmatpush3.bf16.msra.mxu1 %v981_v11  ;;  %v989_v19 = vld [vmem:[%s1122_s7 + $0x20] sm:$0xff]   ;;  %v993_v22 = vld [vmem:[%s1122_s7 + $0x98] sm:$0xff]   ;;  %v996_v25 = vld [vmem:[%s1122_s7 + $0x90] sm:$0xff]  }
  0x2b   : > { %918 = vmatprep.subr.bf16.mxu1 %v984_v14  ;;  %v990_v20 = vld [vmem:[%s1122_s7 + $0xa0] sm:$0xff]   ;;  %v992_v23 = vld [vmem:[%s1122_s7 + $0x18] sm:$0xff]   ;;  %v995_v26 = vld [vmem:[%s1122_s7 + $0x10] sm:$0xff]  }
  0x2c   : > { %881 = vmatpush3.bf16.msra.mxu0 %v983_v13  ;;  %v997_v27 = vld [vmem:[%s1122_s7 + $0x48] sm:$0xff]   ;;  %v1000_v30 = vld [vmem:[%s1122_s7 + $0x40] sm:$0xff]   ;;  %v306_v44 = vld [vmem:[#allocation2 + $0x10] sm:$0xff] }
  0x2d   : > { %882 = vmatprep.subr.bf16.mxu0 %v985_v15  ;;  %v998_v28 = vld [vmem:[%s1122_s7 + $0x8] sm:$0xff]   ;;  %v1002_v31 = vld [vmem:[%s1122_s7 + $0x80] sm:$0xff]   ;;  %v308_v58 = vld [vmem:[#allocation2 + $0x18] sm:$0xff] }
  0x2e   : > { %919 = vmatpush3.bf16.msra.mxu1 %v984_v14  ;;  %v999_v29 = vld [vmem:[%s1122_s7 + $0x88] sm:$0xff]   ;;  %v1005_v32 = vld [vmem:[%s1124_s8 + $0x4] ss:$12 sps:$4 sm:$0xff]  }
  0x2f   : > { %920 = vmatprep.subr.bf16.mxu1 %v987_v17  ;;  %v1006_v33 = vld [vmem:[%s1124_s8 + $0x8] ss:$12 sps:$4 sm:$0xff]   ;;  %574 = vmatprep.mubr.bf16.mxu0 %v1005_v32  ;;  %v1003_v35 = vld [vmem:[%s1124_s8] ss:$12 sps:$4 sm:$0xff]   ;;  %v1010_v38 = vld [vmem:[%s1124_s8 + $0x18] ss:$12 sps:$4 sm:$0xff]  }
  0x30   : > { %883 = vmatpush3.bf16.msra.mxu0 %v986_v16  ;;  %v1001_v34 = vld [vmem:[%s1122_s7] sm:$0xff]   ;;  %932 = vmatprep.mubr.bf16.mxu1 %v1006_v33  ;;  %v1008_v36 = vld [vmem:[%s1124_s8 + $0x1c] ss:$12 sps:$4 sm:$0xff]  }
  0x31   : > { %884 = vmatprep.subr.bf16.mxu0 %v988_v18  ;;  %v1007_v37 = vld [vmem:[%s1124_s8 + $0x20] ss:$12 sps:$4 sm:$0xff]  }
  0x32   : > { %921 = vmatpush3.bf16.msra.mxu1 %v987_v17  ;;  %v307_v52 = vld [vmem:[#allocation2] sm:$0xff]  ;;  %v309_v0 = vld [vmem:[#allocation2 + $0x8] sm:$0xff] }
  0x33   : > { %922 = vmatprep.subr.bf16.mxu1 %v990_v20 }
  0x34   : > { %885 = vmatpush3.bf16.msra.mxu0 %v989_v19 }
  0x35   : > { %886 = vmatprep.subr.bf16.mxu0 %v991_v21 }
  0x36   : > { %923 = vmatpush3.bf16.msra.mxu1 %v990_v20 }
  0x37   : > { %924 = vmatprep.subr.bf16.mxu1 %v993_v22 }
  0x38   : > { %887 = vmatpush3.bf16.msra.mxu0 %v992_v23 }
  0x39   : > { %888 = vmatprep.subr.bf16.mxu0 %v994_v24 }
  0x3a   : > { %925 = vmatpush3.bf16.msra.mxu1 %v993_v22 }
  0x3b   : > { %926 = vmatprep.subr.bf16.mxu1 %v996_v25 }
  0x3c   : > { %889 = vmatpush3.bf16.msra.mxu0 %v995_v26 }
  0x3d   : > { %890 = vmatprep.subr.bf16.mxu0 %v997_v27 }
  0x3e   : > { %927 = vmatpush3.bf16.msra.mxu1 %v996_v25 }
  0x3f   : > { %928 = vmatprep.subr.bf16.mxu1 %v999_v29 }
  0x40   : > { %891 = vmatpush3.bf16.msra.mxu0 %v998_v28 }
  0x41   : > { %892 = vmatprep.subr.bf16.mxu0 %v1000_v30 }
  0x42   : > { %929 = vmatpush3.bf16.msra.mxu1 %v999_v29 }
  0x43   : > { %930 = vmatprep.subr.bf16.mxu1 %v1002_v31 }
  0x44   : > { %893 = vmatpush3.bf16.msra.mxu0 %v1001_v34 }
  0x46   : > { %931 = vmatpush3.bf16.msra.mxu1 %v1002_v31 }
  0x47   : > { %575 = vmatmul.mubr.bf16.vlgmr.msra.gmra.mxu0 %v1003_v35 }
  0x48   : > { %582 = vmatprep.mubr.bf16.mxu0 %v1008_v36 }
  0x49   : > { %933 = vmatmul.mubr.bf16.vlgmr.msra.gmra.mxu1 %v1007_v37 }
  0x4f   : > { %583 = vmatmul.mubr.bf16.gmra.mxu0 %v1010_v38 }
 0x107   : > { %v894_v39 = vpop.f32.mrf.mxu0 }
 0x109   : > { %v895_v40 = vpop.f32.mrf.mxu0  ;;  %v934_v41 = vpop.f32.mrf.mxu1 }
 0x10a   : > { %v896_v42 = vadd.f32 %v895_v40, %v894_v39 }
 0x10b   : > { %v897_v43 = vpop.f32.mrf.mxu0  ;;  %v625_v45 = vpop.f32.mrf.mxu1 }
 0x10c   : > { %v626_v46 = vadd.f32 %v896_v42, %v625_v45 }
 0x10d   : > { %v898_v47 = vpop.f32.mrf.mxu0  ;;  %v935_v48 = vpop.f32.mrf.mxu1 }
 0x10e   : > { %v640_v49 = vadd.f32 %v626_v46, %v306_v44  ;;  %v899_v50 = vadd.f32 %v898_v47, %v897_v43 }
 0x10f   : > { %v900_v51 = vpop.f32.mrf.mxu0  ;;  %v628_v53 = vpop.f32.mrf.mxu1 }
 0x110   : > { %644 = vst [vmem:[#allocation2 + $0x10] sm:$0xff] %v640_v49  ;;  %v629_v54 = vadd.f32 %v899_v50, %v628_v53 }
 0x111   : > { %v901_v55 = vpop.f32.mrf.mxu0 }
 0x112   : > { %v641_v56 = vadd.f32 %v629_v54, %v307_v52  ;;  %v902_v57 = vadd.f32 %v901_v55, %v900_v51 }
 0x113   : > { %v903_v59 = vpop.f32.mrf.mxu0 }
 0x114   : > { %645 = vst [vmem:[#allocation2] sm:$0xff] %v641_v56  ;;  %v634_v60 = vadd.f32 %v934_v41, %v902_v57 }
 0x115   : > { %v904_v61 = vpop.f32.mrf.mxu0 }
 0x116   : > { %v642_v62 = vadd.f32 %v634_v60, %v308_v58  ;;  %v905_v63 = vadd.f32 %v904_v61, %v903_v59 }
 0x118   : > { %646 = vst [vmem:[#allocation2 + $0x18] sm:$0xff] %v642_v62  ;;  %v637_v1 = vadd.f32 %v935_v48, %v905_v63  ;;  %651 = sbr.rel (%p852_p11) target bundleno = 299 (0x12b), region = 66 }
 0x11a   : > { %v643_v2 = vadd.f32 %v637_v1, %v309_v0 }
 0x11c   : > { %647 = vst [vmem:[#allocation2 + $0x8] sm:$0xff] %v643_v2 }
 0x11d   : > { %v652_v3 = vld [vmem:[#allocation2 + $0x10] sm:$0xff]  ;;  %v653_v4 = vld [vmem:[#allocation2] sm:$0xff] }
 0x11e   : > { %v853_v5 = vld [vmem:[%s1184_s2] ss:$0 sm:$0xff] }
 0x11f   : > { %v663_v6 = vadd.f32 %v853_v5, %v652_v3  ;;  %v664_v7 = vadd.f32 %v853_v5, %v653_v4  ;;  %v654_v8 = vld [vmem:[#allocation2 + $0x18] sm:$0xff] }
 0x120   : > { %v665_v10 = vadd.f32 %v853_v5, %v654_v8 }
 0x121   : > { %v667_v12 = vmax.f32 %v663_v6, 0.0  ;;  %v668_v13 = vmax.f32 %v664_v7, 0.0 }
 0x122   : > { %v669_v14 = vmax.f32 %v665_v10, 0.0 }
 0x123   : > { %v655_v9 = vld [vmem:[#allocation2 + $0x8] sm:$0xff]  ;;  %v870_v16 = vpack.c.bf16 %v668_v13, %v667_v12 }
 0x124   : > { %v666_v11 = vadd.f32 %v853_v5, %v655_v9 }
 0x125   : > { %871 = vst [vmem:[%s1185_s3] sm:$0xff] %v870_v16  }
 0x126   : > { %v670_v15 = vmax.f32 %v666_v11, 0.0 }
 0x128   : > { %v875_v17 = vpack.c.bf16 %v670_v15, %v669_v14 }
 0x12a   : > { %877 = vst [vmem:[%s1185_s3 + $0x8] sm:$0xff] %v875_v17  }
 0x12b PF: > { %s13_s16 = sadd.s32 1, %s1049_s16   ;;  %s1186_s12 = smov %s1037_s13 }
 0x12c   : > { %p10_p12 = scmp.ge.s32.totalorder %s13_s16, 5   ;;  %s1187_s13 = smov %s1107_s20 }
 0x12d   : > { %s1188_s14 = smov %s1045_s15  ;;  %s1189_s15 = smov %s1191_s17 }
 0x12e   :  { %12 = sbr.rel (!%p10_p12) target bundleno = 3 (0x3), region = 113 }

// kernel: resnet18_forward.33
= control target key start
LH: loop header
LB: loop body
LE: loop exit
PB: predicated region body
PF: predicated region fallthrough
CT: control target
= control target key end

     0   :  { %s1148_s12 = smov 0   ;;  %s1150_s13 = smov 0   ;;  %s1279_s0 = inlined_call_operand.vmem [shape: bf16[16,1152], index: 0, kind: input, shape index: {}]   ;;  %s1280_s1 = inlined_call_operand.vmem [shape: bf16[1152,256], index: 1, kind: input, shape index: {}]   ;;  %s1281_s2 = inlined_call_operand.vmem [shape: f32[1,256], index: 2, kind: input, shape index: {}]   ;;  %s1282_s3 = inlined_call_operand.vmem [shape: bf16[16,256], index: 3, kind: output, shape index: {}]  }
   0x1   :  { %s1152_s14 = smov 0   ;;  %s1154_s15 = smov 0  }
   0x2   :  { %s1156_s16 = smov 0  }
   0x3 LB: > { %s25_s17 = sadd.s32 1, %s1120_s15  ;;  %p48_p1 = scmp.ne.s32.totalorder %s1112_s13, %s1108_s12  ;;  %s1124_s16 = sphi %s1156_s16, %s13_s16   ;;  %s1120_s15 = sphi %s1154_s15, %s1286_s15   ;;  %s1116_s14 = sphi %s1152_s14, %s1285_s14   ;;  %s1112_s13 = sphi %s1150_s13, %s1284_s13   ;;  %s1108_s12 = sphi %s1148_s12, %s1283_s12  }
   0x4   : > { %p26_p0 = scmp.ge.s32.totalorder %s25_s17, 3  ;;  %p49_p2 = scmp.eq.s32.totalorder %s1124_s16, 0 }
   0x5   : > { %s41_s19 = sadd.s32 1, %s1112_s13  ;;  %p894_p5 = scmp.ge.s32.totalorder %s1124_s16, 3 }
   0x6   : > { %s1288_s17 = smov (%p26_p0, %s25_s17), 0  ;;  %p50_p3 = por %p49_p2, %p48_p1 }
   0x7   : > { %s37_s18 = ssub.s32 %s1120_s15, %s1288_s17  ;;  %164 = sbr.rel (%p894_p5) target bundleno = 19 (0x13), region = 20 }
   0x8   : > { %p39_p4 = scmp.eq.s32.totalorder %s37_s18, 0 }
   0xa   : > { %s1183_s20 = scalar_select %p39_p4, %s1112_s13, %s41_s19  }
   0xc   : > { %167 = sbr.rel (!%p50_p3) target bundleno = 19 (0x13), region = 24  ;;  %s169_s21 = sand.u32 (%p50_p3), 1, %s1112_s13  }
   0xd   : > { %s962_s22 = smul.u32 (%p50_p3), 12, %s1120_s15 }
   0xe   : > { %s966_s23 = smul.u32 (%p50_p3), 24, %s169_s21 }
   0xf   : > { %s177_s26 = scalar_lea.vmem (%p50_p3), %s1279_s0, %s962_s22 }
  0x10   : > { %v192_v0 = vld [vmem:[%s177_s26] sm:$0xff] (%p50_p3)  ;;  %v896_v2 = vld [vmem:[%s177_s26 + $0x8] sm:$0xf] (%p50_p3)  ;;  %s171_s27 = scalar_lea.vmem (%p50_p3), [#allocation3], %s966_s23  ;;  %v898_v3 = vld [vmem:[%s177_s26 + $0x2c] sm:$0xf] (%p50_p3) }
  0x11   : > { %v194_v1 = vld [vmem:[%s177_s26 + $0x24] sm:$0xff]  ;;  %193 = vst [vmem:[%s171_s27] sm:$0xff] %v192_v0  ;;  %897 = vst [vmem:[%s171_s27 + $0x8] sm:$0xf] %v896_v2 }
  0x12   : > { %195 = vst [vmem:[%s171_s27 + $0xc] sm:$0xff] %v194_v1  ;;  %899 = vst [vmem:[%s171_s27 + $0x14] sm:$0xf] %v898_v3 }
  0x13 PF: > { %p900_p6 = scmp.ge.s32.totalorder %s1124_s16, 1  ;;  %p227_p7 = scmp.lt.s32.totalorder %s1124_s16, 4 }
  0x15   : > { %p228_p8 = pnand %p900_p6, %p227_p7 }
  0x16   : > { %s234_s28 = sand.u32 (!%p228_p8), 1, %s1108_s12   ;;  %s278_s29 = smul.u32 (!%p228_p8), 48, %s1116_s14 }
  0x17   : > { %231 = sbr.rel (%p228_p8) target bundleno = 320 (0x140), region = 54  ;;  %p903_p10 = scmp.ne.s32.totalorder (!%p228_p8), %s1116_s14, 0 }
  0x18   : > { %s967_s30 = smul.u32 (!%p228_p8), 24, %s234_s28  ;;  %p280_p9 = scmp.lt.s32.totalorder (!%p228_p8), %s278_s29, 143 }
  0x1a   : > { %s1200_s8 = scalar_lea.vmem (!%p228_p8), [#allocation3], %s967_s30 }
  0x1c   : > { %s1290_s29 = smov (!%p280_p9, %s278_s29), 143  ;;  %311 = sbr.rel (%p903_p10) target bundleno = 36 (0x24), region = 62 }
  0x1d   : > { %s963_s4 = sshll.u32 %s1290_s29, 3 }
  0x1e   : > { %s1198_s7 = scalar_lea.vmem %s1280_s1, %s963_s4 }
  0x21   : > { %v1126_v4 = vmov 0.0  }
  0x22   : > { %312 = vst [vmem:[#allocation2 + $0x10] sm:$0xff] %v1126_v4  ;;  %313 = vst [vmem:[#allocation2] sm:$0xff] %v1126_v4 }
  0x23   : > { %314 = vst [vmem:[#allocation2 + $0x18] sm:$0xff] %v1126_v4  ;;  %315 = vst [vmem:[#allocation2 + $0x8] sm:$0xff] %v1126_v4 }
  0x24 PF: > { %v1010_v5 = vld [vmem:[%s1198_s7 + $0x74] ss:$8 sps:$4 sm:$0xff]   ;;  %v1012_v6 = vld [vmem:[%s1198_s7 + $0x70] ss:$8 sps:$4 sm:$0xff]   ;;  %v1127_v7 = vmov 0   ;;  %p955_p11 = scmp.ne.s32.totalorder %s1116_s14, 2 }
  0x25   : > { %703 = vmatprep.mubr.bf16.mxu1 %v1127_v7  ;;  %628 = vmatprep.subr.bf16.mxu0 %v1010_v5  ;;  %v1013_v8 = vld [vmem:[%s1198_s7 + $0x64] ss:$8 sps:$4 sm:$0xff]   ;;  %v1015_v9 = vld [vmem:[%s1198_s7 + $0x60] ss:$8 sps:$4 sm:$0xff]   ;;  %v1016_v10 = vld [vmem:[%s1198_s7 + $0x54] ss:$8 sps:$4 sm:$0xff]  }
  0x26   : > { %629 = vmatpush1.bf16.msra.mxu0 %v1012_v6  ;;  %v1018_v11 = vld [vmem:[%s1198_s7 + $0x50] ss:$8 sps:$4 sm:$0xff]   ;;  %v1019_v12 = vld [vmem:[%s1198_s7 + $0x44] ss:$8 sps:$4 sm:$0xff]   ;;  %v1031_v13 = vld [vmem:[%s1198_s7 + $0x174] ss:$8 sps:$4 sm:$0xff]  }
  0x27   : > { %630 = vmatprep.subr.bf16.mxu0 %v1013_v8  ;;  %v1033_v14 = vld [vmem:[%s1198_s7 + $0x170] ss:$8 sps:$4 sm:$0xff]   ;;  %v1021_v15 = vld [vmem:[%s1198_s7 + $0x40] ss:$8 sps:$4 sm:$0xff]   ;;  %v1022_v16 = vld [vmem:[%s1198_s7 + $0x34] ss:$8 sps:$4 sm:$0xff]   ;;  %671 = vmatprep.subr.bf16.mxu1 %v1031_v13 }
  0x28   : > { %v1037_v17 = vld [vmem:[%s1198_s7 + $0x164] ss:$8 sps:$4 sm:$0xff]   ;;  %672 = vmatpush1.bf16.msra.mxu1 %v1033_v14  ;;  %v1039_v18 = vld [vmem:[%s1198_s7 + $0x160] ss:$8 sps:$4 sm:$0xff]   ;;  %v1024_v19 = vld [vmem:[%s1198_s7 + $0x30] ss:$8 sps:$4 sm:$0xff]  }
  0x29   : > { %673 = vmatprep.subr.bf16.mxu1 %v1037_v17  ;;  %v1043_v20 = vld [vmem:[%s1198_s7 + $0x154] ss:$8 sps:$4 sm:$0xff]   ;;  %v1025_v21 = vld [vmem:[%s1198_s7 + $0x24] ss:$8 sps:$4 sm:$0xff]   ;;  %v1045_v22 = vld [vmem:[%s1198_s7 + $0x150] ss:$8 sps:$4 sm:$0xff]  }
  0x2a   : > { %631 = vmatpush1.bf16.msra.mxu0 %v1015_v9  ;;  %v1049_v23 = vld [vmem:[%s1198_s7 + $0x144] ss:$8 sps:$4 sm:$0xff]   ;;  %v1027_v24 = vld [vmem:[%s1198_s7 + $0x20] ss:$8 sps:$4 sm:$0xff]   ;;  %v1028_v25 = vld [vmem:[%s1198_s7 + $0x14] ss:$8 sps:$4 sm:$0xff]  }
  0x2b   : > { %632 = vmatprep.subr.bf16.mxu0 %v1016_v10  ;;  %v1051_v26 = vld [vmem:[%s1198_s7 + $0x140] ss:$8 sps:$4 sm:$0xff]   ;;  %v1055_v27 = vld [vmem:[%s1198_s7 + $0x134] ss:$8 sps:$4 sm:$0xff]   ;;  %v1030_v28 = vld [vmem:[%s1198_s7 + $0x10] ss:$8 sps:$4 sm:$0xff]  }
  0x2c   : > { %674 = vmatpush1.bf16.msra.mxu1 %v1039_v18  ;;  %v1034_v29 = vld [vmem:[%s1198_s7 + $0x4] ss:$8 sps:$4 sm:$0xff]   ;;  %v1057_v30 = vld [vmem:[%s1198_s7 + $0x130] ss:$8 sps:$4 sm:$0xff]   ;;  %v1036_v32 = vld [vmem:[%s1198_s7] ss:$8 sps:$4 sm:$0xff]  }
  0x2d   : > { %675 = vmatprep.subr.bf16.mxu1 %v1043_v20  ;;  %v1061_v31 = vld [vmem:[%s1198_s7 + $0x124] ss:$8 sps:$4 sm:$0xff]   ;;  %v1040_v33 = vld [vmem:[%s1198_s7 + $0xf4] ss:$8 sps:$4 sm:$0xff]   ;;  %v1063_v34 = vld [vmem:[%s1198_s7 + $0x120] ss:$8 sps:$4 sm:$0xff]  }
  0x2e   : > { %633 = vmatpush1.bf16.msra.mxu0 %v1018_v11  ;;  %v1067_v35 = vld [vmem:[%s1198_s7 + $0x114] ss:$8 sps:$4 sm:$0xff]   ;;  %v1042_v36 = vld [vmem:[%s1198_s7 + $0xf0] ss:$8 sps:$4 sm:$0xff]   ;;  %v1046_v37 = vld [vmem:[%s1198_s7 + $0xe4] ss:$8 sps:$4 sm:$0xff]  }
  0x2f   : > { %634 = vmatprep.subr.bf16.mxu0 %v1019_v12  ;;  %v1069_v38 = vld [vmem:[%s1198_s7 + $0x110] ss:$8 sps:$4 sm:$0xff]   ;;  %v1073_v39 = vld [vmem:[%s1198_s7 + $0x104] ss:$8 sps:$4 sm:$0xff]   ;;  %v1048_v41 = vld [vmem:[%s1198_s7 + $0xe0] ss:$8 sps:$4 sm:$0xff]  }
  0x30   : > { %676 = vmatpush1.bf16.msra.mxu1 %v1045_v22  ;;  %v1085_v40 = vld [vmem:[%s1200_s8 + $0x4] ss:$12 sps:$4 sm:$0xff]   ;;  %v1079_v46 = vld [vmem:[%s1200_s8 + $0x8] ss:$12 sps:$4 sm:$0xff]   ;;  %v1083_v56 = vld [vmem:[%s1200_s8] ss:$12 sps:$4 sm:$0xff]  }
  0x31   : > { %677 = vmatprep.subr.bf16.mxu1 %v1049_v23  ;;  %v1052_v42 = vld [vmem:[%s1198_s7 + $0xd4] ss:$8 sps:$4 sm:$0xff]   ;;  %660 = vmatprep.mubr.bf16.mxu0 %v1085_v40  ;;  %v1075_v43 = vld [vmem:[%s1198_s7 + $0x100] ss:$8 sps:$4 sm:$0xff]   ;;  %v1054_v44 = vld [vmem:[%s1198_s7 + $0xd0] ss:$8 sps:$4 sm:$0xff]  }
  0x32   : > { %635 = vmatpush1.bf16.msra.mxu0 %v1021_v15  ;;  %v1058_v45 = vld [vmem:[%s1198_s7 + $0xc4] ss:$8 sps:$4 sm:$0xff]   ;;  %v1060_v47 = vld [vmem:[%s1198_s7 + $0xc0] ss:$8 sps:$4 sm:$0xff]   ;;  %v1064_v48 = vld [vmem:[%s1198_s7 + $0xb4] ss:$8 sps:$4 sm:$0xff]  }
  0x33   : > { %636 = vmatprep.subr.bf16.mxu0 %v1022_v16  ;;  %v1066_v49 = vld [vmem:[%s1198_s7 + $0xb0] ss:$8 sps:$4 sm:$0xff]   ;;  %v1070_v50 = vld [vmem:[%s1198_s7 + $0xa4] ss:$8 sps:$4 sm:$0xff]   ;;  %v1072_v51 = vld [vmem:[%s1198_s7 + $0xa0] ss:$8 sps:$4 sm:$0xff]  }
  0x34   : > { %678 = vmatpush1.bf16.msra.mxu1 %v1051_v26  ;;  %v1076_v52 = vld [vmem:[%s1198_s7 + $0x94] ss:$8 sps:$4 sm:$0xff]   ;;  %v1078_v53 = vld [vmem:[%s1198_s7 + $0x90] ss:$8 sps:$4 sm:$0xff]   ;;  %v1080_v54 = vld [vmem:[%s1198_s7 + $0x84] ss:$8 sps:$4 sm:$0xff]  }
  0x35   : > { %679 = vmatprep.subr.bf16.mxu1 %v1055_v27  ;;  %v1082_v55 = vld [vmem:[%s1198_s7 + $0x80] ss:$8 sps:$4 sm:$0xff]   ;;  %v316_v59 = vld [vmem:[#allocation2 + $0x10] sm:$0xff]  ;;  %v318_v3 = vld [vmem:[#allocation2 + $0x18] sm:$0xff] }
  0x36   : > { %637 = vmatpush1.bf16.msra.mxu0 %v1024_v19  ;;  %v317_v63 = vld [vmem:[#allocation2] sm:$0xff]  ;;  %v319_v8 = vld [vmem:[#allocation2 + $0x8] sm:$0xff] }
  0x37   : > { %638 = vmatprep.subr.bf16.mxu0 %v1025_v21 }
  0x38   : > { %680 = vmatpush1.bf16.msra.mxu1 %v1057_v30 }
  0x39   : > { %681 = vmatprep.subr.bf16.mxu1 %v1061_v31 }
  0x3a   : > { %639 = vmatpush1.bf16.msra.mxu0 %v1027_v24 }
  0x3b   : > { %640 = vmatprep.subr.bf16.mxu0 %v1028_v25 }
  0x3c   : > { %682 = vmatpush1.bf16.msra.mxu1 %v1063_v34 }
  0x3d   : > { %683 = vmatprep.subr.bf16.mxu1 %v1067_v35 }
  0x3e   : > { %641 = vmatpush1.bf16.msra.mxu0 %v1030_v28 }
  0x3f   : > { %642 = vmatprep.subr.bf16.mxu0 %v1034_v29 }
  0x40   : > { %684 = vmatpush1.bf16.msra.mxu1 %v1069_v38 }
  0x41   : > { %685 = vmatprep.subr.bf16.mxu1 %v1073_v39 }
  0x42   : > { %643 = vmatpush1.bf16.msra.mxu0 %v1036_v32 }
  0x43   : > { %644 = vmatprep.subr.bf16.mxu0 %v1040_v33 }
  0x44   : > { %686 = vmatpush1.bf16.msra.mxu1 %v1075_v43 }
  0x46   : > { %645 = vmatpush2.bf16.msra.mxu0 %v1042_v36 }
  0x47   : > { %646 = vmatprep.subr.bf16.mxu0 %v1046_v37  ;;  %704 = vmatmul.mubr.bf16.vlgmr.msra.gmra.mxu1 %v1079_v46 }
  0x4a   : > { %647 = vmatpush2.bf16.msra.mxu0 %v1048_v41 }
  0x4b   : > { %648 = vmatprep.subr.bf16.mxu0 %v1052_v42 }
  0x4e   : > { %649 = vmatpush2.bf16.msra.mxu0 %v1054_v44 }
  0x4f   : > { %650 = vmatprep.subr.bf16.mxu0 %v1058_v45 }
  0x52   : > { %651 = vmatpush2.bf16.msra.mxu0 %v1060_v47 }
  0x53   : > { %652 = vmatprep.subr.bf16.mxu0 %v1064_v48 }
  0x56   : > { %653 = vmatpush2.bf16.msra.mxu0 %v1066_v49 }
  0x57   : > { %654 = vmatprep.subr.bf16.mxu0 %v1070_v50 }
  0x5a   : > { %655 = vmatpush2.bf16.msra.mxu0 %v1072_v51 }
  0x5b   : > { %656 = vmatprep.subr.bf16.mxu0 %v1076_v52 }
  0x5e   : > { %657 = vmatpush2.bf16.msra.mxu0 %v1078_v53 }
  0x5f   : > { %658 = vmatprep.subr.bf16.mxu0 %v1080_v54 }
  0x62   : > { %659 = vmatpush2.bf16.msra.mxu0 %v1082_v55 }
  0x65   : > { %661 = vmatmul.mubr.bf16.vlgmr.msra.gmra.mxu0 %v1083_v56 }
 0x107   : > { %v705_v57 = vpop.f32.mrf.mxu1 }
 0x109   : > { %v707_v58 = vpop.f32.mrf.mxu1 }
 0x10b   : > { %v709_v62 = vpop.f32.mrf.mxu1 }
 0x10d   : > { %v711_v7 = vpop.f32.mrf.mxu1 }
 0x125   : > { %v662_v60 = vpop.f32.mrf.mxu0 }
 0x126   : > { %v706_v61 = vadd.f32 %v705_v57, %v662_v60 }
 0x127   : > { %v664_v0 = vpop.f32.mrf.mxu0 }
 0x128   : > { %v714_v1 = vadd.f32 %v706_v61, %v316_v59  ;;  %v708_v2 = vadd.f32 %v707_v58, %v664_v0 }
 0x129   : > { %v666_v4 = vpop.f32.mrf.mxu0 }
 0x12a   : > { %718 = vst [vmem:[#allocation2 + $0x10] sm:$0xff] %v714_v1  ;;  %v715_v5 = vadd.f32 %v708_v2, %v317_v63  ;;  %v710_v6 = vadd.f32 %v709_v62, %v666_v4 }
 0x12b   : > { %v668_v9 = vpop.f32.mrf.mxu0 }
 0x12c   : > { %719 = vst [vmem:[#allocation2] sm:$0xff] %v715_v5  ;;  %v716_v10 = vadd.f32 %v710_v6, %v318_v3  ;;  %v712_v11 = vadd.f32 %v711_v7, %v668_v9  ;;  %725 = sbr.rel (%p955_p11) target bundleno = 320 (0x140), region = 66 }
 0x12e   : > { %720 = vst [vmem:[#allocation2 + $0x18] sm:$0xff] %v716_v10  ;;  %v717_v12 = vadd.f32 %v712_v11, %v319_v8 }
 0x130   : > { %721 = vst [vmem:[#allocation2 + $0x8] sm:$0xff] %v717_v12 }
 0x131   : > { %v732_v13 = vlaneseq  ;;  %v730_v15 = vld [vmem:[%s1281_s2] sm:$0x3]  ;;  %v726_v16 = vld [vmem:[#allocation2 + $0x10] sm:$0xff] }
 0x133   : > { %v733_v14 = vshrl.u32 %v732_v13, 7  ;;  %v727_v19 = vld [vmem:[#allocation2] sm:$0xff] }
 0x135   : > { %v734_v17 = vsub.s32 0, %v733_v14  ;;  %v738_v18 = vsub.s32 1, %v733_v14  ;;  %v728_v20 = vld [vmem:[#allocation2 + $0x18] sm:$0xff] }
 0x137   : > { %v729_v21 = vld [vmem:[#allocation2 + $0x8] sm:$0xff]  ;;  %v735_v22 = vrot.slane %v730_v15, %v734_v17  ;;  %v739_v23 = vrot.slane %v730_v15, %v738_v18 }
 0x139   : > { %v742_v24 = vadd.f32 %v735_v22, %v726_v16  ;;  %v743_v25 = vadd.f32 %v739_v23, %v727_v19  ;;  %v744_v26 = vadd.f32 %v735_v22, %v728_v20  ;;  %v745_v27 = vadd.f32 %v739_v23, %v729_v21 }
 0x13b   : > { %v746_v28 = vmax.f32 %v742_v24, 0.0  ;;  %v747_v29 = vmax.f32 %v743_v25, 0.0  ;;  %v748_v30 = vmax.f32 %v744_v26, 0.0  ;;  %v749_v31 = vmax.f32 %v745_v27, 0.0 }
 0x13d   : > { %v964_v32 = vpack.c.bf16 %v747_v29, %v746_v28  ;;  %v965_v33 = vpack.c.bf16 %v749_v31, %v748_v30 }
 0x13f   : > { %762 = vst [vmem:[%s1282_s3] sm:$0xff] %v964_v32  ;;  %763 = vst [vmem:[%s1282_s3 + $0x8] sm:$0xff] %v965_v33 }
 0x140 PF: > { %s13_s16 = sadd.s32 1, %s1124_s16   ;;  %s1283_s12 = smov %s1112_s13 }
 0x141   : > { %p10_p12 = scmp.ge.s32.totalorder %s13_s16, 5   ;;  %s1284_s13 = smov %s1183_s20 }
 0x142   : > { %s1285_s14 = smov %s1120_s15  ;;  %s1286_s15 = smov %s1288_s17 }
 0x143   :  { %12 = sbr.rel (!%p10_p12) target bundleno = 3 (0x3), region = 113 }

// kernel: resnet18_forward.32
= control target key start
LH: loop header
LB: loop body
LE: loop exit
PB: predicated region body
PF: predicated region fallthrough
CT: control target
= control target key end

     0   :  { %v239_v1 = vmov 0   ;;  %v35_v18 = vlaneseq  ;;  %s320_s1 = inlined_call_operand.vmem [shape: bf16[128,256], index: 1, kind: input, shape index: {}]   ;;  %s321_s0 = inlined_call_operand.vmem [shape: bf16[16,128], index: 0, kind: input, shape index: {}]   ;;  %s322_s2 = inlined_call_operand.vmem [shape: f32[1,256], index: 2, kind: input, shape index: {}]   ;;  %s323_s3 = inlined_call_operand.vmem [shape: bf16[16,256], index: 3, kind: output, shape index: {}]  }
   0x1   :  { %v214_v0 = vld [vmem:[%s320_s1 + $0x74] ss:$8 sps:$4 sm:$0xff]   ;;  %163 = vmatprep.mubr.bf16.mxu0 %v239_v1  ;;  %v216_v2 = vld [vmem:[%s320_s1 + $0x70] ss:$8 sps:$4 sm:$0xff]   ;;  %v217_v3 = vld [vmem:[%s320_s1 + $0x64] ss:$8 sps:$4 sm:$0xff]  }
   0x2   :  { %131 = vmatprep.subr.bf16.mxu0 %v214_v0  ;;  %v219_v4 = vld [vmem:[%s320_s1 + $0x60] ss:$8 sps:$4 sm:$0xff]   ;;  %v220_v5 = vld [vmem:[%s320_s1 + $0x54] ss:$8 sps:$4 sm:$0xff]   ;;  %v222_v6 = vld [vmem:[%s320_s1 + $0x50] ss:$8 sps:$4 sm:$0xff]  }
   0x3   :  { %132 = vmatpush1.bf16.msra.mxu0 %v216_v2  ;;  %v223_v7 = vld [vmem:[%s320_s1 + $0x44] ss:$8 sps:$4 sm:$0xff]   ;;  %v225_v8 = vld [vmem:[%s320_s1 + $0x40] ss:$8 sps:$4 sm:$0xff]   ;;  %v226_v9 = vld [vmem:[%s320_s1 + $0x34] ss:$8 sps:$4 sm:$0xff]  }
   0x4   :  { %133 = vmatprep.subr.bf16.mxu0 %v217_v3  ;;  %v228_v10 = vld [vmem:[%s320_s1 + $0x30] ss:$8 sps:$4 sm:$0xff]   ;;  %v229_v11 = vld [vmem:[%s320_s1 + $0x24] ss:$8 sps:$4 sm:$0xff]   ;;  %v231_v12 = vld [vmem:[%s320_s1 + $0x20] ss:$8 sps:$4 sm:$0xff]  }
   0x5   :  { %v232_v13 = vld [vmem:[%s320_s1 + $0x14] ss:$8 sps:$4 sm:$0xff]   ;;  %v234_v14 = vld [vmem:[%s320_s1 + $0x10] ss:$8 sps:$4 sm:$0xff]   ;;  %v235_v15 = vld [vmem:[%s320_s1 + $0x4] ss:$8 sps:$4 sm:$0xff]  }
   0x6   :  { %v237_v16 = vld [vmem:[%s320_s1] ss:$8 sps:$4 sm:$0xff]   ;;  %v36_v19 = vshrl.u32 %v35_v18, 7 }
   0x7   :  { %134 = vmatpush1.bf16.msra.mxu0 %v219_v4  ;;  %v238_v17 = vld [vmem:[%s321_s0] sm:$0xff]  }
   0x8   :  { %135 = vmatprep.subr.bf16.mxu0 %v220_v5  ;;  %v37_v20 = vsub.s32 0, %v36_v19  ;;  %v41_v21 = vsub.s32 1, %v36_v19  ;;  %v33_v22 = vld [vmem:[%s322_s2] sm:$0x3] }
   0xa   :  { %v38_v23 = vrot.slane %v33_v22, %v37_v20  ;;  %v42_v24 = vrot.slane %v33_v22, %v41_v21 }
   0xb   :  { %136 = vmatpush1.bf16.msra.mxu0 %v222_v6 }
   0xc   :  { %137 = vmatprep.subr.bf16.mxu0 %v223_v7 }
   0xf   :  { %138 = vmatpush1.bf16.msra.mxu0 %v225_v8 }
  0x10   :  { %139 = vmatprep.subr.bf16.mxu0 %v226_v9 }
  0x13   :  { %140 = vmatpush1.bf16.msra.mxu0 %v228_v10 }
  0x14   :  { %141 = vmatprep.subr.bf16.mxu0 %v229_v11 }
  0x17   :  { %142 = vmatpush1.bf16.msra.mxu0 %v231_v12 }
  0x18   :  { %143 = vmatprep.subr.bf16.mxu0 %v232_v13 }
  0x1b   :  { %144 = vmatpush1.bf16.msra.mxu0 %v234_v14 }
  0x1c   :  { %145 = vmatprep.subr.bf16.mxu0 %v235_v15 }
  0x1f   :  { %146 = vmatpush1.bf16.msra.mxu0 %v237_v16 }
  0x22   :  { %164 = vmatmul.mubr.bf16.vlgmr.msra.gmra.mxu0 %v238_v17 }
  0xe2   :  { %v165_v25 = vpop.f32.mrf.mxu0 }
  0xe3   :  { %v166_v27 = vadd.f32 %v165_v25, %v38_v23 }
  0xe4   :  { %v167_v26 = vpop.f32.mrf.mxu0 }
  0xe5   :  { %v168_v28 = vadd.f32 %v167_v26, %v42_v24 }
  0xe6   :  { %v169_v29 = vpop.f32.mrf.mxu0 }
  0xe7   :  { %v211_v30 = vpack.c.bf16 %v168_v28, %v166_v27  ;;  %v170_v32 = vadd.f32 %v169_v29, %v38_v23 }
  0xe8   :  { %v171_v31 = vpop.f32.mrf.mxu0 }
  0xe9   :  { %186 = vst [vmem:[%s323_s3] sm:$0xff] %v211_v30  ;;  %v172_v33 = vadd.f32 %v171_v31, %v42_v24 }
  0xeb   :  { %v212_v34 = vpack.c.bf16 %v172_v33, %v170_v32 }
  0xed   :  { %187 = vst [vmem:[%s323_s3 + $0x8] sm:$0xff] %v212_v34 }

// kernel: resnet18_forward.34
= control target key start
LH: loop header
LB: loop body
LE: loop exit
PB: predicated region body
PF: predicated region fallthrough
CT: control target
= control target key end

     0   :  { %s1253_s15 = smov 0   ;;  %s1255_s16 = smov 0   ;;  %s1390_s0 = inlined_call_operand.vmem [shape: bf16[16,2304], index: 0, kind: input, shape index: {}]   ;;  %s1391_s1 = inlined_call_operand.vmem [shape: bf16[2304,256], index: 1, kind: input, shape index: {}]   ;;  %s1392_s2 = inlined_call_operand.vmem [shape: f32[1,256], index: 2, kind: input, shape index: {}]   ;;  %s1393_s3 = inlined_call_operand.vmem [shape: bf16[16,256], index: 3, kind: input, shape index: {}]   ;;  %s1394_s4 = inlined_call_operand.vmem [shape: bf16[16,256], index: 4, kind: output, shape index: {}]  }
   0x1   :  { %s1257_s17 = smov 0   ;;  %s1259_s18 = smov 0  }
   0x2   :  { %s1261_s19 = smov 0  }
   0x3 LB: > { %s26_s20 = sadd.s32 1, %s1220_s18  ;;  %p49_p1 = scmp.ne.s32.totalorder %s1212_s16, %s1208_s15  ;;  %s1224_s19 = sphi %s1261_s19, %s14_s19   ;;  %s1220_s18 = sphi %s1259_s18, %s1398_s18   ;;  %s1216_s17 = sphi %s1257_s17, %s1397_s17   ;;  %s1212_s16 = sphi %s1255_s16, %s1396_s16   ;;  %s1208_s15 = sphi %s1253_s15, %s1395_s15  }
   0x4   : > { %p27_p0 = scmp.ge.s32.totalorder %s26_s20, 6  ;;  %p50_p2 = scmp.eq.s32.totalorder %s1224_s19, 0 }
   0x5   : > { %s42_s22 = sadd.s32 1, %s1212_s16  ;;  %p994_p5 = scmp.ge.s32.totalorder %s1224_s19, 6 }
   0x6   : > { %s1400_s20 = smov (%p27_p0, %s26_s20), 0  ;;  %p51_p3 = por %p50_p2, %p49_p1 }
   0x7   : > { %s38_s21 = ssub.s32 %s1220_s18, %s1400_s20  ;;  %208 = sbr.rel (%p994_p5) target bundleno = 19 (0x13), region = 24 }
   0x8   : > { %p40_p4 = scmp.eq.s32.totalorder %s38_s21, 0 }
   0xa   : > { %s1288_s23 = scalar_select %p40_p4, %s1212_s16, %s42_s22  }
   0xc   : > { %211 = sbr.rel (!%p51_p3) target bundleno = 19 (0x13), region = 28  ;;  %s213_s24 = sand.u32 (%p51_p3), 1, %s1212_s16  }
   0xd   : > { %s1062_s25 = smul.u32 (%p51_p3), 12, %s1220_s18 }
   0xe   : > { %s1066_s26 = smul.u32 (%p51_p3), 24, %s213_s24 }
   0xf   : > { %s221_s29 = scalar_lea.vmem (%p51_p3), %s1390_s0, %s1062_s25 }
  0x10   : > { %v236_v0 = vld [vmem:[%s221_s29] sm:$0xff] (%p51_p3)  ;;  %v238_v1 = vld [vmem:[%s221_s29 + $0x48] sm:$0xff] (%p51_p3)  ;;  %s215_s30 = scalar_lea.vmem (%p51_p3), [#allocation3], %s1066_s26  ;;  %v998_v3 = vld [vmem:[%s221_s29 + $0x50] sm:$0xf] (%p51_p3) }
  0x11   : > { %v996_v2 = vld [vmem:[%s221_s29 + $0x8] sm:$0xf]  ;;  %237 = vst [vmem:[%s215_s30] sm:$0xff] %v236_v0  ;;  %239 = vst [vmem:[%s215_s30 + $0xc] sm:$0xff] %v238_v1 }
  0x12   : > { %997 = vst [vmem:[%s215_s30 + $0x8] sm:$0xf] %v996_v2  ;;  %999 = vst [vmem:[%s215_s30 + $0x14] sm:$0xf] %v998_v3 }
  0x13 PF: > { %p1000_p6 = scmp.ge.s32.totalorder %s1224_s19, 1  ;;  %p271_p7 = scmp.lt.s32.totalorder %s1224_s19, 7 }
  0x15   : > { %p272_p8 = pnand %p1000_p6, %p271_p7 }
  0x16   : > { %s278_s5 = sand.u32 (!%p272_p8), 1, %s1208_s15   ;;  %s334_s6 = smul.u32 (!%p272_p8), 48, %s1216_s17 }
  0x17   : > { %275 = sbr.rel (%p272_p8) target bundleno = 322 (0x142), region = 58  ;;  %p1003_p10 = scmp.ne.s32.totalorder (!%p272_p8), %s1216_s17, 0 }
  0x18   : > { %s1067_s7 = smul.u32 (!%p272_p8), 24, %s278_s5  ;;  %p336_p9 = scmp.lt.s32.totalorder (!%p272_p8), %s334_s6, 287 }
  0x1a   : > { %s1305_s12 = scalar_lea.vmem (!%p272_p8), [#allocation3], %s1067_s7 }
  0x1c   : > { %s1402_s6 = smov (!%p336_p9, %s334_s6), 287  ;;  %379 = sbr.rel (%p1003_p10) target bundleno = 36 (0x24), region = 66 }
  0x1d   : > { %s1063_s8 = sshll.u32 %s1402_s6, 3 }
  0x1e   : > { %s1303_s11 = scalar_lea.vmem %s1391_s1, %s1063_s8 }
  0x21   : > { %v1226_v4 = vmov 0.0  }
  0x22   : > { %380 = vst [vmem:[#allocation2 + $0x10] sm:$0xff] %v1226_v4  ;;  %381 = vst [vmem:[#allocation2] sm:$0xff] %v1226_v4 }
  0x23   : > { %382 = vst [vmem:[#allocation2 + $0x18] sm:$0xff] %v1226_v4  ;;  %383 = vst [vmem:[#allocation2 + $0x8] sm:$0xff] %v1226_v4 }
  0x24 PF: > { %v1110_v5 = vld [vmem:[%s1303_s11 + $0x74] ss:$8 sps:$4 sm:$0xff]   ;;  %v1112_v6 = vld [vmem:[%s1303_s11 + $0x70] ss:$8 sps:$4 sm:$0xff]   ;;  %v1227_v7 = vmov 0   ;;  %p1055_p11 = scmp.ne.s32.totalorder %s1216_s17, 5 }
  0x25   : > { %771 = vmatprep.mubr.bf16.mxu1 %v1227_v7  ;;  %696 = vmatprep.subr.bf16.mxu0 %v1110_v5  ;;  %v1113_v8 = vld [vmem:[%s1303_s11 + $0x64] ss:$8 sps:$4 sm:$0xff]   ;;  %v1115_v9 = vld [vmem:[%s1303_s11 + $0x60] ss:$8 sps:$4 sm:$0xff]   ;;  %v1116_v10 = vld [vmem:[%s1303_s11 + $0x54] ss:$8 sps:$4 sm:$0xff]  }
  0x26   : > { %697 = vmatpush1.bf16.msra.mxu0 %v1112_v6  ;;  %v1118_v11 = vld [vmem:[%s1303_s11 + $0x50] ss:$8 sps:$4 sm:$0xff]   ;;  %v1119_v12 = vld [vmem:[%s1303_s11 + $0x44] ss:$8 sps:$4 sm:$0xff]   ;;  %v1131_v13 = vld [vmem:[%s1303_s11 + $0x174] ss:$8 sps:$4 sm:$0xff]  }
  0x27   : > { %698 = vmatprep.subr.bf16.mxu0 %v1113_v8  ;;  %v1133_v14 = vld [vmem:[%s1303_s11 + $0x170] ss:$8 sps:$4 sm:$0xff]   ;;  %v1121_v15 = vld [vmem:[%s1303_s11 + $0x40] ss:$8 sps:$4 sm:$0xff]   ;;  %v1122_v16 = vld [vmem:[%s1303_s11 + $0x34] ss:$8 sps:$4 sm:$0xff]   ;;  %739 = vmatprep.subr.bf16.mxu1 %v1131_v13 }
  0x28   : > { %v1137_v17 = vld [vmem:[%s1303_s11 + $0x164] ss:$8 sps:$4 sm:$0xff]   ;;  %740 = vmatpush1.bf16.msra.mxu1 %v1133_v14  ;;  %v1139_v18 = vld [vmem:[%s1303_s11 + $0x160] ss:$8 sps:$4 sm:$0xff]   ;;  %v1124_v19 = vld [vmem:[%s1303_s11 + $0x30] ss:$8 sps:$4 sm:$0xff]  }
  0x29   : > { %741 = vmatprep.subr.bf16.mxu1 %v1137_v17  ;;  %v1143_v20 = vld [vmem:[%s1303_s11 + $0x154] ss:$8 sps:$4 sm:$0xff]   ;;  %v1125_v21 = vld [vmem:[%s1303_s11 + $0x24] ss:$8 sps:$4 sm:$0xff]   ;;  %v1145_v22 = vld [vmem:[%s1303_s11 + $0x150] ss:$8 sps:$4 sm:$0xff]  }
  0x2a   : > { %699 = vmatpush1.bf16.msra.mxu0 %v1115_v9  ;;  %v1149_v23 = vld [vmem:[%s1303_s11 + $0x144] ss:$8 sps:$4 sm:$0xff]   ;;  %v1127_v24 = vld [vmem:[%s1303_s11 + $0x20] ss:$8 sps:$4 sm:$0xff]   ;;  %v1128_v25 = vld [vmem:[%s1303_s11 + $0x14] ss:$8 sps:$4 sm:$0xff]  }
  0x2b   : > { %700 = vmatprep.subr.bf16.mxu0 %v1116_v10  ;;  %v1151_v26 = vld [vmem:[%s1303_s11 + $0x140] ss:$8 sps:$4 sm:$0xff]   ;;  %v1155_v27 = vld [vmem:[%s1303_s11 + $0x134] ss:$8 sps:$4 sm:$0xff]   ;;  %v1130_v28 = vld [vmem:[%s1303_s11 + $0x10] ss:$8 sps:$4 sm:$0xff]  }
  0x2c   : > { %742 = vmatpush1.bf16.msra.mxu1 %v1139_v18  ;;  %v1134_v29 = vld [vmem:[%s1303_s11 + $0x4] ss:$8 sps:$4 sm:$0xff]   ;;  %v1157_v30 = vld [vmem:[%s1303_s11 + $0x130] ss:$8 sps:$4 sm:$0xff]   ;;  %v1136_v32 = vld [vmem:[%s1303_s11] ss:$8 sps:$4 sm:$0xff]  }
  0x2d   : > { %743 = vmatprep.subr.bf16.mxu1 %v1143_v20  ;;  %v1161_v31 = vld [vmem:[%s1303_s11 + $0x124] ss:$8 sps:$4 sm:$0xff]   ;;  %v1140_v33 = vld [vmem:[%s1303_s11 + $0xf4] ss:$8 sps:$4 sm:$0xff]   ;;  %v1163_v34 = vld [vmem:[%s1303_s11 + $0x120] ss:$8 sps:$4 sm:$0xff]  }
  0x2e   : > { %701 = vmatpush1.bf16.msra.mxu0 %v1118_v11  ;;  %v1167_v35 = vld [vmem:[%s1303_s11 + $0x114] ss:$8 sps:$4 sm:$0xff]   ;;  %v1142_v36 = vld [vmem:[%s1303_s11 + $0xf0] ss:$8 sps:$4 sm:$0xff]   ;;  %v1146_v37 = vld [vmem:[%s1303_s11 + $0xe4] ss:$8 sps:$4 sm:$0xff]  }
  0x2f   : > { %702 = vmatprep.subr.bf16.mxu0 %v1119_v12  ;;  %v1169_v38 = vld [vmem:[%s1303_s11 + $0x110] ss:$8 sps:$4 sm:$0xff]   ;;  %v1173_v39 = vld [vmem:[%s1303_s11 + $0x104] ss:$8 sps:$4 sm:$0xff]   ;;  %v1148_v41 = vld [vmem:[%s1303_s11 + $0xe0] ss:$8 sps:$4 sm:$0xff]  }
  0x30   : > { %744 = vmatpush1.bf16.msra.mxu1 %v1145_v22  ;;  %v1185_v40 = vld [vmem:[%s1305_s12 + $0x4] ss:$12 sps:$4 sm:$0xff]   ;;  %v1179_v46 = vld [vmem:[%s1305_s12 + $0x8] ss:$12 sps:$4 sm:$0xff]   ;;  %v1183_v56 = vld [vmem:[%s1305_s12] ss:$12 sps:$4 sm:$0xff]  }
  0x31   : > { %745 = vmatprep.subr.bf16.mxu1 %v1149_v23  ;;  %v1152_v42 = vld [vmem:[%s1303_s11 + $0xd4] ss:$8 sps:$4 sm:$0xff]   ;;  %728 = vmatprep.mubr.bf16.mxu0 %v1185_v40  ;;  %v1175_v43 = vld [vmem:[%s1303_s11 + $0x100] ss:$8 sps:$4 sm:$0xff]   ;;  %v1154_v44 = vld [vmem:[%s1303_s11 + $0xd0] ss:$8 sps:$4 sm:$0xff]  }
  0x32   : > { %703 = vmatpush1.bf16.msra.mxu0 %v1121_v15  ;;  %v1158_v45 = vld [vmem:[%s1303_s11 + $0xc4] ss:$8 sps:$4 sm:$0xff]   ;;  %v1160_v47 = vld [vmem:[%s1303_s11 + $0xc0] ss:$8 sps:$4 sm:$0xff]   ;;  %v1164_v48 = vld [vmem:[%s1303_s11 + $0xb4] ss:$8 sps:$4 sm:$0xff]  }
  0x33   : > { %704 = vmatprep.subr.bf16.mxu0 %v1122_v16  ;;  %v1166_v49 = vld [vmem:[%s1303_s11 + $0xb0] ss:$8 sps:$4 sm:$0xff]   ;;  %v1170_v50 = vld [vmem:[%s1303_s11 + $0xa4] ss:$8 sps:$4 sm:$0xff]   ;;  %v1172_v51 = vld [vmem:[%s1303_s11 + $0xa0] ss:$8 sps:$4 sm:$0xff]  }
  0x34   : > { %746 = vmatpush1.bf16.msra.mxu1 %v1151_v26  ;;  %v1176_v52 = vld [vmem:[%s1303_s11 + $0x94] ss:$8 sps:$4 sm:$0xff]   ;;  %v1178_v53 = vld [vmem:[%s1303_s11 + $0x90] ss:$8 sps:$4 sm:$0xff]   ;;  %v1180_v54 = vld [vmem:[%s1303_s11 + $0x84] ss:$8 sps:$4 sm:$0xff]  }
  0x35   : > { %747 = vmatprep.subr.bf16.mxu1 %v1155_v27  ;;  %v1182_v55 = vld [vmem:[%s1303_s11 + $0x80] ss:$8 sps:$4 sm:$0xff]   ;;  %v384_v59 = vld [vmem:[#allocation2 + $0x10] sm:$0xff]  ;;  %v386_v3 = vld [vmem:[#allocation2 + $0x18] sm:$0xff] }
  0x36   : > { %705 = vmatpush1.bf16.msra.mxu0 %v1124_v19  ;;  %v385_v63 = vld [vmem:[#allocation2] sm:$0xff]  ;;  %v387_v8 = vld [vmem:[#allocation2 + $0x8] sm:$0xff] }
  0x37   : > { %706 = vmatprep.subr.bf16.mxu0 %v1125_v21 }
  0x38   : > { %748 = vmatpush1.bf16.msra.mxu1 %v1157_v30 }
  0x39   : > { %749 = vmatprep.subr.bf16.mxu1 %v1161_v31 }
  0x3a   : > { %707 = vmatpush1.bf16.msra.mxu0 %v1127_v24 }
  0x3b   : > { %708 = vmatprep.subr.bf16.mxu0 %v1128_v25 }
  0x3c   : > { %750 = vmatpush1.bf16.msra.mxu1 %v1163_v34 }
  0x3d   : > { %751 = vmatprep.subr.bf16.mxu1 %v1167_v35 }
  0x3e   : > { %709 = vmatpush1.bf16.msra.mxu0 %v1130_v28 }
  0x3f   : > { %710 = vmatprep.subr.bf16.mxu0 %v1134_v29 }
  0x40   : > { %752 = vmatpush1.bf16.msra.mxu1 %v1169_v38 }
  0x41   : > { %753 = vmatprep.subr.bf16.mxu1 %v1173_v39 }
  0x42   : > { %711 = vmatpush1.bf16.msra.mxu0 %v1136_v32 }
  0x43   : > { %712 = vmatprep.subr.bf16.mxu0 %v1140_v33 }
  0x44   : > { %754 = vmatpush1.bf16.msra.mxu1 %v1175_v43 }
  0x46   : > { %713 = vmatpush2.bf16.msra.mxu0 %v1142_v36 }
  0x47   : > { %714 = vmatprep.subr.bf16.mxu0 %v1146_v37  ;;  %772 = vmatmul.mubr.bf16.vlgmr.msra.gmra.mxu1 %v1179_v46 }
  0x4a   : > { %715 = vmatpush2.bf16.msra.mxu0 %v1148_v41 }
  0x4b   : > { %716 = vmatprep.subr.bf16.mxu0 %v1152_v42 }
  0x4e   : > { %717 = vmatpush2.bf16.msra.mxu0 %v1154_v44 }
  0x4f   : > { %718 = vmatprep.subr.bf16.mxu0 %v1158_v45 }
  0x52   : > { %719 = vmatpush2.bf16.msra.mxu0 %v1160_v47 }
  0x53   : > { %720 = vmatprep.subr.bf16.mxu0 %v1164_v48 }
  0x56   : > { %721 = vmatpush2.bf16.msra.mxu0 %v1166_v49 }
  0x57   : > { %722 = vmatprep.subr.bf16.mxu0 %v1170_v50 }
  0x5a   : > { %723 = vmatpush2.bf16.msra.mxu0 %v1172_v51 }
  0x5b   : > { %724 = vmatprep.subr.bf16.mxu0 %v1176_v52 }
  0x5e   : > { %725 = vmatpush2.bf16.msra.mxu0 %v1178_v53 }
  0x5f   : > { %726 = vmatprep.subr.bf16.mxu0 %v1180_v54 }
  0x62   : > { %727 = vmatpush2.bf16.msra.mxu0 %v1182_v55 }
  0x65   : > { %729 = vmatmul.mubr.bf16.vlgmr.msra.gmra.mxu0 %v1183_v56 }
 0x107   : > { %v773_v57 = vpop.f32.mrf.mxu1 }
 0x109   : > { %v775_v58 = vpop.f32.mrf.mxu1 }
 0x10b   : > { %v777_v62 = vpop.f32.mrf.mxu1 }
 0x10d   : > { %v779_v7 = vpop.f32.mrf.mxu1 }
 0x125   : > { %v730_v60 = vpop.f32.mrf.mxu0 }
 0x126   : > { %v774_v61 = vadd.f32 %v773_v57, %v730_v60 }
 0x127   : > { %v732_v0 = vpop.f32.mrf.mxu0 }
 0x128   : > { %v782_v1 = vadd.f32 %v774_v61, %v384_v59  ;;  %v776_v2 = vadd.f32 %v775_v58, %v732_v0 }
 0x129   : > { %v734_v4 = vpop.f32.mrf.mxu0 }
 0x12a   : > { %786 = vst [vmem:[#allocation2 + $0x10] sm:$0xff] %v782_v1  ;;  %v783_v5 = vadd.f32 %v776_v2, %v385_v63  ;;  %v778_v6 = vadd.f32 %v777_v62, %v734_v4 }
 0x12b   : > { %v736_v9 = vpop.f32.mrf.mxu0 }
 0x12c   : > { %787 = vst [vmem:[#allocation2] sm:$0xff] %v783_v5  ;;  %v784_v10 = vadd.f32 %v778_v6, %v386_v3  ;;  %v780_v11 = vadd.f32 %v779_v7, %v736_v9  ;;  %793 = sbr.rel (%p1055_p11) target bundleno = 322 (0x142), region = 70 }
 0x12e   : > { %788 = vst [vmem:[#allocation2 + $0x18] sm:$0xff] %v784_v10  ;;  %v785_v12 = vadd.f32 %v780_v11, %v387_v8 }
 0x130   : > { %789 = vst [vmem:[#allocation2 + $0x8] sm:$0xff] %v785_v12 }
 0x131   : > { %v800_v13 = vlaneseq  ;;  %v814_v15 = vld [vmem:[%s1393_s3] sm:$0xff]  ;;  %v815_v17 = vld [vmem:[%s1393_s3 + $0x8] sm:$0xff]  ;;  %v794_v18 = vld [vmem:[#allocation2 + $0x10] sm:$0xff] }
 0x132   : > { %v798_v16 = vld [vmem:[%s1392_s2] sm:$0x3]  ;;  %v816_v22 = vunpack.c.l.bf16 %v814_v15  ;;  %v817_v23 = vunpack.c.h.bf16 %v814_v15  ;;  %v818_v28 = vunpack.c.l.bf16 %v815_v17  ;;  %v819_v29 = vunpack.c.h.bf16 %v815_v17 }
 0x133   : > { %v801_v14 = vshrl.u32 %v800_v13, 7  ;;  %v795_v21 = vld [vmem:[#allocation2] sm:$0xff] }
 0x135   : > { %v802_v19 = vsub.s32 0, %v801_v14  ;;  %v806_v20 = vsub.s32 1, %v801_v14  ;;  %v796_v24 = vld [vmem:[#allocation2 + $0x18] sm:$0xff] }
 0x137   : > { %v797_v25 = vld [vmem:[#allocation2 + $0x8] sm:$0xff]  ;;  %v803_v26 = vrot.slane %v798_v16, %v802_v19  ;;  %v807_v27 = vrot.slane %v798_v16, %v806_v20 }
 0x139   : > { %v810_v30 = vadd.f32 %v803_v26, %v794_v18  ;;  %v811_v31 = vadd.f32 %v807_v27, %v795_v21  ;;  %v812_v32 = vadd.f32 %v803_v26, %v796_v24  ;;  %v813_v33 = vadd.f32 %v807_v27, %v797_v25 }
 0x13b   : > { %v820_v34 = vadd.f32 %v816_v22, %v810_v30  ;;  %v821_v35 = vadd.f32 %v817_v23, %v811_v31  ;;  %v822_v36 = vadd.f32 %v818_v28, %v812_v32  ;;  %v823_v37 = vadd.f32 %v819_v29, %v813_v33 }
 0x13d   : > { %v824_v38 = vmax.f32 %v820_v34, 0.0  ;;  %v825_v39 = vmax.f32 %v821_v35, 0.0  ;;  %v826_v40 = vmax.f32 %v822_v36, 0.0  ;;  %v827_v41 = vmax.f32 %v823_v37, 0.0 }
 0x13f   : > { %v1064_v42 = vpack.c.bf16 %v825_v39, %v824_v38  ;;  %v1065_v43 = vpack.c.bf16 %v827_v41, %v826_v40 }
 0x141   : > { %840 = vst [vmem:[%s1394_s4] sm:$0xff] %v1064_v42  ;;  %841 = vst [vmem:[%s1394_s4 + $0x8] sm:$0xff] %v1065_v43 }
 0x142 PF: > { %s14_s19 = sadd.s32 1, %s1224_s19   ;;  %s1395_s15 = smov %s1212_s16 }
 0x143   : > { %p11_p12 = scmp.ge.s32.totalorder %s14_s19, 8   ;;  %s1396_s16 = smov %s1288_s23 }
 0x144   : > { %s1397_s17 = smov %s1220_s18  ;;  %s1398_s18 = smov %s1400_s20 }
 0x145   :  { %13 = sbr.rel (!%p11_p12) target bundleno = 3 (0x3), region = 120 }

// kernel: resnet18_forward.35
= control target key start
LH: loop header
LB: loop body
LE: loop exit
PB: predicated region body
PF: predicated region fallthrough
CT: control target
= control target key end

     0   :  { %s1148_s12 = smov 0   ;;  %s1150_s13 = smov 0   ;;  %s1279_s0 = inlined_call_operand.vmem [shape: bf16[16,2304], index: 0, kind: input, shape index: {}]   ;;  %s1280_s1 = inlined_call_operand.vmem [shape: bf16[2304,256], index: 1, kind: input, shape index: {}]   ;;  %s1281_s2 = inlined_call_operand.vmem [shape: f32[1,256], index: 2, kind: input, shape index: {}]   ;;  %s1282_s3 = inlined_call_operand.vmem [shape: bf16[16,256], index: 3, kind: output, shape index: {}]  }
   0x1   :  { %s1152_s14 = smov 0   ;;  %s1154_s15 = smov 0  }
   0x2   :  { %s1156_s16 = smov 0  }
   0x3 LB: > { %s25_s17 = sadd.s32 1, %s1120_s15  ;;  %p48_p1 = scmp.ne.s32.totalorder %s1112_s13, %s1108_s12  ;;  %s1124_s16 = sphi %s1156_s16, %s13_s16   ;;  %s1120_s15 = sphi %s1154_s15, %s1286_s15   ;;  %s1116_s14 = sphi %s1152_s14, %s1285_s14   ;;  %s1112_s13 = sphi %s1150_s13, %s1284_s13   ;;  %s1108_s12 = sphi %s1148_s12, %s1283_s12  }
   0x4   : > { %p26_p0 = scmp.ge.s32.totalorder %s25_s17, 6  ;;  %p49_p2 = scmp.eq.s32.totalorder %s1124_s16, 0 }
   0x5   : > { %s41_s19 = sadd.s32 1, %s1112_s13  ;;  %p894_p5 = scmp.ge.s32.totalorder %s1124_s16, 6 }
   0x6   : > { %s1288_s17 = smov (%p26_p0, %s25_s17), 0  ;;  %p50_p3 = por %p49_p2, %p48_p1 }
   0x7   : > { %s37_s18 = ssub.s32 %s1120_s15, %s1288_s17  ;;  %164 = sbr.rel (%p894_p5) target bundleno = 19 (0x13), region = 20 }
   0x8   : > { %p39_p4 = scmp.eq.s32.totalorder %s37_s18, 0 }
   0xa   : > { %s1183_s20 = scalar_select %p39_p4, %s1112_s13, %s41_s19  }
   0xc   : > { %167 = sbr.rel (!%p50_p3) target bundleno = 19 (0x13), region = 24  ;;  %s169_s21 = sand.u32 (%p50_p3), 1, %s1112_s13  }
   0xd   : > { %s962_s22 = smul.u32 (%p50_p3), 12, %s1120_s15 }
   0xe   : > { %s966_s23 = smul.u32 (%p50_p3), 24, %s169_s21 }
   0xf   : > { %s177_s26 = scalar_lea.vmem (%p50_p3), %s1279_s0, %s962_s22 }
  0x10   : > { %v192_v0 = vld [vmem:[%s177_s26] sm:$0xff] (%p50_p3)  ;;  %v194_v1 = vld [vmem:[%s177_s26 + $0x48] sm:$0xff] (%p50_p3)  ;;  %s171_s27 = scalar_lea.vmem (%p50_p3), [#allocation3], %s966_s23  ;;  %v898_v3 = vld [vmem:[%s177_s26 + $0x50] sm:$0xf] (%p50_p3) }
  0x11   : > { %v896_v2 = vld [vmem:[%s177_s26 + $0x8] sm:$0xf]  ;;  %193 = vst [vmem:[%s171_s27] sm:$0xff] %v192_v0  ;;  %195 = vst [vmem:[%s171_s27 + $0xc] sm:$0xff] %v194_v1 }
  0x12   : > { %897 = vst [vmem:[%s171_s27 + $0x8] sm:$0xf] %v896_v2  ;;  %899 = vst [vmem:[%s171_s27 + $0x14] sm:$0xf] %v898_v3 }
  0x13 PF: > { %p900_p6 = scmp.ge.s32.totalorder %s1124_s16, 1  ;;  %p227_p7 = scmp.lt.s32.totalorder %s1124_s16, 7 }
  0x15   : > { %p228_p8 = pnand %p900_p6, %p227_p7 }
  0x16   : > { %s234_s28 = sand.u32 (!%p228_p8), 1, %s1108_s12   ;;  %s278_s29 = smul.u32 (!%p228_p8), 48, %s1116_s14 }
  0x17   : > { %231 = sbr.rel (%p228_p8) target bundleno = 320 (0x140), region = 54  ;;  %p903_p10 = scmp.ne.s32.totalorder (!%p228_p8), %s1116_s14, 0 }
  0x18   : > { %s967_s30 = smul.u32 (!%p228_p8), 24, %s234_s28  ;;  %p280_p9 = scmp.lt.s32.totalorder (!%p228_p8), %s278_s29, 287 }
  0x1a   : > { %s1200_s8 = scalar_lea.vmem (!%p228_p8), [#allocation3], %s967_s30 }
  0x1c   : > { %s1290_s29 = smov (!%p280_p9, %s278_s29), 287  ;;  %311 = sbr.rel (%p903_p10) target bundleno = 36 (0x24), region = 62 }
  0x1d   : > { %s963_s4 = sshll.u32 %s1290_s29, 3 }
  0x1e   : > { %s1198_s7 = scalar_lea.vmem %s1280_s1, %s963_s4 }
  0x21   : > { %v1126_v4 = vmov 0.0  }
  0x22   : > { %312 = vst [vmem:[#allocation2 + $0x10] sm:$0xff] %v1126_v4  ;;  %313 = vst [vmem:[#allocation2] sm:$0xff] %v1126_v4 }
  0x23   : > { %314 = vst [vmem:[#allocation2 + $0x18] sm:$0xff] %v1126_v4  ;;  %315 = vst [vmem:[#allocation2 + $0x8] sm:$0xff] %v1126_v4 }
  0x24 PF: > { %v1010_v5 = vld [vmem:[%s1198_s7 + $0x74] ss:$8 sps:$4 sm:$0xff]   ;;  %v1012_v6 = vld [vmem:[%s1198_s7 + $0x70] ss:$8 sps:$4 sm:$0xff]   ;;  %v1127_v7 = vmov 0   ;;  %p955_p11 = scmp.ne.s32.totalorder %s1116_s14, 5 }
  0x25   : > { %703 = vmatprep.mubr.bf16.mxu1 %v1127_v7  ;;  %628 = vmatprep.subr.bf16.mxu0 %v1010_v5  ;;  %v1013_v8 = vld [vmem:[%s1198_s7 + $0x64] ss:$8 sps:$4 sm:$0xff]   ;;  %v1015_v9 = vld [vmem:[%s1198_s7 + $0x60] ss:$8 sps:$4 sm:$0xff]   ;;  %v1016_v10 = vld [vmem:[%s1198_s7 + $0x54] ss:$8 sps:$4 sm:$0xff]  }
  0x26   : > { %629 = vmatpush1.bf16.msra.mxu0 %v1012_v6  ;;  %v1018_v11 = vld [vmem:[%s1198_s7 + $0x50] ss:$8 sps:$4 sm:$0xff]   ;;  %v1019_v12 = vld [vmem:[%s1198_s7 + $0x44] ss:$8 sps:$4 sm:$0xff]   ;;  %v1031_v13 = vld [vmem:[%s1198_s7 + $0x174] ss:$8 sps:$4 sm:$0xff]  }
  0x27   : > { %630 = vmatprep.subr.bf16.mxu0 %v1013_v8  ;;  %v1033_v14 = vld [vmem:[%s1198_s7 + $0x170] ss:$8 sps:$4 sm:$0xff]   ;;  %v1021_v15 = vld [vmem:[%s1198_s7 + $0x40] ss:$8 sps:$4 sm:$0xff]   ;;  %v1022_v16 = vld [vmem:[%s1198_s7 + $0x34] ss:$8 sps:$4 sm:$0xff]   ;;  %671 = vmatprep.subr.bf16.mxu1 %v1031_v13 }
  0x28   : > { %v1037_v17 = vld [vmem:[%s1198_s7 + $0x164] ss:$8 sps:$4 sm:$0xff]   ;;  %672 = vmatpush1.bf16.msra.mxu1 %v1033_v14  ;;  %v1039_v18 = vld [vmem:[%s1198_s7 + $0x160] ss:$8 sps:$4 sm:$0xff]   ;;  %v1024_v19 = vld [vmem:[%s1198_s7 + $0x30] ss:$8 sps:$4 sm:$0xff]  }
  0x29   : > { %673 = vmatprep.subr.bf16.mxu1 %v1037_v17  ;;  %v1043_v20 = vld [vmem:[%s1198_s7 + $0x154] ss:$8 sps:$4 sm:$0xff]   ;;  %v1025_v21 = vld [vmem:[%s1198_s7 + $0x24] ss:$8 sps:$4 sm:$0xff]   ;;  %v1045_v22 = vld [vmem:[%s1198_s7 + $0x150] ss:$8 sps:$4 sm:$0xff]  }
  0x2a   : > { %631 = vmatpush1.bf16.msra.mxu0 %v1015_v9  ;;  %v1049_v23 = vld [vmem:[%s1198_s7 + $0x144] ss:$8 sps:$4 sm:$0xff]   ;;  %v1027_v24 = vld [vmem:[%s1198_s7 + $0x20] ss:$8 sps:$4 sm:$0xff]   ;;  %v1028_v25 = vld [vmem:[%s1198_s7 + $0x14] ss:$8 sps:$4 sm:$0xff]  }
  0x2b   : > { %632 = vmatprep.subr.bf16.mxu0 %v1016_v10  ;;  %v1051_v26 = vld [vmem:[%s1198_s7 + $0x140] ss:$8 sps:$4 sm:$0xff]   ;;  %v1055_v27 = vld [vmem:[%s1198_s7 + $0x134] ss:$8 sps:$4 sm:$0xff]   ;;  %v1030_v28 = vld [vmem:[%s1198_s7 + $0x10] ss:$8 sps:$4 sm:$0xff]  }
  0x2c   : > { %674 = vmatpush1.bf16.msra.mxu1 %v1039_v18  ;;  %v1034_v29 = vld [vmem:[%s1198_s7 + $0x4] ss:$8 sps:$4 sm:$0xff]   ;;  %v1057_v30 = vld [vmem:[%s1198_s7 + $0x130] ss:$8 sps:$4 sm:$0xff]   ;;  %v1036_v32 = vld [vmem:[%s1198_s7] ss:$8 sps:$4 sm:$0xff]  }
  0x2d   : > { %675 = vmatprep.subr.bf16.mxu1 %v1043_v20  ;;  %v1061_v31 = vld [vmem:[%s1198_s7 + $0x124] ss:$8 sps:$4 sm:$0xff]   ;;  %v1040_v33 = vld [vmem:[%s1198_s7 + $0xf4] ss:$8 sps:$4 sm:$0xff]   ;;  %v1063_v34 = vld [vmem:[%s1198_s7 + $0x120] ss:$8 sps:$4 sm:$0xff]  }
  0x2e   : > { %633 = vmatpush1.bf16.msra.mxu0 %v1018_v11  ;;  %v1067_v35 = vld [vmem:[%s1198_s7 + $0x114] ss:$8 sps:$4 sm:$0xff]   ;;  %v1042_v36 = vld [vmem:[%s1198_s7 + $0xf0] ss:$8 sps:$4 sm:$0xff]   ;;  %v1046_v37 = vld [vmem:[%s1198_s7 + $0xe4] ss:$8 sps:$4 sm:$0xff]  }
  0x2f   : > { %634 = vmatprep.subr.bf16.mxu0 %v1019_v12  ;;  %v1069_v38 = vld [vmem:[%s1198_s7 + $0x110] ss:$8 sps:$4 sm:$0xff]   ;;  %v1073_v39 = vld [vmem:[%s1198_s7 + $0x104] ss:$8 sps:$4 sm:$0xff]   ;;  %v1048_v41 = vld [vmem:[%s1198_s7 + $0xe0] ss:$8 sps:$4 sm:$0xff]  }
  0x30   : > { %676 = vmatpush1.bf16.msra.mxu1 %v1045_v22  ;;  %v1085_v40 = vld [vmem:[%s1200_s8 + $0x4] ss:$12 sps:$4 sm:$0xff]   ;;  %v1079_v46 = vld [vmem:[%s1200_s8 + $0x8] ss:$12 sps:$4 sm:$0xff]   ;;  %v1083_v56 = vld [vmem:[%s1200_s8] ss:$12 sps:$4 sm:$0xff]  }
  0x31   : > { %677 = vmatprep.subr.bf16.mxu1 %v1049_v23  ;;  %v1052_v42 = vld [vmem:[%s1198_s7 + $0xd4] ss:$8 sps:$4 sm:$0xff]   ;;  %660 = vmatprep.mubr.bf16.mxu0 %v1085_v40  ;;  %v1075_v43 = vld [vmem:[%s1198_s7 + $0x100] ss:$8 sps:$4 sm:$0xff]   ;;  %v1054_v44 = vld [vmem:[%s1198_s7 + $0xd0] ss:$8 sps:$4 sm:$0xff]  }
  0x32   : > { %635 = vmatpush1.bf16.msra.mxu0 %v1021_v15  ;;  %v1058_v45 = vld [vmem:[%s1198_s7 + $0xc4] ss:$8 sps:$4 sm:$0xff]   ;;  %v1060_v47 = vld [vmem:[%s1198_s7 + $0xc0] ss:$8 sps:$4 sm:$0xff]   ;;  %v1064_v48 = vld [vmem:[%s1198_s7 + $0xb4] ss:$8 sps:$4 sm:$0xff]  }
  0x33   : > { %636 = vmatprep.subr.bf16.mxu0 %v1022_v16  ;;  %v1066_v49 = vld [vmem:[%s1198_s7 + $0xb0] ss:$8 sps:$4 sm:$0xff]   ;;  %v1070_v50 = vld [vmem:[%s1198_s7 + $0xa4] ss:$8 sps:$4 sm:$0xff]   ;;  %v1072_v51 = vld [vmem:[%s1198_s7 + $0xa0] ss:$8 sps:$4 sm:$0xff]  }
  0x34   : > { %678 = vmatpush1.bf16.msra.mxu1 %v1051_v26  ;;  %v1076_v52 = vld [vmem:[%s1198_s7 + $0x94] ss:$8 sps:$4 sm:$0xff]   ;;  %v1078_v53 = vld [vmem:[%s1198_s7 + $0x90] ss:$8 sps:$4 sm:$0xff]   ;;  %v1080_v54 = vld [vmem:[%s1198_s7 + $0x84] ss:$8 sps:$4 sm:$0xff]  }
  0x35   : > { %679 = vmatprep.subr.bf16.mxu1 %v1055_v27  ;;  %v1082_v55 = vld [vmem:[%s1198_s7 + $0x80] ss:$8 sps:$4 sm:$0xff]   ;;  %v316_v59 = vld [vmem:[#allocation2 + $0x10] sm:$0xff]  ;;  %v318_v3 = vld [vmem:[#allocation2 + $0x18] sm:$0xff] }
  0x36   : > { %637 = vmatpush1.bf16.msra.mxu0 %v1024_v19  ;;  %v317_v63 = vld [vmem:[#allocation2] sm:$0xff]  ;;  %v319_v8 = vld [vmem:[#allocation2 + $0x8] sm:$0xff] }
  0x37   : > { %638 = vmatprep.subr.bf16.mxu0 %v1025_v21 }
  0x38   : > { %680 = vmatpush1.bf16.msra.mxu1 %v1057_v30 }
  0x39   : > { %681 = vmatprep.subr.bf16.mxu1 %v1061_v31 }
  0x3a   : > { %639 = vmatpush1.bf16.msra.mxu0 %v1027_v24 }
  0x3b   : > { %640 = vmatprep.subr.bf16.mxu0 %v1028_v25 }
  0x3c   : > { %682 = vmatpush1.bf16.msra.mxu1 %v1063_v34 }
  0x3d   : > { %683 = vmatprep.subr.bf16.mxu1 %v1067_v35 }
  0x3e   : > { %641 = vmatpush1.bf16.msra.mxu0 %v1030_v28 }
  0x3f   : > { %642 = vmatprep.subr.bf16.mxu0 %v1034_v29 }
  0x40   : > { %684 = vmatpush1.bf16.msra.mxu1 %v1069_v38 }
  0x41   : > { %685 = vmatprep.subr.bf16.mxu1 %v1073_v39 }
  0x42   : > { %643 = vmatpush1.bf16.msra.mxu0 %v1036_v32 }
  0x43   : > { %644 = vmatprep.subr.bf16.mxu0 %v1040_v33 }
  0x44   : > { %686 = vmatpush1.bf16.msra.mxu1 %v1075_v43 }
  0x46   : > { %645 = vmatpush2.bf16.msra.mxu0 %v1042_v36 }
  0x47   : > { %646 = vmatprep.subr.bf16.mxu0 %v1046_v37  ;;  %704 = vmatmul.mubr.bf16.vlgmr.msra.gmra.mxu1 %v1079_v46 }
  0x4a   : > { %647 = vmatpush2.bf16.msra.mxu0 %v1048_v41 }
  0x4b   : > { %648 = vmatprep.subr.bf16.mxu0 %v1052_v42 }
  0x4e   : > { %649 = vmatpush2.bf16.msra.mxu0 %v1054_v44 }
  0x4f   : > { %650 = vmatprep.subr.bf16.mxu0 %v1058_v45 }
  0x52   : > { %651 = vmatpush2.bf16.msra.mxu0 %v1060_v47 }
  0x53   : > { %652 = vmatprep.subr.bf16.mxu0 %v1064_v48 }
  0x56   : > { %653 = vmatpush2.bf16.msra.mxu0 %v1066_v49 }
  0x57   : > { %654 = vmatprep.subr.bf16.mxu0 %v1070_v50 }
  0x5a   : > { %655 = vmatpush2.bf16.msra.mxu0 %v1072_v51 }
  0x5b   : > { %656 = vmatprep.subr.bf16.mxu0 %v1076_v52 }
  0x5e   : > { %657 = vmatpush2.bf16.msra.mxu0 %v1078_v53 }
  0x5f   : > { %658 = vmatprep.subr.bf16.mxu0 %v1080_v54 }
  0x62   : > { %659 = vmatpush2.bf16.msra.mxu0 %v1082_v55 }
  0x65   : > { %661 = vmatmul.mubr.bf16.vlgmr.msra.gmra.mxu0 %v1083_v56 }
 0x107   : > { %v705_v57 = vpop.f32.mrf.mxu1 }
 0x109   : > { %v707_v58 = vpop.f32.mrf.mxu1 }
 0x10b   : > { %v709_v62 = vpop.f32.mrf.mxu1 }
 0x10d   : > { %v711_v7 = vpop.f32.mrf.mxu1 }
 0x125   : > { %v662_v60 = vpop.f32.mrf.mxu0 }
 0x126   : > { %v706_v61 = vadd.f32 %v705_v57, %v662_v60 }
 0x127   : > { %v664_v0 = vpop.f32.mrf.mxu0 }
 0x128   : > { %v714_v1 = vadd.f32 %v706_v61, %v316_v59  ;;  %v708_v2 = vadd.f32 %v707_v58, %v664_v0 }
 0x129   : > { %v666_v4 = vpop.f32.mrf.mxu0 }
 0x12a   : > { %718 = vst [vmem:[#allocation2 + $0x10] sm:$0xff] %v714_v1  ;;  %v715_v5 = vadd.f32 %v708_v2, %v317_v63  ;;  %v710_v6 = vadd.f32 %v709_v62, %v666_v4 }
 0x12b   : > { %v668_v9 = vpop.f32.mrf.mxu0 }
 0x12c   : > { %719 = vst [vmem:[#allocation2] sm:$0xff] %v715_v5  ;;  %v716_v10 = vadd.f32 %v710_v6, %v318_v3  ;;  %v712_v11 = vadd.f32 %v711_v7, %v668_v9  ;;  %725 = sbr.rel (%p955_p11) target bundleno = 320 (0x140), region = 66 }
 0x12e   : > { %720 = vst [vmem:[#allocation2 + $0x18] sm:$0xff] %v716_v10  ;;  %v717_v12 = vadd.f32 %v712_v11, %v319_v8 }
 0x130   : > { %721 = vst [vmem:[#allocation2 + $0x8] sm:$0xff] %v717_v12 }
 0x131   : > { %v732_v13 = vlaneseq  ;;  %v730_v15 = vld [vmem:[%s1281_s2] sm:$0x3]  ;;  %v726_v16 = vld [vmem:[#allocation2 + $0x10] sm:$0xff] }
 0x133   : > { %v733_v14 = vshrl.u32 %v732_v13, 7  ;;  %v727_v19 = vld [vmem:[#allocation2] sm:$0xff] }
 0x135   : > { %v734_v17 = vsub.s32 0, %v733_v14  ;;  %v738_v18 = vsub.s32 1, %v733_v14  ;;  %v728_v20 = vld [vmem:[#allocation2 + $0x18] sm:$0xff] }
 0x137   : > { %v729_v21 = vld [vmem:[#allocation2 + $0x8] sm:$0xff]  ;;  %v735_v22 = vrot.slane %v730_v15, %v734_v17  ;;  %v739_v23 = vrot.slane %v730_v15, %v738_v18 }
 0x139   : > { %v742_v24 = vadd.f32 %v735_v22, %v726_v16  ;;  %v743_v25 = vadd.f32 %v739_v23, %v727_v19  ;;  %v744_v26 = vadd.f32 %v735_v22, %v728_v20  ;;  %v745_v27 = vadd.f32 %v739_v23, %v729_v21 }
 0x13b   : > { %v746_v28 = vmax.f32 %v742_v24, 0.0  ;;  %v747_v29 = vmax.f32 %v743_v25, 0.0  ;;  %v748_v30 = vmax.f32 %v744_v26, 0.0  ;;  %v749_v31 = vmax.f32 %v745_v27, 0.0 }
 0x13d   : > { %v964_v32 = vpack.c.bf16 %v747_v29, %v746_v28  ;;  %v965_v33 = vpack.c.bf16 %v749_v31, %v748_v30 }
 0x13f   : > { %762 = vst [vmem:[%s1282_s3] sm:$0xff] %v964_v32  ;;  %763 = vst [vmem:[%s1282_s3 + $0x8] sm:$0xff] %v965_v33 }
 0x140 PF: > { %s13_s16 = sadd.s32 1, %s1124_s16   ;;  %s1283_s12 = smov %s1112_s13 }
 0x141   : > { %p10_p12 = scmp.ge.s32.totalorder %s13_s16, 8   ;;  %s1284_s13 = smov %s1183_s20 }
 0x142   : > { %s1285_s14 = smov %s1120_s15  ;;  %s1286_s15 = smov %s1288_s17 }
 0x143   :  { %12 = sbr.rel (!%p10_p12) target bundleno = 3 (0x3), region = 113 }

// kernel: resnet18_forward.38
= control target key start
LH: loop header
LB: loop body
LE: loop exit
PB: predicated region body
PF: predicated region fallthrough
CT: control target
= control target key end

     0   :  { %s1698_s12 = smov 0   ;;  %s1700_s13 = smov 0   ;;  %s1893_s0 = inlined_call_operand.vmem [shape: bf16[16,2304], index: 0, kind: input, shape index: {}]   ;;  %s1894_s1 = inlined_call_operand.vmem [shape: bf16[2304,512], index: 1, kind: input, shape index: {}]   ;;  %s1895_s2 = inlined_call_operand.vmem [shape: f32[1,512], index: 2, kind: input, shape index: {}]   ;;  %s1896_s3 = inlined_call_operand.vmem [shape: bf16[16,512], index: 3, kind: output, shape index: {}]  }
   0x1   :  { %s1702_s14 = smov 0   ;;  %s1704_s15 = smov 0  }
   0x2   :  { %s1706_s16 = smov 0  }
   0x3 LB: > { %s25_s17 = sadd.s32 1, %s1670_s15  ;;  %p48_p1 = scmp.ne.s32.totalorder %s1662_s13, %s1658_s12  ;;  %s1674_s16 = sphi %s1706_s16, %s13_s16   ;;  %s1670_s15 = sphi %s1704_s15, %s1900_s15   ;;  %s1666_s14 = sphi %s1702_s14, %s1899_s14   ;;  %s1662_s13 = sphi %s1700_s13, %s1898_s13   ;;  %s1658_s12 = sphi %s1698_s12, %s1897_s12  }
   0x4   : > { %p26_p0 = scmp.ge.s32.totalorder %s25_s17, 6  ;;  %p49_p2 = scmp.eq.s32.totalorder %s1674_s16, 0 }
   0x5   : > { %s41_s19 = sadd.s32 1, %s1662_s13  ;;  %p1320_p5 = scmp.ge.s32.totalorder %s1674_s16, 6 }
   0x6   : > { %s1902_s17 = smov (%p26_p0, %s25_s17), 0  ;;  %p50_p3 = por %p49_p2, %p48_p1 }
   0x7   : > { %s37_s18 = ssub.s32 %s1670_s15, %s1902_s17  ;;  %164 = sbr.rel (%p1320_p5) target bundleno = 19 (0x13), region = 20 }
   0x8   : > { %p39_p4 = scmp.eq.s32.totalorder %s37_s18, 0 }
   0xa   : > { %s1733_s20 = scalar_select %p39_p4, %s1662_s13, %s41_s19  }
   0xc   : > { %167 = sbr.rel (!%p50_p3) target bundleno = 19 (0x13), region = 24  ;;  %s169_s21 = sand.u32 (%p50_p3), 1, %s1662_s13  }
   0xd   : > { %s1438_s22 = smul.u32 (%p50_p3), 12, %s1670_s15 }
   0xe   : > { %s1444_s23 = smul.u32 (%p50_p3), 24, %s169_s21 }
   0xf   : > { %s177_s26 = scalar_lea.vmem (%p50_p3), %s1893_s0, %s1438_s22 }
  0x10   : > { %v192_v0 = vld [vmem:[%s177_s26] sm:$0xff] (%p50_p3)  ;;  %v194_v1 = vld [vmem:[%s177_s26 + $0x48] sm:$0xff] (%p50_p3)  ;;  %s171_s27 = scalar_lea.vmem (%p50_p3), [#allocation3], %s1444_s23  ;;  %v1324_v3 = vld [vmem:[%s177_s26 + $0x50] sm:$0xf] (%p50_p3) }
  0x11   : > { %v1322_v2 = vld [vmem:[%s177_s26 + $0x8] sm:$0xf]  ;;  %193 = vst [vmem:[%s171_s27] sm:$0xff] %v192_v0  ;;  %195 = vst [vmem:[%s171_s27 + $0xc] sm:$0xff] %v194_v1 }
  0x12   : > { %1323 = vst [vmem:[%s171_s27 + $0x8] sm:$0xf] %v1322_v2  ;;  %1325 = vst [vmem:[%s171_s27 + $0x14] sm:$0xf] %v1324_v3 }
  0x13 PF: > { %p1326_p6 = scmp.ge.s32.totalorder %s1674_s16, 1  ;;  %p227_p7 = scmp.lt.s32.totalorder %s1674_s16, 7 }
  0x15   : > { %p228_p8 = pnand %p1326_p6, %p227_p7 }
  0x16   : > { %s234_s28 = sand.u32 (!%p228_p8), 1, %s1658_s12   ;;  %s278_s29 = smul.u32 (!%p228_p8), 48, %s1666_s14 }
  0x17   : > { %231 = sbr.rel (%p228_p8) target bundleno = 356 (0x164), region = 54  ;;  %p1329_p10 = scmp.ne.s32.totalorder (!%p228_p8), %s1666_s14, 0 }
  0x18   : > { %s1445_s30 = smul.u32 (!%p228_p8), 24, %s234_s28  ;;  %p280_p9 = scmp.lt.s32.totalorder (!%p228_p8), %s278_s29, 287 }
  0x1a   : > { %s1750_s8 = scalar_lea.vmem (!%p228_p8), [#allocation3], %s1445_s30 }
  0x1c   : > { %s1904_s29 = smov (!%p280_p9, %s278_s29), 287  ;;  %311 = sbr.rel (%p1329_p10) target bundleno = 38 (0x26), region = 62 }
  0x1d   : > { %s1439_s4 = sshll.u32 %s1904_s29, 4 }
  0x1e   : > { %s1748_s7 = scalar_lea.vmem %s1894_s1, %s1439_s4 }
  0x21   : > { %v1676_v4 = vmov 0.0  }
  0x22   : > { %312 = vst [vmem:[#allocation2 + $0x30] sm:$0xff] %v1676_v4  ;;  %313 = vst [vmem:[#allocation2] sm:$0xff] %v1676_v4 }
  0x23   : > { %314 = vst [vmem:[#allocation2 + $0x18] sm:$0xff] %v1676_v4  ;;  %315 = vst [vmem:[#allocation2 + $0x10] sm:$0xff] %v1676_v4 }
  0x24   : > { %316 = vst [vmem:[#allocation2 + $0x8] sm:$0xff] %v1676_v4  ;;  %317 = vst [vmem:[#allocation2 + $0x20] sm:$0xff] %v1676_v4 }
  0x25   : > { %318 = vst [vmem:[#allocation2 + $0x28] sm:$0xff] %v1676_v4  ;;  %319 = vst [vmem:[#allocation2 + $0x38] sm:$0xff] %v1676_v4 }
  0x26 PF: > { %v1488_v5 = vld [vmem:[%s1748_s7 + $0xe4] ss:$16 sps:$4 sm:$0xff]   ;;  %v1677_v7 = vmov 0   ;;  %v1492_v8 = vld [vmem:[%s1748_s7 + $0xe0] ss:$16 sps:$4 sm:$0xff]   ;;  %p1429_p11 = scmp.ne.s32.totalorder %s1666_s14, 5 }
  0x27   : > { %v1490_v6 = vld [vmem:[%s1748_s7 + $0x2e4] ss:$16 sps:$4 sm:$0xff]   ;;  %999 = vmatprep.mubr.bf16.mxu1 %v1677_v7  ;;  %924 = vmatprep.subr.bf16.mxu0 %v1488_v5  ;;  %v1493_v9 = vld [vmem:[%s1748_s7 + $0x2e0] ss:$16 sps:$4 sm:$0xff]   ;;  %v1541_v39 = vld [vmem:[%s1748_s7 + $0xec] ss:$16 sps:$4 sm:$0xff]  }
  0x28   : > { %967 = vmatprep.subr.bf16.mxu1 %v1490_v6  ;;  %v1494_v10 = vld [vmem:[%s1748_s7 + $0xc4] ss:$16 sps:$4 sm:$0xff]   ;;  %925 = vmatpush1.bf16.msra.mxu0 %v1492_v8  ;;  %v1498_v12 = vld [vmem:[%s1748_s7 + $0xc0] ss:$16 sps:$4 sm:$0xff]   ;;  %v1539_v41 = vld [vmem:[%s1748_s7 + $0xe8] ss:$16 sps:$4 sm:$0xff]  }
  0x29   : > { %968 = vmatpush1.bf16.msra.mxu1 %v1493_v9  ;;  %v1496_v11 = vld [vmem:[%s1748_s7 + $0x2c4] ss:$16 sps:$4 sm:$0xff]   ;;  %926 = vmatprep.subr.bf16.mxu0 %v1494_v10  ;;  %v1499_v13 = vld [vmem:[%s1748_s7 + $0x2c0] ss:$16 sps:$4 sm:$0xff]   ;;  %v1547_v44 = vld [vmem:[%s1748_s7 + $0xcc] ss:$16 sps:$4 sm:$0xff]  }
  0x2a   : > { %969 = vmatprep.subr.bf16.mxu1 %v1496_v11  ;;  %v1500_v14 = vld [vmem:[%s1748_s7 + $0xa4] ss:$16 sps:$4 sm:$0xff]   ;;  %v1504_v16 = vld [vmem:[%s1748_s7 + $0xa0] ss:$16 sps:$4 sm:$0xff]   ;;  %v1545_v45 = vld [vmem:[%s1748_s7 + $0xc8] ss:$16 sps:$4 sm:$0xff]  }
  0x2b   : > { %v1502_v15 = vld [vmem:[%s1748_s7 + $0x2a4] ss:$16 sps:$4 sm:$0xff]   ;;  %v1505_v17 = vld [vmem:[%s1748_s7 + $0x2a0] ss:$16 sps:$4 sm:$0xff]   ;;  %v1553_v48 = vld [vmem:[%s1748_s7 + $0xac] ss:$16 sps:$4 sm:$0xff]  }
  0x2c   : > { %927 = vmatpush1.bf16.msra.mxu0 %v1498_v12  ;;  %v1506_v18 = vld [vmem:[%s1748_s7 + $0x84] ss:$16 sps:$4 sm:$0xff]   ;;  %v1510_v20 = vld [vmem:[%s1748_s7 + $0x80] ss:$16 sps:$4 sm:$0xff]   ;;  %v1551_v49 = vld [vmem:[%s1748_s7 + $0xa8] ss:$16 sps:$4 sm:$0xff]  }
  0x2d   : > { %970 = vmatpush1.bf16.msra.mxu1 %v1499_v13  ;;  %928 = vmatprep.subr.bf16.mxu0 %v1500_v14  ;;  %v1508_v19 = vld [vmem:[%s1748_s7 + $0x284] ss:$16 sps:$4 sm:$0xff]   ;;  %v1511_v21 = vld [vmem:[%s1748_s7 + $0x280] ss:$16 sps:$4 sm:$0xff]   ;;  %v1559_v52 = vld [vmem:[%s1748_s7 + $0x8c] ss:$16 sps:$4 sm:$0xff]  }
  0x2e   : > { %971 = vmatprep.subr.bf16.mxu1 %v1502_v15  ;;  %v1512_v22 = vld [vmem:[%s1748_s7 + $0x64] ss:$16 sps:$4 sm:$0xff]   ;;  %v1516_v24 = vld [vmem:[%s1748_s7 + $0x60] ss:$16 sps:$4 sm:$0xff]   ;;  %v1557_v53 = vld [vmem:[%s1748_s7 + $0x88] ss:$16 sps:$4 sm:$0xff]  }
  0x2f   : > { %v1514_v23 = vld [vmem:[%s1748_s7 + $0x264] ss:$16 sps:$4 sm:$0xff]   ;;  %v1517_v25 = vld [vmem:[%s1748_s7 + $0x260] ss:$16 sps:$4 sm:$0xff]   ;;  %v1565_v57 = vld [vmem:[%s1748_s7 + $0x6c] ss:$16 sps:$4 sm:$0xff]  }
  0x30   : > { %929 = vmatpush1.bf16.msra.mxu0 %v1504_v16  ;;  %v1518_v26 = vld [vmem:[%s1748_s7 + $0x44] ss:$16 sps:$4 sm:$0xff]   ;;  %v1522_v28 = vld [vmem:[%s1748_s7 + $0x40] ss:$16 sps:$4 sm:$0xff]   ;;  %v1563_v58 = vld [vmem:[%s1748_s7 + $0x68] ss:$16 sps:$4 sm:$0xff]  }
  0x31   : > { %972 = vmatpush1.bf16.msra.mxu1 %v1505_v17  ;;  %930 = vmatprep.subr.bf16.mxu0 %v1506_v18  ;;  %v1520_v27 = vld [vmem:[%s1748_s7 + $0x244] ss:$16 sps:$4 sm:$0xff]   ;;  %v1523_v29 = vld [vmem:[%s1748_s7 + $0x240] ss:$16 sps:$4 sm:$0xff]   ;;  %v1571_v61 = vld [vmem:[%s1748_s7 + $0x4c] ss:$16 sps:$4 sm:$0xff]  }
  0x32   : > { %973 = vmatprep.subr.bf16.mxu1 %v1508_v19  ;;  %v1524_v30 = vld [vmem:[%s1748_s7 + $0x24] ss:$16 sps:$4 sm:$0xff]   ;;  %v1528_v32 = vld [vmem:[%s1748_s7 + $0x20] ss:$16 sps:$4 sm:$0xff]   ;;  %v1569_v62 = vld [vmem:[%s1748_s7 + $0x48] ss:$16 sps:$4 sm:$0xff]  }
  0x33   : > { %v1526_v31 = vld [vmem:[%s1748_s7 + $0x224] ss:$16 sps:$4 sm:$0xff]   ;;  %v1529_v33 = vld [vmem:[%s1748_s7 + $0x220] ss:$16 sps:$4 sm:$0xff]   ;;  %v1577_v1 = vld [vmem:[%s1748_s7 + $0x2c] ss:$16 sps:$4 sm:$0xff]  }
  0x34   : > { %931 = vmatpush1.bf16.msra.mxu0 %v1510_v20  ;;  %v1530_v34 = vld [vmem:[%s1748_s7 + $0x4] ss:$16 sps:$4 sm:$0xff]   ;;  %v1534_v36 = vld [vmem:[%s1748_s7] ss:$16 sps:$4 sm:$0xff]   ;;  %v1575_v2 = vld [vmem:[%s1748_s7 + $0x28] ss:$16 sps:$4 sm:$0xff]  }
  0x35   : > { %974 = vmatpush1.bf16.msra.mxu1 %v1511_v21  ;;  %932 = vmatprep.subr.bf16.mxu0 %v1512_v22  ;;  %v1532_v35 = vld [vmem:[%s1748_s7 + $0x204] ss:$16 sps:$4 sm:$0xff]   ;;  %v1535_v37 = vld [vmem:[%s1748_s7 + $0x200] ss:$16 sps:$4 sm:$0xff]   ;;  %v1583_v5 = vld [vmem:[%s1748_s7 + $0xc] ss:$16 sps:$4 sm:$0xff]  }
  0x36   : > { %975 = vmatprep.subr.bf16.mxu1 %v1514_v23  ;;  %v1536_v38 = vld [vmem:[%s1748_s7 + $0x1e4] ss:$16 sps:$4 sm:$0xff]   ;;  %v1542_v42 = vld [vmem:[%s1748_s7 + $0x1e0] ss:$16 sps:$4 sm:$0xff]   ;;  %v1581_v6 = vld [vmem:[%s1748_s7 + $0x8] ss:$16 sps:$4 sm:$0xff]  }
  0x37   : > { %v1789_v40 = vld [vmem:[%s1750_s8 + $0x8] ss:$12 sps:$4 sm:$0xff]   ;;  %v1587_v56 = vld [vmem:[%s1750_s8 + $0x4] ss:$12 sps:$4 sm:$0xff]   ;;  %v1826_v11 = vld [vmem:[%s1750_s8] ss:$12 sps:$4 sm:$0xff]  }
  0x38   : > { %933 = vmatpush1.bf16.msra.mxu0 %v1516_v24  ;;  %v1543_v43 = vld [vmem:[%s1748_s7 + $0x1c4] ss:$16 sps:$4 sm:$0xff]   ;;  %v1548_v46 = vld [vmem:[%s1748_s7 + $0x1c0] ss:$16 sps:$4 sm:$0xff]   ;;  %956 = vmatprep.mubr.bf16.mxu0 %v1587_v56  ;;  %v1590_v9 = vld [vmem:[%s1748_s7 + $0x1ec] ss:$16 sps:$4 sm:$0xff]  }
  0x39   : > { %976 = vmatpush1.bf16.msra.mxu1 %v1517_v25  ;;  %934 = vmatprep.subr.bf16.mxu0 %v1518_v26  ;;  %v1549_v47 = vld [vmem:[%s1748_s7 + $0x1a4] ss:$16 sps:$4 sm:$0xff]   ;;  %v1554_v50 = vld [vmem:[%s1748_s7 + $0x1a0] ss:$16 sps:$4 sm:$0xff]   ;;  %v1593_v10 = vld [vmem:[%s1748_s7 + $0x2ec] ss:$16 sps:$4 sm:$0xff]  }
  0x3a   : > { %977 = vmatprep.subr.bf16.mxu1 %v1520_v27  ;;  %v1555_v51 = vld [vmem:[%s1748_s7 + $0x184] ss:$16 sps:$4 sm:$0xff]   ;;  %v1560_v54 = vld [vmem:[%s1748_s7 + $0x180] ss:$16 sps:$4 sm:$0xff]   ;;  %v1588_v12 = vld [vmem:[%s1748_s7 + $0x1e8] ss:$16 sps:$4 sm:$0xff]  }
  0x3b   : > { %v1561_v55 = vld [vmem:[%s1748_s7 + $0x164] ss:$16 sps:$4 sm:$0xff]   ;;  %v1566_v59 = vld [vmem:[%s1748_s7 + $0x160] ss:$16 sps:$4 sm:$0xff]   ;;  %v1591_v13 = vld [vmem:[%s1748_s7 + $0x2e8] ss:$16 sps:$4 sm:$0xff]  }
  0x3c   : > { %935 = vmatpush1.bf16.msra.mxu0 %v1522_v28  ;;  %v1567_v60 = vld [vmem:[%s1748_s7 + $0x144] ss:$16 sps:$4 sm:$0xff]   ;;  %v1572_v63 = vld [vmem:[%s1748_s7 + $0x140] ss:$16 sps:$4 sm:$0xff]   ;;  %v1596_v14 = vld [vmem:[%s1748_s7 + $0x1cc] ss:$16 sps:$4 sm:$0xff]  }
  0x3d   : > { %978 = vmatpush1.bf16.msra.mxu1 %v1523_v29  ;;  %936 = vmatprep.subr.bf16.mxu0 %v1524_v30  ;;  %v1573_v0 = vld [vmem:[%s1748_s7 + $0x124] ss:$16 sps:$4 sm:$0xff]   ;;  %v1578_v3 = vld [vmem:[%s1748_s7 + $0x120] ss:$16 sps:$4 sm:$0xff]   ;;  %v1599_v15 = vld [vmem:[%s1748_s7 + $0x2cc] ss:$16 sps:$4 sm:$0xff]  }
  0x3e   : > { %979 = vmatprep.subr.bf16.mxu1 %v1526_v31  ;;  %v1579_v4 = vld [vmem:[%s1748_s7 + $0x104] ss:$16 sps:$4 sm:$0xff]   ;;  %v1584_v8 = vld [vmem:[%s1748_s7 + $0x100] ss:$16 sps:$4 sm:$0xff]   ;;  %v1594_v16 = vld [vmem:[%s1748_s7 + $0x1c8] ss:$16 sps:$4 sm:$0xff]  }
  0x3f   : > { %v1597_v17 = vld [vmem:[%s1748_s7 + $0x2c8] ss:$16 sps:$4 sm:$0xff]   ;;  %v1602_v18 = vld [vmem:[%s1748_s7 + $0x1ac] ss:$16 sps:$4 sm:$0xff]  }
  0x40   : > { %937 = vmatpush1.bf16.msra.mxu0 %v1528_v32  ;;  %v1605_v19 = vld [vmem:[%s1748_s7 + $0x2ac] ss:$16 sps:$4 sm:$0xff]   ;;  %v1600_v20 = vld [vmem:[%s1748_s7 + $0x1a8] ss:$16 sps:$4 sm:$0xff]  }
  0x41   : > { %980 = vmatpush1.bf16.msra.mxu1 %v1529_v33  ;;  %938 = vmatprep.subr.bf16.mxu0 %v1530_v34  ;;  %v1603_v21 = vld [vmem:[%s1748_s7 + $0x2a8] ss:$16 sps:$4 sm:$0xff]   ;;  %v1608_v22 = vld [vmem:[%s1748_s7 + $0x18c] ss:$16 sps:$4 sm:$0xff]  }
  0x42   : > { %981 = vmatprep.subr.bf16.mxu1 %v1532_v35  ;;  %v1611_v23 = vld [vmem:[%s1748_s7 + $0x28c] ss:$16 sps:$4 sm:$0xff]   ;;  %v1606_v24 = vld [vmem:[%s1748_s7 + $0x188] ss:$16 sps:$4 sm:$0xff]  }
  0x43   : > { %v1609_v25 = vld [vmem:[%s1748_s7 + $0x288] ss:$16 sps:$4 sm:$0xff]   ;;  %v1617_v26 = vld [vmem:[%s1748_s7 + $0x26c] ss:$16 sps:$4 sm:$0xff]  }
  0x44   : > { %939 = vmatpush1.bf16.msra.mxu0 %v1534_v36  ;;  %v1612_v27 = vld [vmem:[%s1748_s7 + $0x168] ss:$16 sps:$4 sm:$0xff]   ;;  %v1620_v29 = vld [vmem:[%s1748_s7 + $0x14c] ss:$16 sps:$4 sm:$0xff]  }
  0x45   : > { %982 = vmatpush1.bf16.msra.mxu1 %v1535_v37  ;;  %940 = vmatprep.subr.bf16.mxu0 %v1536_v38  ;;  %v1615_v28 = vld [vmem:[%s1748_s7 + $0x268] ss:$16 sps:$4 sm:$0xff]   ;;  %v1623_v30 = vld [vmem:[%s1748_s7 + $0x24c] ss:$16 sps:$4 sm:$0xff]  }
  0x46   : > { %1010 = vmatprep.subr.bf16.mxu1 %v1541_v39  ;;  %v1618_v31 = vld [vmem:[%s1748_s7 + $0x148] ss:$16 sps:$4 sm:$0xff]   ;;  %v1626_v33 = vld [vmem:[%s1748_s7 + $0x12c] ss:$16 sps:$4 sm:$0xff]  }
  0x47   : > { %v1621_v32 = vld [vmem:[%s1748_s7 + $0x248] ss:$16 sps:$4 sm:$0xff]   ;;  %v1629_v34 = vld [vmem:[%s1748_s7 + $0x22c] ss:$16 sps:$4 sm:$0xff]  }
  0x48   : > { %1000 = vmatmul.mubr.bf16.vlgmr.msra.gmra.mxu1 %v1789_v40  ;;  %941 = vmatpush2.bf16.msra.mxu0 %v1542_v42  ;;  %v1624_v35 = vld [vmem:[%s1748_s7 + $0x128] ss:$16 sps:$4 sm:$0xff]   ;;  %v1632_v37 = vld [vmem:[%s1748_s7 + $0x10c] ss:$16 sps:$4 sm:$0xff]  }
  0x49   : > { %1011 = vmatpush1.bf16.msra.mxu1 %v1539_v41  ;;  %942 = vmatprep.subr.bf16.mxu0 %v1543_v43  ;;  %v1627_v36 = vld [vmem:[%s1748_s7 + $0x228] ss:$16 sps:$4 sm:$0xff]   ;;  %v1635_v38 = vld [vmem:[%s1748_s7 + $0x20c] ss:$16 sps:$4 sm:$0xff]  }
  0x4a   : > { %1012 = vmatprep.subr.bf16.mxu1 %v1547_v44  ;;  %1042 = vmatprep.mubr.bf16.mxu1 %v1587_v56  ;;  %v1630_v39 = vld [vmem:[%s1748_s7 + $0x108] ss:$16 sps:$4 sm:$0xff]   ;;  %v320_v44 = vld [vmem:[#allocation2 + $0x30] sm:$0xff] }
  0x4b   : > { %v1633_v41 = vld [vmem:[%s1748_s7 + $0x208] ss:$16 sps:$4 sm:$0xff]  }
  0x4c   : > { %943 = vmatpush2.bf16.msra.mxu0 %v1548_v46 }
  0x4d   : > { %1013 = vmatpush1.bf16.msra.mxu1 %v1545_v45  ;;  %944 = vmatprep.subr.bf16.mxu0 %v1549_v47 }
  0x4e   : > { %1014 = vmatprep.subr.bf16.mxu1 %v1553_v48  ;;  %v321_v48 = vld [vmem:[#allocation2] sm:$0xff] }
  0x50   : > { %945 = vmatpush2.bf16.msra.mxu0 %v1554_v50 }
  0x51   : > { %1015 = vmatpush1.bf16.msra.mxu1 %v1551_v49  ;;  %946 = vmatprep.subr.bf16.mxu0 %v1555_v51 }
  0x52   : > { %1016 = vmatprep.subr.bf16.mxu1 %v1559_v52  ;;  %v324_v52 = vld [vmem:[#allocation2 + $0x8] sm:$0xff] }
  0x54   : > { %947 = vmatpush2.bf16.msra.mxu0 %v1560_v54 }
  0x55   : > { %1017 = vmatpush1.bf16.msra.mxu1 %v1557_v53  ;;  %948 = vmatprep.subr.bf16.mxu0 %v1561_v55 }
  0x56   : > { %1018 = vmatprep.subr.bf16.mxu1 %v1565_v57  ;;  %v325_v57 = vld [vmem:[#allocation2 + $0x20] sm:$0xff] }
  0x58   : > { %949 = vmatpush2.bf16.msra.mxu0 %v1566_v59 }
  0x59   : > { %1019 = vmatpush1.bf16.msra.mxu1 %v1563_v58  ;;  %950 = vmatprep.subr.bf16.mxu0 %v1567_v60 }
  0x5a   : > { %1020 = vmatprep.subr.bf16.mxu1 %v1571_v61 }
  0x5c   : > { %951 = vmatpush2.bf16.msra.mxu0 %v1572_v63 }
  0x5d   : > { %1021 = vmatpush1.bf16.msra.mxu1 %v1569_v62  ;;  %952 = vmatprep.subr.bf16.mxu0 %v1573_v0  ;;  %v322_v62 = vld [vmem:[#allocation2 + $0x18] sm:$0xff] }
  0x5e   : > { %1022 = vmatprep.subr.bf16.mxu1 %v1577_v1 }
  0x60   : > { %953 = vmatpush2.bf16.msra.mxu0 %v1578_v3 }
  0x61   : > { %1023 = vmatpush1.bf16.msra.mxu1 %v1575_v2  ;;  %954 = vmatprep.subr.bf16.mxu0 %v1579_v4  ;;  %v323_v2 = vld [vmem:[#allocation2 + $0x10] sm:$0xff] }
  0x62   : > { %1024 = vmatprep.subr.bf16.mxu1 %v1583_v5 }
  0x64   : > { %955 = vmatpush2.bf16.msra.mxu0 %v1584_v8  ;;  %v326_v8 = vld [vmem:[#allocation2 + $0x28] sm:$0xff] }
  0x65   : > { %1025 = vmatpush1.bf16.msra.mxu1 %v1581_v6  ;;  %1053 = vmatprep.subr.bf16.mxu0 %v1593_v10 }
  0x66   : > { %1026 = vmatprep.subr.bf16.mxu1 %v1590_v9 }
  0x67   : > { %957 = vmatmul.mubr.bf16.vlgmr.msra.gmra.mxu0 %v1826_v11 }
  0x68   : > { %1054 = vmatpush1.bf16.msra.mxu0 %v1591_v13  ;;  %1085 = vmatprep.mubr.bf16.mxu0 %v1677_v7  ;;  %v1614_v7 = vld [vmem:[%s1748_s7 + $0x16c] ss:$16 sps:$4 sm:$0xff]  }
  0x69   : > { %1027 = vmatpush2.bf16.msra.mxu1 %v1588_v12  ;;  %1055 = vmatprep.subr.bf16.mxu0 %v1599_v15  ;;  %v327_v13 = vld [vmem:[#allocation2 + $0x38] sm:$0xff] }
  0x6a   : > { %1028 = vmatprep.subr.bf16.mxu1 %v1596_v14 }
  0x6c   : > { %1056 = vmatpush1.bf16.msra.mxu0 %v1597_v17 }
  0x6d   : > { %1029 = vmatpush2.bf16.msra.mxu1 %v1594_v16  ;;  %1057 = vmatprep.subr.bf16.mxu0 %v1605_v19 }
  0x6e   : > { %1030 = vmatprep.subr.bf16.mxu1 %v1602_v18 }
  0x70   : > { %1058 = vmatpush1.bf16.msra.mxu0 %v1603_v21 }
  0x71   : > { %1031 = vmatpush2.bf16.msra.mxu1 %v1600_v20  ;;  %1059 = vmatprep.subr.bf16.mxu0 %v1611_v23 }
  0x72   : > { %1032 = vmatprep.subr.bf16.mxu1 %v1608_v22 }
  0x74   : > { %1060 = vmatpush1.bf16.msra.mxu0 %v1609_v25 }
  0x75   : > { %1033 = vmatpush2.bf16.msra.mxu1 %v1606_v24  ;;  %1061 = vmatprep.subr.bf16.mxu0 %v1617_v26 }
  0x76   : > { %1034 = vmatprep.subr.bf16.mxu1 %v1614_v7 }
  0x78   : > { %1062 = vmatpush1.bf16.msra.mxu0 %v1615_v28 }
  0x79   : > { %1035 = vmatpush2.bf16.msra.mxu1 %v1612_v27  ;;  %1063 = vmatprep.subr.bf16.mxu0 %v1623_v30 }
  0x7a   : > { %1036 = vmatprep.subr.bf16.mxu1 %v1620_v29 }
  0x7c   : > { %1064 = vmatpush1.bf16.msra.mxu0 %v1621_v32 }
  0x7d   : > { %1037 = vmatpush2.bf16.msra.mxu1 %v1618_v31  ;;  %1065 = vmatprep.subr.bf16.mxu0 %v1629_v34 }
  0x7e   : > { %1038 = vmatprep.subr.bf16.mxu1 %v1626_v33 }
  0x80   : > { %1066 = vmatpush1.bf16.msra.mxu0 %v1627_v36 }
  0x81   : > { %1039 = vmatpush2.bf16.msra.mxu1 %v1624_v35  ;;  %1067 = vmatprep.subr.bf16.mxu0 %v1635_v38 }
  0x82   : > { %1040 = vmatprep.subr.bf16.mxu1 %v1632_v37 }
  0x84   : > { %1068 = vmatpush1.bf16.msra.mxu0 %v1633_v41 }
  0x85   : > { %1041 = vmatpush2.bf16.msra.mxu1 %v1630_v39 }
  0x87   : > { %1086 = vmatmul.mubr.bf16.vlgmr.msra.gmra.mxu0 %v1789_v40 }
  0x88   : > { %1043 = vmatmul.mubr.bf16.vlgmr.msra.gmra.mxu1 %v1826_v11 }
 0x108   : > { %v1001_v42 = vpop.f32.mrf.mxu1 }
 0x10a   : > { %v1003_v43 = vpop.f32.mrf.mxu1 }
 0x10c   : > { %v1005_v47 = vpop.f32.mrf.mxu1 }
 0x10e   : > { %v1007_v56 = vpop.f32.mrf.mxu1 }
 0x127   : > { %v958_v45 = vpop.f32.mrf.mxu0 }
 0x128   : > { %v1002_v46 = vadd.f32 %v1001_v42, %v958_v45 }
 0x129   : > { %v960_v49 = vpop.f32.mrf.mxu0 }
 0x12a   : > { %v1096_v50 = vadd.f32 %v1002_v46, %v320_v44  ;;  %v1004_v51 = vadd.f32 %v1003_v43, %v960_v49 }
 0x12b   : > { %v962_v53 = vpop.f32.mrf.mxu0 }
 0x12c   : > { %1104 = vst [vmem:[#allocation2 + $0x30] sm:$0xff] %v1096_v50  ;;  %v1097_v54 = vadd.f32 %v1004_v51, %v321_v48  ;;  %v1006_v55 = vadd.f32 %v1005_v47, %v962_v53 }
 0x12d   : > { %v964_v58 = vpop.f32.mrf.mxu0 }
 0x12e   : > { %1105 = vst [vmem:[#allocation2] sm:$0xff] %v1097_v54  ;;  %v1100_v40 = vadd.f32 %v1006_v55, %v324_v52  ;;  %v1008_v59 = vadd.f32 %v1007_v56, %v964_v58 }
 0x130   : > { %1108 = vst [vmem:[#allocation2 + $0x8] sm:$0xff] %v1100_v40  ;;  %v1101_v60 = vadd.f32 %v1008_v59, %v325_v57 }
 0x132   : > { %1109 = vst [vmem:[#allocation2 + $0x20] sm:$0xff] %v1101_v60 }
 0x147   : > { %v1087_v63 = vpop.f32.mrf.mxu0 }
 0x148   : > { %v1044_v61 = vpop.f32.mrf.mxu1 }
 0x149   : > { %v1088_v0 = vadd.f32 %v1087_v63, %v1044_v61  ;;  %v1089_v3 = vpop.f32.mrf.mxu0 }
 0x14a   : > { %v1046_v1 = vpop.f32.mrf.mxu1 }
 0x14b   : > { %v1098_v4 = vadd.f32 %v1088_v0, %v322_v62  ;;  %v1090_v5 = vadd.f32 %v1089_v3, %v1046_v1  ;;  %v1091_v9 = vpop.f32.mrf.mxu0 }
 0x14c   : > { %v1048_v6 = vpop.f32.mrf.mxu1 }
 0x14d   : > { %1106 = vst [vmem:[#allocation2 + $0x18] sm:$0xff] %v1098_v4  ;;  %v1099_v10 = vadd.f32 %v1090_v5, %v323_v2  ;;  %v1092_v11 = vadd.f32 %v1091_v9, %v1048_v6  ;;  %v1093_v14 = vpop.f32.mrf.mxu0 }
 0x14e   : > { %v1050_v12 = vpop.f32.mrf.mxu1 }
 0x14f   : > { %1107 = vst [vmem:[#allocation2 + $0x10] sm:$0xff] %v1099_v10  ;;  %v1102_v15 = vadd.f32 %v1092_v11, %v326_v8  ;;  %v1094_v16 = vadd.f32 %v1093_v14, %v1050_v12  ;;  %1115 = sbr.rel (%p1429_p11) target bundleno = 356 (0x164), region = 66 }
 0x151   : > { %1110 = vst [vmem:[#allocation2 + $0x28] sm:$0xff] %v1102_v15  ;;  %v1103_v17 = vadd.f32 %v1094_v16, %v327_v13 }
 0x153   : > { %1111 = vst [vmem:[#allocation2 + $0x38] sm:$0xff] %v1103_v17 }
 0x154   : > { %v1126_v18 = vlaneseq  ;;  %v1124_v20 = vld [vmem:[%s1895_s2] sm:$0xf]  ;;  %v1116_v21 = vld [vmem:[#allocation2 + $0x30] sm:$0xff]  ;;  %v1118_v26 = vld [vmem:[#allocation2 + $0x18] sm:$0xff] }
 0x155   : > { %v1117_v22 = vld [vmem:[#allocation2] sm:$0xff]  ;;  %v1120_v28 = vld [vmem:[#allocation2 + $0x8] sm:$0xff] }
 0x156   : > { %v1127_v19 = vshrl.u32 %v1126_v18, 7  ;;  %v1119_v27 = vld [vmem:[#allocation2 + $0x10] sm:$0xff]  ;;  %v1121_v33 = vld [vmem:[#allocation2 + $0x20] sm:$0xff] }
 0x158   : > { %v1128_v23 = vsub.s32 0, %v1127_v19  ;;  %v1132_v24 = vsub.s32 1, %v1127_v19  ;;  %v1136_v25 = vsub.s32 2, %v1127_v19  ;;  %v1140_v7 = vsub.s32 3, %v1127_v19  ;;  %v1122_v34 = vld [vmem:[#allocation2 + $0x28] sm:$0xff] }
 0x15a   : > { %v1129_v29 = vrot.slane %v1124_v20, %v1128_v23  ;;  %v1133_v30 = vrot.slane %v1124_v20, %v1132_v24  ;;  %v1137_v31 = vrot.slane %v1124_v20, %v1136_v25  ;;  %v1141_v32 = vrot.slane %v1124_v20, %v1140_v7  ;;  %v1123_v35 = vld [vmem:[#allocation2 + $0x38] sm:$0xff] }
 0x15c   : > { %v1146_v36 = vadd.f32 %v1129_v29, %v1116_v21  ;;  %v1147_v37 = vadd.f32 %v1133_v30, %v1117_v22  ;;  %v1148_v38 = vadd.f32 %v1137_v31, %v1118_v26  ;;  %v1149_v39 = vadd.f32 %v1141_v32, %v1119_v27 }
 0x15d   : > { %v1150_v41 = vadd.f32 %v1129_v29, %v1120_v28  ;;  %v1151_v42 = vadd.f32 %v1133_v30, %v1121_v33  ;;  %v1152_v43 = vadd.f32 %v1137_v31, %v1122_v34  ;;  %v1153_v44 = vadd.f32 %v1141_v32, %v1123_v35 }
 0x15e   : > { %v1154_v45 = vmax.f32 %v1146_v36, 0.0  ;;  %v1155_v46 = vmax.f32 %v1147_v37, 0.0  ;;  %v1156_v47 = vmax.f32 %v1148_v38, 0.0  ;;  %v1157_v48 = vmax.f32 %v1149_v39, 0.0 }
 0x15f   : > { %v1158_v49 = vmax.f32 %v1150_v41, 0.0  ;;  %v1159_v50 = vmax.f32 %v1151_v42, 0.0  ;;  %v1160_v51 = vmax.f32 %v1152_v43, 0.0  ;;  %v1161_v52 = vmax.f32 %v1153_v44, 0.0 }
 0x160   : > { %v1440_v53 = vpack.c.bf16 %v1155_v46, %v1154_v45  ;;  %v1441_v54 = vpack.c.bf16 %v1157_v48, %v1156_v47 }
 0x161   : > { %v1442_v55 = vpack.c.bf16 %v1159_v50, %v1158_v49  ;;  %v1443_v56 = vpack.c.bf16 %v1161_v52, %v1160_v51 }
 0x162   : > { %1186 = vst [vmem:[%s1896_s3] sm:$0xff] %v1440_v53  ;;  %1187 = vst [vmem:[%s1896_s3 + $0x8] sm:$0xff] %v1441_v54 }
 0x163   : > { %1188 = vst [vmem:[%s1896_s3 + $0x10] sm:$0xff] %v1442_v55  ;;  %1189 = vst [vmem:[%s1896_s3 + $0x18] sm:$0xff] %v1443_v56 }
 0x164 PF: > { %s13_s16 = sadd.s32 1, %s1674_s16   ;;  %s1897_s12 = smov %s1662_s13 }
 0x165   : > { %p10_p12 = scmp.ge.s32.totalorder %s13_s16, 8   ;;  %s1898_s13 = smov %s1733_s20 }
 0x166   : > { %s1899_s14 = smov %s1670_s15  ;;  %s1900_s15 = smov %s1902_s17 }
 0x167   :  { %12 = sbr.rel (!%p10_p12) target bundleno = 3 (0x3), region = 113 }

// kernel: resnet18_forward.37
= control target key start
LH: loop header
LB: loop body
LE: loop exit
PB: predicated region body
PF: predicated region fallthrough
CT: control target
= control target key end

     0   :  { %s956_s1 = inlined_call_operand.vmem [shape: bf16[256,512], index: 1, kind: input, shape index: {}]   ;;  %s957_s0 = inlined_call_operand.vmem [shape: bf16[16,256], index: 0, kind: input, shape index: {}]   ;;  %s958_s2 = inlined_call_operand.vmem [shape: f32[1,512], index: 2, kind: input, shape index: {}]   ;;  %s959_s3 = inlined_call_operand.vmem [shape: bf16[16,512], index: 3, kind: output, shape index: {}]  }
   0x1   :  { %v624_v0 = vld [vmem:[%s956_s1 + $0xe4] ss:$16 sps:$4 sm:$0xff]   ;;  %v626_v1 = vld [vmem:[%s956_s1 + $0xec] ss:$16 sps:$4 sm:$0xff]   ;;  %v628_v2 = vld [vmem:[%s956_s1 + $0xe0] ss:$16 sps:$4 sm:$0xff]  }
   0x2   :  { %432 = vmatprep.subr.bf16.mxu0 %v624_v0  ;;  %v629_v3 = vld [vmem:[%s956_s1 + $0xe8] ss:$16 sps:$4 sm:$0xff]   ;;  %475 = vmatprep.subr.bf16.mxu1 %v626_v1  ;;  %v630_v4 = vld [vmem:[%s956_s1 + $0xc4] ss:$16 sps:$4 sm:$0xff]   ;;  %v632_v5 = vld [vmem:[%s956_s1 + $0xcc] ss:$16 sps:$4 sm:$0xff]  }
   0x3   :  { %433 = vmatpush1.bf16.msra.mxu0 %v628_v2  ;;  %476 = vmatpush1.bf16.msra.mxu1 %v629_v3  ;;  %v634_v6 = vld [vmem:[%s956_s1 + $0xc0] ss:$16 sps:$4 sm:$0xff]   ;;  %v635_v7 = vld [vmem:[%s956_s1 + $0xc8] ss:$16 sps:$4 sm:$0xff]   ;;  %v636_v8 = vld [vmem:[%s956_s1 + $0xa4] ss:$16 sps:$4 sm:$0xff]   ;;  %v82_v2 = vlaneseq }
   0x4   :  { %434 = vmatprep.subr.bf16.mxu0 %v630_v4  ;;  %477 = vmatprep.subr.bf16.mxu1 %v632_v5  ;;  %v638_v9 = vld [vmem:[%s956_s1 + $0xac] ss:$16 sps:$4 sm:$0xff]   ;;  %v640_v10 = vld [vmem:[%s956_s1 + $0xa0] ss:$16 sps:$4 sm:$0xff]   ;;  %v641_v11 = vld [vmem:[%s956_s1 + $0xa8] ss:$16 sps:$4 sm:$0xff]  }
   0x5   :  { %v642_v12 = vld [vmem:[%s956_s1 + $0x84] ss:$16 sps:$4 sm:$0xff]   ;;  %v644_v13 = vld [vmem:[%s956_s1 + $0x8c] ss:$16 sps:$4 sm:$0xff]   ;;  %v646_v14 = vld [vmem:[%s956_s1 + $0x80] ss:$16 sps:$4 sm:$0xff]  }
   0x6   :  { %v647_v15 = vld [vmem:[%s956_s1 + $0x88] ss:$16 sps:$4 sm:$0xff]   ;;  %v648_v16 = vld [vmem:[%s956_s1 + $0x64] ss:$16 sps:$4 sm:$0xff]   ;;  %v650_v17 = vld [vmem:[%s956_s1 + $0x6c] ss:$16 sps:$4 sm:$0xff]  }
   0x7   :  { %435 = vmatpush1.bf16.msra.mxu0 %v634_v6  ;;  %478 = vmatpush1.bf16.msra.mxu1 %v635_v7  ;;  %v652_v18 = vld [vmem:[%s956_s1 + $0x60] ss:$16 sps:$4 sm:$0xff]   ;;  %v653_v19 = vld [vmem:[%s956_s1 + $0x68] ss:$16 sps:$4 sm:$0xff]   ;;  %v654_v20 = vld [vmem:[%s956_s1 + $0x44] ss:$16 sps:$4 sm:$0xff]  }
   0x8   :  { %436 = vmatprep.subr.bf16.mxu0 %v636_v8  ;;  %479 = vmatprep.subr.bf16.mxu1 %v638_v9  ;;  %v656_v21 = vld [vmem:[%s956_s1 + $0x4c] ss:$16 sps:$4 sm:$0xff]   ;;  %v658_v22 = vld [vmem:[%s956_s1 + $0x40] ss:$16 sps:$4 sm:$0xff]   ;;  %v659_v23 = vld [vmem:[%s956_s1 + $0x48] ss:$16 sps:$4 sm:$0xff]  }
   0x9   :  { %v660_v24 = vld [vmem:[%s956_s1 + $0x24] ss:$16 sps:$4 sm:$0xff]   ;;  %v662_v25 = vld [vmem:[%s956_s1 + $0x2c] ss:$16 sps:$4 sm:$0xff]   ;;  %v664_v26 = vld [vmem:[%s956_s1 + $0x20] ss:$16 sps:$4 sm:$0xff]  }
   0xa   :  { %v665_v27 = vld [vmem:[%s956_s1 + $0x28] ss:$16 sps:$4 sm:$0xff]   ;;  %v666_v28 = vld [vmem:[%s956_s1 + $0x4] ss:$16 sps:$4 sm:$0xff]   ;;  %v668_v29 = vld [vmem:[%s956_s1 + $0xc] ss:$16 sps:$4 sm:$0xff]  }
   0xb   :  { %437 = vmatpush1.bf16.msra.mxu0 %v640_v10  ;;  %480 = vmatpush1.bf16.msra.mxu1 %v641_v11  ;;  %v670_v30 = vld [vmem:[%s956_s1] ss:$16 sps:$4 sm:$0xff]   ;;  %v671_v31 = vld [vmem:[%s956_s1 + $0x8] ss:$16 sps:$4 sm:$0xff]   ;;  %v672_v32 = vld [vmem:[%s956_s1 + $0x1e4] ss:$16 sps:$4 sm:$0xff]  }
   0xc   :  { %438 = vmatprep.subr.bf16.mxu0 %v642_v12  ;;  %481 = vmatprep.subr.bf16.mxu1 %v644_v13  ;;  %v674_v33 = vld [vmem:[%s956_s1 + $0x1ec] ss:$16 sps:$4 sm:$0xff]   ;;  %v676_v34 = vld [vmem:[%s956_s1 + $0x1e0] ss:$16 sps:$4 sm:$0xff]   ;;  %v677_v35 = vld [vmem:[%s956_s1 + $0x1e8] ss:$16 sps:$4 sm:$0xff]  }
   0xd   :  { %v678_v36 = vld [vmem:[%s956_s1 + $0x1c4] ss:$16 sps:$4 sm:$0xff]   ;;  %v680_v37 = vld [vmem:[%s956_s1 + $0x1cc] ss:$16 sps:$4 sm:$0xff]   ;;  %v682_v38 = vld [vmem:[%s956_s1 + $0x1c0] ss:$16 sps:$4 sm:$0xff]  }
   0xe   :  { %v683_v39 = vld [vmem:[%s956_s1 + $0x1c8] ss:$16 sps:$4 sm:$0xff]   ;;  %v684_v40 = vld [vmem:[%s956_s1 + $0x1a4] ss:$16 sps:$4 sm:$0xff]   ;;  %v686_v41 = vld [vmem:[%s956_s1 + $0x1ac] ss:$16 sps:$4 sm:$0xff]  }
   0xf   :  { %439 = vmatpush1.bf16.msra.mxu0 %v646_v14  ;;  %482 = vmatpush1.bf16.msra.mxu1 %v647_v15  ;;  %v688_v42 = vld [vmem:[%s956_s1 + $0x1a0] ss:$16 sps:$4 sm:$0xff]   ;;  %v689_v43 = vld [vmem:[%s956_s1 + $0x1a8] ss:$16 sps:$4 sm:$0xff]   ;;  %v690_v44 = vld [vmem:[%s956_s1 + $0x184] ss:$16 sps:$4 sm:$0xff]  }
  0x10   :  { %440 = vmatprep.subr.bf16.mxu0 %v648_v16  ;;  %483 = vmatprep.subr.bf16.mxu1 %v650_v17  ;;  %v692_v45 = vld [vmem:[%s956_s1 + $0x18c] ss:$16 sps:$4 sm:$0xff]   ;;  %v694_v47 = vld [vmem:[%s956_s1 + $0x180] ss:$16 sps:$4 sm:$0xff]   ;;  %v695_v48 = vld [vmem:[%s956_s1 + $0x188] ss:$16 sps:$4 sm:$0xff]  }
  0x11   :  { %v722_v46 = vld [vmem:[%s957_s0 + $0x4] ss:$8 sps:$4 sm:$0xff]   ;;  %v700_v51 = vld [vmem:[%s956_s1 + $0x160] ss:$16 sps:$4 sm:$0xff]   ;;  %v701_v52 = vld [vmem:[%s956_s1 + $0x168] ss:$16 sps:$4 sm:$0xff]  }
  0x12   :  { %v696_v49 = vld [vmem:[%s956_s1 + $0x164] ss:$16 sps:$4 sm:$0xff]   ;;  %v698_v50 = vld [vmem:[%s956_s1 + $0x16c] ss:$16 sps:$4 sm:$0xff]   ;;  %464 = vmatprep.mubr.bf16.mxu0 %v722_v46  ;;  %507 = vmatprep.mubr.bf16.mxu1 %v722_v46  ;;  %v706_v55 = vld [vmem:[%s956_s1 + $0x140] ss:$16 sps:$4 sm:$0xff]  }
  0x13   :  { %441 = vmatpush1.bf16.msra.mxu0 %v652_v18  ;;  %484 = vmatpush1.bf16.msra.mxu1 %v653_v19  ;;  %v702_v53 = vld [vmem:[%s956_s1 + $0x144] ss:$16 sps:$4 sm:$0xff]   ;;  %v704_v54 = vld [vmem:[%s956_s1 + $0x14c] ss:$16 sps:$4 sm:$0xff]   ;;  %v707_v56 = vld [vmem:[%s956_s1 + $0x148] ss:$16 sps:$4 sm:$0xff]  }
  0x14   :  { %442 = vmatprep.subr.bf16.mxu0 %v654_v20  ;;  %485 = vmatprep.subr.bf16.mxu1 %v656_v21  ;;  %v708_v57 = vld [vmem:[%s956_s1 + $0x124] ss:$16 sps:$4 sm:$0xff]   ;;  %v710_v58 = vld [vmem:[%s956_s1 + $0x12c] ss:$16 sps:$4 sm:$0xff]   ;;  %v712_v59 = vld [vmem:[%s956_s1 + $0x120] ss:$16 sps:$4 sm:$0xff]  }
  0x15   :  { %v713_v60 = vld [vmem:[%s956_s1 + $0x128] ss:$16 sps:$4 sm:$0xff]   ;;  %v714_v61 = vld [vmem:[%s956_s1 + $0x104] ss:$16 sps:$4 sm:$0xff]   ;;  %v716_v62 = vld [vmem:[%s956_s1 + $0x10c] ss:$16 sps:$4 sm:$0xff]  }
  0x16   :  { %v718_v63 = vld [vmem:[%s956_s1 + $0x100] ss:$16 sps:$4 sm:$0xff]   ;;  %v719_v0 = vld [vmem:[%s956_s1 + $0x108] ss:$16 sps:$4 sm:$0xff]   ;;  %v83_v3 = vshrl.u32 %v82_v2, 7 }
  0x17   :  { %443 = vmatpush1.bf16.msra.mxu0 %v658_v22  ;;  %486 = vmatpush1.bf16.msra.mxu1 %v659_v23  ;;  %v720_v1 = vld [vmem:[%s957_s0] ss:$8 sps:$4 sm:$0xff]  }
  0x18   :  { %444 = vmatprep.subr.bf16.mxu0 %v660_v24  ;;  %487 = vmatprep.subr.bf16.mxu1 %v662_v25  ;;  %v84_v4 = vsub.s32 0, %v83_v3  ;;  %v92_v5 = vsub.s32 2, %v83_v3  ;;  %v88_v6 = vsub.s32 1, %v83_v3  ;;  %v96_v7 = vsub.s32 3, %v83_v3  ;;  %v80_v8 = vld [vmem:[%s958_s2] sm:$0xf] }
  0x1a   :  { %v85_v9 = vrot.slane %v80_v8, %v84_v4  ;;  %v93_v10 = vrot.slane %v80_v8, %v92_v5  ;;  %v89_v11 = vrot.slane %v80_v8, %v88_v6  ;;  %v97_v12 = vrot.slane %v80_v8, %v96_v7 }
  0x1b   :  { %445 = vmatpush1.bf16.msra.mxu0 %v664_v26  ;;  %488 = vmatpush1.bf16.msra.mxu1 %v665_v27 }
  0x1c   :  { %446 = vmatprep.subr.bf16.mxu0 %v666_v28  ;;  %489 = vmatprep.subr.bf16.mxu1 %v668_v29 }
  0x1f   :  { %447 = vmatpush1.bf16.msra.mxu0 %v670_v30  ;;  %490 = vmatpush1.bf16.msra.mxu1 %v671_v31 }
  0x20   :  { %448 = vmatprep.subr.bf16.mxu0 %v672_v32  ;;  %491 = vmatprep.subr.bf16.mxu1 %v674_v33 }
  0x23   :  { %449 = vmatpush2.bf16.msra.mxu0 %v676_v34  ;;  %492 = vmatpush2.bf16.msra.mxu1 %v677_v35 }
  0x24   :  { %450 = vmatprep.subr.bf16.mxu0 %v678_v36  ;;  %493 = vmatprep.subr.bf16.mxu1 %v680_v37 }
  0x27   :  { %451 = vmatpush2.bf16.msra.mxu0 %v682_v38  ;;  %494 = vmatpush2.bf16.msra.mxu1 %v683_v39 }
  0x28   :  { %452 = vmatprep.subr.bf16.mxu0 %v684_v40  ;;  %495 = vmatprep.subr.bf16.mxu1 %v686_v41 }
  0x2b   :  { %453 = vmatpush2.bf16.msra.mxu0 %v688_v42  ;;  %496 = vmatpush2.bf16.msra.mxu1 %v689_v43 }
  0x2c   :  { %454 = vmatprep.subr.bf16.mxu0 %v690_v44  ;;  %497 = vmatprep.subr.bf16.mxu1 %v692_v45 }
  0x2f   :  { %455 = vmatpush2.bf16.msra.mxu0 %v694_v47  ;;  %498 = vmatpush2.bf16.msra.mxu1 %v695_v48 }
  0x30   :  { %456 = vmatprep.subr.bf16.mxu0 %v696_v49  ;;  %499 = vmatprep.subr.bf16.mxu1 %v698_v50 }
  0x33   :  { %457 = vmatpush2.bf16.msra.mxu0 %v700_v51  ;;  %500 = vmatpush2.bf16.msra.mxu1 %v701_v52 }
  0x34   :  { %458 = vmatprep.subr.bf16.mxu0 %v702_v53  ;;  %501 = vmatprep.subr.bf16.mxu1 %v704_v54 }
  0x37   :  { %459 = vmatpush2.bf16.msra.mxu0 %v706_v55  ;;  %502 = vmatpush2.bf16.msra.mxu1 %v707_v56 }
  0x38   :  { %460 = vmatprep.subr.bf16.mxu0 %v708_v57  ;;  %503 = vmatprep.subr.bf16.mxu1 %v710_v58 }
  0x3b   :  { %461 = vmatpush2.bf16.msra.mxu0 %v712_v59  ;;  %504 = vmatpush2.bf16.msra.mxu1 %v713_v60 }
  0x3c   :  { %462 = vmatprep.subr.bf16.mxu0 %v714_v61  ;;  %505 = vmatprep.subr.bf16.mxu1 %v716_v62 }
  0x3f   :  { %463 = vmatpush2.bf16.msra.mxu0 %v718_v63  ;;  %506 = vmatpush2.bf16.msra.mxu1 %v719_v0 }
  0x42   :  { %465 = vmatmul.mubr.bf16.vlgmr.msra.gmra.mxu0 %v720_v1  ;;  %508 = vmatmul.mubr.bf16.vlgmr.msra.gmra.mxu1 %v720_v1 }
 0x102   :  { %v466_v13 = vpop.f32.mrf.mxu0  ;;  %v509_v14 = vpop.f32.mrf.mxu1 }
 0x103   :  { %v467_v17 = vadd.f32 %v466_v13, %v85_v9  ;;  %v510_v18 = vadd.f32 %v509_v14, %v93_v10 }
 0x104   :  { %v468_v15 = vpop.f32.mrf.mxu0  ;;  %v511_v16 = vpop.f32.mrf.mxu1 }
 0x105   :  { %v469_v19 = vadd.f32 %v468_v15, %v89_v11  ;;  %v512_v20 = vadd.f32 %v511_v16, %v97_v12 }
 0x106   :  { %v470_v21 = vpop.f32.mrf.mxu0  ;;  %v513_v22 = vpop.f32.mrf.mxu1 }
 0x107   :  { %v620_v23 = vpack.c.bf16 %v469_v19, %v467_v17  ;;  %v621_v24 = vpack.c.bf16 %v512_v20, %v510_v18  ;;  %v471_v27 = vadd.f32 %v470_v21, %v85_v9  ;;  %v514_v28 = vadd.f32 %v513_v22, %v93_v10 }
 0x108   :  { %v472_v25 = vpop.f32.mrf.mxu0  ;;  %v515_v26 = vpop.f32.mrf.mxu1 }
 0x109   :  { %542 = vst [vmem:[%s959_s3] sm:$0xff] %v620_v23  ;;  %543 = vst [vmem:[%s959_s3 + $0x8] sm:$0xff] %v621_v24  ;;  %v473_v29 = vadd.f32 %v472_v25, %v89_v11  ;;  %v516_v30 = vadd.f32 %v515_v26, %v97_v12 }
 0x10b   :  { %v622_v31 = vpack.c.bf16 %v473_v29, %v471_v27  ;;  %v623_v32 = vpack.c.bf16 %v516_v30, %v514_v28 }
 0x10d   :  { %544 = vst [vmem:[%s959_s3 + $0x10] sm:$0xff] %v622_v31  ;;  %545 = vst [vmem:[%s959_s3 + $0x18] sm:$0xff] %v623_v32 }

// kernel: resnet18_forward.39
= control target key start
LH: loop header
LB: loop body
LE: loop exit
PB: predicated region body
PF: predicated region fallthrough
CT: control target
= control target key end

     0   :  { %s2073_s15 = smov 0   ;;  %s2075_s16 = smov 0   ;;  %s2311_s0 = inlined_call_operand.vmem [shape: bf16[16,4608], index: 0, kind: input, shape index: {}]   ;;  %s2312_s1 = inlined_call_operand.vmem [shape: bf16[4608,512], index: 1, kind: input, shape index: {}]   ;;  %s2313_s2 = inlined_call_operand.vmem [shape: f32[1,512], index: 2, kind: input, shape index: {}]   ;;  %s2314_s3 = inlined_call_operand.vmem [shape: bf16[16,512], index: 3, kind: input, shape index: {}]   ;;  %s2315_s4 = inlined_call_operand.vmem [shape: bf16[16,512], index: 4, kind: output, shape index: {}]  }
   0x1   :  { %s2077_s17 = smov 0   ;;  %s2079_s18 = smov 0  }
   0x2   :  { %s2081_s19 = smov 0  }
   0x3 LB: > { %s26_s20 = sadd.s32 1, %s2041_s18  ;;  %p49_p1 = scmp.ne.s32.totalorder %s2033_s16, %s2029_s15  ;;  %s2045_s19 = sphi %s2081_s19, %s14_s19   ;;  %s2041_s18 = sphi %s2079_s18, %s2319_s18   ;;  %s2037_s17 = sphi %s2077_s17, %s2318_s17   ;;  %s2033_s16 = sphi %s2075_s16, %s2317_s16   ;;  %s2029_s15 = sphi %s2073_s15, %s2316_s15  }
   0x4   : > { %p27_p0 = scmp.ge.s32.totalorder %s26_s20, 9  ;;  %p50_p2 = scmp.eq.s32.totalorder %s2045_s19, 0 }
   0x5   : > { %s42_s22 = sadd.s32 1, %s2033_s16  ;;  %p1611_p5 = scmp.ge.s32.totalorder %s2045_s19, 9 }
   0x6   : > { %s2321_s20 = smov (%p27_p0, %s26_s20), 0  ;;  %p51_p3 = por %p50_p2, %p49_p1 }
   0x7   : > { %s38_s21 = ssub.s32 %s2041_s18, %s2321_s20  ;;  %208 = sbr.rel (%p1611_p5) target bundleno = 18 (0x12), region = 24 }
   0x8   : > { %p40_p4 = scmp.eq.s32.totalorder %s38_s21, 0 }
   0xa   : > { %s2108_s23 = scalar_select %p40_p4, %s2033_s16, %s42_s22  }
   0xc   : > { %211 = sbr.rel (!%p51_p3) target bundleno = 18 (0x12), region = 28  ;;  %s213_s24 = sand.u32 (%p51_p3), 1, %s2033_s16  }
   0xd   : > { %s1762_s25 = sshll.u32 (%p51_p3), %s2041_s18, 4  ;;  %s1612_s26 = sshll.u32 (%p51_p3), %s213_s24, 5 }
   0xe   : > { %s221_s29 = scalar_lea.vmem (%p51_p3), %s2311_s0, %s1762_s25  ;;  %s215_s30 = scalar_lea.vmem (%p51_p3), [#allocation3], %s1612_s26 }
   0xf   : > { %v234_v0 = vld [vmem:[%s221_s29] sm:$0xff] (%p51_p3)  ;;  %v236_v1 = vld [vmem:[%s221_s29 + $0x8] sm:$0xff] (%p51_p3)  ;;  %v238_v2 = vld [vmem:[%s221_s29 + $0x90] sm:$0xff] (%p51_p3) }
  0x10   : > { %235 = vst [vmem:[%s215_s30] sm:$0xff] (%p51_p3), %v234_v0  ;;  %237 = vst [vmem:[%s215_s30 + $0x8] sm:$0xff] (%p51_p3), %v236_v1  ;;  %v240_v3 = vld [vmem:[%s221_s29 + $0x98] sm:$0xff] (%p51_p3) }
  0x11   : > { %239 = vst [vmem:[%s215_s30 + $0x10] sm:$0xff] %v238_v2  ;;  %241 = vst [vmem:[%s215_s30 + $0x18] sm:$0xff] %v240_v3 }
  0x12 PF: > { %p1615_p6 = scmp.ge.s32.totalorder %s2045_s19, 1  ;;  %p261_p7 = scmp.lt.s32.totalorder %s2045_s19, 10 }
  0x14   : > { %p262_p8 = pnand %p1615_p6, %p261_p7 }
  0x15   : > { %s268_s5 = sand.u32 (!%p262_p8), 1, %s2029_s15   ;;  %s1617_s6 = sshll.u32 (!%p262_p8), %s2037_s17, 6 }
  0x16   : > { %265 = sbr.rel (%p262_p8) target bundleno = 389 (0x185), region = 55  ;;  %s1616_s7 = sshll.u32 (!%p262_p8), %s268_s5, 5 }
  0x17   : > { %p326_p9 = scmp.lt.s32.totalorder (!%p262_p8), %s1617_s6, 575  ;;  %s2125_s12 = scalar_lea.vmem (!%p262_p8), [#allocation3], %s1616_s7 }
  0x18   : > { %p1620_p10 = scmp.ne.s32.totalorder (!%p262_p8), %s2037_s17, 0 }
  0x1b   : > { %s2323_s6 = smov (!%p326_p9, %s1617_s6), 575  ;;  %368 = sbr.rel (%p1620_p10) target bundleno = 37 (0x25), region = 63 }
  0x1c   : > { %s1763_s8 = sshll.u32 %s2323_s6, 4 }
  0x1d   : > { %s2123_s11 = scalar_lea.vmem %s2312_s1, %s1763_s8 }
  0x20   : > { %v2047_v4 = vmov 0.0  }
  0x21   : > { %369 = vst [vmem:[#allocation2 + $0x30] sm:$0xff] %v2047_v4  ;;  %370 = vst [vmem:[#allocation2] sm:$0xff] %v2047_v4 }
  0x22   : > { %371 = vst [vmem:[#allocation2 + $0x18] sm:$0xff] %v2047_v4  ;;  %372 = vst [vmem:[#allocation2 + $0x10] sm:$0xff] %v2047_v4 }
  0x23   : > { %373 = vst [vmem:[#allocation2 + $0x8] sm:$0xff] %v2047_v4  ;;  %374 = vst [vmem:[#allocation2 + $0x20] sm:$0xff] %v2047_v4 }
  0x24   : > { %375 = vst [vmem:[#allocation2 + $0x28] sm:$0xff] %v2047_v4  ;;  %376 = vst [vmem:[#allocation2 + $0x38] sm:$0xff] %v2047_v4 }
  0x25 PF: > { %v1809_v5 = vld [vmem:[%s2123_s11 + $0xe4] ss:$16 sps:$4 sm:$0xff]   ;;  %v1813_v7 = vld [vmem:[%s2123_s11 + $0xe0] ss:$16 sps:$4 sm:$0xff]   ;;  %v1910_v56 = vld [vmem:[%s2125_s12 + $0xc] ss:$16 sps:$4 sm:$0xff]  }
  0x26   : > { %v1811_v6 = vld [vmem:[%s2123_s11 + $0x2e4] ss:$16 sps:$4 sm:$0xff]   ;;  %1177 = vmatprep.subr.bf16.mxu0 %v1809_v5  ;;  %v1814_v8 = vld [vmem:[%s2123_s11 + $0x2e0] ss:$16 sps:$4 sm:$0xff]   ;;  %1252 = vmatprep.mubr.bf16.mxu1 %v1910_v56  ;;  %p1753_p11 = scmp.ne.s32.totalorder %s2037_s17, 8 }
  0x27   : > { %1220 = vmatprep.subr.bf16.mxu1 %v1811_v6  ;;  %v1815_v9 = vld [vmem:[%s2123_s11 + $0xc4] ss:$16 sps:$4 sm:$0xff]   ;;  %1178 = vmatpush1.bf16.msra.mxu0 %v1813_v7  ;;  %v1819_v11 = vld [vmem:[%s2123_s11 + $0xc0] ss:$16 sps:$4 sm:$0xff]   ;;  %v1913_v7 = vld [vmem:[%s2123_s11 + $0xec] ss:$16 sps:$4 sm:$0xff]  }
  0x28   : > { %1221 = vmatpush1.bf16.msra.mxu1 %v1814_v8  ;;  %v1817_v10 = vld [vmem:[%s2123_s11 + $0x2c4] ss:$16 sps:$4 sm:$0xff]   ;;  %1179 = vmatprep.subr.bf16.mxu0 %v1815_v9  ;;  %v1820_v12 = vld [vmem:[%s2123_s11 + $0x2c0] ss:$16 sps:$4 sm:$0xff]   ;;  %v1916_v8 = vld [vmem:[%s2123_s11 + $0x2ec] ss:$16 sps:$4 sm:$0xff]  }
  0x29   : > { %1222 = vmatprep.subr.bf16.mxu1 %v1817_v10  ;;  %v1821_v13 = vld [vmem:[%s2123_s11 + $0xa4] ss:$16 sps:$4 sm:$0xff]   ;;  %v1825_v15 = vld [vmem:[%s2123_s11 + $0xa0] ss:$16 sps:$4 sm:$0xff]   ;;  %v2200_v10 = vld [vmem:[%s2125_s12 + $0x8] ss:$16 sps:$4 sm:$0xff]  }
  0x2a   : > { %v1823_v14 = vld [vmem:[%s2123_s11 + $0x2a4] ss:$16 sps:$4 sm:$0xff]   ;;  %v1826_v16 = vld [vmem:[%s2123_s11 + $0x2a0] ss:$16 sps:$4 sm:$0xff]  }
  0x2b   : > { %1180 = vmatpush1.bf16.msra.mxu0 %v1819_v11  ;;  %v1827_v17 = vld [vmem:[%s2123_s11 + $0x84] ss:$16 sps:$4 sm:$0xff]   ;;  %v1831_v19 = vld [vmem:[%s2123_s11 + $0x80] ss:$16 sps:$4 sm:$0xff]   ;;  %v1911_v11 = vld [vmem:[%s2123_s11 + $0xe8] ss:$16 sps:$4 sm:$0xff]  }
  0x2c   : > { %1223 = vmatpush1.bf16.msra.mxu1 %v1820_v12  ;;  %1181 = vmatprep.subr.bf16.mxu0 %v1821_v13  ;;  %v1829_v18 = vld [vmem:[%s2123_s11 + $0x284] ss:$16 sps:$4 sm:$0xff]   ;;  %v1832_v20 = vld [vmem:[%s2123_s11 + $0x280] ss:$16 sps:$4 sm:$0xff]   ;;  %v1914_v12 = vld [vmem:[%s2123_s11 + $0x2e8] ss:$16 sps:$4 sm:$0xff]  }
  0x2d   : > { %1224 = vmatprep.subr.bf16.mxu1 %v1823_v14  ;;  %v1833_v21 = vld [vmem:[%s2123_s11 + $0x64] ss:$16 sps:$4 sm:$0xff]   ;;  %v1837_v23 = vld [vmem:[%s2123_s11 + $0x60] ss:$16 sps:$4 sm:$0xff]   ;;  %v1919_v13 = vld [vmem:[%s2123_s11 + $0xcc] ss:$16 sps:$4 sm:$0xff]  }
  0x2e   : > { %v1835_v22 = vld [vmem:[%s2123_s11 + $0x264] ss:$16 sps:$4 sm:$0xff]   ;;  %v1838_v24 = vld [vmem:[%s2123_s11 + $0x260] ss:$16 sps:$4 sm:$0xff]   ;;  %v1922_v14 = vld [vmem:[%s2123_s11 + $0x2cc] ss:$16 sps:$4 sm:$0xff]  }
  0x2f   : > { %1182 = vmatpush1.bf16.msra.mxu0 %v1825_v15  ;;  %v1839_v25 = vld [vmem:[%s2123_s11 + $0x44] ss:$16 sps:$4 sm:$0xff]   ;;  %v1843_v27 = vld [vmem:[%s2123_s11 + $0x40] ss:$16 sps:$4 sm:$0xff]   ;;  %v1917_v15 = vld [vmem:[%s2123_s11 + $0xc8] ss:$16 sps:$4 sm:$0xff]  }
  0x30   : > { %1225 = vmatpush1.bf16.msra.mxu1 %v1826_v16  ;;  %1183 = vmatprep.subr.bf16.mxu0 %v1827_v17  ;;  %v1841_v26 = vld [vmem:[%s2123_s11 + $0x244] ss:$16 sps:$4 sm:$0xff]   ;;  %v1844_v28 = vld [vmem:[%s2123_s11 + $0x240] ss:$16 sps:$4 sm:$0xff]   ;;  %v1920_v16 = vld [vmem:[%s2123_s11 + $0x2c8] ss:$16 sps:$4 sm:$0xff]  }
  0x31   : > { %1226 = vmatprep.subr.bf16.mxu1 %v1829_v18  ;;  %v1845_v29 = vld [vmem:[%s2123_s11 + $0x24] ss:$16 sps:$4 sm:$0xff]   ;;  %v1849_v31 = vld [vmem:[%s2123_s11 + $0x20] ss:$16 sps:$4 sm:$0xff]   ;;  %v1925_v17 = vld [vmem:[%s2123_s11 + $0xac] ss:$16 sps:$4 sm:$0xff]  }
  0x32   : > { %v1847_v30 = vld [vmem:[%s2123_s11 + $0x224] ss:$16 sps:$4 sm:$0xff]   ;;  %v1850_v32 = vld [vmem:[%s2123_s11 + $0x220] ss:$16 sps:$4 sm:$0xff]   ;;  %v1928_v18 = vld [vmem:[%s2123_s11 + $0x2ac] ss:$16 sps:$4 sm:$0xff]  }
  0x33   : > { %1184 = vmatpush1.bf16.msra.mxu0 %v1831_v19  ;;  %v1851_v33 = vld [vmem:[%s2123_s11 + $0x4] ss:$16 sps:$4 sm:$0xff]   ;;  %v1855_v35 = vld [vmem:[%s2123_s11] ss:$16 sps:$4 sm:$0xff]   ;;  %v1923_v19 = vld [vmem:[%s2123_s11 + $0xa8] ss:$16 sps:$4 sm:$0xff]  }
  0x34   : > { %1227 = vmatpush1.bf16.msra.mxu1 %v1832_v20  ;;  %1185 = vmatprep.subr.bf16.mxu0 %v1833_v21  ;;  %v1853_v34 = vld [vmem:[%s2123_s11 + $0x204] ss:$16 sps:$4 sm:$0xff]   ;;  %v1856_v36 = vld [vmem:[%s2123_s11 + $0x200] ss:$16 sps:$4 sm:$0xff]   ;;  %v1926_v20 = vld [vmem:[%s2123_s11 + $0x2a8] ss:$16 sps:$4 sm:$0xff]  }
  0x35   : > { %1228 = vmatprep.subr.bf16.mxu1 %v1835_v22  ;;  %v1857_v37 = vld [vmem:[%s2123_s11 + $0x1e4] ss:$16 sps:$4 sm:$0xff]   ;;  %v1861_v39 = vld [vmem:[%s2123_s11 + $0x1e0] ss:$16 sps:$4 sm:$0xff]   ;;  %v1931_v21 = vld [vmem:[%s2123_s11 + $0x8c] ss:$16 sps:$4 sm:$0xff]  }
  0x36   : > { %v1859_v38 = vld [vmem:[%s2123_s11 + $0x3e4] ss:$16 sps:$4 sm:$0xff]   ;;  %v1862_v40 = vld [vmem:[%s2123_s11 + $0x3e0] ss:$16 sps:$4 sm:$0xff]   ;;  %v1934_v22 = vld [vmem:[%s2123_s11 + $0x28c] ss:$16 sps:$4 sm:$0xff]  }
  0x37   : > { %1186 = vmatpush1.bf16.msra.mxu0 %v1837_v23  ;;  %v1863_v41 = vld [vmem:[%s2123_s11 + $0x1c4] ss:$16 sps:$4 sm:$0xff]   ;;  %v1867_v43 = vld [vmem:[%s2123_s11 + $0x1c0] ss:$16 sps:$4 sm:$0xff]   ;;  %v1929_v23 = vld [vmem:[%s2123_s11 + $0x88] ss:$16 sps:$4 sm:$0xff]  }
  0x38   : > { %1229 = vmatpush1.bf16.msra.mxu1 %v1838_v24  ;;  %1187 = vmatprep.subr.bf16.mxu0 %v1839_v25  ;;  %v1865_v42 = vld [vmem:[%s2123_s11 + $0x3c4] ss:$16 sps:$4 sm:$0xff]   ;;  %v1868_v44 = vld [vmem:[%s2123_s11 + $0x3c0] ss:$16 sps:$4 sm:$0xff]   ;;  %v1932_v24 = vld [vmem:[%s2123_s11 + $0x288] ss:$16 sps:$4 sm:$0xff]  }
  0x39   : > { %1230 = vmatprep.subr.bf16.mxu1 %v1841_v26  ;;  %v1869_v45 = vld [vmem:[%s2123_s11 + $0x1a4] ss:$16 sps:$4 sm:$0xff]   ;;  %v1873_v47 = vld [vmem:[%s2123_s11 + $0x1a0] ss:$16 sps:$4 sm:$0xff]   ;;  %v1937_v25 = vld [vmem:[%s2123_s11 + $0x6c] ss:$16 sps:$4 sm:$0xff]  }
  0x3a   : > { %v1871_v46 = vld [vmem:[%s2123_s11 + $0x3a4] ss:$16 sps:$4 sm:$0xff]   ;;  %v1874_v48 = vld [vmem:[%s2123_s11 + $0x3a0] ss:$16 sps:$4 sm:$0xff]   ;;  %v1940_v26 = vld [vmem:[%s2123_s11 + $0x26c] ss:$16 sps:$4 sm:$0xff]  }
  0x3b   : > { %1188 = vmatpush1.bf16.msra.mxu0 %v1843_v27  ;;  %v1875_v49 = vld [vmem:[%s2123_s11 + $0x184] ss:$16 sps:$4 sm:$0xff]   ;;  %v1879_v51 = vld [vmem:[%s2123_s11 + $0x180] ss:$16 sps:$4 sm:$0xff]   ;;  %v1935_v27 = vld [vmem:[%s2123_s11 + $0x68] ss:$16 sps:$4 sm:$0xff]  }
  0x3c   : > { %1231 = vmatpush1.bf16.msra.mxu1 %v1844_v28  ;;  %1189 = vmatprep.subr.bf16.mxu0 %v1845_v29  ;;  %v1877_v50 = vld [vmem:[%s2123_s11 + $0x384] ss:$16 sps:$4 sm:$0xff]   ;;  %v1880_v52 = vld [vmem:[%s2123_s11 + $0x380] ss:$16 sps:$4 sm:$0xff]   ;;  %v1938_v28 = vld [vmem:[%s2123_s11 + $0x268] ss:$16 sps:$4 sm:$0xff]  }
  0x3d   : > { %1232 = vmatprep.subr.bf16.mxu1 %v1847_v30  ;;  %v1881_v53 = vld [vmem:[%s2123_s11 + $0x164] ss:$16 sps:$4 sm:$0xff]   ;;  %v1885_v57 = vld [vmem:[%s2123_s11 + $0x160] ss:$16 sps:$4 sm:$0xff]   ;;  %v1943_v29 = vld [vmem:[%s2123_s11 + $0x4c] ss:$16 sps:$4 sm:$0xff]  }
  0x3e   : > { %v1907_v54 = vld [vmem:[%s2125_s12 + $0x4] ss:$16 sps:$4 sm:$0xff]   ;;  %v1886_v58 = vld [vmem:[%s2123_s11 + $0x360] ss:$16 sps:$4 sm:$0xff]   ;;  %v1946_v30 = vld [vmem:[%s2123_s11 + $0x24c] ss:$16 sps:$4 sm:$0xff]  }
  0x3f   : > { %1190 = vmatpush1.bf16.msra.mxu0 %v1849_v31  ;;  %v1883_v55 = vld [vmem:[%s2123_s11 + $0x364] ss:$16 sps:$4 sm:$0xff]   ;;  %1209 = vmatprep.mubr.bf16.mxu0 %v1907_v54  ;;  %v1891_v61 = vld [vmem:[%s2123_s11 + $0x140] ss:$16 sps:$4 sm:$0xff]   ;;  %v1941_v31 = vld [vmem:[%s2123_s11 + $0x48] ss:$16 sps:$4 sm:$0xff]  }
  0x40   : > { %1233 = vmatpush1.bf16.msra.mxu1 %v1850_v32  ;;  %1191 = vmatprep.subr.bf16.mxu0 %v1851_v33  ;;  %v1887_v59 = vld [vmem:[%s2123_s11 + $0x144] ss:$16 sps:$4 sm:$0xff]   ;;  %v1892_v62 = vld [vmem:[%s2123_s11 + $0x340] ss:$16 sps:$4 sm:$0xff]   ;;  %v1944_v32 = vld [vmem:[%s2123_s11 + $0x248] ss:$16 sps:$4 sm:$0xff]  }
  0x41   : > { %1234 = vmatprep.subr.bf16.mxu1 %v1853_v34  ;;  %v1889_v60 = vld [vmem:[%s2123_s11 + $0x344] ss:$16 sps:$4 sm:$0xff]   ;;  %v1897_v1 = vld [vmem:[%s2123_s11 + $0x120] ss:$16 sps:$4 sm:$0xff]   ;;  %v1949_v33 = vld [vmem:[%s2123_s11 + $0x2c] ss:$16 sps:$4 sm:$0xff]  }
  0x42   : > { %v1893_v63 = vld [vmem:[%s2123_s11 + $0x124] ss:$16 sps:$4 sm:$0xff]   ;;  %v1898_v2 = vld [vmem:[%s2123_s11 + $0x320] ss:$16 sps:$4 sm:$0xff]   ;;  %v1952_v34 = vld [vmem:[%s2123_s11 + $0x22c] ss:$16 sps:$4 sm:$0xff]  }
  0x43   : > { %1192 = vmatpush1.bf16.msra.mxu0 %v1855_v35  ;;  %v1895_v0 = vld [vmem:[%s2123_s11 + $0x324] ss:$16 sps:$4 sm:$0xff]   ;;  %v1903_v5 = vld [vmem:[%s2123_s11 + $0x100] ss:$16 sps:$4 sm:$0xff]   ;;  %v1947_v35 = vld [vmem:[%s2123_s11 + $0x28] ss:$16 sps:$4 sm:$0xff]  }
  0x44   : > { %1235 = vmatpush1.bf16.msra.mxu1 %v1856_v36  ;;  %1193 = vmatprep.subr.bf16.mxu0 %v1857_v37  ;;  %v1899_v3 = vld [vmem:[%s2123_s11 + $0x104] ss:$16 sps:$4 sm:$0xff]   ;;  %v1904_v6 = vld [vmem:[%s2123_s11 + $0x300] ss:$16 sps:$4 sm:$0xff]   ;;  %v1950_v36 = vld [vmem:[%s2123_s11 + $0x228] ss:$16 sps:$4 sm:$0xff]  }
  0x45   : > { %1236 = vmatprep.subr.bf16.mxu1 %v1859_v38  ;;  %v1901_v4 = vld [vmem:[%s2123_s11 + $0x304] ss:$16 sps:$4 sm:$0xff]   ;;  %v2197_v9 = vld [vmem:[%s2125_s12] ss:$16 sps:$4 sm:$0xff]   ;;  %v1955_v37 = vld [vmem:[%s2123_s11 + $0xc] ss:$16 sps:$4 sm:$0xff]  }
  0x46   : > { %v1958_v38 = vld [vmem:[%s2123_s11 + $0x20c] ss:$16 sps:$4 sm:$0xff]  }
  0x47   : > { %1194 = vmatpush2.bf16.msra.mxu0 %v1861_v39  ;;  %v1953_v39 = vld [vmem:[%s2123_s11 + $0x8] ss:$16 sps:$4 sm:$0xff]  }
  0x48   : > { %1237 = vmatpush2.bf16.msra.mxu1 %v1862_v40  ;;  %1195 = vmatprep.subr.bf16.mxu0 %v1863_v41  ;;  %v1956_v40 = vld [vmem:[%s2123_s11 + $0x208] ss:$16 sps:$4 sm:$0xff]   ;;  %v1961_v41 = vld [vmem:[%s2123_s11 + $0x1ec] ss:$16 sps:$4 sm:$0xff]  }
  0x49   : > { %1238 = vmatprep.subr.bf16.mxu1 %v1865_v42  ;;  %v1964_v42 = vld [vmem:[%s2123_s11 + $0x3ec] ss:$16 sps:$4 sm:$0xff]  }
  0x4b   : > { %1196 = vmatpush2.bf16.msra.mxu0 %v1867_v43  ;;  %v1959_v43 = vld [vmem:[%s2123_s11 + $0x1e8] ss:$16 sps:$4 sm:$0xff]  }
  0x4c   : > { %1239 = vmatpush2.bf16.msra.mxu1 %v1868_v44  ;;  %1197 = vmatprep.subr.bf16.mxu0 %v1869_v45  ;;  %v1962_v44 = vld [vmem:[%s2123_s11 + $0x3e8] ss:$16 sps:$4 sm:$0xff]   ;;  %v1967_v45 = vld [vmem:[%s2123_s11 + $0x1cc] ss:$16 sps:$4 sm:$0xff]  }
  0x4d   : > { %1240 = vmatprep.subr.bf16.mxu1 %v1871_v46  ;;  %v1970_v46 = vld [vmem:[%s2123_s11 + $0x3cc] ss:$16 sps:$4 sm:$0xff]  }
  0x4f   : > { %1198 = vmatpush2.bf16.msra.mxu0 %v1873_v47  ;;  %v1965_v47 = vld [vmem:[%s2123_s11 + $0x1c8] ss:$16 sps:$4 sm:$0xff]  }
  0x50   : > { %1241 = vmatpush2.bf16.msra.mxu1 %v1874_v48  ;;  %1199 = vmatprep.subr.bf16.mxu0 %v1875_v49  ;;  %v1968_v48 = vld [vmem:[%s2123_s11 + $0x3c8] ss:$16 sps:$4 sm:$0xff]   ;;  %v1973_v49 = vld [vmem:[%s2123_s11 + $0x1ac] ss:$16 sps:$4 sm:$0xff]  }
  0x51   : > { %1242 = vmatprep.subr.bf16.mxu1 %v1877_v50  ;;  %v1976_v50 = vld [vmem:[%s2123_s11 + $0x3ac] ss:$16 sps:$4 sm:$0xff]  }
  0x53   : > { %1200 = vmatpush2.bf16.msra.mxu0 %v1879_v51  ;;  %v1971_v51 = vld [vmem:[%s2123_s11 + $0x1a8] ss:$16 sps:$4 sm:$0xff]  }
  0x54   : > { %1243 = vmatpush2.bf16.msra.mxu1 %v1880_v52  ;;  %1201 = vmatprep.subr.bf16.mxu0 %v1881_v53  ;;  %v1974_v52 = vld [vmem:[%s2123_s11 + $0x3a8] ss:$16 sps:$4 sm:$0xff]   ;;  %v1979_v53 = vld [vmem:[%s2123_s11 + $0x18c] ss:$16 sps:$4 sm:$0xff]  }
  0x55   : > { %1244 = vmatprep.subr.bf16.mxu1 %v1883_v55  ;;  %v1977_v55 = vld [vmem:[%s2123_s11 + $0x188] ss:$16 sps:$4 sm:$0xff]  }
  0x57   : > { %1202 = vmatpush2.bf16.msra.mxu0 %v1885_v57  ;;  %v1985_v57 = vld [vmem:[%s2123_s11 + $0x16c] ss:$16 sps:$4 sm:$0xff]  }
  0x58   : > { %1245 = vmatpush2.bf16.msra.mxu1 %v1886_v58  ;;  %1203 = vmatprep.subr.bf16.mxu0 %v1887_v59  ;;  %v1988_v58 = vld [vmem:[%s2123_s11 + $0x36c] ss:$16 sps:$4 sm:$0xff]   ;;  %v1983_v59 = vld [vmem:[%s2123_s11 + $0x168] ss:$16 sps:$4 sm:$0xff]  }
  0x59   : > { %1246 = vmatprep.subr.bf16.mxu1 %v1889_v60  ;;  %v1986_v60 = vld [vmem:[%s2123_s11 + $0x368] ss:$16 sps:$4 sm:$0xff]  }
  0x5b   : > { %1204 = vmatpush2.bf16.msra.mxu0 %v1891_v61  ;;  %v1991_v61 = vld [vmem:[%s2123_s11 + $0x14c] ss:$16 sps:$4 sm:$0xff]  }
  0x5c   : > { %1247 = vmatpush2.bf16.msra.mxu1 %v1892_v62  ;;  %1205 = vmatprep.subr.bf16.mxu0 %v1893_v63  ;;  %v1994_v62 = vld [vmem:[%s2123_s11 + $0x34c] ss:$16 sps:$4 sm:$0xff]   ;;  %v1989_v63 = vld [vmem:[%s2123_s11 + $0x148] ss:$16 sps:$4 sm:$0xff]  }
  0x5d   : > { %1248 = vmatprep.subr.bf16.mxu1 %v1895_v0  ;;  %v1992_v0 = vld [vmem:[%s2123_s11 + $0x348] ss:$16 sps:$4 sm:$0xff]  }
  0x5f   : > { %1206 = vmatpush2.bf16.msra.mxu0 %v1897_v1  ;;  %v1997_v1 = vld [vmem:[%s2123_s11 + $0x12c] ss:$16 sps:$4 sm:$0xff]  }
  0x60   : > { %1249 = vmatpush2.bf16.msra.mxu1 %v1898_v2  ;;  %1207 = vmatprep.subr.bf16.mxu0 %v1899_v3  ;;  %v2000_v2 = vld [vmem:[%s2123_s11 + $0x32c] ss:$16 sps:$4 sm:$0xff]   ;;  %v1995_v3 = vld [vmem:[%s2123_s11 + $0x128] ss:$16 sps:$4 sm:$0xff]  }
  0x61   : > { %1250 = vmatprep.subr.bf16.mxu1 %v1901_v4  ;;  %v1998_v4 = vld [vmem:[%s2123_s11 + $0x328] ss:$16 sps:$4 sm:$0xff]  }
  0x63   : > { %1208 = vmatpush2.bf16.msra.mxu0 %v1903_v5  ;;  %v2003_v5 = vld [vmem:[%s2123_s11 + $0x10c] ss:$16 sps:$4 sm:$0xff]  }
  0x64   : > { %1251 = vmatpush2.bf16.msra.mxu1 %v1904_v6  ;;  %1263 = vmatprep.subr.bf16.mxu0 %v1913_v7  ;;  %v2006_v6 = vld [vmem:[%s2123_s11 + $0x30c] ss:$16 sps:$4 sm:$0xff]   ;;  %v2001_v7 = vld [vmem:[%s2123_s11 + $0x108] ss:$16 sps:$4 sm:$0xff]  }
  0x65   : > { %1306 = vmatprep.subr.bf16.mxu1 %v1916_v8  ;;  %v2004_v8 = vld [vmem:[%s2123_s11 + $0x308] ss:$16 sps:$4 sm:$0xff]  }
  0x66   : > { %1210 = vmatmul.mubr.bf16.vlgmr.msra.gmra.mxu0 %v2197_v9 }
  0x67   : > { %1253 = vmatmul.mubr.bf16.vlgmr.msra.gmra.mxu1 %v2200_v10  ;;  %1264 = vmatpush1.bf16.msra.mxu0 %v1911_v11 }
  0x68   : > { %1307 = vmatpush1.bf16.msra.mxu1 %v1914_v12  ;;  %1265 = vmatprep.subr.bf16.mxu0 %v1919_v13  ;;  %v377_v12 = vld [vmem:[#allocation2 + $0x30] sm:$0xff] }
  0x69   : > { %1308 = vmatprep.subr.bf16.mxu1 %v1922_v14  ;;  %1295 = vmatprep.mubr.bf16.mxu0 %v1907_v54  ;;  %v1982_v54 = vld [vmem:[%s2123_s11 + $0x38c] ss:$16 sps:$4 sm:$0xff]  }
  0x6a   : > { %1338 = vmatprep.mubr.bf16.mxu1 %v1910_v56  ;;  %v1980_v56 = vld [vmem:[%s2123_s11 + $0x388] ss:$16 sps:$4 sm:$0xff]  }
  0x6b   : > { %1266 = vmatpush1.bf16.msra.mxu0 %v1917_v15 }
  0x6c   : > { %1309 = vmatpush1.bf16.msra.mxu1 %v1920_v16  ;;  %1267 = vmatprep.subr.bf16.mxu0 %v1925_v17  ;;  %v378_v16 = vld [vmem:[#allocation2] sm:$0xff] }
  0x6d   : > { %1310 = vmatprep.subr.bf16.mxu1 %v1928_v18 }
  0x6f   : > { %1268 = vmatpush1.bf16.msra.mxu0 %v1923_v19 }
  0x70   : > { %1311 = vmatpush1.bf16.msra.mxu1 %v1926_v20  ;;  %1269 = vmatprep.subr.bf16.mxu0 %v1931_v21  ;;  %v381_v21 = vld [vmem:[#allocation2 + $0x8] sm:$0xff] }
  0x71   : > { %1312 = vmatprep.subr.bf16.mxu1 %v1934_v22 }
  0x73   : > { %1270 = vmatpush1.bf16.msra.mxu0 %v1929_v23 }
  0x74   : > { %1313 = vmatpush1.bf16.msra.mxu1 %v1932_v24  ;;  %1271 = vmatprep.subr.bf16.mxu0 %v1937_v25 }
  0x75   : > { %1314 = vmatprep.subr.bf16.mxu1 %v1940_v26  ;;  %v382_v26 = vld [vmem:[#allocation2 + $0x20] sm:$0xff] }
  0x77   : > { %1272 = vmatpush1.bf16.msra.mxu0 %v1935_v27 }
  0x78   : > { %1315 = vmatpush1.bf16.msra.mxu1 %v1938_v28  ;;  %1273 = vmatprep.subr.bf16.mxu0 %v1943_v29 }
  0x79   : > { %1316 = vmatprep.subr.bf16.mxu1 %v1946_v30  ;;  %v379_v30 = vld [vmem:[#allocation2 + $0x18] sm:$0xff] }
  0x7b   : > { %1274 = vmatpush1.bf16.msra.mxu0 %v1941_v31 }
  0x7c   : > { %1317 = vmatpush1.bf16.msra.mxu1 %v1944_v32  ;;  %1275 = vmatprep.subr.bf16.mxu0 %v1949_v33 }
  0x7d   : > { %1318 = vmatprep.subr.bf16.mxu1 %v1952_v34  ;;  %v380_v34 = vld [vmem:[#allocation2 + $0x10] sm:$0xff] }
  0x7f   : > { %1276 = vmatpush1.bf16.msra.mxu0 %v1947_v35 }
  0x80   : > { %1319 = vmatpush1.bf16.msra.mxu1 %v1950_v36  ;;  %1277 = vmatprep.subr.bf16.mxu0 %v1955_v37 }
  0x81   : > { %1320 = vmatprep.subr.bf16.mxu1 %v1958_v38 }
  0x83   : > { %1278 = vmatpush1.bf16.msra.mxu0 %v1953_v39  ;;  %v383_v39 = vld [vmem:[#allocation2 + $0x28] sm:$0xff] }
  0x84   : > { %1321 = vmatpush1.bf16.msra.mxu1 %v1956_v40  ;;  %1279 = vmatprep.subr.bf16.mxu0 %v1961_v41 }
  0x85   : > { %1322 = vmatprep.subr.bf16.mxu1 %v1964_v42 }
  0x87   : > { %1280 = vmatpush2.bf16.msra.mxu0 %v1959_v43 }
  0x88   : > { %1323 = vmatpush2.bf16.msra.mxu1 %v1962_v44  ;;  %1281 = vmatprep.subr.bf16.mxu0 %v1967_v45  ;;  %v384_v44 = vld [vmem:[#allocation2 + $0x38] sm:$0xff] }
  0x89   : > { %1324 = vmatprep.subr.bf16.mxu1 %v1970_v46 }
  0x8b   : > { %1282 = vmatpush2.bf16.msra.mxu0 %v1965_v47 }
  0x8c   : > { %1325 = vmatpush2.bf16.msra.mxu1 %v1968_v48  ;;  %1283 = vmatprep.subr.bf16.mxu0 %v1973_v49 }
  0x8d   : > { %1326 = vmatprep.subr.bf16.mxu1 %v1976_v50 }
  0x8f   : > { %1284 = vmatpush2.bf16.msra.mxu0 %v1971_v51 }
  0x90   : > { %1327 = vmatpush2.bf16.msra.mxu1 %v1974_v52  ;;  %1285 = vmatprep.subr.bf16.mxu0 %v1979_v53 }
  0x91   : > { %1328 = vmatprep.subr.bf16.mxu1 %v1982_v54 }
  0x93   : > { %1286 = vmatpush2.bf16.msra.mxu0 %v1977_v55 }
  0x94   : > { %1329 = vmatpush2.bf16.msra.mxu1 %v1980_v56  ;;  %1287 = vmatprep.subr.bf16.mxu0 %v1985_v57 }
  0x95   : > { %1330 = vmatprep.subr.bf16.mxu1 %v1988_v58 }
  0x97   : > { %1288 = vmatpush2.bf16.msra.mxu0 %v1983_v59 }
  0x98   : > { %1331 = vmatpush2.bf16.msra.mxu1 %v1986_v60  ;;  %1289 = vmatprep.subr.bf16.mxu0 %v1991_v61 }
  0x99   : > { %1332 = vmatprep.subr.bf16.mxu1 %v1994_v62 }
  0x9b   : > { %1290 = vmatpush2.bf16.msra.mxu0 %v1989_v63 }
  0x9c   : > { %1333 = vmatpush2.bf16.msra.mxu1 %v1992_v0  ;;  %1291 = vmatprep.subr.bf16.mxu0 %v1997_v1 }
  0x9d   : > { %1334 = vmatprep.subr.bf16.mxu1 %v2000_v2 }
  0x9f   : > { %1292 = vmatpush2.bf16.msra.mxu0 %v1995_v3 }
  0xa0   : > { %1335 = vmatpush2.bf16.msra.mxu1 %v1998_v4  ;;  %1293 = vmatprep.subr.bf16.mxu0 %v2003_v5 }
  0xa1   : > { %1336 = vmatprep.subr.bf16.mxu1 %v2006_v6 }
  0xa3   : > { %1294 = vmatpush2.bf16.msra.mxu0 %v2001_v7 }
  0xa4   : > { %1337 = vmatpush2.bf16.msra.mxu1 %v2004_v8 }
  0xa6   : > { %1296 = vmatmul.mubr.bf16.vlgmr.msra.gmra.mxu0 %v2197_v9 }
  0xa7   : > { %1339 = vmatmul.mubr.bf16.vlgmr.msra.gmra.mxu1 %v2200_v10 }
 0x126   : > { %v1211_v11 = vpop.f32.mrf.mxu0 }
 0x127   : > { %v1254_v13 = vpop.f32.mrf.mxu1 }
 0x128   : > { %v1255_v14 = vadd.f32 %v1254_v13, %v1211_v11  ;;  %v1213_v15 = vpop.f32.mrf.mxu0 }
 0x129   : > { %v1256_v17 = vpop.f32.mrf.mxu1 }
 0x12a   : > { %v1349_v18 = vadd.f32 %v1255_v14, %v377_v12  ;;  %v1257_v19 = vadd.f32 %v1256_v17, %v1213_v15  ;;  %v1215_v20 = vpop.f32.mrf.mxu0 }
 0x12b   : > { %v1258_v22 = vpop.f32.mrf.mxu1 }
 0x12c   : > { %1357 = vst [vmem:[#allocation2 + $0x30] sm:$0xff] %v1349_v18  ;;  %v1350_v23 = vadd.f32 %v1257_v19, %v378_v16  ;;  %v1259_v24 = vadd.f32 %v1258_v22, %v1215_v20  ;;  %v1217_v25 = vpop.f32.mrf.mxu0 }
 0x12d   : > { %v1260_v9 = vpop.f32.mrf.mxu1 }
 0x12e   : > { %1358 = vst [vmem:[#allocation2] sm:$0xff] %v1350_v23  ;;  %v1353_v10 = vadd.f32 %v1259_v24, %v381_v21  ;;  %v1261_v27 = vadd.f32 %v1260_v9, %v1217_v25 }
 0x130   : > { %1361 = vst [vmem:[#allocation2 + $0x8] sm:$0xff] %v1353_v10  ;;  %v1354_v28 = vadd.f32 %v1261_v27, %v382_v26 }
 0x132   : > { %1362 = vst [vmem:[#allocation2 + $0x20] sm:$0xff] %v1354_v28 }
 0x166   : > { %v1297_v29 = vpop.f32.mrf.mxu0 }
 0x167   : > { %v1340_v31 = vpop.f32.mrf.mxu1 }
 0x168   : > { %v1341_v32 = vadd.f32 %v1340_v31, %v1297_v29  ;;  %v1299_v33 = vpop.f32.mrf.mxu0 }
 0x169   : > { %v1342_v35 = vpop.f32.mrf.mxu1 }
 0x16a   : > { %v1351_v36 = vadd.f32 %v1341_v32, %v379_v30  ;;  %v1343_v37 = vadd.f32 %v1342_v35, %v1299_v33  ;;  %v1301_v38 = vpop.f32.mrf.mxu0 }
 0x16b   : > { %v1344_v40 = vpop.f32.mrf.mxu1 }
 0x16c   : > { %1359 = vst [vmem:[#allocation2 + $0x18] sm:$0xff] %v1351_v36  ;;  %v1352_v41 = vadd.f32 %v1343_v37, %v380_v34  ;;  %v1345_v42 = vadd.f32 %v1344_v40, %v1301_v38  ;;  %v1303_v43 = vpop.f32.mrf.mxu0 }
 0x16d   : > { %v1346_v45 = vpop.f32.mrf.mxu1 }
 0x16e   : > { %1360 = vst [vmem:[#allocation2 + $0x10] sm:$0xff] %v1352_v41  ;;  %v1355_v46 = vadd.f32 %v1345_v42, %v383_v39  ;;  %v1347_v47 = vadd.f32 %v1346_v45, %v1303_v43  ;;  %1368 = sbr.rel (%p1753_p11) target bundleno = 389 (0x185), region = 67 }
 0x170   : > { %1363 = vst [vmem:[#allocation2 + $0x28] sm:$0xff] %v1355_v46  ;;  %v1356_v48 = vadd.f32 %v1347_v47, %v384_v44 }
 0x172   : > { %1364 = vst [vmem:[#allocation2 + $0x38] sm:$0xff] %v1356_v48 }
 0x173   : > { %v1379_v49 = vlaneseq  ;;  %v1407_v51 = vld [vmem:[%s2314_s3] sm:$0xff]  ;;  %v1408_v52 = vld [vmem:[%s2314_s3 + $0x8] sm:$0xff]  ;;  %v1369_v53 = vld [vmem:[#allocation2 + $0x30] sm:$0xff] }
 0x174   : > { %v1370_v54 = vld [vmem:[#allocation2] sm:$0xff]  ;;  %v1409_v60 = vld [vmem:[%s2314_s3 + $0x10] sm:$0xff]  ;;  %v1410_v61 = vld [vmem:[%s2314_s3 + $0x18] sm:$0xff]  ;;  %v1411_v62 = vunpack.c.l.bf16 %v1407_v51  ;;  %v1412_v63 = vunpack.c.h.bf16 %v1407_v51  ;;  %v1413_v2 = vunpack.c.l.bf16 %v1408_v52  ;;  %v1414_v3 = vunpack.c.h.bf16 %v1408_v52 }
 0x175   : > { %v1380_v50 = vshrl.u32 %v1379_v49, 7  ;;  %v1377_v55 = vld [vmem:[%s2313_s2] sm:$0xf]  ;;  %v1371_v0 = vld [vmem:[#allocation2 + $0x18] sm:$0xff]  ;;  %v1372_v1 = vld [vmem:[#allocation2 + $0x10] sm:$0xff]  ;;  %v1415_v14 = vunpack.c.l.bf16 %v1409_v60  ;;  %v1416_v15 = vunpack.c.h.bf16 %v1409_v60  ;;  %v1417_v16 = vunpack.c.l.bf16 %v1410_v61 }
 0x176   : > { %v1373_v4 = vld [vmem:[#allocation2 + $0x8] sm:$0xff]  ;;  %v1374_v11 = vld [vmem:[#allocation2 + $0x20] sm:$0xff]  ;;  %v1418_v17 = vunpack.c.h.bf16 %v1410_v61 }
 0x177   : > { %v1381_v56 = vsub.s32 0, %v1380_v50  ;;  %v1385_v57 = vsub.s32 1, %v1380_v50  ;;  %v1389_v58 = vsub.s32 2, %v1380_v50  ;;  %v1393_v59 = vsub.s32 3, %v1380_v50  ;;  %v1375_v12 = vld [vmem:[#allocation2 + $0x28] sm:$0xff] }
 0x179   : > { %v1382_v5 = vrot.slane %v1377_v55, %v1381_v56  ;;  %v1386_v6 = vrot.slane %v1377_v55, %v1385_v57  ;;  %v1390_v7 = vrot.slane %v1377_v55, %v1389_v58  ;;  %v1394_v8 = vrot.slane %v1377_v55, %v1393_v59  ;;  %v1376_v13 = vld [vmem:[#allocation2 + $0x38] sm:$0xff] }
 0x17b   : > { %v1399_v18 = vadd.f32 %v1382_v5, %v1369_v53  ;;  %v1400_v19 = vadd.f32 %v1386_v6, %v1370_v54  ;;  %v1401_v20 = vadd.f32 %v1390_v7, %v1371_v0  ;;  %v1402_v21 = vadd.f32 %v1394_v8, %v1372_v1 }
 0x17c   : > { %v1403_v22 = vadd.f32 %v1382_v5, %v1373_v4  ;;  %v1404_v23 = vadd.f32 %v1386_v6, %v1374_v11  ;;  %v1405_v24 = vadd.f32 %v1390_v7, %v1375_v12  ;;  %v1406_v25 = vadd.f32 %v1394_v8, %v1376_v13 }
 0x17d   : > { %v1419_v26 = vadd.f32 %v1411_v62, %v1399_v18  ;;  %v1420_v9 = vadd.f32 %v1412_v63, %v1400_v19  ;;  %v1421_v10 = vadd.f32 %v1413_v2, %v1401_v20  ;;  %v1422_v27 = vadd.f32 %v1414_v3, %v1402_v21 }
 0x17e   : > { %v1423_v28 = vadd.f32 %v1415_v14, %v1403_v22  ;;  %v1424_v29 = vadd.f32 %v1416_v15, %v1404_v23  ;;  %v1425_v30 = vadd.f32 %v1417_v16, %v1405_v24  ;;  %v1426_v31 = vadd.f32 %v1418_v17, %v1406_v25 }
 0x17f   : > { %v1427_v32 = vmax.f32 %v1419_v26, 0.0  ;;  %v1428_v33 = vmax.f32 %v1420_v9, 0.0  ;;  %v1429_v34 = vmax.f32 %v1421_v10, 0.0  ;;  %v1430_v35 = vmax.f32 %v1422_v27, 0.0 }
 0x180   : > { %v1431_v36 = vmax.f32 %v1423_v28, 0.0  ;;  %v1432_v37 = vmax.f32 %v1424_v29, 0.0  ;;  %v1433_v38 = vmax.f32 %v1425_v30, 0.0  ;;  %v1434_v39 = vmax.f32 %v1426_v31, 0.0 }
 0x181   : > { %v1764_v40 = vpack.c.bf16 %v1428_v33, %v1427_v32  ;;  %v1765_v41 = vpack.c.bf16 %v1430_v35, %v1429_v34 }
 0x182   : > { %v1766_v42 = vpack.c.bf16 %v1432_v37, %v1431_v36  ;;  %v1767_v43 = vpack.c.bf16 %v1434_v39, %v1433_v38 }
 0x183   : > { %1459 = vst [vmem:[%s2315_s4] sm:$0xff] %v1764_v40  ;;  %1460 = vst [vmem:[%s2315_s4 + $0x8] sm:$0xff] %v1765_v41 }
 0x184   : > { %1461 = vst [vmem:[%s2315_s4 + $0x10] sm:$0xff] %v1766_v42  ;;  %1462 = vst [vmem:[%s2315_s4 + $0x18] sm:$0xff] %v1767_v43 }
 0x185 PF: > { %s14_s19 = sadd.s32 1, %s2045_s19   ;;  %s2316_s15 = smov %s2033_s16 }
 0x186   : > { %p11_p12 = scmp.ge.s32.totalorder %s14_s19, 11   ;;  %s2317_s16 = smov %s2108_s23 }
 0x187   : > { %s2318_s17 = smov %s2041_s18  ;;  %s2319_s18 = smov %s2321_s20 }
 0x188   :  { %13 = sbr.rel (!%p11_p12) target bundleno = 3 (0x3), region = 111 }

// kernel: resnet18_forward.40
= control target key start
LH: loop header
LB: loop body
LE: loop exit
PB: predicated region body
PF: predicated region fallthrough
CT: control target
= control target key end

     0   :  { %s1958_s12 = smov 0   ;;  %s1960_s13 = smov 0   ;;  %s2184_s0 = inlined_call_operand.vmem [shape: bf16[16,4608], index: 0, kind: input, shape index: {}]   ;;  %s2185_s1 = inlined_call_operand.vmem [shape: bf16[4608,512], index: 1, kind: input, shape index: {}]   ;;  %s2186_s2 = inlined_call_operand.vmem [shape: f32[1,512], index: 2, kind: input, shape index: {}]   ;;  %s2187_s3 = inlined_call_operand.vmem [shape: bf16[16,512], index: 3, kind: output, shape index: {}]  }
   0x1   :  { %s1962_s14 = smov 0   ;;  %s1964_s15 = smov 0  }
   0x2   :  { %s1966_s16 = smov 0  }
   0x3 LB: > { %s25_s17 = sadd.s32 1, %s1931_s15  ;;  %p48_p1 = scmp.ne.s32.totalorder %s1923_s13, %s1919_s12  ;;  %s1935_s16 = sphi %s1966_s16, %s13_s16   ;;  %s1931_s15 = sphi %s1964_s15, %s2191_s15   ;;  %s1927_s14 = sphi %s1962_s14, %s2190_s14   ;;  %s1923_s13 = sphi %s1960_s13, %s2189_s13   ;;  %s1919_s12 = sphi %s1958_s12, %s2188_s12  }
   0x4   : > { %p26_p0 = scmp.ge.s32.totalorder %s25_s17, 9  ;;  %p49_p2 = scmp.eq.s32.totalorder %s1935_s16, 0 }
   0x5   : > { %s41_s19 = sadd.s32 1, %s1923_s13  ;;  %p1501_p5 = scmp.ge.s32.totalorder %s1935_s16, 9 }
   0x6   : > { %s2193_s17 = smov (%p26_p0, %s25_s17), 0  ;;  %p50_p3 = por %p49_p2, %p48_p1 }
   0x7   : > { %s37_s18 = ssub.s32 %s1931_s15, %s2193_s17  ;;  %164 = sbr.rel (%p1501_p5) target bundleno = 18 (0x12), region = 20 }
   0x8   : > { %p39_p4 = scmp.eq.s32.totalorder %s37_s18, 0 }
   0xa   : > { %s1993_s20 = scalar_select %p39_p4, %s1923_s13, %s41_s19  }
   0xc   : > { %167 = sbr.rel (!%p50_p3) target bundleno = 18 (0x12), region = 24  ;;  %s169_s21 = sand.u32 (%p50_p3), 1, %s1923_s13  }
   0xd   : > { %s1652_s22 = sshll.u32 (%p50_p3), %s1931_s15, 4  ;;  %s1502_s23 = sshll.u32 (%p50_p3), %s169_s21, 5 }
   0xe   : > { %s177_s26 = scalar_lea.vmem (%p50_p3), %s2184_s0, %s1652_s22  ;;  %s171_s27 = scalar_lea.vmem (%p50_p3), [#allocation3], %s1502_s23 }
   0xf   : > { %v190_v0 = vld [vmem:[%s177_s26] sm:$0xff] (%p50_p3)  ;;  %v192_v1 = vld [vmem:[%s177_s26 + $0x8] sm:$0xff] (%p50_p3)  ;;  %v194_v2 = vld [vmem:[%s177_s26 + $0x90] sm:$0xff] (%p50_p3) }
  0x10   : > { %191 = vst [vmem:[%s171_s27] sm:$0xff] (%p50_p3), %v190_v0  ;;  %193 = vst [vmem:[%s171_s27 + $0x8] sm:$0xff] (%p50_p3), %v192_v1  ;;  %v196_v3 = vld [vmem:[%s177_s26 + $0x98] sm:$0xff] (%p50_p3) }
  0x11   : > { %195 = vst [vmem:[%s171_s27 + $0x10] sm:$0xff] %v194_v2  ;;  %197 = vst [vmem:[%s171_s27 + $0x18] sm:$0xff] %v196_v3 }
  0x12 PF: > { %p1505_p6 = scmp.ge.s32.totalorder %s1935_s16, 1  ;;  %p217_p7 = scmp.lt.s32.totalorder %s1935_s16, 10 }
  0x14   : > { %p218_p8 = pnand %p1505_p6, %p217_p7 }
  0x15   : > { %s224_s28 = sand.u32 (!%p218_p8), 1, %s1919_s12   ;;  %s1507_s29 = sshll.u32 (!%p218_p8), %s1927_s14, 6 }
  0x16   : > { %221 = sbr.rel (%p218_p8) target bundleno = 387 (0x183), region = 51  ;;  %s1506_s30 = sshll.u32 (!%p218_p8), %s224_s28, 5 }
  0x17   : > { %p270_p9 = scmp.lt.s32.totalorder (!%p218_p8), %s1507_s29, 575  ;;  %s2010_s8 = scalar_lea.vmem (!%p218_p8), [#allocation3], %s1506_s30 }
  0x18   : > { %p1510_p10 = scmp.ne.s32.totalorder (!%p218_p8), %s1927_s14, 0 }
  0x1b   : > { %s2195_s29 = smov (!%p270_p9, %s1507_s29), 575  ;;  %300 = sbr.rel (%p1510_p10) target bundleno = 37 (0x25), region = 59 }
  0x1c   : > { %s1653_s4 = sshll.u32 %s2195_s29, 4 }
  0x1d   : > { %s2008_s7 = scalar_lea.vmem %s2185_s1, %s1653_s4 }
  0x20   : > { %v1937_v4 = vmov 0.0  }
  0x21   : > { %301 = vst [vmem:[#allocation2 + $0x30] sm:$0xff] %v1937_v4  ;;  %302 = vst [vmem:[#allocation2] sm:$0xff] %v1937_v4 }
  0x22   : > { %303 = vst [vmem:[#allocation2 + $0x18] sm:$0xff] %v1937_v4  ;;  %304 = vst [vmem:[#allocation2 + $0x10] sm:$0xff] %v1937_v4 }
  0x23   : > { %305 = vst [vmem:[#allocation2 + $0x8] sm:$0xff] %v1937_v4  ;;  %306 = vst [vmem:[#allocation2 + $0x20] sm:$0xff] %v1937_v4 }
  0x24   : > { %307 = vst [vmem:[#allocation2 + $0x28] sm:$0xff] %v1937_v4  ;;  %308 = vst [vmem:[#allocation2 + $0x38] sm:$0xff] %v1937_v4 }
  0x25 PF: > { %v1699_v5 = vld [vmem:[%s2008_s7 + $0xe4] ss:$16 sps:$4 sm:$0xff]   ;;  %v1703_v7 = vld [vmem:[%s2008_s7 + $0xe0] ss:$16 sps:$4 sm:$0xff]   ;;  %v1800_v56 = vld [vmem:[%s2010_s8 + $0xc] ss:$16 sps:$4 sm:$0xff]  }
  0x26   : > { %v1701_v6 = vld [vmem:[%s2008_s7 + $0x2e4] ss:$16 sps:$4 sm:$0xff]   ;;  %1109 = vmatprep.subr.bf16.mxu0 %v1699_v5  ;;  %v1704_v8 = vld [vmem:[%s2008_s7 + $0x2e0] ss:$16 sps:$4 sm:$0xff]   ;;  %1184 = vmatprep.mubr.bf16.mxu1 %v1800_v56  ;;  %p1643_p11 = scmp.ne.s32.totalorder %s1927_s14, 8 }
  0x27   : > { %1152 = vmatprep.subr.bf16.mxu1 %v1701_v6  ;;  %v1705_v9 = vld [vmem:[%s2008_s7 + $0xc4] ss:$16 sps:$4 sm:$0xff]   ;;  %1110 = vmatpush1.bf16.msra.mxu0 %v1703_v7  ;;  %v1709_v11 = vld [vmem:[%s2008_s7 + $0xc0] ss:$16 sps:$4 sm:$0xff]   ;;  %v1803_v7 = vld [vmem:[%s2008_s7 + $0xec] ss:$16 sps:$4 sm:$0xff]  }
  0x28   : > { %1153 = vmatpush1.bf16.msra.mxu1 %v1704_v8  ;;  %v1707_v10 = vld [vmem:[%s2008_s7 + $0x2c4] ss:$16 sps:$4 sm:$0xff]   ;;  %1111 = vmatprep.subr.bf16.mxu0 %v1705_v9  ;;  %v1710_v12 = vld [vmem:[%s2008_s7 + $0x2c0] ss:$16 sps:$4 sm:$0xff]   ;;  %v1806_v8 = vld [vmem:[%s2008_s7 + $0x2ec] ss:$16 sps:$4 sm:$0xff]  }
  0x29   : > { %1154 = vmatprep.subr.bf16.mxu1 %v1707_v10  ;;  %v1711_v13 = vld [vmem:[%s2008_s7 + $0xa4] ss:$16 sps:$4 sm:$0xff]   ;;  %v1715_v15 = vld [vmem:[%s2008_s7 + $0xa0] ss:$16 sps:$4 sm:$0xff]   ;;  %v2085_v10 = vld [vmem:[%s2010_s8 + $0x8] ss:$16 sps:$4 sm:$0xff]  }
  0x2a   : > { %v1713_v14 = vld [vmem:[%s2008_s7 + $0x2a4] ss:$16 sps:$4 sm:$0xff]   ;;  %v1716_v16 = vld [vmem:[%s2008_s7 + $0x2a0] ss:$16 sps:$4 sm:$0xff]  }
  0x2b   : > { %1112 = vmatpush1.bf16.msra.mxu0 %v1709_v11  ;;  %v1717_v17 = vld [vmem:[%s2008_s7 + $0x84] ss:$16 sps:$4 sm:$0xff]   ;;  %v1721_v19 = vld [vmem:[%s2008_s7 + $0x80] ss:$16 sps:$4 sm:$0xff]   ;;  %v1801_v11 = vld [vmem:[%s2008_s7 + $0xe8] ss:$16 sps:$4 sm:$0xff]  }
  0x2c   : > { %1155 = vmatpush1.bf16.msra.mxu1 %v1710_v12  ;;  %1113 = vmatprep.subr.bf16.mxu0 %v1711_v13  ;;  %v1719_v18 = vld [vmem:[%s2008_s7 + $0x284] ss:$16 sps:$4 sm:$0xff]   ;;  %v1722_v20 = vld [vmem:[%s2008_s7 + $0x280] ss:$16 sps:$4 sm:$0xff]   ;;  %v1804_v12 = vld [vmem:[%s2008_s7 + $0x2e8] ss:$16 sps:$4 sm:$0xff]  }
  0x2d   : > { %1156 = vmatprep.subr.bf16.mxu1 %v1713_v14  ;;  %v1723_v21 = vld [vmem:[%s2008_s7 + $0x64] ss:$16 sps:$4 sm:$0xff]   ;;  %v1727_v23 = vld [vmem:[%s2008_s7 + $0x60] ss:$16 sps:$4 sm:$0xff]   ;;  %v1809_v13 = vld [vmem:[%s2008_s7 + $0xcc] ss:$16 sps:$4 sm:$0xff]  }
  0x2e   : > { %v1725_v22 = vld [vmem:[%s2008_s7 + $0x264] ss:$16 sps:$4 sm:$0xff]   ;;  %v1728_v24 = vld [vmem:[%s2008_s7 + $0x260] ss:$16 sps:$4 sm:$0xff]   ;;  %v1812_v14 = vld [vmem:[%s2008_s7 + $0x2cc] ss:$16 sps:$4 sm:$0xff]  }
  0x2f   : > { %1114 = vmatpush1.bf16.msra.mxu0 %v1715_v15  ;;  %v1729_v25 = vld [vmem:[%s2008_s7 + $0x44] ss:$16 sps:$4 sm:$0xff]   ;;  %v1733_v27 = vld [vmem:[%s2008_s7 + $0x40] ss:$16 sps:$4 sm:$0xff]   ;;  %v1807_v15 = vld [vmem:[%s2008_s7 + $0xc8] ss:$16 sps:$4 sm:$0xff]  }
  0x30   : > { %1157 = vmatpush1.bf16.msra.mxu1 %v1716_v16  ;;  %1115 = vmatprep.subr.bf16.mxu0 %v1717_v17  ;;  %v1731_v26 = vld [vmem:[%s2008_s7 + $0x244] ss:$16 sps:$4 sm:$0xff]   ;;  %v1734_v28 = vld [vmem:[%s2008_s7 + $0x240] ss:$16 sps:$4 sm:$0xff]   ;;  %v1810_v16 = vld [vmem:[%s2008_s7 + $0x2c8] ss:$16 sps:$4 sm:$0xff]  }
  0x31   : > { %1158 = vmatprep.subr.bf16.mxu1 %v1719_v18  ;;  %v1735_v29 = vld [vmem:[%s2008_s7 + $0x24] ss:$16 sps:$4 sm:$0xff]   ;;  %v1739_v31 = vld [vmem:[%s2008_s7 + $0x20] ss:$16 sps:$4 sm:$0xff]   ;;  %v1815_v17 = vld [vmem:[%s2008_s7 + $0xac] ss:$16 sps:$4 sm:$0xff]  }
  0x32   : > { %v1737_v30 = vld [vmem:[%s2008_s7 + $0x224] ss:$16 sps:$4 sm:$0xff]   ;;  %v1740_v32 = vld [vmem:[%s2008_s7 + $0x220] ss:$16 sps:$4 sm:$0xff]   ;;  %v1818_v18 = vld [vmem:[%s2008_s7 + $0x2ac] ss:$16 sps:$4 sm:$0xff]  }
  0x33   : > { %1116 = vmatpush1.bf16.msra.mxu0 %v1721_v19  ;;  %v1741_v33 = vld [vmem:[%s2008_s7 + $0x4] ss:$16 sps:$4 sm:$0xff]   ;;  %v1745_v35 = vld [vmem:[%s2008_s7] ss:$16 sps:$4 sm:$0xff]   ;;  %v1813_v19 = vld [vmem:[%s2008_s7 + $0xa8] ss:$16 sps:$4 sm:$0xff]  }
  0x34   : > { %1159 = vmatpush1.bf16.msra.mxu1 %v1722_v20  ;;  %1117 = vmatprep.subr.bf16.mxu0 %v1723_v21  ;;  %v1743_v34 = vld [vmem:[%s2008_s7 + $0x204] ss:$16 sps:$4 sm:$0xff]   ;;  %v1746_v36 = vld [vmem:[%s2008_s7 + $0x200] ss:$16 sps:$4 sm:$0xff]   ;;  %v1816_v20 = vld [vmem:[%s2008_s7 + $0x2a8] ss:$16 sps:$4 sm:$0xff]  }
  0x35   : > { %1160 = vmatprep.subr.bf16.mxu1 %v1725_v22  ;;  %v1747_v37 = vld [vmem:[%s2008_s7 + $0x1e4] ss:$16 sps:$4 sm:$0xff]   ;;  %v1751_v39 = vld [vmem:[%s2008_s7 + $0x1e0] ss:$16 sps:$4 sm:$0xff]   ;;  %v1821_v21 = vld [vmem:[%s2008_s7 + $0x8c] ss:$16 sps:$4 sm:$0xff]  }
  0x36   : > { %v1749_v38 = vld [vmem:[%s2008_s7 + $0x3e4] ss:$16 sps:$4 sm:$0xff]   ;;  %v1752_v40 = vld [vmem:[%s2008_s7 + $0x3e0] ss:$16 sps:$4 sm:$0xff]   ;;  %v1824_v22 = vld [vmem:[%s2008_s7 + $0x28c] ss:$16 sps:$4 sm:$0xff]  }
  0x37   : > { %1118 = vmatpush1.bf16.msra.mxu0 %v1727_v23  ;;  %v1753_v41 = vld [vmem:[%s2008_s7 + $0x1c4] ss:$16 sps:$4 sm:$0xff]   ;;  %v1757_v43 = vld [vmem:[%s2008_s7 + $0x1c0] ss:$16 sps:$4 sm:$0xff]   ;;  %v1819_v23 = vld [vmem:[%s2008_s7 + $0x88] ss:$16 sps:$4 sm:$0xff]  }
  0x38   : > { %1161 = vmatpush1.bf16.msra.mxu1 %v1728_v24  ;;  %1119 = vmatprep.subr.bf16.mxu0 %v1729_v25  ;;  %v1755_v42 = vld [vmem:[%s2008_s7 + $0x3c4] ss:$16 sps:$4 sm:$0xff]   ;;  %v1758_v44 = vld [vmem:[%s2008_s7 + $0x3c0] ss:$16 sps:$4 sm:$0xff]   ;;  %v1822_v24 = vld [vmem:[%s2008_s7 + $0x288] ss:$16 sps:$4 sm:$0xff]  }
  0x39   : > { %1162 = vmatprep.subr.bf16.mxu1 %v1731_v26  ;;  %v1759_v45 = vld [vmem:[%s2008_s7 + $0x1a4] ss:$16 sps:$4 sm:$0xff]   ;;  %v1763_v47 = vld [vmem:[%s2008_s7 + $0x1a0] ss:$16 sps:$4 sm:$0xff]   ;;  %v1827_v25 = vld [vmem:[%s2008_s7 + $0x6c] ss:$16 sps:$4 sm:$0xff]  }
  0x3a   : > { %v1761_v46 = vld [vmem:[%s2008_s7 + $0x3a4] ss:$16 sps:$4 sm:$0xff]   ;;  %v1764_v48 = vld [vmem:[%s2008_s7 + $0x3a0] ss:$16 sps:$4 sm:$0xff]   ;;  %v1830_v26 = vld [vmem:[%s2008_s7 + $0x26c] ss:$16 sps:$4 sm:$0xff]  }
  0x3b   : > { %1120 = vmatpush1.bf16.msra.mxu0 %v1733_v27  ;;  %v1765_v49 = vld [vmem:[%s2008_s7 + $0x184] ss:$16 sps:$4 sm:$0xff]   ;;  %v1769_v51 = vld [vmem:[%s2008_s7 + $0x180] ss:$16 sps:$4 sm:$0xff]   ;;  %v1825_v27 = vld [vmem:[%s2008_s7 + $0x68] ss:$16 sps:$4 sm:$0xff]  }
  0x3c   : > { %1163 = vmatpush1.bf16.msra.mxu1 %v1734_v28  ;;  %1121 = vmatprep.subr.bf16.mxu0 %v1735_v29  ;;  %v1767_v50 = vld [vmem:[%s2008_s7 + $0x384] ss:$16 sps:$4 sm:$0xff]   ;;  %v1770_v52 = vld [vmem:[%s2008_s7 + $0x380] ss:$16 sps:$4 sm:$0xff]   ;;  %v1828_v28 = vld [vmem:[%s2008_s7 + $0x268] ss:$16 sps:$4 sm:$0xff]  }
  0x3d   : > { %1164 = vmatprep.subr.bf16.mxu1 %v1737_v30  ;;  %v1771_v53 = vld [vmem:[%s2008_s7 + $0x164] ss:$16 sps:$4 sm:$0xff]   ;;  %v1775_v57 = vld [vmem:[%s2008_s7 + $0x160] ss:$16 sps:$4 sm:$0xff]   ;;  %v1833_v29 = vld [vmem:[%s2008_s7 + $0x4c] ss:$16 sps:$4 sm:$0xff]  }
  0x3e   : > { %v1797_v54 = vld [vmem:[%s2010_s8 + $0x4] ss:$16 sps:$4 sm:$0xff]   ;;  %v1776_v58 = vld [vmem:[%s2008_s7 + $0x360] ss:$16 sps:$4 sm:$0xff]   ;;  %v1836_v30 = vld [vmem:[%s2008_s7 + $0x24c] ss:$16 sps:$4 sm:$0xff]  }
  0x3f   : > { %1122 = vmatpush1.bf16.msra.mxu0 %v1739_v31  ;;  %v1773_v55 = vld [vmem:[%s2008_s7 + $0x364] ss:$16 sps:$4 sm:$0xff]   ;;  %1141 = vmatprep.mubr.bf16.mxu0 %v1797_v54  ;;  %v1781_v61 = vld [vmem:[%s2008_s7 + $0x140] ss:$16 sps:$4 sm:$0xff]   ;;  %v1831_v31 = vld [vmem:[%s2008_s7 + $0x48] ss:$16 sps:$4 sm:$0xff]  }
  0x40   : > { %1165 = vmatpush1.bf16.msra.mxu1 %v1740_v32  ;;  %1123 = vmatprep.subr.bf16.mxu0 %v1741_v33  ;;  %v1777_v59 = vld [vmem:[%s2008_s7 + $0x144] ss:$16 sps:$4 sm:$0xff]   ;;  %v1782_v62 = vld [vmem:[%s2008_s7 + $0x340] ss:$16 sps:$4 sm:$0xff]   ;;  %v1834_v32 = vld [vmem:[%s2008_s7 + $0x248] ss:$16 sps:$4 sm:$0xff]  }
  0x41   : > { %1166 = vmatprep.subr.bf16.mxu1 %v1743_v34  ;;  %v1779_v60 = vld [vmem:[%s2008_s7 + $0x344] ss:$16 sps:$4 sm:$0xff]   ;;  %v1787_v1 = vld [vmem:[%s2008_s7 + $0x120] ss:$16 sps:$4 sm:$0xff]   ;;  %v1839_v33 = vld [vmem:[%s2008_s7 + $0x2c] ss:$16 sps:$4 sm:$0xff]  }
  0x42   : > { %v1783_v63 = vld [vmem:[%s2008_s7 + $0x124] ss:$16 sps:$4 sm:$0xff]   ;;  %v1788_v2 = vld [vmem:[%s2008_s7 + $0x320] ss:$16 sps:$4 sm:$0xff]   ;;  %v1842_v34 = vld [vmem:[%s2008_s7 + $0x22c] ss:$16 sps:$4 sm:$0xff]  }
  0x43   : > { %1124 = vmatpush1.bf16.msra.mxu0 %v1745_v35  ;;  %v1785_v0 = vld [vmem:[%s2008_s7 + $0x324] ss:$16 sps:$4 sm:$0xff]   ;;  %v1793_v5 = vld [vmem:[%s2008_s7 + $0x100] ss:$16 sps:$4 sm:$0xff]   ;;  %v1837_v35 = vld [vmem:[%s2008_s7 + $0x28] ss:$16 sps:$4 sm:$0xff]  }
  0x44   : > { %1167 = vmatpush1.bf16.msra.mxu1 %v1746_v36  ;;  %1125 = vmatprep.subr.bf16.mxu0 %v1747_v37  ;;  %v1789_v3 = vld [vmem:[%s2008_s7 + $0x104] ss:$16 sps:$4 sm:$0xff]   ;;  %v1794_v6 = vld [vmem:[%s2008_s7 + $0x300] ss:$16 sps:$4 sm:$0xff]   ;;  %v1840_v36 = vld [vmem:[%s2008_s7 + $0x228] ss:$16 sps:$4 sm:$0xff]  }
  0x45   : > { %1168 = vmatprep.subr.bf16.mxu1 %v1749_v38  ;;  %v1791_v4 = vld [vmem:[%s2008_s7 + $0x304] ss:$16 sps:$4 sm:$0xff]   ;;  %v2082_v9 = vld [vmem:[%s2010_s8] ss:$16 sps:$4 sm:$0xff]   ;;  %v1845_v37 = vld [vmem:[%s2008_s7 + $0xc] ss:$16 sps:$4 sm:$0xff]  }
  0x46   : > { %v1848_v38 = vld [vmem:[%s2008_s7 + $0x20c] ss:$16 sps:$4 sm:$0xff]  }
  0x47   : > { %1126 = vmatpush2.bf16.msra.mxu0 %v1751_v39  ;;  %v1843_v39 = vld [vmem:[%s2008_s7 + $0x8] ss:$16 sps:$4 sm:$0xff]  }
  0x48   : > { %1169 = vmatpush2.bf16.msra.mxu1 %v1752_v40  ;;  %1127 = vmatprep.subr.bf16.mxu0 %v1753_v41  ;;  %v1846_v40 = vld [vmem:[%s2008_s7 + $0x208] ss:$16 sps:$4 sm:$0xff]   ;;  %v1851_v41 = vld [vmem:[%s2008_s7 + $0x1ec] ss:$16 sps:$4 sm:$0xff]  }
  0x49   : > { %1170 = vmatprep.subr.bf16.mxu1 %v1755_v42  ;;  %v1854_v42 = vld [vmem:[%s2008_s7 + $0x3ec] ss:$16 sps:$4 sm:$0xff]  }
  0x4b   : > { %1128 = vmatpush2.bf16.msra.mxu0 %v1757_v43  ;;  %v1849_v43 = vld [vmem:[%s2008_s7 + $0x1e8] ss:$16 sps:$4 sm:$0xff]  }
  0x4c   : > { %1171 = vmatpush2.bf16.msra.mxu1 %v1758_v44  ;;  %1129 = vmatprep.subr.bf16.mxu0 %v1759_v45  ;;  %v1852_v44 = vld [vmem:[%s2008_s7 + $0x3e8] ss:$16 sps:$4 sm:$0xff]   ;;  %v1857_v45 = vld [vmem:[%s2008_s7 + $0x1cc] ss:$16 sps:$4 sm:$0xff]  }
  0x4d   : > { %1172 = vmatprep.subr.bf16.mxu1 %v1761_v46  ;;  %v1860_v46 = vld [vmem:[%s2008_s7 + $0x3cc] ss:$16 sps:$4 sm:$0xff]  }
  0x4f   : > { %1130 = vmatpush2.bf16.msra.mxu0 %v1763_v47  ;;  %v1855_v47 = vld [vmem:[%s2008_s7 + $0x1c8] ss:$16 sps:$4 sm:$0xff]  }
  0x50   : > { %1173 = vmatpush2.bf16.msra.mxu1 %v1764_v48  ;;  %1131 = vmatprep.subr.bf16.mxu0 %v1765_v49  ;;  %v1858_v48 = vld [vmem:[%s2008_s7 + $0x3c8] ss:$16 sps:$4 sm:$0xff]   ;;  %v1863_v49 = vld [vmem:[%s2008_s7 + $0x1ac] ss:$16 sps:$4 sm:$0xff]  }
  0x51   : > { %1174 = vmatprep.subr.bf16.mxu1 %v1767_v50  ;;  %v1866_v50 = vld [vmem:[%s2008_s7 + $0x3ac] ss:$16 sps:$4 sm:$0xff]  }
  0x53   : > { %1132 = vmatpush2.bf16.msra.mxu0 %v1769_v51  ;;  %v1861_v51 = vld [vmem:[%s2008_s7 + $0x1a8] ss:$16 sps:$4 sm:$0xff]  }
  0x54   : > { %1175 = vmatpush2.bf16.msra.mxu1 %v1770_v52  ;;  %1133 = vmatprep.subr.bf16.mxu0 %v1771_v53  ;;  %v1864_v52 = vld [vmem:[%s2008_s7 + $0x3a8] ss:$16 sps:$4 sm:$0xff]   ;;  %v1869_v53 = vld [vmem:[%s2008_s7 + $0x18c] ss:$16 sps:$4 sm:$0xff]  }
  0x55   : > { %1176 = vmatprep.subr.bf16.mxu1 %v1773_v55  ;;  %v1867_v55 = vld [vmem:[%s2008_s7 + $0x188] ss:$16 sps:$4 sm:$0xff]  }
  0x57   : > { %1134 = vmatpush2.bf16.msra.mxu0 %v1775_v57  ;;  %v1875_v57 = vld [vmem:[%s2008_s7 + $0x16c] ss:$16 sps:$4 sm:$0xff]  }
  0x58   : > { %1177 = vmatpush2.bf16.msra.mxu1 %v1776_v58  ;;  %1135 = vmatprep.subr.bf16.mxu0 %v1777_v59  ;;  %v1878_v58 = vld [vmem:[%s2008_s7 + $0x36c] ss:$16 sps:$4 sm:$0xff]   ;;  %v1873_v59 = vld [vmem:[%s2008_s7 + $0x168] ss:$16 sps:$4 sm:$0xff]  }
  0x59   : > { %1178 = vmatprep.subr.bf16.mxu1 %v1779_v60  ;;  %v1876_v60 = vld [vmem:[%s2008_s7 + $0x368] ss:$16 sps:$4 sm:$0xff]  }
  0x5b   : > { %1136 = vmatpush2.bf16.msra.mxu0 %v1781_v61  ;;  %v1881_v61 = vld [vmem:[%s2008_s7 + $0x14c] ss:$16 sps:$4 sm:$0xff]  }
  0x5c   : > { %1179 = vmatpush2.bf16.msra.mxu1 %v1782_v62  ;;  %1137 = vmatprep.subr.bf16.mxu0 %v1783_v63  ;;  %v1884_v62 = vld [vmem:[%s2008_s7 + $0x34c] ss:$16 sps:$4 sm:$0xff]   ;;  %v1879_v63 = vld [vmem:[%s2008_s7 + $0x148] ss:$16 sps:$4 sm:$0xff]  }
  0x5d   : > { %1180 = vmatprep.subr.bf16.mxu1 %v1785_v0  ;;  %v1882_v0 = vld [vmem:[%s2008_s7 + $0x348] ss:$16 sps:$4 sm:$0xff]  }
  0x5f   : > { %1138 = vmatpush2.bf16.msra.mxu0 %v1787_v1  ;;  %v1887_v1 = vld [vmem:[%s2008_s7 + $0x12c] ss:$16 sps:$4 sm:$0xff]  }
  0x60   : > { %1181 = vmatpush2.bf16.msra.mxu1 %v1788_v2  ;;  %1139 = vmatprep.subr.bf16.mxu0 %v1789_v3  ;;  %v1890_v2 = vld [vmem:[%s2008_s7 + $0x32c] ss:$16 sps:$4 sm:$0xff]   ;;  %v1885_v3 = vld [vmem:[%s2008_s7 + $0x128] ss:$16 sps:$4 sm:$0xff]  }
  0x61   : > { %1182 = vmatprep.subr.bf16.mxu1 %v1791_v4  ;;  %v1888_v4 = vld [vmem:[%s2008_s7 + $0x328] ss:$16 sps:$4 sm:$0xff]  }
  0x63   : > { %1140 = vmatpush2.bf16.msra.mxu0 %v1793_v5  ;;  %v1893_v5 = vld [vmem:[%s2008_s7 + $0x10c] ss:$16 sps:$4 sm:$0xff]  }
  0x64   : > { %1183 = vmatpush2.bf16.msra.mxu1 %v1794_v6  ;;  %1195 = vmatprep.subr.bf16.mxu0 %v1803_v7  ;;  %v1896_v6 = vld [vmem:[%s2008_s7 + $0x30c] ss:$16 sps:$4 sm:$0xff]   ;;  %v1891_v7 = vld [vmem:[%s2008_s7 + $0x108] ss:$16 sps:$4 sm:$0xff]  }
  0x65   : > { %1238 = vmatprep.subr.bf16.mxu1 %v1806_v8  ;;  %v1894_v8 = vld [vmem:[%s2008_s7 + $0x308] ss:$16 sps:$4 sm:$0xff]  }
  0x66   : > { %1142 = vmatmul.mubr.bf16.vlgmr.msra.gmra.mxu0 %v2082_v9 }
  0x67   : > { %1185 = vmatmul.mubr.bf16.vlgmr.msra.gmra.mxu1 %v2085_v10  ;;  %1196 = vmatpush1.bf16.msra.mxu0 %v1801_v11 }
  0x68   : > { %1239 = vmatpush1.bf16.msra.mxu1 %v1804_v12  ;;  %1197 = vmatprep.subr.bf16.mxu0 %v1809_v13  ;;  %v309_v12 = vld [vmem:[#allocation2 + $0x30] sm:$0xff] }
  0x69   : > { %1240 = vmatprep.subr.bf16.mxu1 %v1812_v14  ;;  %1227 = vmatprep.mubr.bf16.mxu0 %v1797_v54  ;;  %v1872_v54 = vld [vmem:[%s2008_s7 + $0x38c] ss:$16 sps:$4 sm:$0xff]  }
  0x6a   : > { %1270 = vmatprep.mubr.bf16.mxu1 %v1800_v56  ;;  %v1870_v56 = vld [vmem:[%s2008_s7 + $0x388] ss:$16 sps:$4 sm:$0xff]  }
  0x6b   : > { %1198 = vmatpush1.bf16.msra.mxu0 %v1807_v15 }
  0x6c   : > { %1241 = vmatpush1.bf16.msra.mxu1 %v1810_v16  ;;  %1199 = vmatprep.subr.bf16.mxu0 %v1815_v17  ;;  %v310_v16 = vld [vmem:[#allocation2] sm:$0xff] }
  0x6d   : > { %1242 = vmatprep.subr.bf16.mxu1 %v1818_v18 }
  0x6f   : > { %1200 = vmatpush1.bf16.msra.mxu0 %v1813_v19 }
  0x70   : > { %1243 = vmatpush1.bf16.msra.mxu1 %v1816_v20  ;;  %1201 = vmatprep.subr.bf16.mxu0 %v1821_v21  ;;  %v313_v21 = vld [vmem:[#allocation2 + $0x8] sm:$0xff] }
  0x71   : > { %1244 = vmatprep.subr.bf16.mxu1 %v1824_v22 }
  0x73   : > { %1202 = vmatpush1.bf16.msra.mxu0 %v1819_v23 }
  0x74   : > { %1245 = vmatpush1.bf16.msra.mxu1 %v1822_v24  ;;  %1203 = vmatprep.subr.bf16.mxu0 %v1827_v25 }
  0x75   : > { %1246 = vmatprep.subr.bf16.mxu1 %v1830_v26  ;;  %v314_v26 = vld [vmem:[#allocation2 + $0x20] sm:$0xff] }
  0x77   : > { %1204 = vmatpush1.bf16.msra.mxu0 %v1825_v27 }
  0x78   : > { %1247 = vmatpush1.bf16.msra.mxu1 %v1828_v28  ;;  %1205 = vmatprep.subr.bf16.mxu0 %v1833_v29 }
  0x79   : > { %1248 = vmatprep.subr.bf16.mxu1 %v1836_v30  ;;  %v311_v30 = vld [vmem:[#allocation2 + $0x18] sm:$0xff] }
  0x7b   : > { %1206 = vmatpush1.bf16.msra.mxu0 %v1831_v31 }
  0x7c   : > { %1249 = vmatpush1.bf16.msra.mxu1 %v1834_v32  ;;  %1207 = vmatprep.subr.bf16.mxu0 %v1839_v33 }
  0x7d   : > { %1250 = vmatprep.subr.bf16.mxu1 %v1842_v34  ;;  %v312_v34 = vld [vmem:[#allocation2 + $0x10] sm:$0xff] }
  0x7f   : > { %1208 = vmatpush1.bf16.msra.mxu0 %v1837_v35 }
  0x80   : > { %1251 = vmatpush1.bf16.msra.mxu1 %v1840_v36  ;;  %1209 = vmatprep.subr.bf16.mxu0 %v1845_v37 }
  0x81   : > { %1252 = vmatprep.subr.bf16.mxu1 %v1848_v38 }
  0x83   : > { %1210 = vmatpush1.bf16.msra.mxu0 %v1843_v39  ;;  %v315_v39 = vld [vmem:[#allocation2 + $0x28] sm:$0xff] }
  0x84   : > { %1253 = vmatpush1.bf16.msra.mxu1 %v1846_v40  ;;  %1211 = vmatprep.subr.bf16.mxu0 %v1851_v41 }
  0x85   : > { %1254 = vmatprep.subr.bf16.mxu1 %v1854_v42 }
  0x87   : > { %1212 = vmatpush2.bf16.msra.mxu0 %v1849_v43 }
  0x88   : > { %1255 = vmatpush2.bf16.msra.mxu1 %v1852_v44  ;;  %1213 = vmatprep.subr.bf16.mxu0 %v1857_v45  ;;  %v316_v44 = vld [vmem:[#allocation2 + $0x38] sm:$0xff] }
  0x89   : > { %1256 = vmatprep.subr.bf16.mxu1 %v1860_v46 }
  0x8b   : > { %1214 = vmatpush2.bf16.msra.mxu0 %v1855_v47 }
  0x8c   : > { %1257 = vmatpush2.bf16.msra.mxu1 %v1858_v48  ;;  %1215 = vmatprep.subr.bf16.mxu0 %v1863_v49 }
  0x8d   : > { %1258 = vmatprep.subr.bf16.mxu1 %v1866_v50 }
  0x8f   : > { %1216 = vmatpush2.bf16.msra.mxu0 %v1861_v51 }
  0x90   : > { %1259 = vmatpush2.bf16.msra.mxu1 %v1864_v52  ;;  %1217 = vmatprep.subr.bf16.mxu0 %v1869_v53 }
  0x91   : > { %1260 = vmatprep.subr.bf16.mxu1 %v1872_v54 }
  0x93   : > { %1218 = vmatpush2.bf16.msra.mxu0 %v1867_v55 }
  0x94   : > { %1261 = vmatpush2.bf16.msra.mxu1 %v1870_v56  ;;  %1219 = vmatprep.subr.bf16.mxu0 %v1875_v57 }
  0x95   : > { %1262 = vmatprep.subr.bf16.mxu1 %v1878_v58 }
  0x97   : > { %1220 = vmatpush2.bf16.msra.mxu0 %v1873_v59 }
  0x98   : > { %1263 = vmatpush2.bf16.msra.mxu1 %v1876_v60  ;;  %1221 = vmatprep.subr.bf16.mxu0 %v1881_v61 }
  0x99   : > { %1264 = vmatprep.subr.bf16.mxu1 %v1884_v62 }
  0x9b   : > { %1222 = vmatpush2.bf16.msra.mxu0 %v1879_v63 }
  0x9c   : > { %1265 = vmatpush2.bf16.msra.mxu1 %v1882_v0  ;;  %1223 = vmatprep.subr.bf16.mxu0 %v1887_v1 }
  0x9d   : > { %1266 = vmatprep.subr.bf16.mxu1 %v1890_v2 }
  0x9f   : > { %1224 = vmatpush2.bf16.msra.mxu0 %v1885_v3 }
  0xa0   : > { %1267 = vmatpush2.bf16.msra.mxu1 %v1888_v4  ;;  %1225 = vmatprep.subr.bf16.mxu0 %v1893_v5 }
  0xa1   : > { %1268 = vmatprep.subr.bf16.mxu1 %v1896_v6 }
  0xa3   : > { %1226 = vmatpush2.bf16.msra.mxu0 %v1891_v7 }
  0xa4   : > { %1269 = vmatpush2.bf16.msra.mxu1 %v1894_v8 }
  0xa6   : > { %1228 = vmatmul.mubr.bf16.vlgmr.msra.gmra.mxu0 %v2082_v9 }
  0xa7   : > { %1271 = vmatmul.mubr.bf16.vlgmr.msra.gmra.mxu1 %v2085_v10 }
 0x126   : > { %v1143_v11 = vpop.f32.mrf.mxu0 }
 0x127   : > { %v1186_v13 = vpop.f32.mrf.mxu1 }
 0x128   : > { %v1187_v14 = vadd.f32 %v1186_v13, %v1143_v11  ;;  %v1145_v15 = vpop.f32.mrf.mxu0 }
 0x129   : > { %v1188_v17 = vpop.f32.mrf.mxu1 }
 0x12a   : > { %v1281_v18 = vadd.f32 %v1187_v14, %v309_v12  ;;  %v1189_v19 = vadd.f32 %v1188_v17, %v1145_v15  ;;  %v1147_v20 = vpop.f32.mrf.mxu0 }
 0x12b   : > { %v1190_v22 = vpop.f32.mrf.mxu1 }
 0x12c   : > { %1289 = vst [vmem:[#allocation2 + $0x30] sm:$0xff] %v1281_v18  ;;  %v1282_v23 = vadd.f32 %v1189_v19, %v310_v16  ;;  %v1191_v24 = vadd.f32 %v1190_v22, %v1147_v20  ;;  %v1149_v25 = vpop.f32.mrf.mxu0 }
 0x12d   : > { %v1192_v9 = vpop.f32.mrf.mxu1 }
 0x12e   : > { %1290 = vst [vmem:[#allocation2] sm:$0xff] %v1282_v23  ;;  %v1285_v10 = vadd.f32 %v1191_v24, %v313_v21  ;;  %v1193_v27 = vadd.f32 %v1192_v9, %v1149_v25 }
 0x130   : > { %1293 = vst [vmem:[#allocation2 + $0x8] sm:$0xff] %v1285_v10  ;;  %v1286_v28 = vadd.f32 %v1193_v27, %v314_v26 }
 0x132   : > { %1294 = vst [vmem:[#allocation2 + $0x20] sm:$0xff] %v1286_v28 }
 0x166   : > { %v1229_v29 = vpop.f32.mrf.mxu0 }
 0x167   : > { %v1272_v31 = vpop.f32.mrf.mxu1 }
 0x168   : > { %v1273_v32 = vadd.f32 %v1272_v31, %v1229_v29  ;;  %v1231_v33 = vpop.f32.mrf.mxu0 }
 0x169   : > { %v1274_v35 = vpop.f32.mrf.mxu1 }
 0x16a   : > { %v1283_v36 = vadd.f32 %v1273_v32, %v311_v30  ;;  %v1275_v37 = vadd.f32 %v1274_v35, %v1231_v33  ;;  %v1233_v38 = vpop.f32.mrf.mxu0 }
 0x16b   : > { %v1276_v40 = vpop.f32.mrf.mxu1 }
 0x16c   : > { %1291 = vst [vmem:[#allocation2 + $0x18] sm:$0xff] %v1283_v36  ;;  %v1284_v41 = vadd.f32 %v1275_v37, %v312_v34  ;;  %v1277_v42 = vadd.f32 %v1276_v40, %v1233_v38  ;;  %v1235_v43 = vpop.f32.mrf.mxu0 }
 0x16d   : > { %v1278_v45 = vpop.f32.mrf.mxu1 }
 0x16e   : > { %1292 = vst [vmem:[#allocation2 + $0x10] sm:$0xff] %v1284_v41  ;;  %v1287_v46 = vadd.f32 %v1277_v42, %v315_v39  ;;  %v1279_v47 = vadd.f32 %v1278_v45, %v1235_v43  ;;  %1300 = sbr.rel (%p1643_p11) target bundleno = 387 (0x183), region = 63 }
 0x170   : > { %1295 = vst [vmem:[#allocation2 + $0x28] sm:$0xff] %v1287_v46  ;;  %v1288_v48 = vadd.f32 %v1279_v47, %v316_v44 }
 0x172   : > { %1296 = vst [vmem:[#allocation2 + $0x38] sm:$0xff] %v1288_v48 }
 0x173   : > { %v1311_v49 = vlaneseq  ;;  %v1309_v51 = vld [vmem:[%s2186_s2] sm:$0xf]  ;;  %v1301_v52 = vld [vmem:[#allocation2 + $0x30] sm:$0xff]  ;;  %v1303_v58 = vld [vmem:[#allocation2 + $0x18] sm:$0xff] }
 0x174   : > { %v1302_v53 = vld [vmem:[#allocation2] sm:$0xff]  ;;  %v1305_v60 = vld [vmem:[#allocation2 + $0x8] sm:$0xff] }
 0x175   : > { %v1312_v50 = vshrl.u32 %v1311_v49, 7  ;;  %v1304_v59 = vld [vmem:[#allocation2 + $0x10] sm:$0xff]  ;;  %v1306_v1 = vld [vmem:[#allocation2 + $0x20] sm:$0xff] }
 0x177   : > { %v1313_v54 = vsub.s32 0, %v1312_v50  ;;  %v1317_v55 = vsub.s32 1, %v1312_v50  ;;  %v1321_v56 = vsub.s32 2, %v1312_v50  ;;  %v1325_v57 = vsub.s32 3, %v1312_v50  ;;  %v1307_v2 = vld [vmem:[#allocation2 + $0x28] sm:$0xff] }
 0x179   : > { %v1314_v61 = vrot.slane %v1309_v51, %v1313_v54  ;;  %v1318_v62 = vrot.slane %v1309_v51, %v1317_v55  ;;  %v1322_v63 = vrot.slane %v1309_v51, %v1321_v56  ;;  %v1326_v0 = vrot.slane %v1309_v51, %v1325_v57  ;;  %v1308_v3 = vld [vmem:[#allocation2 + $0x38] sm:$0xff] }
 0x17b   : > { %v1331_v4 = vadd.f32 %v1314_v61, %v1301_v52  ;;  %v1332_v5 = vadd.f32 %v1318_v62, %v1302_v53  ;;  %v1333_v6 = vadd.f32 %v1322_v63, %v1303_v58  ;;  %v1334_v7 = vadd.f32 %v1326_v0, %v1304_v59 }
 0x17c   : > { %v1335_v8 = vadd.f32 %v1314_v61, %v1305_v60  ;;  %v1336_v11 = vadd.f32 %v1318_v62, %v1306_v1  ;;  %v1337_v12 = vadd.f32 %v1322_v63, %v1307_v2  ;;  %v1338_v13 = vadd.f32 %v1326_v0, %v1308_v3 }
 0x17d   : > { %v1339_v14 = vmax.f32 %v1331_v4, 0.0  ;;  %v1340_v15 = vmax.f32 %v1332_v5, 0.0  ;;  %v1341_v16 = vmax.f32 %v1333_v6, 0.0  ;;  %v1342_v17 = vmax.f32 %v1334_v7, 0.0 }
 0x17e   : > { %v1343_v18 = vmax.f32 %v1335_v8, 0.0  ;;  %v1344_v19 = vmax.f32 %v1336_v11, 0.0  ;;  %v1345_v20 = vmax.f32 %v1337_v12, 0.0  ;;  %v1346_v21 = vmax.f32 %v1338_v13, 0.0 }
 0x17f   : > { %v1654_v22 = vpack.c.bf16 %v1340_v15, %v1339_v14  ;;  %v1655_v23 = vpack.c.bf16 %v1342_v17, %v1341_v16 }
 0x180   : > { %v1656_v24 = vpack.c.bf16 %v1344_v19, %v1343_v18  ;;  %v1657_v25 = vpack.c.bf16 %v1346_v21, %v1345_v20 }
 0x181   : > { %1371 = vst [vmem:[%s2187_s3] sm:$0xff] %v1654_v22  ;;  %1372 = vst [vmem:[%s2187_s3 + $0x8] sm:$0xff] %v1655_v23 }
 0x182   : > { %1373 = vst [vmem:[%s2187_s3 + $0x10] sm:$0xff] %v1656_v24  ;;  %1374 = vst [vmem:[%s2187_s3 + $0x18] sm:$0xff] %v1657_v25 }
 0x183 PF: > { %s13_s16 = sadd.s32 1, %s1935_s16   ;;  %s2188_s12 = smov %s1923_s13 }
 0x184   : > { %p10_p12 = scmp.ge.s32.totalorder %s13_s16, 11   ;;  %s2189_s13 = smov %s1993_s20 }
 0x185   : > { %s2190_s14 = smov %s1931_s15  ;;  %s2191_s15 = smov %s2193_s17 }
 0x186   :  { %12 = sbr.rel (!%p10_p12) target bundleno = 3 (0x3), region = 104 }

</bundles_post_ra>
